<compile_context>
chip_gen: v5e
topology: v5e:2x2
jax: 0.10.0
libtpu: 0.0.40
codegen_flags: <defaults>
</compile_context>

<pallas_src>
import functools

import jax
import jax.numpy as jnp
from jax import lax
from jax.experimental import pallas as pl
from jax.experimental.pallas import tpu as pltpu

CP = 128  # padded class dimension (lane-dense outputs)


# ---------------------------------------------------------------------------
# Fused kernel
# ---------------------------------------------------------------------------
def _make_kernel(cp, hw_chunk):
    def kernel(x_ref, wconv_ref, bconv_ref, wb_ref, bb_ref,
               wh1_ref, bh1_ref, wh2_ref, bh2_ref,
               feat_ref, slab_ref):
        nb, cin, hw = x_ref.shape
        fdim = wconv_ref.shape[0]
        n_chunks = hw // hw_chunk

        wconv = wconv_ref[...]                  # (F, Cin): column c = channel c weights
        bconv = bconv_ref[...]                  # (F, 1)

        # ---- synthetic backbone: pointwise projection + ReLU, GAP streamed over
        # hw chunks so no (nb, F, hw) intermediate is ever resident at once.
        gap = jnp.zeros((nb, fdim), jnp.float32)
        for j in range(n_chunks):               # static unroll; hw/128 chunks
            sl = slice(j * hw_chunk, (j + 1) * hw_chunk)
            acc = bconv[None]                   # (1, F, 1)
            for c in range(cin):                # Cin is tiny: unrolled VPU FMAs
                acc = acc + x_ref[:, c:c + 1, sl] * wconv[None, :, c:c + 1]
            gap = gap + jnp.sum(jnp.maximum(acc, 0.0), axis=-1)
        base_feat = gap * (1.0 / hw)            # (nb, F) global average pool

        # ---- bottleneck: Linear (BN folded host-side) + ReLU; dropout = id
        f = jnp.dot(base_feat.astype(jnp.bfloat16), wb_ref[...],
                    preferred_element_type=jnp.float32) + bb_ref[...]
        f = jnp.maximum(f, 0.0)                 # (nb, D) f32
        feat_ref[...] = f

        # ---- both heads fused: [classifier | adversarial (GRL fwd = id)]
        h12 = jnp.dot(f.astype(jnp.bfloat16), wh1_ref[...],
                      preferred_element_type=jnp.float32) + bh1_ref[...]
        h12 = jnp.maximum(h12, 0.0)             # (nb, 2*width)
        logits_all = jnp.dot(h12.astype(jnp.bfloat16), wh2_ref[...],
                             preferred_element_type=jnp.float32) + bh2_ref[...]
        logits = logits_all[:, :cp]             # padded lanes carry -1e30 bias
        adv = logits_all[:, cp:]

        # ---- softmax (padding already masked via the -1e30 bias lanes)
        m = jnp.max(logits, axis=1, keepdims=True)
        e = jnp.exp(logits - m)
        sm = e / jnp.sum(e, axis=1, keepdims=True)   # exact divide (parity)

        # three direct, lane-aligned stores into the (nb, 3*cp) slab
        slab_ref[:, :cp] = logits
        slab_ref[:, cp:2 * cp] = sm
        slab_ref[:, 2 * cp:] = adv

    return kernel


def _const_spec(shape, single_buffer):
    nd = len(shape)
    idx = lambda i, _nd=nd: (0,) * _nd
    if single_buffer:
        try:
            # Grid-invariant weights: single-buffer them (no point double-buffering).
            return pl.BlockSpec(shape, idx, pipeline_mode=pl.Buffered(1))
        except TypeError:
            pass
    return pl.BlockSpec(shape, idx)


def _round_up(a, b):
    return (a + b - 1) // b * b


def _choose_batch_tile(n):
    """Pad batch to a sublane multiple and pick an MXU-filling batch tile."""
    n_pad = _round_up(max(n, 1), 8)
    nb = min(128, n_pad)                 # fill MXU rows (128 = full v5e / half v6e row dim)
    n_pad = _round_up(n_pad, nb)
    # Prefer >=2 grid steps so v7x's second TensorCore gets work via "parallel".
    if n_pad // nb == 1 and n_pad >= 16 and (n_pad // 2) % 8 == 0:
        nb = n_pad // 2
    return n_pad, nb


# ---------------------------------------------------------------------------
# Wrapper
# ---------------------------------------------------------------------------
def rdanet_forward(x_nchw, fp, class_num, cp=CP, single_buffer_weights=True):
    N, C, H, W = x_nchw.shape
    HW = H * W
    x = x_nchw.reshape(N, C, HW)          # NCHW natural flatten: HW on lanes
    n_pad, nb = _choose_batch_tile(N)
    if n_pad != N:
        x = jnp.pad(x, ((0, n_pad - N), (0, 0), (0, 0)))

    D = fp["wb"].shape[1]
    F = fp["wconv"].shape[0]
    W2 = fp["wh1"].shape[1]
    hw_chunk = 128 if HW % 128 == 0 else HW

    weights = (fp["wconv"], fp["bconv"], fp["wb"], fp["bb"],
               fp["wh1"], fp["bh1"], fp["wh2"], fp["bh2"])

    flops = 2 * n_pad * (C * F * HW + F * D + D * W2 + W2 * 2 * cp)
    bytes_accessed = int(x.size) * 4 \
        + sum(int(w.size) * w.dtype.itemsize for w in weights) \
        + n_pad * D * 4 + n_pad * 3 * cp * 4
    cost = pl.CostEstimate(flops=int(flops), transcendentals=int(n_pad * cp),
                           bytes_accessed=int(bytes_accessed))

    grid = (n_pad // nb,)
    feat, slab = pl.pallas_call(
        _make_kernel(cp, hw_chunk),
        out_shape=(jax.ShapeDtypeStruct((n_pad, D), jnp.float32),
                   jax.ShapeDtypeStruct((n_pad, 3 * cp), jnp.float32)),
        grid=grid,
        in_specs=[pl.BlockSpec((nb, C, HW), lambda i: (i, 0, 0))]
        + [_const_spec(w.shape, single_buffer_weights) for w in weights],
        out_specs=(pl.BlockSpec((nb, D), lambda i: (i, 0)),
                   pl.BlockSpec((nb, 3 * cp), lambda i: (i, 0))),
        compiler_params=pltpu.CompilerParams(
            dimension_semantics=("parallel",),
            # <= ~48 MiB keeps headroom on v7x (64 MiB physical); fine on v5e/v6e.
            vmem_limit_bytes=48 * 1024 * 1024),
        cost_estimate=cost,
    )(x, *weights)

    features = feat[:N]
    outputs = slab[:N, :class_num]
    softmax_outputs = slab[:N, cp:cp + class_num]
    outputs_adv = slab[:N, 2 * cp:2 * cp + class_num]
    return features, outputs, softmax_outputs, outputs_adv


# ---------------------------------------------------------------------------
# Parameter construction (mirrors the module's __init__ init) + host-side prep
# ---------------------------------------------------------------------------
def make_params(key, cin, base_feat_dim, bottleneck_dim, width, class_num):
    ks = jax.random.split(key, 6)
    p = {}
    # synthetic backbone projection
    p["w_conv"] = 0.05 * jax.random.normal(ks[0], (cin, base_feat_dim), jnp.float32)
    p["b_conv"] = jnp.zeros((base_feat_dim,), jnp.float32)
    # bottleneck Linear: weight ~ N(0, 0.005), bias = 0.1
    p["wb"] = 0.005 * jax.random.normal(ks[1], (base_feat_dim, bottleneck_dim), jnp.float32)
    p["bb"] = jnp.full((1, bottleneck_dim), 0.1, jnp.float32)
    # BatchNorm1d (eval): gamma=1, beta=0, running_mean=0, running_var=1
    p["bn_gamma"] = jnp.ones((1, bottleneck_dim), jnp.float32)
    p["bn_beta"] = jnp.zeros((1, bottleneck_dim), jnp.float32)
    p["bn_mean"] = jnp.zeros((1, bottleneck_dim), jnp.float32)
    p["bn_var"] = jnp.ones((1, bottleneck_dim), jnp.float32)
    # classifier_layer: weight ~ N(0, 0.01), bias = 0
    p["wc1"] = 0.01 * jax.random.normal(ks[2], (bottleneck_dim, width), jnp.float32)
    p["bc1"] = jnp.zeros((1, width), jnp.float32)
    p["wc2"] = 0.01 * jax.random.normal(ks[3], (width, class_num), jnp.float32)
    p["bc2"] = jnp.zeros((1, class_num), jnp.float32)
    # classifier_layer_2: weight ~ N(0, 0.01), bias = 0
    p["wa1"] = 0.01 * jax.random.normal(ks[4], (bottleneck_dim, width), jnp.float32)
    p["ba1"] = jnp.zeros((1, width), jnp.float32)
    p["wa2"] = 0.01 * jax.random.normal(ks[5], (width, class_num), jnp.float32)
    p["ba2"] = jnp.zeros((1, class_num), jnp.float32)
    return p


def prepare_fused_params(p, class_num, cp=CP):
    width = p["wc1"].shape[1]
    # Fold eval-mode BatchNorm1d into the bottleneck Linear.
    scale = p["bn_gamma"] * lax.rsqrt(p["bn_var"] + 1e-5)                     # (1, D)
    wb = (p["wb"] * scale).astype(jnp.bfloat16)                               # (F, D)
    bb = (p["bb"] - p["bn_mean"]) * scale + p["bn_beta"]                      # (1, D)
    # Concatenate both heads' first layers -> one MXU pass.
    wh1 = jnp.concatenate([p["wc1"], p["wa1"]], axis=1).astype(jnp.bfloat16)  # (D, 2W)
    bh1 = jnp.concatenate([p["bc1"], p["ba1"]], axis=1)                       # (1, 2W)
    # Block-diagonal second layer with the class dim padded to cp lanes.
    wh2 = jnp.zeros((2 * width, 2 * cp), jnp.float32)
    wh2 = wh2.at[:width, :class_num].set(p["wc2"])
    wh2 = wh2.at[width:, cp:cp + class_num].set(p["wa2"])
    # Softmax padding mask folded into the classifier-half bias: padded lanes
    # get -1e30 so exp() zeroes them in-kernel (no iota/where needed there).
    bh2 = jnp.zeros((1, 2 * cp), jnp.float32)
    bh2 = bh2.at[:, :class_num].set(p["bc2"])
    bh2 = bh2.at[:, class_num:cp].set(-1e30)
    bh2 = bh2.at[:, cp:cp + class_num].set(p["ba2"])
    return {
        "wconv": p["w_conv"].T,                 # (F, Cin): F on sublanes
        "bconv": p["b_conv"].reshape(-1, 1),    # (F, 1)
        "wb": wb, "bb": bb,
        "wh1": wh1, "bh1": bh1,
        "wh2": wh2.astype(jnp.bfloat16), "bh2": bh2,
    }


if __name__ == "__main__":
    # Small shapes consistent with the module's forward
    N, C_IN, H, W = 4, 3, 16, 16
    BASE_FEAT = 64        # stand-in for ResNet50's 2048-d output
    BOTTLENECK = 128      # stand-in for 1024
    WIDTH = 128           # stand-in for 1024
    CLASS_NUM = 16        # stand-in for 31

    key = jax.random.PRNGKey(0)
    k_x, k_p = jax.random.split(key)
    x = jax.random.normal(k_x, (N, C_IN, H, W), jnp.float32)     # NCHW like PyTorch
    raw = make_params(k_p, C_IN, BASE_FEAT, BOTTLENECK, WIDTH, CLASS_NUM)
    fused = prepare_fused_params(raw, CLASS_NUM)

    def run(single_buffer):
        fwd = jax.jit(functools.partial(rdanet_forward, class_num=CLASS_NUM,
                                        single_buffer_weights=single_buffer))
        outs = fwd(x, fused)
        jax.block_until_ready(outs)
        return outs

    try:
        features, outputs, softmax_outputs, outputs_adv = run(True)
    except Exception:
        # Fallback for jax versions without BlockSpec pipeline_mode support:
        # identical kernel, default (double) buffering of the constant weights.
        features, outputs, softmax_outputs, outputs_adv = run(False)

    assert features.shape == (N, BOTTLENECK)
    assert outputs.shape == (N, CLASS_NUM)
    assert softmax_outputs.shape == (N, CLASS_NUM)
    assert outputs_adv.shape == (N, CLASS_NUM)
    # exact softmax divide => rows sum to 1 tightly
    assert bool(jnp.all(jnp.abs(jnp.sum(softmax_outputs, axis=1) - 1.0) < 1e-3))
    assert bool(jnp.all(jnp.isfinite(outputs))) and bool(jnp.all(jnp.isfinite(outputs_adv)))
    print("KERNEL_OK")
</pallas_src>

<mosaic_0001>
module attributes {stable_mosaic.version = 11 : i64} {
  func.func @kernel(%arg0: i32, %arg1: memref<8x3x256xf32, #tpu.memory_space<vmem>>, %arg2: memref<64x3xf32, #tpu.memory_space<vmem>>, %arg3: memref<64x1xf32, #tpu.memory_space<vmem>>, %arg4: memref<64x128xbf16, #tpu.memory_space<vmem>>, %arg5: memref<1x128xf32, #tpu.memory_space<vmem>>, %arg6: memref<128x256xbf16, #tpu.memory_space<vmem>>, %arg7: memref<1x256xf32, #tpu.memory_space<vmem>>, %arg8: memref<256x256xbf16, #tpu.memory_space<vmem>>, %arg9: memref<1x256xf32, #tpu.memory_space<vmem>>, %arg10: memref<8x128xf32, #tpu.memory_space<vmem>>, %arg11: memref<8x384xf32, #tpu.memory_space<vmem>>) attributes {dimension_semantics = [#tpu.dimension_semantics<parallel>], iteration_bounds = array<i64: 1>, scalar_prefetch = 0 : i64, scratch_operands = 0 : i64, tpu.core_type = #tpu.core_type<tc>, window_params = [{transform_indices = @transform_0, window_bounds = array<i64: 8, 3, 256>}, {pipeline_mode = #tpu.pipeline_mode<synchronous>, transform_indices = @transform_1, window_bounds = array<i64: 64, 3>}, {pipeline_mode = #tpu.pipeline_mode<synchronous>, transform_indices = @transform_2, window_bounds = array<i64: 64, 1>}, {pipeline_mode = #tpu.pipeline_mode<synchronous>, transform_indices = @transform_3, window_bounds = array<i64: 64, 128>}, {pipeline_mode = #tpu.pipeline_mode<synchronous>, transform_indices = @transform_4, window_bounds = array<i64: 1, 128>}, {pipeline_mode = #tpu.pipeline_mode<synchronous>, transform_indices = @transform_5, window_bounds = array<i64: 128, 256>}, {pipeline_mode = #tpu.pipeline_mode<synchronous>, transform_indices = @transform_6, window_bounds = array<i64: 1, 256>}, {pipeline_mode = #tpu.pipeline_mode<synchronous>, transform_indices = @transform_7, window_bounds = array<i64: 256, 256>}, {pipeline_mode = #tpu.pipeline_mode<synchronous>, transform_indices = @transform_8, window_bounds = array<i64: 1, 256>}, {transform_indices = @transform_9, window_bounds = array<i64: 8, 128>}, {transform_indices = @transform_10, window_bounds = array<i64: 8, 384>}]} {
    %c0 = arith.constant 0 : index
    %c0_0 = arith.constant 0 : index
    %0 = vector.load %arg2[%c0, %c0_0] : memref<64x3xf32, #tpu.memory_space<vmem>>, vector<64x3xf32>
    %c0_1 = arith.constant 0 : index
    %c0_2 = arith.constant 0 : index
    %1 = vector.load %arg3[%c0_1, %c0_2] : memref<64x1xf32, #tpu.memory_space<vmem>>, vector<64x1xf32>
    %cst = arith.constant 0.000000e+00 : f32
    %2 = vector.broadcast %cst : f32 to vector<8x64xf32>
    %3 = vector.shape_cast %1 : vector<64x1xf32> to vector<1x64x1xf32>
    %c0_3 = arith.constant 0 : index
    %c0_4 = arith.constant 0 : index
    %c0_5 = arith.constant 0 : index
    %4 = vector.load %arg1[%c0_3, %c0_4, %c0_5] : memref<8x3x256xf32, #tpu.memory_space<vmem>>, vector<8x1x128xf32>
    %5 = vector.extract_strided_slice %0 {offsets = [0, 0], sizes = [64, 1], strides = [1, 1]} : vector<64x3xf32> to vector<64x1xf32>
    %6 = vector.shape_cast %5 : vector<64x1xf32> to vector<1x64x1xf32>
    %7 = vector.broadcast %4 : vector<8x1x128xf32> to vector<8x64x128xf32>
    %8 = vector.broadcast %6 : vector<1x64x1xf32> to vector<8x64x128xf32>
    %9 = arith.mulf %7, %8 : vector<8x64x128xf32>
    %10 = vector.broadcast %3 : vector<1x64x1xf32> to vector<8x64x128xf32>
    %11 = arith.addf %10, %9 : vector<8x64x128xf32>
    %c0_6 = arith.constant 0 : index
    %c1 = arith.constant 1 : index
    %c0_7 = arith.constant 0 : index
    %12 = vector.load %arg1[%c0_6, %c1, %c0_7] : memref<8x3x256xf32, #tpu.memory_space<vmem>>, vector<8x1x128xf32>
    %13 = vector.extract_strided_slice %0 {offsets = [0, 1], sizes = [64, 1], strides = [1, 1]} : vector<64x3xf32> to vector<64x1xf32>
    %14 = vector.shape_cast %13 : vector<64x1xf32> to vector<1x64x1xf32>
    %15 = vector.broadcast %12 : vector<8x1x128xf32> to vector<8x64x128xf32>
    %16 = vector.broadcast %14 : vector<1x64x1xf32> to vector<8x64x128xf32>
    %17 = arith.mulf %15, %16 : vector<8x64x128xf32>
    %18 = arith.addf %11, %17 : vector<8x64x128xf32>
    %c0_8 = arith.constant 0 : index
    %c2 = arith.constant 2 : index
    %c0_9 = arith.constant 0 : index
    %19 = vector.load %arg1[%c0_8, %c2, %c0_9] : memref<8x3x256xf32, #tpu.memory_space<vmem>>, vector<8x1x128xf32>
    %20 = vector.extract_strided_slice %0 {offsets = [0, 2], sizes = [64, 1], strides = [1, 1]} : vector<64x3xf32> to vector<64x1xf32>
    %21 = vector.shape_cast %20 : vector<64x1xf32> to vector<1x64x1xf32>
    %22 = vector.broadcast %19 : vector<8x1x128xf32> to vector<8x64x128xf32>
    %23 = vector.broadcast %21 : vector<1x64x1xf32> to vector<8x64x128xf32>
    %24 = arith.mulf %22, %23 : vector<8x64x128xf32>
    %25 = arith.addf %18, %24 : vector<8x64x128xf32>
    %cst_10 = arith.constant 0.000000e+00 : f32
    %26 = vector.broadcast %cst_10 : f32 to vector<8x64x128xf32>
    %27 = arith.maximumf %25, %26 : vector<8x64x128xf32>
    %cst_11 = arith.constant dense<0.000000e+00> : vector<8x64xf32>
    %28 = vector.multi_reduction <add>, %27, %cst_11 [2] : vector<8x64x128xf32> to vector<8x64xf32>
    %29 = arith.addf %2, %28 : vector<8x64xf32>
    %30 = vector.shape_cast %1 : vector<64x1xf32> to vector<1x64x1xf32>
    %c0_12 = arith.constant 0 : index
    %c0_13 = arith.constant 0 : index
    %c128 = arith.constant 128 : index
    %31 = vector.load %arg1[%c0_12, %c0_13, %c128] : memref<8x3x256xf32, #tpu.memory_space<vmem>>, vector<8x1x128xf32>
    %32 = vector.extract_strided_slice %0 {offsets = [0, 0], sizes = [64, 1], strides = [1, 1]} : vector<64x3xf32> to vector<64x1xf32>
    %33 = vector.shape_cast %32 : vector<64x1xf32> to vector<1x64x1xf32>
    %34 = vector.broadcast %31 : vector<8x1x128xf32> to vector<8x64x128xf32>
    %35 = vector.broadcast %33 : vector<1x64x1xf32> to vector<8x64x128xf32>
    %36 = arith.mulf %34, %35 : vector<8x64x128xf32>
    %37 = vector.broadcast %30 : vector<1x64x1xf32> to vector<8x64x128xf32>
    %38 = arith.addf %37, %36 : vector<8x64x128xf32>
    %c0_14 = arith.constant 0 : index
    %c1_15 = arith.constant 1 : index
    %c128_16 = arith.constant 128 : index
    %39 = vector.load %arg1[%c0_14, %c1_15, %c128_16] : memref<8x3x256xf32, #tpu.memory_space<vmem>>, vector<8x1x128xf32>
    %40 = vector.extract_strided_slice %0 {offsets = [0, 1], sizes = [64, 1], strides = [1, 1]} : vector<64x3xf32> to vector<64x1xf32>
    %41 = vector.shape_cast %40 : vector<64x1xf32> to vector<1x64x1xf32>
    %42 = vector.broadcast %39 : vector<8x1x128xf32> to vector<8x64x128xf32>
    %43 = vector.broadcast %41 : vector<1x64x1xf32> to vector<8x64x128xf32>
    %44 = arith.mulf %42, %43 : vector<8x64x128xf32>
    %45 = arith.addf %38, %44 : vector<8x64x128xf32>
    %c0_17 = arith.constant 0 : index
    %c2_18 = arith.constant 2 : index
    %c128_19 = arith.constant 128 : index
    %46 = vector.load %arg1[%c0_17, %c2_18, %c128_19] : memref<8x3x256xf32, #tpu.memory_space<vmem>>, vector<8x1x128xf32>
    %47 = vector.extract_strided_slice %0 {offsets = [0, 2], sizes = [64, 1], strides = [1, 1]} : vector<64x3xf32> to vector<64x1xf32>
    %48 = vector.shape_cast %47 : vector<64x1xf32> to vector<1x64x1xf32>
    %49 = vector.broadcast %46 : vector<8x1x128xf32> to vector<8x64x128xf32>
    %50 = vector.broadcast %48 : vector<1x64x1xf32> to vector<8x64x128xf32>
    %51 = arith.mulf %49, %50 : vector<8x64x128xf32>
    %52 = arith.addf %45, %51 : vector<8x64x128xf32>
    %cst_20 = arith.constant 0.000000e+00 : f32
    %53 = vector.broadcast %cst_20 : f32 to vector<8x64x128xf32>
    %54 = arith.maximumf %52, %53 : vector<8x64x128xf32>
    %cst_21 = arith.constant dense<0.000000e+00> : vector<8x64xf32>
    %55 = vector.multi_reduction <add>, %54, %cst_21 [2] : vector<8x64x128xf32> to vector<8x64xf32>
    %56 = arith.addf %29, %55 : vector<8x64xf32>
    %cst_22 = arith.constant 3.906250e-03 : f32
    %57 = vector.broadcast %cst_22 : f32 to vector<8x64xf32>
    %58 = arith.mulf %56, %57 : vector<8x64xf32>
    %59 = arith.truncf %58 : vector<8x64xf32> to vector<8x64xbf16>
    %c0_23 = arith.constant 0 : index
    %c0_24 = arith.constant 0 : index
    %60 = vector.load %arg4[%c0_23, %c0_24] : memref<64x128xbf16, #tpu.memory_space<vmem>>, vector<64x128xbf16>
    %cst_25 = arith.constant dense<0.000000e+00> : vector<8x128xf32>
    %61 = tpu.matmul %59, %60, %cst_25 {dimension_numbers = #tpu.dot_dimension_numbers<[1], [0], [0], [1], [0, 0, 1, 1], [], []>} : vector<8x64xbf16>, vector<64x128xbf16>, vector<8x128xf32> -> vector<8x128xf32>
    %c0_26 = arith.constant 0 : index
    %c0_27 = arith.constant 0 : index
    %62 = vector.load %arg5[%c0_26, %c0_27] : memref<1x128xf32, #tpu.memory_space<vmem>>, vector<1x128xf32>
    %63 = vector.broadcast %62 : vector<1x128xf32> to vector<8x128xf32>
    %64 = arith.addf %61, %63 : vector<8x128xf32>
    %cst_28 = arith.constant 0.000000e+00 : f32
    %65 = vector.broadcast %cst_28 : f32 to vector<8x128xf32>
    %66 = arith.maximumf %64, %65 : vector<8x128xf32>
    %c0_29 = arith.constant 0 : index
    %c0_30 = arith.constant 0 : index
    %67 = vector.load %arg10[%c0_29, %c0_30] : memref<8x128xf32, #tpu.memory_space<vmem>>, vector<8x128xf32>
    tpu.vector_store %arg10[%c0_29, %c0_30], %66 {strides = array<i32>} : memref<8x128xf32, #tpu.memory_space<vmem>>, vector<8x128xf32>,
    %68 = arith.truncf %66 : vector<8x128xf32> to vector<8x128xbf16>
    %c0_31 = arith.constant 0 : index
    %c0_32 = arith.constant 0 : index
    %69 = vector.load %arg6[%c0_31, %c0_32] : memref<128x256xbf16, #tpu.memory_space<vmem>>, vector<128x256xbf16>
    %cst_33 = arith.constant dense<0.000000e+00> : vector<8x256xf32>
    %70 = tpu.matmul %68, %69, %cst_33 {dimension_numbers = #tpu.dot_dimension_numbers<[1], [0], [0], [1], [0, 0, 1, 1], [], []>} : vector<8x128xbf16>, vector<128x256xbf16>, vector<8x256xf32> -> vector<8x256xf32>
    %c0_34 = arith.constant 0 : index
    %c0_35 = arith.constant 0 : index
    %71 = vector.load %arg7[%c0_34, %c0_35] : memref<1x256xf32, #tpu.memory_space<vmem>>, vector<1x256xf32>
    %72 = vector.broadcast %71 : vector<1x256xf32> to vector<8x256xf32>
    %73 = arith.addf %70, %72 : vector<8x256xf32>
    %cst_36 = arith.constant 0.000000e+00 : f32
    %74 = vector.broadcast %cst_36 : f32 to vector<8x256xf32>
    %75 = arith.maximumf %73, %74 : vector<8x256xf32>
    %76 = arith.truncf %75 : vector<8x256xf32> to vector<8x256xbf16>
    %c0_37 = arith.constant 0 : index
    %c0_38 = arith.constant 0 : index
    %77 = vector.load %arg8[%c0_37, %c0_38] : memref<256x256xbf16, #tpu.memory_space<vmem>>, vector<256x256xbf16>
    %cst_39 = arith.constant dense<0.000000e+00> : vector<8x256xf32>
    %78 = tpu.matmul %76, %77, %cst_39 {dimension_numbers = #tpu.dot_dimension_numbers<[1], [0], [0], [1], [0, 0, 1, 1], [], []>} : vector<8x256xbf16>, vector<256x256xbf16>, vector<8x256xf32> -> vector<8x256xf32>
    %c0_40 = arith.constant 0 : index
    %c0_41 = arith.constant 0 : index
    %79 = vector.load %arg9[%c0_40, %c0_41] : memref<1x256xf32, #tpu.memory_space<vmem>>, vector<1x256xf32>
    %80 = vector.broadcast %79 : vector<1x256xf32> to vector<8x256xf32>
    %81 = arith.addf %78, %80 : vector<8x256xf32>
    %82 = vector.extract_strided_slice %81 {offsets = [0, 0], sizes = [8, 128], strides = [1, 1]} : vector<8x256xf32> to vector<8x128xf32>
    %83 = vector.extract_strided_slice %81 {offsets = [0, 128], sizes = [8, 128], strides = [1, 1]} : vector<8x256xf32> to vector<8x128xf32>
    %cst_42 = arith.constant dense<0xFF800000> : vector<8xf32>
    %84 = vector.multi_reduction <maximumf>, %82, %cst_42 [1] : vector<8x128xf32> to vector<8xf32>
    %85 = vector.shape_cast %84 : vector<8xf32> to vector<8x1xf32>
    %86 = vector.broadcast %85 : vector<8x1xf32> to vector<8x128xf32>
    %87 = arith.subf %82, %86 : vector<8x128xf32>
    %88 = math.exp %87 : vector<8x128xf32>
    %cst_43 = arith.constant dense<0.000000e+00> : vector<8xf32>
    %89 = vector.multi_reduction <add>, %88, %cst_43 [1] : vector<8x128xf32> to vector<8xf32>
    %90 = vector.shape_cast %89 : vector<8xf32> to vector<8x1xf32>
    %91 = vector.broadcast %90 : vector<8x1xf32> to vector<8x128xf32>
    %92 = arith.divf %88, %91 : vector<8x128xf32>
    %c0_44 = arith.constant 0 : index
    %c0_45 = arith.constant 0 : index
    %93 = vector.load %arg11[%c0_44, %c0_45] : memref<8x384xf32, #tpu.memory_space<vmem>>, vector<8x128xf32>
    tpu.vector_store %arg11[%c0_44, %c0_45], %82 {strides = array<i32>} : memref<8x384xf32, #tpu.memory_space<vmem>>, vector<8x128xf32>,
    %c0_46 = arith.constant 0 : index
    %c128_47 = arith.constant 128 : index
    %94 = vector.load %arg11[%c0_46, %c128_47] : memref<8x384xf32, #tpu.memory_space<vmem>>, vector<8x128xf32>
    tpu.vector_store %arg11[%c0_46, %c128_47], %92 {strides = array<i32>} : memref<8x384xf32, #tpu.memory_space<vmem>>, vector<8x128xf32>,
    %c0_48 = arith.constant 0 : index
    %c256 = arith.constant 256 : index
    %95 = vector.load %arg11[%c0_48, %c256] : memref<8x384xf32, #tpu.memory_space<vmem>>, vector<8x128xf32>
    tpu.vector_store %arg11[%c0_48, %c256], %83 {strides = array<i32>} : memref<8x384xf32, #tpu.memory_space<vmem>>, vector<8x128xf32>,
    return
  }
  func.func @transform_0(%arg0: i32) -> (i32, i32, i32) {
    %c0_i32 = arith.constant 0 : i32
    %c0_i32_0 = arith.constant 0 : i32
    %c0_i32_1 = arith.constant 0 : i32
    return %arg0, %c0_i32, %c0_i32_0 : i32, i32, i32
  }
  func.func @transform_1(%arg0: i32) -> (i32, i32) {
    %c0_i32 = arith.constant 0 : i32
    %c0_i32_0 = arith.constant 0 : i32
    %c0_i32_1 = arith.constant 0 : i32
    return %c0_i32, %c0_i32_0 : i32, i32
  }
  func.func @transform_2(%arg0: i32) -> (i32, i32) {
    %c0_i32 = arith.constant 0 : i32
    %c0_i32_0 = arith.constant 0 : i32
    %c0_i32_1 = arith.constant 0 : i32
    return %c0_i32, %c0_i32_0 : i32, i32
  }
  func.func @transform_3(%arg0: i32) -> (i32, i32) {
    %c0_i32 = arith.constant 0 : i32
    %c0_i32_0 = arith.constant 0 : i32
    %c0_i32_1 = arith.constant 0 : i32
    return %c0_i32, %c0_i32_0 : i32, i32
  }
  func.func @transform_4(%arg0: i32) -> (i32, i32) {
    %c0_i32 = arith.constant 0 : i32
    %c0_i32_0 = arith.constant 0 : i32
    %c0_i32_1 = arith.constant 0 : i32
    return %c0_i32, %c0_i32_0 : i32, i32
  }
  func.func @transform_5(%arg0: i32) -> (i32, i32) {
    %c0_i32 = arith.constant 0 : i32
    %c0_i32_0 = arith.constant 0 : i32
    %c0_i32_1 = arith.constant 0 : i32
    return %c0_i32, %c0_i32_0 : i32, i32
  }
  func.func @transform_6(%arg0: i32) -> (i32, i32) {
    %c0_i32 = arith.constant 0 : i32
    %c0_i32_0 = arith.constant 0 : i32
    %c0_i32_1 = arith.constant 0 : i32
    return %c0_i32, %c0_i32_0 : i32, i32
  }
  func.func @transform_7(%arg0: i32) -> (i32, i32) {
    %c0_i32 = arith.constant 0 : i32
    %c0_i32_0 = arith.constant 0 : i32
    %c0_i32_1 = arith.constant 0 : i32
    return %c0_i32, %c0_i32_0 : i32, i32
  }
  func.func @transform_8(%arg0: i32) -> (i32, i32) {
    %c0_i32 = arith.constant 0 : i32
    %c0_i32_0 = arith.constant 0 : i32
    %c0_i32_1 = arith.constant 0 : i32
    return %c0_i32, %c0_i32_0 : i32, i32
  }
  func.func @transform_9(%arg0: i32) -> (i32, i32) {
    %c0_i32 = arith.constant 0 : i32
    %c0_i32_0 = arith.constant 0 : i32
    return %arg0, %c0_i32 : i32, i32
  }
  func.func @transform_10(%arg0: i32) -> (i32, i32) {
    %c0_i32 = arith.constant 0 : i32
    %c0_i32_0 = arith.constant 0 : i32
    return %arg0, %c0_i32 : i32, i32
  }
}

module attributes {stable_mosaic.version = 11 : i64} {
  func.func @kernel(%arg0: i32, %arg1: memref<8x3x256xf32, #tpu.memory_space<vmem>>, %arg2: memref<64x3xf32, #tpu.memory_space<vmem>>, %arg3: memref<64x1xf32, #tpu.memory_space<vmem>>, %arg4: memref<64x128xbf16, #tpu.memory_space<vmem>>, %arg5: memref<1x128xf32, #tpu.memory_space<vmem>>, %arg6: memref<128x256xbf16, #tpu.memory_space<vmem>>, %arg7: memref<1x256xf32, #tpu.memory_space<vmem>>, %arg8: memref<256x256xbf16, #tpu.memory_space<vmem>>, %arg9: memref<1x256xf32, #tpu.memory_space<vmem>>, %arg10: memref<8x128xf32, #tpu.memory_space<vmem>>, %arg11: memref<8x384xf32, #tpu.memory_space<vmem>>) attributes {dimension_semantics = [#tpu.dimension_semantics<parallel>], iteration_bounds = array<i64: 1>, scalar_prefetch = 0 : i64, scratch_operands = 0 : i64, tpu.core_type = #tpu.core_type<tc>, window_params = [{transform_indices = @transform_0, window_bounds = array<i64: 8, 3, 256>}, {pipeline_mode = #tpu.pipeline_mode<synchronous>, transform_indices = @transform_1, window_bounds = array<i64: 64, 3>}, {pipeline_mode = #tpu.pipeline_mode<synchronous>, transform_indices = @transform_2, window_bounds = array<i64: 64, 1>}, {pipeline_mode = #tpu.pipeline_mode<synchronous>, transform_indices = @transform_3, window_bounds = array<i64: 64, 128>}, {pipeline_mode = #tpu.pipeline_mode<synchronous>, transform_indices = @transform_4, window_bounds = array<i64: 1, 128>}, {pipeline_mode = #tpu.pipeline_mode<synchronous>, transform_indices = @transform_5, window_bounds = array<i64: 128, 256>}, {pipeline_mode = #tpu.pipeline_mode<synchronous>, transform_indices = @transform_6, window_bounds = array<i64: 1, 256>}, {pipeline_mode = #tpu.pipeline_mode<synchronous>, transform_indices = @transform_7, window_bounds = array<i64: 256, 256>}, {pipeline_mode = #tpu.pipeline_mode<synchronous>, transform_indices = @transform_8, window_bounds = array<i64: 1, 256>}, {transform_indices = @transform_9, window_bounds = array<i64: 8, 128>}, {transform_indices = @transform_10, window_bounds = array<i64: 8, 384>}]} {
    %c0 = arith.constant 0 : index
    %c0_0 = arith.constant 0 : index
    %0 = vector.load %arg2[%c0, %c0_0] : memref<64x3xf32, #tpu.memory_space<vmem>>, vector<64x3xf32>
    %c0_1 = arith.constant 0 : index
    %c0_2 = arith.constant 0 : index
    %1 = vector.load %arg3[%c0_1, %c0_2] : memref<64x1xf32, #tpu.memory_space<vmem>>, vector<64x1xf32>
    %cst = arith.constant 0.000000e+00 : f32
    %2 = vector.broadcast %cst : f32 to vector<8x64xf32>
    %3 = vector.shape_cast %1 : vector<64x1xf32> to vector<1x64x1xf32>
    %c0_3 = arith.constant 0 : index
    %c0_4 = arith.constant 0 : index
    %c0_5 = arith.constant 0 : index
    %4 = vector.load %arg1[%c0_3, %c0_4, %c0_5] : memref<8x3x256xf32, #tpu.memory_space<vmem>>, vector<8x1x128xf32>
    %5 = vector.extract_strided_slice %0 {offsets = [0, 0], sizes = [64, 1], strides = [1, 1]} : vector<64x3xf32> to vector<64x1xf32>
    %6 = vector.shape_cast %5 : vector<64x1xf32> to vector<1x64x1xf32>
    %7 = vector.broadcast %4 : vector<8x1x128xf32> to vector<8x64x128xf32>
    %8 = vector.broadcast %6 : vector<1x64x1xf32> to vector<8x64x128xf32>
    %9 = arith.mulf %7, %8 : vector<8x64x128xf32>
    %10 = vector.broadcast %3 : vector<1x64x1xf32> to vector<8x64x128xf32>
    %11 = arith.addf %10, %9 : vector<8x64x128xf32>
    %c0_6 = arith.constant 0 : index
    %c1 = arith.constant 1 : index
    %c0_7 = arith.constant 0 : index
    %12 = vector.load %arg1[%c0_6, %c1, %c0_7] : memref<8x3x256xf32, #tpu.memory_space<vmem>>, vector<8x1x128xf32>
    %13 = vector.extract_strided_slice %0 {offsets = [0, 1], sizes = [64, 1], strides = [1, 1]} : vector<64x3xf32> to vector<64x1xf32>
    %14 = vector.shape_cast %13 : vector<64x1xf32> to vector<1x64x1xf32>
    %15 = vector.broadcast %12 : vector<8x1x128xf32> to vector<8x64x128xf32>
    %16 = vector.broadcast %14 : vector<1x64x1xf32> to vector<8x64x128xf32>
    %17 = arith.mulf %15, %16 : vector<8x64x128xf32>
    %18 = arith.addf %11, %17 : vector<8x64x128xf32>
    %c0_8 = arith.constant 0 : index
    %c2 = arith.constant 2 : index
    %c0_9 = arith.constant 0 : index
    %19 = vector.load %arg1[%c0_8, %c2, %c0_9] : memref<8x3x256xf32, #tpu.memory_space<vmem>>, vector<8x1x128xf32>
    %20 = vector.extract_strided_slice %0 {offsets = [0, 2], sizes = [64, 1], strides = [1, 1]} : vector<64x3xf32> to vector<64x1xf32>
    %21 = vector.shape_cast %20 : vector<64x1xf32> to vector<1x64x1xf32>
    %22 = vector.broadcast %19 : vector<8x1x128xf32> to vector<8x64x128xf32>
    %23 = vector.broadcast %21 : vector<1x64x1xf32> to vector<8x64x128xf32>
    %24 = arith.mulf %22, %23 : vector<8x64x128xf32>
    %25 = arith.addf %18, %24 : vector<8x64x128xf32>
    %cst_10 = arith.constant 0.000000e+00 : f32
    %26 = vector.broadcast %cst_10 : f32 to vector<8x64x128xf32>
    %27 = arith.maximumf %25, %26 : vector<8x64x128xf32>
    %cst_11 = arith.constant dense<0.000000e+00> : vector<8x64xf32>
    %28 = vector.multi_reduction <add>, %27, %cst_11 [2] : vector<8x64x128xf32> to vector<8x64xf32>
    %29 = arith.addf %2, %28 : vector<8x64xf32>
    %30 = vector.shape_cast %1 : vector<64x1xf32> to vector<1x64x1xf32>
    %c0_12 = arith.constant 0 : index
    %c0_13 = arith.constant 0 : index
    %c128 = arith.constant 128 : index
    %31 = vector.load %arg1[%c0_12, %c0_13, %c128] : memref<8x3x256xf32, #tpu.memory_space<vmem>>, vector<8x1x128xf32>
    %32 = vector.extract_strided_slice %0 {offsets = [0, 0], sizes = [64, 1], strides = [1, 1]} : vector<64x3xf32> to vector<64x1xf32>
    %33 = vector.shape_cast %32 : vector<64x1xf32> to vector<1x64x1xf32>
    %34 = vector.broadcast %31 : vector<8x1x128xf32> to vector<8x64x128xf32>
    %35 = vector.broadcast %33 : vector<1x64x1xf32> to vector<8x64x128xf32>
    %36 = arith.mulf %34, %35 : vector<8x64x128xf32>
    %37 = vector.broadcast %30 : vector<1x64x1xf32> to vector<8x64x128xf32>
    %38 = arith.addf %37, %36 : vector<8x64x128xf32>
    %c0_14 = arith.constant 0 : index
    %c1_15 = arith.constant 1 : index
    %c128_16 = arith.constant 128 : index
    %39 = vector.load %arg1[%c0_14, %c1_15, %c128_16] : memref<8x3x256xf32, #tpu.memory_space<vmem>>, vector<8x1x128xf32>
    %40 = vector.extract_strided_slice %0 {offsets = [0, 1], sizes = [64, 1], strides = [1, 1]} : vector<64x3xf32> to vector<64x1xf32>
    %41 = vector.shape_cast %40 : vector<64x1xf32> to vector<1x64x1xf32>
    %42 = vector.broadcast %39 : vector<8x1x128xf32> to vector<8x64x128xf32>
    %43 = vector.broadcast %41 : vector<1x64x1xf32> to vector<8x64x128xf32>
    %44 = arith.mulf %42, %43 : vector<8x64x128xf32>
    %45 = arith.addf %38, %44 : vector<8x64x128xf32>
    %c0_17 = arith.constant 0 : index
    %c2_18 = arith.constant 2 : index
    %c128_19 = arith.constant 128 : index
    %46 = vector.load %arg1[%c0_17, %c2_18, %c128_19] : memref<8x3x256xf32, #tpu.memory_space<vmem>>, vector<8x1x128xf32>
    %47 = vector.extract_strided_slice %0 {offsets = [0, 2], sizes = [64, 1], strides = [1, 1]} : vector<64x3xf32> to vector<64x1xf32>
    %48 = vector.shape_cast %47 : vector<64x1xf32> to vector<1x64x1xf32>
    %49 = vector.broadcast %46 : vector<8x1x128xf32> to vector<8x64x128xf32>
    %50 = vector.broadcast %48 : vector<1x64x1xf32> to vector<8x64x128xf32>
    %51 = arith.mulf %49, %50 : vector<8x64x128xf32>
    %52 = arith.addf %45, %51 : vector<8x64x128xf32>
    %cst_20 = arith.constant 0.000000e+00 : f32
    %53 = vector.broadcast %cst_20 : f32 to vector<8x64x128xf32>
    %54 = arith.maximumf %52, %53 : vector<8x64x128xf32>
    %cst_21 = arith.constant dense<0.000000e+00> : vector<8x64xf32>
    %55 = vector.multi_reduction <add>, %54, %cst_21 [2] : vector<8x64x128xf32> to vector<8x64xf32>
    %56 = arith.addf %29, %55 : vector<8x64xf32>
    %cst_22 = arith.constant 3.906250e-03 : f32
    %57 = vector.broadcast %cst_22 : f32 to vector<8x64xf32>
    %58 = arith.mulf %56, %57 : vector<8x64xf32>
    %59 = arith.truncf %58 : vector<8x64xf32> to vector<8x64xbf16>
    %c0_23 = arith.constant 0 : index
    %c0_24 = arith.constant 0 : index
    %60 = vector.load %arg4[%c0_23, %c0_24] : memref<64x128xbf16, #tpu.memory_space<vmem>>, vector<64x128xbf16>
    %cst_25 = arith.constant dense<0.000000e+00> : vector<8x128xf32>
    %61 = tpu.matmul %59, %60, %cst_25 {dimension_numbers = #tpu.dot_dimension_numbers<[1], [0], [0], [1], [0, 0, 1, 1], [], []>} : vector<8x64xbf16>, vector<64x128xbf16>, vector<8x128xf32> -> vector<8x128xf32>
    %c0_26 = arith.constant 0 : index
    %c0_27 = arith.constant 0 : index
    %62 = vector.load %arg5[%c0_26, %c0_27] : memref<1x128xf32, #tpu.memory_space<vmem>>, vector<1x128xf32>
    %63 = vector.broadcast %62 : vector<1x128xf32> to vector<8x128xf32>
    %64 = arith.addf %61, %63 : vector<8x128xf32>
    %cst_28 = arith.constant 0.000000e+00 : f32
    %65 = vector.broadcast %cst_28 : f32 to vector<8x128xf32>
    %66 = arith.maximumf %64, %65 : vector<8x128xf32>
    %c0_29 = arith.constant 0 : index
    %c0_30 = arith.constant 0 : index
    %67 = vector.load %arg10[%c0_29, %c0_30] : memref<8x128xf32, #tpu.memory_space<vmem>>, vector<8x128xf32>
    tpu.vector_store %arg10[%c0_29, %c0_30], %66 {strides = array<i32>} : memref<8x128xf32, #tpu.memory_space<vmem>>, vector<8x128xf32>,
    %68 = arith.truncf %66 : vector<8x128xf32> to vector<8x128xbf16>
    %c0_31 = arith.constant 0 : index
    %c0_32 = arith.constant 0 : index
    %69 = vector.load %arg6[%c0_31, %c0_32] : memref<128x256xbf16, #tpu.memory_space<vmem>>, vector<128x256xbf16>
    %cst_33 = arith.constant dense<0.000000e+00> : vector<8x256xf32>
    %70 = tpu.matmul %68, %69, %cst_33 {dimension_numbers = #tpu.dot_dimension_numbers<[1], [0], [0], [1], [0, 0, 1, 1], [], []>} : vector<8x128xbf16>, vector<128x256xbf16>, vector<8x256xf32> -> vector<8x256xf32>
    %c0_34 = arith.constant 0 : index
    %c0_35 = arith.constant 0 : index
    %71 = vector.load %arg7[%c0_34, %c0_35] : memref<1x256xf32, #tpu.memory_space<vmem>>, vector<1x256xf32>
    %72 = vector.broadcast %71 : vector<1x256xf32> to vector<8x256xf32>
    %73 = arith.addf %70, %72 : vector<8x256xf32>
    %cst_36 = arith.constant 0.000000e+00 : f32
    %74 = vector.broadcast %cst_36 : f32 to vector<8x256xf32>
    %75 = arith.maximumf %73, %74 : vector<8x256xf32>
    %76 = arith.truncf %75 : vector<8x256xf32> to vector<8x256xbf16>
    %c0_37 = arith.constant 0 : index
    %c0_38 = arith.constant 0 : index
    %77 = vector.load %arg8[%c0_37, %c0_38] : memref<256x256xbf16, #tpu.memory_space<vmem>>, vector<256x256xbf16>
    %cst_39 = arith.constant dense<0.000000e+00> : vector<8x256xf32>
    %78 = tpu.matmul %76, %77, %cst_39 {dimension_numbers = #tpu.dot_dimension_numbers<[1], [0], [0], [1], [0, 0, 1, 1], [], []>} : vector<8x256xbf16>, vector<256x256xbf16>, vector<8x256xf32> -> vector<8x256xf32>
    %c0_40 = arith.constant 0 : index
    %c0_41 = arith.constant 0 : index
    %79 = vector.load %arg9[%c0_40, %c0_41] : memref<1x256xf32, #tpu.memory_space<vmem>>, vector<1x256xf32>
    %80 = vector.broadcast %79 : vector<1x256xf32> to vector<8x256xf32>
    %81 = arith.addf %78, %80 : vector<8x256xf32>
    %82 = vector.extract_strided_slice %81 {offsets = [0, 0], sizes = [8, 128], strides = [1, 1]} : vector<8x256xf32> to vector<8x128xf32>
    %83 = vector.extract_strided_slice %81 {offsets = [0, 128], sizes = [8, 128], strides = [1, 1]} : vector<8x256xf32> to vector<8x128xf32>
    %cst_42 = arith.constant dense<0xFF800000> : vector<8xf32>
    %84 = vector.multi_reduction <maximumf>, %82, %cst_42 [1] : vector<8x128xf32> to vector<8xf32>
    %85 = vector.shape_cast %84 : vector<8xf32> to vector<8x1xf32>
    %86 = vector.broadcast %85 : vector<8x1xf32> to vector<8x128xf32>
    %87 = arith.subf %82, %86 : vector<8x128xf32>
    %88 = math.exp %87 : vector<8x128xf32>
    %cst_43 = arith.constant dense<0.000000e+00> : vector<8xf32>
    %89 = vector.multi_reduction <add>, %88, %cst_43 [1] : vector<8x128xf32> to vector<8xf32>
    %90 = vector.shape_cast %89 : vector<8xf32> to vector<8x1xf32>
    %91 = vector.broadcast %90 : vector<8x1xf32> to vector<8x128xf32>
    %92 = arith.divf %88, %91 : vector<8x128xf32>
    %c0_44 = arith.constant 0 : index
    %c0_45 = arith.constant 0 : index
    %93 = vector.load %arg11[%c0_44, %c0_45] : memref<8x384xf32, #tpu.memory_space<vmem>>, vector<8x128xf32>
    tpu.vector_store %arg11[%c0_44, %c0_45], %82 {strides = array<i32>} : memref<8x384xf32, #tpu.memory_space<vmem>>, vector<8x128xf32>,
    %c0_46 = arith.constant 0 : index
    %c128_47 = arith.constant 128 : index
    %94 = vector.load %arg11[%c0_46, %c128_47] : memref<8x384xf32, #tpu.memory_space<vmem>>, vector<8x128xf32>
    tpu.vector_store %arg11[%c0_46, %c128_47], %92 {strides = array<i32>} : memref<8x384xf32, #tpu.memory_space<vmem>>, vector<8x128xf32>,
    %c0_48 = arith.constant 0 : index
    %c256 = arith.constant 256 : index
    %95 = vector.load %arg11[%c0_48, %c256] : memref<8x384xf32, #tpu.memory_space<vmem>>, vector<8x128xf32>
    tpu.vector_store %arg11[%c0_48, %c256], %83 {strides = array<i32>} : memref<8x384xf32, #tpu.memory_space<vmem>>, vector<8x128xf32>,
    return
  }
  func.func @transform_0(%arg0: i32) -> (i32, i32, i32) {
    %c0_i32 = arith.constant 0 : i32
    %c0_i32_0 = arith.constant 0 : i32
    %c0_i32_1 = arith.constant 0 : i32
    return %arg0, %c0_i32, %c0_i32_0 : i32, i32, i32
  }
  func.func @transform_1(%arg0: i32) -> (i32, i32) {
    %c0_i32 = arith.constant 0 : i32
    %c0_i32_0 = arith.constant 0 : i32
    %c0_i32_1 = arith.constant 0 : i32
    return %c0_i32, %c0_i32_0 : i32, i32
  }
  func.func @transform_2(%arg0: i32) -> (i32, i32) {
    %c0_i32 = arith.constant 0 : i32
    %c0_i32_0 = arith.constant 0 : i32
    %c0_i32_1 = arith.constant 0 : i32
    return %c0_i32, %c0_i32_0 : i32, i32
  }
  func.func @transform_3(%arg0: i32) -> (i32, i32) {
    %c0_i32 = arith.constant 0 : i32
    %c0_i32_0 = arith.constant 0 : i32
    %c0_i32_1 = arith.constant 0 : i32
    return %c0_i32, %c0_i32_0 : i32, i32
  }
  func.func @transform_4(%arg0: i32) -> (i32, i32) {
    %c0_i32 = arith.constant 0 : i32
    %c0_i32_0 = arith.constant 0 : i32
    %c0_i32_1 = arith.constant 0 : i32
    return %c0_i32, %c0_i32_0 : i32, i32
  }
  func.func @transform_5(%arg0: i32) -> (i32, i32) {
    %c0_i32 = arith.constant 0 : i32
    %c0_i32_0 = arith.constant 0 : i32
    %c0_i32_1 = arith.constant 0 : i32
    return %c0_i32, %c0_i32_0 : i32, i32
  }
  func.func @transform_6(%arg0: i32) -> (i32, i32) {
    %c0_i32 = arith.constant 0 : i32
    %c0_i32_0 = arith.constant 0 : i32
    %c0_i32_1 = arith.constant 0 : i32
    return %c0_i32, %c0_i32_0 : i32, i32
  }
  func.func @transform_7(%arg0: i32) -> (i32, i32) {
    %c0_i32 = arith.constant 0 : i32
    %c0_i32_0 = arith.constant 0 : i32
    %c0_i32_1 = arith.constant 0 : i32
    return %c0_i32, %c0_i32_0 : i32, i32
  }
  func.func @transform_8(%arg0: i32) -> (i32, i32) {
    %c0_i32 = arith.constant 0 : i32
    %c0_i32_0 = arith.constant 0 : i32
    %c0_i32_1 = arith.constant 0 : i32
    return %c0_i32, %c0_i32_0 : i32, i32
  }
  func.func @transform_9(%arg0: i32) -> (i32, i32) {
    %c0_i32 = arith.constant 0 : i32
    %c0_i32_0 = arith.constant 0 : i32
    return %arg0, %c0_i32 : i32, i32
  }
  func.func @transform_10(%arg0: i32) -> (i32, i32) {
    %c0_i32 = arith.constant 0 : i32
    %c0_i32_0 = arith.constant 0 : i32
    return %arg0, %c0_i32 : i32, i32
  }
}

</mosaic_0001>

<bundles_post_ra>
// kernel: rdanet_forward.1
= control target key start
LH: loop header
LB: loop body
LE: loop exit
PB: predicated region body
PF: predicated region fallthrough
CT: control target
= control target key end

     0   :  { %v2770_v0 = vmov 0   ;;  %v2771_v9 = vmov 1   ;;  %v2772_v14 = vmov 2   ;;  %vm1780_vm0 = vcmask 130112   ;;  %s4932_s2 = inlined_call_operand.vmem [shape: f32[64,1], index: 2, kind: input, shape index: {}]   ;;  %s4933_s1 = inlined_call_operand.vmem [shape: f32[64,3], index: 1, kind: input, shape index: {}]   ;;  %s4934_s0 = inlined_call_operand.vmem [shape: f32[8,3,256], index: 0, kind: input, shape index: {}]   ;;  %s4935_s4 = inlined_call_operand.vmem [shape: f32[1,128], index: 4, kind: input, shape index: {}]   ;;  %s4936_s3 = inlined_call_operand.vmem [shape: bf16[64,128], index: 3, kind: input, shape index: {}]   ;;  %s4937_s5 = inlined_call_operand.vmem [shape: bf16[128,256], index: 5, kind: input, shape index: {}]   ;;  %s4938_s7 = inlined_call_operand.vmem [shape: bf16[256,256], index: 7, kind: input, shape index: {}]   ;;  %s4939_s9 = inlined_call_operand.vmem [shape: f32[8,128], index: 9, kind: output, shape index: {0}]   ;;  %s4940_s6 = inlined_call_operand.vmem [shape: f32[1,256], index: 6, kind: input, shape index: {}]   ;;  %s4941_s8 = inlined_call_operand.vmem [shape: f32[1,256], index: 8, kind: input, shape index: {}]   ;;  %s4942_s10 = inlined_call_operand.vmem [shape: f32[8,384], index: 10, kind: output, shape index: {1}]  }
   0x1   :  { %2651 = vset.pattern.permute.xlu2 %v2770_v0  ;;  %2650 = vset.pattern.permute.xlu1 %v2770_v0  ;;  %v43_v1 = vld [vmem:[%s4932_s2] sm:$0xff]  ;;  %v37_v2 = vld [vmem:[%s4933_s1 + $0x10] sm:$0xff]  ;;  %v44_v4 = vld [vmem:[%s4932_s2 + $0x8] sm:$0xff]  ;;  %vm1784_vm1 = vcmask 195712   ;;  %vm1788_vm2 = vcmask 261312   ;;  %vm1792_vm3 = vcmask 326912  }
   0x2   :  { %v35_v3 = vld [vmem:[%s4933_s1] sm:$0xff]  ;;  %2649 = vset.pattern.permute.xlu0 %v2770_v0  ;;  %173 = vperm.xlu2 %2651, %v43_v1   ;;  %v38_v5 = vld [vmem:[%s4933_s1 + $0x18] sm:$0xff]  ;;  %v36_v6 = vld [vmem:[%s4933_s1 + $0x8] sm:$0xff]  ;;  %vm1796_vm4 = vcmask 392512   ;;  %vm1800_vm5 = vcmask 458112   ;;  %vm1804_vm6 = vcmask 523712  }
   0x3   :  { %79 = vperm.xlu1 %2650, %v37_v2   ;;  %69 = vperm.xlu0 %2649, %v35_v3   ;;  %v39_v7 = vld [vmem:[%s4933_s1 + $0x20] sm:$0xff]  ;;  %v46_v8 = vld [vmem:[%s4932_s2 + $0x18] sm:$0xff]  ;;  %v45_v10 = vld [vmem:[%s4932_s2 + $0x10] sm:$0xff]  ;;  %vm1911_vm7 = vcmask 1041409   ;;  %vm1913_vm8 = vcmask 1042434   ;;  %vm1915_vm9 = vcmask 1043459  }
   0x4   :  { %v41_v11 = vld [vmem:[%s4933_s1 + $0x30] sm:$0xff]  ;;  %v40_v12 = vld [vmem:[%s4933_s1 + $0x28] sm:$0xff]  ;;  %v47_v15 = vld [vmem:[%s4932_s2 + $0x20] sm:$0xff]  ;;  %vm1917_vm10 = vcmask 1044484   ;;  %vm1919_vm11 = vcmask 1045509   ;;  %vm1921_vm12 = vcmask 1046534  }
   0x5   :  { %v48_v13 = vld [vmem:[%s4932_s2 + $0x28] sm:$0xff]  ;;  %v42_v16 = vld [vmem:[%s4933_s1 + $0x38] sm:$0xff]  ;;  %v49_v17 = vld [vmem:[%s4932_s2 + $0x30] sm:$0xff]  ;;  %vm1923_vm13 = vcmask 1047559   ;;  %vm1950_vm14 = vcmask 523264  }
   0x6   :  { %v50_v18 = vld [vmem:[%s4932_s2 + $0x38] sm:$0xff]  ;;  %v2905_v28 = vld [vmem:[%s4934_s0] ss:$0 sm:$0xff]  ;;  %v2912_v30 = vld [vmem:[%s4934_s0 + $0x1] ss:$0 sm:$0xff] }
   0x7   :  { %5083 = vst [vmem:[#allocation8_spill] sm:$0xff] %v2912_v30  ;;  %v2917_v31 = vld [vmem:[%s4934_s0 + $0x2] ss:$0 sm:$0xff]  ;;  %v2924_v33 = vld [vmem:[%s4934_s0 + $0x4] ss:$0 sm:$0xff] }
   0x8   :  { %5084 = vst [vmem:[#allocation9_spill] sm:$0xff] %v2917_v31  ;;  %v2929_v34 = vld [vmem:[%s4934_s0 + $0x5] ss:$0 sm:$0xff]  ;;  %v2947_v43 = vld [vmem:[%s4934_s0 + $0x6] ss:$0 sm:$0xff] }
   0x9   :  { %v2972_v61 = vld [vmem:[%s4934_s0 + $0x8] ss:$0 sm:$0xff] }
   0xa   :  { %178 = vperm.xlu2 %2651, %v44_v4   ;;  %5092 = vst [vmem:[#allocation17_spill] sm:$0xff] %v2972_v61 }
   0xb   :  { %84 = vperm.xlu1 %2650, %v38_v5   ;;  %74 = vperm.xlu0 %2649, %v36_v6  }
  0x12   :  { %89 = vperm.xlu2 %2651, %v39_v7  }
  0x13   :  { %2652 = vset.pattern.permute.xlu1 %v2771_v9  ;;  %188 = vperm.xlu0 %2649, %v46_v8  }
  0x14   :  { %296 = vperm.xlu1 %2652, %v36_v6  }
  0x1a   :  { %183 = vperm.xlu2 %2651, %v45_v10  }
  0x1b   :  { %99 = vperm.xlu0 %2649, %v41_v11  }
  0x1c   :  { %2653 = vset.pattern.permute.xlu1 %v2770_v0 }
  0x1d   :  { %94 = vperm.xlu1 %2653, %v40_v12  }
  0x22   :  { %2655 = vset.pattern.permute.xlu2 %v2771_v9 }
  0x23   :  { %198 = vperm.xlu0 %2649, %v48_v13   ;;  %304 = vperm.xlu2 %2655, %v38_v5  }
  0x25   :  { %2654 = vset.pattern.permute.xlu1 %v2771_v9 }
  0x26   :  { %300 = vperm.xlu1 %2654, %v37_v2  }
  0x2b   :  { %2662 = vset.pattern.permute.xlu0 %v2772_v14  ;;  %2657 = vset.pattern.permute.xlu2 %v2772_v14 }
  0x2c   :  { %476 = vperm.xlu0 %2662, %v37_v2   ;;  %472 = vperm.xlu2 %2657, %v36_v6   ;;  %v2991_v6 = vld [vmem:[%s4934_s0 + $0xa] ss:$0 sm:$0xff] }
  0x2d   :  { %5094 = vst [vmem:[#allocation19_spill] sm:$0xff] %v2991_v6 }
  0x2e   :  { %2656 = vset.pattern.permute.xlu1 %v2772_v14 }
  0x2f   :  { %468 = vperm.xlu1 %2656, %v35_v3  }
  0x34   :  { %2663 = vset.pattern.permute.xlu0 %v2771_v9  ;;  %2659 = vset.pattern.permute.xlu2 %v2770_v0 }
  0x35   :  { %292 = vperm.xlu0 %2663, %v35_v3   ;;  %193 = vperm.xlu2 %2659, %v47_v15   ;;  %v2983_v3 = vld [vmem:[%s4934_s0 + $0x9] ss:$0 sm:$0xff] }
  0x36   :  { %5093 = vst [vmem:[#allocation18_spill] sm:$0xff] %v2983_v3 }
  0x37   :  { %2658 = vset.pattern.permute.xlu1 %v2770_v0 }
  0x38   :  { %104 = vperm.xlu1 %2658, %v42_v16  }
  0x3d   :  { %320 = vperm.xlu0 %2663, %v42_v16   ;;  %2661 = vset.pattern.permute.xlu2 %v2771_v9 }
  0x3e   :  { %312 = vperm.xlu2 %2661, %v40_v12  }
  0x40   :  { %2660 = vset.pattern.permute.xlu1 %v2771_v9 }
  0x41   :  { %308 = vperm.xlu1 %2660, %v39_v7  }
  0x45   :  { %2670 = vset.pattern.permute.xlu0 %v2772_v14 }
  0x46   :  { %2665 = vset.pattern.permute.xlu2 %v2770_v0 }
  0x47   :  { %203 = vperm.xlu2 %2665, %v49_v17  }
  0x49   :  { %2664 = vset.pattern.permute.xlu1 %v2772_v14 }
  0x4a   :  { %480 = vperm.xlu1 %2664, %v38_v5  }
  0x4f   :  { %2667 = vset.pattern.permute.xlu2 %v2771_v9 }
  0x50   :  { %316 = vperm.xlu2 %2667, %v41_v11  }
  0x52   :  { %2666 = vset.pattern.permute.xlu1 %v2770_v0 }
  0x53   :  { %208 = vperm.xlu1 %2666, %v50_v18  }
  0x58   :  { %2669 = vset.pattern.permute.xlu2 %v2772_v14 }
  0x59   :  { %488 = vperm.xlu2 %2669, %v40_v12  }
  0x5b   :  { %2668 = vset.pattern.permute.xlu1 %v2772_v14 }
  0x5c   :  { %484 = vperm.xlu1 %2668, %v39_v7   ;;  %v2884_v19 = vpop.permute.xlu2 %173 }
  0x61   :  { %496 = vperm.xlu2 %2669, %v42_v16  }
  0x64   :  { %492 = vperm.xlu1 %2668, %v41_v11   ;;  %v2886_v20 = vpop.permute.xlu2 %178 }
  0x65   :  { %5077 = vst [vmem:[#allocation2_spill] sm:$0xff] %v2886_v20 }
  0x6c   :  { %v2888_v21 = vpop.permute.xlu2 %89 }
  0x74   :  { %v2890_v22 = vpop.permute.xlu2 %183 }
  0x75   :  { %5078 = vst [vmem:[#allocation3_spill] sm:$0xff] %v2890_v22  ;;  %v2892_v23 = vpop.permute.xlu1 %79  ;;  %v2894_v24 = vpop.permute.xlu0 %69 }
  0x76   :  { %5079 = vst [vmem:[#allocation4_spill] sm:$0xff] %v2892_v23  ;;  %v109_v55 = vmul.f32 %v2905_v28, %v2892_v23  ;;  %v115_v1 = vmul.f32 %v2972_v61, %v2894_v24  ;;  %v107_v2 = vmul.f32 %v2905_v28, %v2894_v24  ;;  %v899_v7 = vmul.f32 %v2924_v33, %v2894_v24 }
  0x78   :  { %v213_v57 = vadd.f32 %v2890_v22, %v109_v55  ;;  %v219_v5 = vadd.f32 %v2884_v19, %v115_v1  ;;  %v211_v9 = vadd.f32 %v2884_v19, %v107_v2  ;;  %v3035_v55 = vld [vmem:[%s4934_s0 + $0xe] ss:$0 sm:$0xff] }
  0x7d   :  { %v2896_v25 = vpop.permute.xlu1 %84  ;;  %v2898_v26 = vpop.permute.xlu0 %74 }
  0x7e   :  { %5080 = vst [vmem:[#allocation5_spill] sm:$0xff] %v2896_v25  ;;  %v2900_v27 = vpop.permute.xlu2 %304  ;;  %v108_v29 = vmul.f32 %v2905_v28, %v2898_v26  ;;  %v900_v40 = vmul.f32 %v2924_v33, %v2898_v26  ;;  %v116_v11 = vmul.f32 %v2972_v61, %v2898_v26 }
  0x7f   :  { %5081 = vst [vmem:[#allocation6_spill] sm:$0xff] %v2898_v26 }
  0x80   :  { %5082 = vst [vmem:[#allocation7_spill] sm:$0xff] %v2900_v27  ;;  %v212_v37 = vadd.f32 %v2886_v20, %v108_v29  ;;  %v964_v45 = vadd.f32 %v900_v40, %v2886_v20  ;;  %v3017_v40 = vld [vmem:[%s4934_s0 + $0xc] ss:$0 sm:$0xff] }
  0x85   :  { %v2919_v32 = vpop.permute.xlu0 %188 }
  0x86   :  { %5085 = vst [vmem:[#allocation10_spill] sm:$0xff] %v2919_v32  ;;  %v2931_v35 = vpop.permute.xlu1 %296  ;;  %v2933_v36 = vpop.permute.xlu2 %472 }
  0x87   :  { %5086 = vst [vmem:[#allocation11_spill] sm:$0xff] %v2931_v35  ;;  %v324_v38 = vmul.f32 %v2912_v30, %v2931_v35  ;;  %v500_v39 = vmul.f32 %v2917_v31, %v2933_v36  ;;  %v1044_v42 = vmul.f32 %v2929_v34, %v2931_v35  ;;  %v1188_v49 = vmul.f32 %v2947_v43, %v2933_v36 }
  0x88   :  { %5087 = vst [vmem:[#allocation12_spill] sm:$0xff] %v2933_v36  ;;  %v332_v13 = vmul.f32 %v2983_v3, %v2931_v35  ;;  %v1196_v2 = vmul.f32 %v3035_v55, %v2933_v36 }
  0x89   :  { %v388_v41 = vadd.f32 %v324_v38, %v212_v37  ;;  %v1108_v48 = vadd.f32 %v1044_v42, %v964_v45  ;;  %v220_v38 = vadd.f32 %v2886_v20, %v116_v11 }
  0x8b   :  { %v564_v44 = vadd.f32 %v500_v39, %v388_v41  ;;  %v1252_v51 = vadd.f32 %v1188_v49, %v1108_v48  ;;  %v963_v39 = vadd.f32 %v899_v7, %v2884_v19  ;;  %v508_v41 = vmul.f32 %v2991_v6, %v2933_v36  ;;  %v3024_v48 = vld [vmem:[%s4934_s0 + $0xd] ss:$0 sm:$0xff] }
  0x8c   :  { %v396_v45 = vadd.f32 %v332_v13, %v220_v38  ;;  %v334_v13 = vmul.f32 %v2983_v3, %v2900_v27 }
  0x8d   :  { %v2950_v46 = vpop.permute.xlu0 %99  ;;  %v628_v47 = vmax.f32 %v564_v44, 0.0  ;;  %v1316_v53 = vmax.f32 %v1252_v51, 0.0  ;;  %v907_v51 = vmul.f32 %v3017_v40, %v2894_v24 }
  0x8e   :  { %5088 = vst [vmem:[#allocation13_spill] sm:$0xff] %v2950_v46 }
  0x8f   :  { %693 = vadd.xlane.f32.xlu1 %v628_v47  ;;  %v2954_v50 = vpop.permute.xlu1 %94 }
  0x90   :  { %5089 = vst [vmem:[#allocation14_spill] sm:$0xff] %v2954_v50 }
  0x95   :  { %v2956_v52 = vpop.permute.xlu0 %198 }
  0x96   :  { %5090 = vst [vmem:[#allocation15_spill] sm:$0xff] %v2956_v52 }
  0x97   :  { %1381 = vadd.xlane.f32.xlu1 %v1316_v53  ;;  %v908_v53 = vmul.f32 %v3017_v40, %v2898_v26 }
  0x98   :  { %v2958_v54 = vpop.permute.xlu1 %300 }
  0x99   :  { %5091 = vst [vmem:[#allocation16_spill] sm:$0xff] %v2958_v54  ;;  %v325_v56 = vmul.f32 %v2912_v30, %v2958_v54  ;;  %v972_v1 = vadd.f32 %v908_v53, %v2886_v20 }
  0x9b   :  { %v389_v59 = vadd.f32 %v325_v56, %v213_v57  ;;  %v572_v56 = vadd.f32 %v508_v41, %v396_v45  ;;  %v333_v41 = vmul.f32 %v2983_v3, %v2958_v54 }
  0x9e   :  { %v2965_v58 = vpop.permute.xlu0 %476 }
  0x9f   :  { %v501_v60 = vmul.f32 %v2917_v31, %v2965_v58 }
  0xa1   :  { %v2974_v62 = vpop.permute.xlu1 %468  ;;  %v565_v63 = vadd.f32 %v501_v60, %v389_v59  ;;  %v1052_v60 = vmul.f32 %v3024_v48, %v2931_v35 }
  0xa2   :  { %v507_v12 = vmul.f32 %v2991_v6, %v2974_v62  ;;  %v499_v17 = vmul.f32 %v2917_v31, %v2974_v62  ;;  %v1187_v49 = vmul.f32 %v2947_v43, %v2974_v62  ;;  %v1195_v11 = vmul.f32 %v3035_v55, %v2974_v62 }
  0xa3   :  { %v629_v0 = vmax.f32 %v565_v63, 0.0 }
  0xa5   :  { %695 = vadd.xlane.f32.xlu1 %v629_v0  ;;  %v971_v0 = vadd.f32 %v907_v51, %v2884_v19 }
  0xa7   :  { %v2985_v4 = vpop.permute.xlu0 %292 }
  0xa8   :  { %v331_v8 = vmul.f32 %v2983_v3, %v2985_v4  ;;  %v323_v10 = vmul.f32 %v2912_v30, %v2985_v4  ;;  %v1043_v18 = vmul.f32 %v2929_v34, %v2985_v4  ;;  %v1051_v59 = vmul.f32 %v3024_v48, %v2985_v4 }
  0xaa   :  { %v3006_v14 = vpop.permute.xlu1 %104  ;;  %v395_v15 = vadd.f32 %v331_v8, %v219_v5  ;;  %v387_v16 = vadd.f32 %v323_v10, %v211_v9  ;;  %v1107_v47 = vadd.f32 %v1043_v18, %v963_v39  ;;  %v636_v5 = vmax.f32 %v572_v56, 0.0 }
  0xab   :  { %5095 = vst [vmem:[#allocation20_spill] sm:$0xff] %v3006_v14  ;;  %v1115_v8 = vadd.f32 %v1051_v59, %v971_v0  ;;  %v1116_v9 = vadd.f32 %v1052_v60, %v972_v1  ;;  %v118_v10 = vmul.f32 %v2972_v61, %v2896_v25  ;;  %v110_v18 = vmul.f32 %v2905_v28, %v2896_v25  ;;  %v3084_v59 = vld [vmem:[%s4934_s0 + $0x11] ss:$0 sm:$0xff] }
  0xac   :  { %v571_v29 = vadd.f32 %v507_v12, %v395_v15  ;;  %v563_v37 = vadd.f32 %v499_v17, %v387_v16  ;;  %v1251_v57 = vadd.f32 %v1187_v49, %v1107_v47  ;;  %v117_v15 = vmul.f32 %v2972_v61, %v2892_v23  ;;  %v3075_v49 = vpop.permute.xlu2 %193  ;;  %5097 = vst [vmem:[#allocation22_spill] sm:$0xff] %v3084_v59 }
  0xad   :  { %v222_v12 = vadd.f32 %v2919_v32, %v118_v10  ;;  %v1259_v16 = vadd.f32 %v1195_v11, %v1115_v8  ;;  %v1260_v17 = vadd.f32 %v1196_v2, %v1116_v9  ;;  %v214_v38 = vadd.f32 %v2919_v32, %v110_v18  ;;  %v3098_v11 = vld [vmem:[%s4934_s0 + $0x12] ss:$0 sm:$0xff] }
  0xae   :  { %v635_v42 = vmax.f32 %v571_v29, 0.0  ;;  %v627_v44 = vmax.f32 %v563_v37, 0.0  ;;  %v1315_v7 = vmax.f32 %v1251_v57, 0.0  ;;  %v3061_v29 = vld [vmem:[%s4934_s0 + $0x10] ss:$0 sm:$0xff]  ;;  %v326_v39 = vmul.f32 %v2912_v30, %v2900_v27 }
  0xaf   :  { %v221_v45 = vadd.f32 %v2890_v22, %v117_v15  ;;  %v901_v47 = vmul.f32 %v2924_v33, %v2892_v23  ;;  %v1323_v51 = vmax.f32 %v1259_v16, 0.0  ;;  %v1324_v53 = vmax.f32 %v1260_v17, 0.0 }
  0xb0   :  { %707 = vadd.xlane.f32.xlu2 %v635_v42  ;;  %691 = vadd.xlane.f32.xlu0 %v627_v44  ;;  %v398_v42 = vadd.f32 %v334_v13, %v222_v12  ;;  %v509_v57 = vmul.f32 %v2991_v6, %v2965_v58  ;;  %v1045_v0 = vmul.f32 %v2929_v34, %v2958_v54 }
  0xb1   :  { %v123_v1 = vmul.f32 %v3061_v29, %v2894_v24  ;;  %v390_v2 = vadd.f32 %v326_v39, %v214_v38  ;;  %v965_v9 = vadd.f32 %v901_v47, %v2890_v22  ;;  %v1189_v10 = vmul.f32 %v2947_v43, %v2965_v58 }
  0xb2   :  { %v339_v15 = vmul.f32 %v3084_v59, %v2985_v4  ;;  %v340_v16 = vmul.f32 %v3084_v59, %v2931_v35 }
  0xb3   :  { %v3041_v63 = vpop.permute.xlu1 %308  ;;  %v1109_v17 = vadd.f32 %v1045_v0, %v965_v9  ;;  %v227_v18 = vadd.f32 %v2884_v19, %v123_v1 }
  0xb5   :  { %v1253_v39 = vadd.f32 %v1189_v10, %v1109_v17  ;;  %v403_v47 = vadd.f32 %v339_v15, %v227_v18  ;;  %v3126_v10 = vld [vmem:[%s4934_s0 + $0x14] ss:$0 sm:$0xff]  ;;  %v1053_v15 = vmul.f32 %v3024_v48, %v2958_v54  ;;  %v125_v18 = vmul.f32 %v3061_v29, %v2892_v23 }
  0xb6   :  { %5099 = vst [vmem:[#allocation24_spill] sm:$0xff] %v3126_v10 }
  0xb7   :  { %v1317_v0 = vmax.f32 %v1253_v39, 0.0 }
  0xb8   :  { %709 = vadd.xlane.f32.xlu2 %v636_v5  ;;  %1379 = vadd.xlane.f32.xlu0 %v1315_v7  ;;  %v397_v5 = vadd.f32 %v333_v41, %v221_v45  ;;  %v124_v7 = vmul.f32 %v3061_v29, %v2898_v26  ;;  %v516_v41 = vmul.f32 %v3098_v11, %v2933_v36 }
  0xba   :  { %v573_v13 = vadd.f32 %v509_v57, %v397_v5  ;;  %v228_v38 = vadd.f32 %v2886_v20, %v124_v7  ;;  %v3113_v57 = vpop.permute.xlu2 %312 }
  0xbb   :  { %5098 = vst [vmem:[#allocation23_spill] sm:$0xff] %v3113_v57 }
  0xbc   :  { %v3063_v37 = vpop.permute.xlu1 %480  ;;  %v637_v45 = vmax.f32 %v573_v13, 0.0  ;;  %v1046_v13 = vmul.f32 %v2929_v34, %v2900_v27 }
  0xbd   :  { %5096 = vst [vmem:[#allocation21_spill] sm:$0xff] %v3063_v37  ;;  %v510_v44 = vmul.f32 %v2991_v6, %v3063_v37  ;;  %v502_v56 = vmul.f32 %v2917_v31, %v3063_v37  ;;  %v1198_v1 = vmul.f32 %v3035_v55, %v3063_v37 }
  0xbf   :  { %v574_v60 = vadd.f32 %v510_v44, %v398_v42  ;;  %v566_v12 = vadd.f32 %v502_v56, %v390_v2  ;;  %v910_v42 = vmul.f32 %v3017_v40, %v2896_v25  ;;  %v1054_v56 = vmul.f32 %v3024_v48, %v2900_v27 }
  0xc0   :  { %1395 = vadd.xlane.f32.xlu2 %v1323_v51  ;;  %1397 = vadd.xlane.f32.xlu0 %v1324_v53  ;;  %v404_v51 = vadd.f32 %v340_v16, %v228_v38  ;;  %v909_v2 = vmul.f32 %v3017_v40, %v2892_v23 }
  0xc1   :  { %v638_v8 = vmax.f32 %v574_v60, 0.0  ;;  %v630_v44 = vmax.f32 %v566_v12, 0.0  ;;  %v974_v53 = vadd.f32 %v910_v42, %v2919_v32  ;;  %v515_v60 = vmul.f32 %v3098_v11, %v2974_v62 }
  0xc2   :  { %v580_v7 = vadd.f32 %v516_v41, %v404_v51  ;;  %v973_v17 = vadd.f32 %v909_v2, %v2890_v22  ;;  %v1190_v41 = vmul.f32 %v2947_v43, %v3063_v37  ;;  %v1197_v42 = vmul.f32 %v3035_v55, %v2965_v58 }
  0xc3   :  { %713 = vadd.xlane.f32.xlu1 %v638_v8  ;;  %v579_v5 = vadd.f32 %v515_v60, %v403_v47  ;;  %v902_v8 = vmul.f32 %v2924_v33, %v2896_v25  ;;  %v1118_v9 = vadd.f32 %v1054_v56, %v974_v53  ;;  %v915_v47 = vmul.f32 %v3126_v10, %v2894_v24  ;;  %v3154_v60 = vld [vmem:[%s4934_s0 + $0x18] ss:$0 sm:$0xff] }
  0xc4   :  { %v644_v39 = vmax.f32 %v580_v7, 0.0  ;;  %v1117_v53 = vadd.f32 %v1053_v15, %v973_v17  ;;  %v916_v56 = vmul.f32 %v3126_v10, %v2898_v26  ;;  %v517_v2 = vmul.f32 %v3098_v11, %v2965_v58  ;;  %v3167_v7 = vld [vmem:[%s4934_s0 + $0x19] ss:$0 sm:$0xff] }
  0xc5   :  { %v966_v12 = vadd.f32 %v902_v8, %v2919_v32  ;;  %v1262_v16 = vadd.f32 %v1198_v1, %v1118_v9  ;;  %v643_v38 = vmax.f32 %v579_v5, 0.0  ;;  %v229_v1 = vadd.f32 %v2890_v22, %v125_v18  ;;  %v3162_v5 = vld [vmem:[%s4934_s0 + $0x16] ss:$0 sm:$0xff]  ;;  %v3169_v8 = vpop.permute.xlu2 %203 }
  0xc6   :  { %5101 = vst [vmem:[#allocation26_spill] sm:$0xff] %v3162_v5  ;;  %v132_v17 = vmul.f32 %v3154_v60, %v2898_v26  ;;  %v979_v18 = vadd.f32 %v915_v47, %v2884_v19 }
  0xc7   :  { %v1110_v51 = vadd.f32 %v1046_v13, %v966_v12  ;;  %5102 = vst [vmem:[#allocation27_spill] sm:$0xff] %v3169_v8  ;;  %v1261_v12 = vadd.f32 %v1197_v42, %v1117_v53  ;;  %v348_v42 = vmul.f32 %v3167_v7, %v2931_v35 }
  0xc8   :  { %697 = vadd.xlane.f32.xlu2 %v630_v44  ;;  %711 = vadd.xlane.f32.xlu0 %v637_v45  ;;  %v3143_v44 = vld [vmem:[%s4934_s0 + $0x15] ss:$0 sm:$0xff]  ;;  %v341_v45 = vmul.f32 %v3084_v59, %v2958_v54  ;;  %v236_v47 = vadd.f32 %v2886_v20, %v132_v17  ;;  %v126_v17 = vmul.f32 %v3061_v29, %v2896_v25 }
  0xc9   :  { %5100 = vst [vmem:[#allocation25_spill] sm:$0xff] %v3143_v44  ;;  %v1254_v9 = vadd.f32 %v1190_v41, %v1110_v51  ;;  %v1059_v13 = vmul.f32 %v3143_v44, %v2985_v4  ;;  %v1060_v15 = vmul.f32 %v3143_v44, %v2931_v35  ;;  %v1204_v41 = vmul.f32 %v3162_v5, %v2933_v36  ;;  %v3186_v51 = vld [vmem:[%s4934_s0 + $0x1a] ss:$0 sm:$0xff] }
  0xca   :  { %v1325_v53 = vmax.f32 %v1261_v12, 0.0  ;;  %v524_v12 = vmul.f32 %v3186_v51, %v2933_v36 }
  0xcb   :  { %1383 = vadd.xlane.f32.xlu1 %v1317_v0  ;;  %v1326_v0 = vmax.f32 %v1262_v16, 0.0  ;;  %v405_v16 = vadd.f32 %v341_v45, %v229_v1  ;;  %v1318_v45 = vmax.f32 %v1254_v9, 0.0  ;;  %v412_v9 = vadd.f32 %v348_v42, %v236_v47 }
  0xcd   :  { %v3211_v42 = vpop.permute.xlu2 %316 }
  0xce   :  { %5105 = vst [vmem:[#allocation30_spill] sm:$0xff] %v3211_v42  ;;  %v523_v42 = vmul.f32 %v3186_v51, %v2974_v62 }
  0xd0   :  { %723 = vadd.xlane.f32.xlu2 %v643_v38  ;;  %725 = vadd.xlane.f32.xlu0 %v644_v39  ;;  %v980_v38 = vadd.f32 %v916_v56, %v2886_v20  ;;  %v581_v39 = vadd.f32 %v517_v2, %v405_v16  ;;  %v3192_v56 = vld [vmem:[%s4934_s0 + $0x1c] ss:$0 sm:$0xff]  ;;  %v1203_v2 = vmul.f32 %v3162_v5, %v2974_v62 }
  0xd1   :  { %5103 = vst [vmem:[#allocation28_spill] sm:$0xff] %v3192_v56  ;;  %v131_v16 = vmul.f32 %v3154_v60, %v2894_v24 }
  0xd2   :  { %v1124_v1 = vadd.f32 %v1060_v15, %v980_v38  ;;  %v645_v14 = vmax.f32 %v581_v39, 0.0  ;;  %v923_v38 = vmul.f32 %v3192_v56, %v2894_v24  ;;  %v3209_v39 = vld [vmem:[%s4934_s0 + $0x1d] ss:$0 sm:$0xff] }
  0xd3   :  { %1401 = vadd.xlane.f32.xlu1 %v1326_v0  ;;  %v1123_v0 = vadd.f32 %v1059_v13, %v979_v18  ;;  %v347_v18 = vmul.f32 %v3167_v7, %v2985_v4  ;;  %5104 = vst [vmem:[#allocation29_spill] sm:$0xff] %v3209_v39 }
  0xd4   :  { %v1268_v15 = vadd.f32 %v1204_v41, %v1124_v1  ;;  %v342_v41 = vmul.f32 %v3084_v59, %v2900_v27  ;;  %v987_v46 = vadd.f32 %v923_v38, %v2884_v19  ;;  %v3224_v59 = vpop.permute.xlu1 %208  ;;  %v918_v38 = vmul.f32 %v3126_v10, %v2896_v25 }
  0xd5   :  { %v1267_v13 = vadd.f32 %v1203_v2, %v1123_v0  ;;  %v588_v0 = vadd.f32 %v524_v12, %v412_v9  ;;  %v518_v2 = vmul.f32 %v3098_v11, %v3063_v37  ;;  %5106 = vst [vmem:[#allocation31_spill] sm:$0xff] %v3224_v59  ;;  %v3229_v12 = vld [vmem:[%s4934_s0 + $0x1e] ss:$0 sm:$0xff] }
  0xd6   :  { %v1332_v47 = vmax.f32 %v1268_v15, 0.0  ;;  %5107 = vst [vmem:[#allocation32_spill] sm:$0xff] %v3229_v12 }
  0xd7   :  { %v1331_v1 = vmax.f32 %v1267_v13, 0.0  ;;  %v917_v13 = vmul.f32 %v3126_v10, %v2892_v23 }
  0xd8   :  { %1385 = vadd.xlane.f32.xlu2 %v1318_v45  ;;  %1399 = vadd.xlane.f32.xlu0 %v1325_v53  ;;  %v230_v45 = vadd.f32 %v2919_v32, %v126_v17  ;;  %v235_v53 = vadd.f32 %v2884_v19, %v131_v16  ;;  %v652_v16 = vmax.f32 %v588_v0, 0.0 }
  0xda   :  { %v411_v8 = vadd.f32 %v347_v18, %v235_v53  ;;  %v406_v17 = vadd.f32 %v342_v41, %v230_v45  ;;  %v1211_v45 = vmul.f32 %v3229_v12, %v2974_v62  ;;  %v982_v41 = vadd.f32 %v918_v38, %v2919_v32 }
  0xdb   :  { %727 = vadd.xlane.f32.xlu1 %v645_v14  ;;  %v1067_v14 = vmul.f32 %v3209_v39, %v2985_v4  ;;  %v1062_v53 = vmul.f32 %v3143_v44, %v2900_v27  ;;  %v924_v38 = vmul.f32 %v3192_v56, %v2898_v26 }
  0xdc   :  { %v582_v15 = vadd.f32 %v518_v2, %v406_v17  ;;  %v587_v18 = vadd.f32 %v523_v42, %v411_v8  ;;  %v112_v8 = vmul.f32 %v2905_v28, %v2954_v50  ;;  %v3245_v42 = vpop.permute.xlu2 %488  ;;  %v1205_v2 = vmul.f32 %v3162_v5, %v2965_v58  ;;  %v3260_v10 = vpop.permute.xlu1 %484 }
  0xdd   :  { %v1131_v9 = vadd.f32 %v1067_v14, %v987_v46  ;;  %v1061_v46 = vmul.f32 %v3143_v44, %v2958_v54  ;;  %v981_v14 = vadd.f32 %v917_v13, %v2890_v22  ;;  %5108 = vst [vmem:[#allocation33_spill] sm:$0xff] %v3245_v42  ;;  %v1206_v17 = vmul.f32 %v3162_v5, %v3063_v37 }
  0xde   :  { %v1126_v13 = vadd.f32 %v1062_v53, %v982_v41  ;;  %v1068_v5 = vmul.f32 %v3209_v39, %v2931_v35  ;;  %5109 = vst [vmem:[#allocation34_spill] sm:$0xff] %v3260_v10  ;;  %v988_v41 = vadd.f32 %v924_v38, %v2886_v20  ;;  %v327_v53 = vmul.f32 %v2912_v30, %v3041_v63 }
  0xdf   :  { %v1275_v0 = vadd.f32 %v1211_v45, %v1131_v9  ;;  %v1125_v9 = vadd.f32 %v1061_v46, %v981_v14  ;;  %v111_v46 = vmul.f32 %v2905_v28, %v2888_v21  ;;  %v1212_v14 = vmul.f32 %v3229_v12, %v2933_v36 }
  0xe0   :  { %1411 = vadd.xlane.f32.xlu2 %v1331_v1  ;;  %1413 = vadd.xlane.f32.xlu0 %v1332_v47  ;;  %v646_v1 = vmax.f32 %v582_v15, 0.0  ;;  %v651_v47 = vmax.f32 %v587_v18, 0.0  ;;  %v216_v15 = vadd.f32 %v2956_v52, %v112_v8  ;;  %v504_v18 = vmul.f32 %v2917_v31, %v3245_v42 }
  0xe1   :  { %v1339_v45 = vmax.f32 %v1275_v0, 0.0  ;;  %v1269_v59 = vadd.f32 %v1205_v2, %v1125_v9  ;;  %v1270_v44 = vadd.f32 %v1206_v17, %v1126_v13  ;;  %v215_v8 = vadd.f32 %v3075_v49, %v111_v46 }
  0xe2   :  { %v503_v9 = vmul.f32 %v2917_v31, %v3260_v10  ;;  %v349_v13 = vmul.f32 %v3167_v7, %v2958_v54 }
  0xe3   :  { %741 = vadd.xlane.f32.xlu1 %v652_v16  ;;  %v328_v16 = vmul.f32 %v2912_v30, %v3113_v57  ;;  %v1333_v2 = vmax.f32 %v1269_v59, 0.0  ;;  %v1334_v17 = vmax.f32 %v1270_v44, 0.0  ;;  %v391_v38 = vadd.f32 %v327_v53, %v215_v8  ;;  %v3284_v44 = vld [vmem:[%s4934_s0 + $0x20] ss:$0 sm:$0xff] }
  0xe4   :  { %v120_v59 = vmul.f32 %v2972_v61, %v2954_v50  ;;  %5110 = vst [vmem:[#allocation35_spill] sm:$0xff] %v3284_v44  ;;  %v119_v53 = vmul.f32 %v2972_v61, %v2888_v21  ;;  %v335_v8 = vmul.f32 %v2983_v3, %v3041_v63 }
  0xe5   :  { %v567_v46 = vadd.f32 %v503_v9, %v391_v38  ;;  %v3306_v9 = vld [vmem:[%s4934_s0 + $0x22] ss:$0 sm:$0xff] }
  0xe7   :  { %v631_v38 = vmax.f32 %v567_v46, 0.0  ;;  %v3317_v46 = vpop.permute.xlu1 %492 }
  0xe8   :  { %729 = vadd.xlane.f32.xlu2 %v646_v1  ;;  %739 = vadd.xlane.f32.xlu0 %v651_v47  ;;  %v392_v1 = vadd.f32 %v328_v16, %v216_v15  ;;  %v133_v47 = vmul.f32 %v3154_v60, %v2892_v23  ;;  %v1132_v16 = vadd.f32 %v1068_v5, %v988_v41  ;;  %v3289_v5 = vld [vmem:[%s4934_s0 + $0x21] ss:$0 sm:$0xff] }
  0xea   :  { %v568_v0 = vadd.f32 %v504_v18, %v392_v1  ;;  %v237_v15 = vadd.f32 %v2890_v22, %v133_v47  ;;  %v525_v18 = vmul.f32 %v3186_v51, %v2965_v58  ;;  %v1276_v1 = vadd.f32 %v1212_v14, %v1132_v16 }
  0xeb   :  { %1427 = vadd.xlane.f32.xlu1 %v1339_v45  ;;  %v336_v47 = vmul.f32 %v2983_v3, %v3113_v57  ;;  %v224_v14 = vadd.f32 %v2956_v52, %v120_v59  ;;  %v356_v16 = vmul.f32 %v3289_v5, %v2931_v35 }
  0xec   :  { %v632_v45 = vmax.f32 %v568_v0, 0.0  ;;  %v413_v41 = vadd.f32 %v349_v13, %v237_v15  ;;  %v140_v0 = vmul.f32 %v3284_v44, %v2898_v26  ;;  %v1340_v13 = vmax.f32 %v1276_v1, 0.0 }
  0xed   :  { %v512_v15 = vmul.f32 %v2991_v6, %v3245_v42  ;;  %v532_v1 = vmul.f32 %v3306_v9, %v2933_v36 }
  0xf0   :  { %1415 = vadd.xlane.f32.xlu2 %v1333_v2  ;;  %1417 = vadd.xlane.f32.xlu0 %v1334_v17  ;;  %v589_v2 = vadd.f32 %v525_v18, %v413_v41  ;;  %v223_v17 = vadd.f32 %v3075_v49, %v119_v53  ;;  %v244_v18 = vadd.f32 %v2886_v20, %v140_v0 }
  0xf1   :  { %v400_v41 = vadd.f32 %v336_v47, %v224_v14  ;;  %v139_v53 = vmul.f32 %v3284_v44, %v2894_v24  ;;  %v355_v0 = vmul.f32 %v3289_v5, %v2985_v4  ;;  %v350_v47 = vmul.f32 %v3167_v7, %v2900_v27 }
  0xf2   :  { %v399_v59 = vadd.f32 %v335_v8, %v223_v17  ;;  %v653_v3 = vmax.f32 %v589_v2, 0.0  ;;  %v420_v61 = vadd.f32 %v356_v16, %v244_v18 }
  0xf3   :  { %701 = vadd.xlane.f32.xlu1 %v632_v45  ;;  %v511_v45 = vmul.f32 %v2991_v6, %v3260_v10  ;;  %v576_v30 = vadd.f32 %v512_v15, %v400_v41  ;;  %v134_v6 = vmul.f32 %v3154_v60, %v2896_v25  ;;  %v243_v2 = vadd.f32 %v2884_v19, %v139_v53 }
  0xf4   :  { %v596_v17 = vadd.f32 %v532_v1, %v420_v61  ;;  %v531_v15 = vmul.f32 %v3306_v9, %v2974_v62  ;;  %v904_v61 = vmul.f32 %v2924_v33, %v2954_v50 }
  0xf5   :  { %v575_v31 = vadd.f32 %v511_v45, %v399_v59  ;;  %v238_v8 = vadd.f32 %v2919_v32, %v134_v6  ;;  %v640_v16 = vmax.f32 %v576_v30, 0.0  ;;  %v911_v45 = vmul.f32 %v3017_v40, %v2888_v21 }
  0xf6   :  { %v660_v18 = vmax.f32 %v596_v17, 0.0  ;;  %v1199_v30 = vmul.f32 %v3035_v55, %v3260_v10 }
  0xf7   :  { %v639_v14 = vmax.f32 %v575_v31, 0.0  ;;  %v414_v6 = vadd.f32 %v350_v47, %v238_v8  ;;  %v975_v31 = vadd.f32 %v911_v45, %v3075_v49  ;;  %v1047_v8 = vmul.f32 %v2929_v34, %v3041_v63 }
  0xf8   :  { %1429 = vadd.xlane.f32.xlu2 %v1340_v13  ;;  %699 = vadd.xlane.f32.xlu0 %v631_v38  ;;  %v526_v13 = vmul.f32 %v3186_v51, %v3063_v37  ;;  %v419_v38 = vadd.f32 %v355_v0, %v243_v2  ;;  %v903_v0 = vmul.f32 %v2924_v33, %v2888_v21 }
  0xf9   :  { %v1048_v47 = vmul.f32 %v2929_v34, %v3113_v57  ;;  %v1191_v45 = vmul.f32 %v2947_v43, %v3260_v10  ;;  %v1192_v33 = vmul.f32 %v2947_v43, %v3245_v42  ;;  %v1070_v34 = vmul.f32 %v3209_v39, %v2900_v27 }
  0xfa   :  { %v590_v41 = vadd.f32 %v526_v13, %v414_v6  ;;  %v595_v53 = vadd.f32 %v531_v15, %v419_v38  ;;  %v967_v17 = vadd.f32 %v903_v0, %v3075_v49 }
  0xfb   :  { %743 = vadd.xlane.f32.xlu1 %v653_v3  ;;  %v1055_v3 = vmul.f32 %v3024_v48, %v3041_v63 }
  0xfc   :  { %v654_v13 = vmax.f32 %v590_v41, 0.0  ;;  %v659_v38 = vmax.f32 %v595_v53, 0.0  ;;  %v1111_v6 = vadd.f32 %v1047_v8, %v967_v17  ;;  %v1056_v8 = vmul.f32 %v3024_v48, %v3113_v57 }
  0xfd   :  { %v1119_v1 = vadd.f32 %v1055_v3, %v975_v31  ;;  %v1214_v31 = vmul.f32 %v3229_v12, %v3063_v37  ;;  %v1213_v48 = vmul.f32 %v3229_v12, %v2965_v58 }
  0xfe   :  { %v1255_v41 = vadd.f32 %v1191_v45, %v1111_v6 }
  0xff   :  { %v1263_v2 = vadd.f32 %v1199_v30, %v1119_v1  ;;  %v912_v30 = vmul.f32 %v3017_v40, %v2954_v50  ;;  %v3372_v40 = vld [vmem:[%s4934_s0 + $0x24] ss:$0 sm:$0xff] }
 0x100   :  { %715 = vadd.xlane.f32.xlu2 %v639_v14  ;;  %717 = vadd.xlane.f32.xlu0 %v640_v16  ;;  %v968_v14 = vadd.f32 %v904_v61, %v2956_v52  ;;  %v926_v16 = vmul.f32 %v3192_v56, %v2896_v25  ;;  %v925_v61 = vmul.f32 %v3192_v56, %v2892_v23 }
 0x101   :  { %5111 = vst [vmem:[#allocation36_spill] sm:$0xff] %v3372_v40  ;;  %v976_v17 = vadd.f32 %v912_v30, %v2956_v52  ;;  %v519_v30 = vmul.f32 %v3098_v11, %v3260_v10 }
 0x102   :  { %v694_v59 = vpop.xlane.xlu1 %693  ;;  %v990_v3 = vadd.f32 %v926_v16, %v2919_v32  ;;  %v1112_v15 = vadd.f32 %v1048_v47, %v968_v14  ;;  %v1069_v47 = vmul.f32 %v3209_v39, %v2958_v54  ;;  %v989_v14 = vadd.f32 %v925_v61, %v2890_v22  ;;  %v3399_v61 = vld [vmem:[%s4934_s0 + $0x26] ss:$0 sm:$0xff] }
 0x103   :  { %757 = vadd.xlane.f32.xlu1 %v660_v18  ;;  %v1327_v18 = vmax.f32 %v1263_v2, 0.0  ;;  %v1120_v45 = vadd.f32 %v1056_v8, %v976_v17 }
 0x104   :  { %v1256_v53 = vadd.f32 %v1192_v33, %v1112_v15  ;;  %v1134_v0 = vadd.f32 %v1070_v34, %v990_v3  ;;  %v127_v33 = vmul.f32 %v3061_v29, %v2888_v21  ;;  %v5113_v3 = vld [vmem:[#allocation22_spill] sm:$0xff]  ;;  %v1133_v6 = vadd.f32 %v1069_v47, %v989_v14 }
 0x105   :  { %v343_v34 = vmul.f32 %v5113_v3, %v3041_v63  ;;  %v932_v15 = vmul.f32 %v3372_v40, %v2898_v26  ;;  %5114 = vst [vmem:[#allocation22_spill] sm:$0xff] %v3399_v61  ;;  %v1220_v14 = vmul.f32 %v3399_v61, %v2933_v36 }
 0x106   :  { %v1278_v2 = vadd.f32 %v1214_v31, %v1134_v0  ;;  %v1320_v16 = vmax.f32 %v1256_v53, 0.0  ;;  %v231_v31 = vadd.f32 %v3075_v49, %v127_v33 }
 0x108   :  { %745 = vadd.xlane.f32.xlu2 %v654_v13  ;;  %755 = vadd.xlane.f32.xlu0 %v659_v38  ;;  %v1200_v13 = vmul.f32 %v3035_v55, %v3245_v42  ;;  %v3383_v38 = vld [vmem:[%s4934_s0 + $0x25] ss:$0 sm:$0xff]  ;;  %v931_v55 = vmul.f32 %v3372_v40, %v2894_v24  ;;  %v407_v8 = vadd.f32 %v343_v34, %v231_v31 }
 0x109   :  { %5112 = vst [vmem:[#allocation37_spill] sm:$0xff] %v3383_v38  ;;  %v1075_v53 = vmul.f32 %v3383_v38, %v2985_v4  ;;  %v1076_v0 = vmul.f32 %v3383_v38, %v2931_v35  ;;  %v358_v34 = vmul.f32 %v3289_v5, %v2900_v27  ;;  %v141_v31 = vmul.f32 %v3284_v44, %v2892_v23 }
 0x10a   :  { %v1382_v43 = vpop.xlane.xlu1 %1381  ;;  %v995_v47 = vadd.f32 %v931_v55, %v2884_v19  ;;  %v583_v17 = vadd.f32 %v519_v30, %v407_v8  ;;  %v344_v8 = vmul.f32 %v5113_v3, %v3113_v57 }
 0x10b   :  { %v3363_v1 = vadd.f32 %v1382_v43, %v694_v59  ;;  %1403 = vadd.xlane.f32.xlu1 %v1327_v18  ;;  %v1319_v59 = vmax.f32 %v1255_v41, 0.0  ;;  %v1342_v18 = vmax.f32 %v1278_v2, 0.0  ;;  %v1264_v43 = vadd.f32 %v1200_v13, %v1120_v45 }
 0x10c   :  { %v1277_v41 = vadd.f32 %v1213_v48, %v1133_v6  ;;  %v996_v2 = vadd.f32 %v932_v15, %v2886_v20  ;;  %v1139_v48 = vadd.f32 %v1075_v53, %v995_v47  ;;  %v1219_v6 = vmul.f32 %v3399_v61, %v2974_v62  ;;  %v3424_v53 = vpop.permute.xlu2 %496 }
 0x10d   :  { %v647_v55 = vmax.f32 %v583_v17, 0.0  ;;  %v534_v15 = vmul.f32 %v3306_v9, %v3063_v37  ;;  %5115 = vst [vmem:[#allocation38_spill] sm:$0xff] %v3424_v53  ;;  %v357_v47 = vmul.f32 %v3289_v5, %v2958_v54  ;;  %v520_v5 = vmul.f32 %v3098_v11, %v3245_v42 }
 0x10e   :  { %v1341_v13 = vmax.f32 %v1277_v41, 0.0  ;;  %v1140_v45 = vadd.f32 %v1076_v0, %v996_v2  ;;  %v1283_v30 = vadd.f32 %v1219_v6, %v1139_v48  ;;  %v3422_v41 = vpop.permute.xlu0 %320  ;;  %v5117_v48 = vld [vmem:[#allocation24_spill] sm:$0xff] }
 0x110   :  { %1387 = vadd.xlane.f32.xlu2 %v1319_v59  ;;  %1389 = vadd.xlane.f32.xlu0 %v1320_v16  ;;  %v142_v59 = vmul.f32 %v3284_v44, %v2896_v25  ;;  %v1328_v16 = vmax.f32 %v1264_v43, 0.0  ;;  %v1284_v43 = vadd.f32 %v1220_v14, %v1140_v45  ;;  %v245_v14 = vadd.f32 %v2890_v22, %v141_v31 }
 0x111   :  { %v919_v45 = vmul.f32 %v5117_v48, %v2888_v21 }
 0x112   :  { %v246_v33 = vadd.f32 %v2919_v32, %v142_v59  ;;  %v3440_v59 = vld [vmem:[%s4934_s0 + $0x29] ss:$0 sm:$0xff]  ;;  %v1348_v3 = vmax.f32 %v1284_v43, 0.0  ;;  %v3460_v43 = vld [vmem:[%s4934_s0 + $0x2a] ss:$0 sm:$0xff] }
 0x113   :  { %1433 = vadd.xlane.f32.xlu1 %v1342_v18  ;;  %v128_v18 = vmul.f32 %v3061_v29, %v2954_v50  ;;  %v3433_v29 = vld [vmem:[%s4934_s0 + $0x28] ss:$0 sm:$0xff]  ;;  %v983_v31 = vadd.f32 %v919_v45, %v3075_v49  ;;  %v540_v39 = vmul.f32 %v3460_v43, %v2933_v36 }
 0x114   :  { %v422_v0 = vadd.f32 %v358_v34, %v246_v33  ;;  %5116 = vst [vmem:[#allocation39_spill] sm:$0xff] %v3433_v29  ;;  %v5118_v33 = vld [vmem:[#allocation25_spill] sm:$0xff]  ;;  %v148_v6 = vmul.f32 %v3433_v29, %v2898_v26 }
 0x115   :  { %v232_v17 = vadd.f32 %v2956_v52, %v128_v18  ;;  %v1063_v34 = vmul.f32 %v5118_v33, %v3041_v63  ;;  %v147_v18 = vmul.f32 %v3433_v29, %v2894_v24 }
 0x116   :  { %v598_v2 = vadd.f32 %v534_v15, %v422_v0  ;;  %v421_v15 = vadd.f32 %v357_v47, %v245_v14  ;;  %v364_v0 = vmul.f32 %v3440_v59, %v2931_v35  ;;  %v363_v47 = vmul.f32 %v3440_v59, %v2985_v4 }
 0x117   :  { %v1127_v14 = vadd.f32 %v1063_v34, %v983_v31  ;;  %v251_v45 = vadd.f32 %v2884_v19, %v147_v18  ;;  %v1078_v34 = vmul.f32 %v3383_v38, %v2900_v27  ;;  %v920_v18 = vmul.f32 %v5117_v48, %v2954_v50  ;;  %v3490_v48 = vld [vmem:[%s4934_s0 + $0x2c] ss:$0 sm:$0xff] }
 0x118   :  { %1405 = vadd.xlane.f32.xlu2 %v1328_v16  ;;  %1431 = vadd.xlane.f32.xlu0 %v1341_v13  ;;  %v1347_v16 = vmax.f32 %v1283_v30, 0.0  ;;  %v533_v13 = vmul.f32 %v3306_v9, %v2965_v58  ;;  %v662_v11 = vmax.f32 %v598_v2, 0.0  ;;  %v5119_v9 = vld [vmem:[#allocation26_spill] sm:$0xff]  ;;  %5120 = vst [vmem:[#allocation24_spill] sm:$0xff] %v3490_v48 }
 0x119   :  { %v1207_v30 = vmul.f32 %v5119_v9, %v3260_v10 }
 0x11b   :  { %731 = vadd.xlane.f32.xlu1 %v647_v55  ;;  %v408_v55 = vadd.f32 %v344_v8, %v232_v17  ;;  %v597_v8 = vadd.f32 %v533_v13, %v421_v15  ;;  %v1271_v44 = vadd.f32 %v1207_v30, %v1127_v14  ;;  %v427_v15 = vadd.f32 %v363_v47, %v251_v45 }
 0x11d   :  { %v1335_v31 = vmax.f32 %v1271_v44, 0.0  ;;  %v984_v44 = vadd.f32 %v920_v18, %v2956_v52  ;;  %v1208_v18 = vmul.f32 %v5119_v9, %v3245_v42 }
 0x120   :  { %1443 = vadd.xlane.f32.xlu2 %v1347_v16  ;;  %1445 = vadd.xlane.f32.xlu0 %v1348_v3  ;;  %v584_v16 = vadd.f32 %v520_v5, %v408_v55  ;;  %v252_v3 = vadd.f32 %v2886_v20, %v148_v6  ;;  %v934_v5 = vmul.f32 %v3372_v40, %v2896_v25  ;;  %v661_v55 = vmax.f32 %v597_v8, 0.0 }
 0x121   :  { %v539_v6 = vmul.f32 %v3460_v43, %v2974_v62 }
 0x122   :  { %v428_v12 = vadd.f32 %v364_v0, %v252_v3  ;;  %v648_v13 = vmax.f32 %v584_v16, 0.0  ;;  %v998_v56 = vadd.f32 %v934_v5, %v2919_v32  ;;  %v1222_v0 = vmul.f32 %v3399_v61, %v3063_v37 }
 0x123   :  { %v3466_v17 = vpop.xlane.xlu2 %707  ;;  %761 = vadd.xlane.f32.xlu1 %v662_v11  ;;  %v692_v2 = vpop.xlane.xlu0 %691  ;;  %v933_v11 = vmul.f32 %v3372_v40, %v2892_v23  ;;  %v603_v16 = vadd.f32 %v539_v6, %v427_v15  ;;  %v1064_v3 = vmul.f32 %v5118_v33, %v3113_v57 }
 0x124   :  { %v604_v30 = vadd.f32 %v540_v39, %v428_v12  ;;  %v1142_v14 = vadd.f32 %v1078_v34, %v998_v56  ;;  %v1077_v12 = vmul.f32 %v3383_v38, %v2958_v54  ;;  %v3499_v56 = vld [vmem:[%s4934_s0 + $0x2d] ss:$0 sm:$0xff]  ;;  %v3506_v15 = vpop.xlane.xlu1 %695 }
 0x125   :  { %v997_v39 = vadd.f32 %v933_v11, %v2890_v22  ;;  %5121 = vst [vmem:[#allocation25_spill] sm:$0xff] %v3499_v56  ;;  %v667_v6 = vmax.f32 %v603_v16, 0.0  ;;  %v1128_v11 = vadd.f32 %v1064_v3, %v984_v44  ;;  %v3521_v16 = vld [vmem:[%s4934_s0 + $0x2e] ss:$0 sm:$0xff]  ;;  %v1084_v9 = vmul.f32 %v3499_v56, %v2931_v35  ;;  %v5128_v44 = vld [vmem:[#allocation9_spill] sm:$0xff] }
 0x126   :  { %v668_v5 = vmax.f32 %v604_v30, 0.0  ;;  %v1286_v33 = vadd.f32 %v1222_v0, %v1142_v14  ;;  %v5123_v0 = vld [vmem:[#allocation30_spill] sm:$0xff]  ;;  %v5127_v3 = vld [vmem:[#allocation27_spill] sm:$0xff] }
 0x128   :  { %733 = vadd.xlane.f32.xlu2 %v648_v13  ;;  %759 = vadd.xlane.f32.xlu0 %v661_v55  ;;  %v1221_v13 = vmul.f32 %v3399_v61, %v2965_v58  ;;  %v1572_v55 = vmul.f32 0.00390625, %v3363_v1  ;;  %v939_v61 = vmul.f32 %v3490_v48, %v2894_v24  ;;  %v1141_v1 = vadd.f32 %v1077_v12, %v997_v39 }
 0x12b   :  { %v710_v8 = vpop.xlane.xlu2 %709  ;;  %1419 = vadd.xlane.f32.xlu1 %v1335_v31  ;;  %v1380_v47 = vpop.xlane.xlu0 %1379  ;;  %v5122_v31 = vld [vmem:[#allocation13_spill] sm:$0xff] }
 0x12c   :  { %v1507_v45 = vadd.f32 %v1380_v47, %v692_v2  ;;  %v940_v2 = vmul.f32 %v3490_v48, %v2898_v26  ;;  %v113_v30 = vmul.f32 %v2905_v28, %v5122_v31  ;;  %v5124_v47 = vld [vmem:[#allocation8_spill] sm:$0xff]  ;;  %v1350_v28 = vmax.f32 %v1286_v33, 0.0  ;;  %v5130_v33 = vld [vmem:[#allocation17_spill] sm:$0xff] }
 0x12d   :  { %v329_v14 = vmul.f32 %v5124_v47, %v5123_v0  ;;  %5126 = vst [vmem:[#allocation8_spill] sm:$0xff] %v3521_v16  ;;  %v505_v47 = vmul.f32 %v5128_v44, %v3317_v46  ;;  %v1003_v48 = vadd.f32 %v939_v61, %v2884_v19 }
 0x12e   :  { %v1571_v34 = vmul.f32 0.00390625, %v1507_v45  ;;  %v217_v45 = vadd.f32 %v5127_v3, %v113_v30  ;;  %v1004_v39 = vadd.f32 %v940_v2, %v2886_v20 }
 0x130   :  { %v3516_v38 = vpack.c.bf16 %v1572_v55, %v1571_v34  ;;  %771 = vadd.xlane.f32.xlu2 %v667_v6  ;;  %773 = vadd.xlane.f32.xlu0 %v668_v5  ;;  %v1083_v55 = vmul.f32 %v3499_v56, %v2985_v4  ;;  %v1272_v34 = vadd.f32 %v1208_v18, %v1128_v11  ;;  %v5131_v11 = vld [vmem:[#allocation31_spill] sm:$0xff] }
 0x131   :  { %v1285_v5 = vadd.f32 %v1221_v13, %v1141_v1  ;;  %v393_v40 = vadd.f32 %v329_v14, %v217_v45  ;;  %v1148_v44 = vadd.f32 %v1084_v9, %v1004_v39  ;;  %v1228_v56 = vmul.f32 %v3521_v16, %v2933_v36  ;;  %v3541_v14 = vld [vmem:[%s4934_s0 + $0x30] ss:$0 sm:$0xff]  ;;  %v5133_v9 = vld [vmem:[#allocation18_spill] sm:$0xff] }
 0x132   :  { %5125 = vst [vmem:[#allocation26_spill] sm:$0xff] %v3516_v38  ;;  %v5129_v38 = vld [vmem:[#allocation20_spill] sm:$0xff]  ;;  %v1147_v13 = vadd.f32 %v1083_v55, %v1003_v48  ;;  %v1336_v45 = vmax.f32 %v1272_v34, 0.0  ;;  %v156_v48 = vmul.f32 %v3541_v14, %v2898_v26  ;;  %v2724_v34 = vld [vmem:[%s4934_s0] ss:$0 sm:$0xff] }
 0x133   :  { %v1396_v12 = vpop.xlane.xlu2 %1395  ;;  %1449 = vadd.xlane.f32.xlu1 %v1350_v28  ;;  %v1398_v6 = vpop.xlane.xlu0 %1397  ;;  %v122_v37 = vmul.f32 %v5130_v33, %v5129_v38  ;;  %v569_v18 = vadd.f32 %v505_v47, %v393_v40  ;;  %5132 = vst [vmem:[#allocation9_spill] sm:$0xff] %v3541_v14  ;;  %v338_v40 = vmul.f32 %v5133_v9, %v3422_v41 }
 0x134   :  { %v1515_v30 = vadd.f32 %v1396_v12, %v3466_v17  ;;  %v1516_v32 = vadd.f32 %v1398_v6, %v710_v8  ;;  %v1349_v17 = vmax.f32 %v1285_v5, 0.0  ;;  %v1227_v8 = vmul.f32 %v3521_v16, %v2974_v62 }
 0x135   :  { %v226_v2 = vadd.f32 %v5131_v11, %v122_v37  ;;  %v149_v37 = vmul.f32 %v3433_v29, %v2892_v23  ;;  %v1292_v55 = vadd.f32 %v1228_v56, %v1148_v44  ;;  %v114_v5 = vmul.f32 %v2724_v34, %v5129_v38 }
 0x136   :  { %v1579_v61 = vmul.f32 0.00390625, %v1515_v30  ;;  %v1580_v1 = vmul.f32 0.00390625, %v1516_v32  ;;  %v3543_v28 = vpop.xlane.xlu1 %713  ;;  %v3556_v32 = vld [vmem:[%s4934_s0 + $0x31] ss:$0 sm:$0xff]  ;;  %v633_v39 = vmax.f32 %v569_v18, 0.0  ;;  %v1291_v12 = vadd.f32 %v1227_v8, %v1147_v13  ;;  %v5135_v30 = vld [vmem:[#allocation19_spill] sm:$0xff] }
 0x137   :  { %5134 = vst [vmem:[#allocation17_spill] sm:$0xff] %v3556_v32  ;;  %v402_v6 = vadd.f32 %v338_v40, %v226_v2  ;;  %v514_v26 = vmul.f32 %v5135_v30, %v3424_v53  ;;  %v218_v16 = vadd.f32 %v5131_v11, %v114_v5  ;;  %v365_v56 = vmul.f32 %v3440_v59, %v2958_v54  ;;  %v2725_v8 = vld [vmem:[%s4934_s0 + $0x1] ss:$0 sm:$0xff]  ;;  %v2727_v54 = vld [vmem:[%s4934_s0 + $0xa] ss:$0 sm:$0xff] }
 0x138   :  { %v3558_v47 = vpack.c.bf16 %v1580_v1, %v1579_v61  ;;  %1421 = vadd.xlane.f32.xlu2 %v1336_v45  ;;  %1447 = vadd.xlane.f32.xlu0 %v1349_v17  ;;  %v121_v61 = vmul.f32 %v5130_v33, %v5122_v31  ;;  %v135_v44 = vmul.f32 %v3154_v60, %v2888_v21  ;;  %v1356_v17 = vmax.f32 %v1292_v55, 0.0 }
 0x139   :  { %v253_v13 = vadd.f32 %v2890_v22, %v149_v37  ;;  %v136_v2 = vmul.f32 %v3154_v60, %v2954_v50  ;;  %v352_v45 = vmul.f32 %v3167_v7, %v3113_v57  ;;  %v372_v33 = vmul.f32 %v3556_v32, %v2931_v35  ;;  %v3593_v60 = vld [vmem:[%s4934_s0 + $0x32] ss:$0 sm:$0xff] }
 0x13a   :  { %v330_v40 = vmul.f32 %v2725_v8, %v3422_v41  ;;  %v337_v34 = vmul.f32 %v5133_v9, %v5123_v0  ;;  %5136 = vst [vmem:[#allocation31_spill] sm:$0xff] %v3593_v60  ;;  %v155_v37 = vmul.f32 %v3541_v14, %v2894_v24  ;;  %v1355_v5 = vmax.f32 %v1291_v12, 0.0  ;;  %v2726_v9 = vld [vmem:[%s4934_s0 + $0x2] ss:$0 sm:$0xff] }
 0x13b   :  { %v3573_v1 = vpop.xlane.xlu2 %697  ;;  %703 = vadd.xlane.f32.xlu1 %v633_v39  ;;  %v3575_v18 = vpop.xlane.xlu0 %711  ;;  %v578_v39 = vadd.f32 %v514_v26, %v402_v6  ;;  %v225_v55 = vadd.f32 %v5127_v3, %v121_v61  ;;  %v260_v30 = vadd.f32 %v2886_v20, %v156_v48  ;;  %v506_v8 = vmul.f32 %v2726_v9, %v3424_v53 }
 0x13c   :  { %v394_v22 = vadd.f32 %v330_v40, %v218_v16  ;;  %v513_v14 = vmul.f32 %v2727_v54, %v3317_v46  ;;  %v371_v26 = vmul.f32 %v3556_v32, %v2985_v4  ;;  %v429_v48 = vadd.f32 %v365_v56, %v253_v13 }
 0x13d   :  { %v541_v16 = vmul.f32 %v3460_v43, %v2965_v58  ;;  %v436_v6 = vadd.f32 %v372_v33, %v260_v30  ;;  %v401_v61 = vadd.f32 %v337_v34, %v225_v55  ;;  %v548_v40 = vmul.f32 %v3593_v60, %v2933_v36 }
 0x13e   :  { %v1384_v35 = vpop.xlane.xlu1 %1383  ;;  %v259_v9 = vadd.f32 %v2884_v19, %v155_v37  ;;  %v642_v54 = vmax.f32 %v578_v39, 0.0  ;;  %v351_v32 = vmul.f32 %v3167_v7, %v3041_v63  ;;  %v570_v56 = vadd.f32 %v506_v8, %v394_v22 }
 0x13f   :  { %v3610_v12 = vadd.f32 %v1384_v35, %v3506_v15  ;;  %v240_v35 = vadd.f32 %v2956_v52, %v136_v2  ;;  %v528_v15 = vmul.f32 %v3186_v51, %v3245_v42  ;;  %v577_v13 = vadd.f32 %v513_v14, %v401_v61 }
 0x140   :  { %1459 = vadd.xlane.f32.xlu2 %v1355_v5  ;;  %1461 = vadd.xlane.f32.xlu0 %v1356_v17  ;;  %v239_v33 = vadd.f32 %v3075_v49, %v135_v44  ;;  %v435_v17 = vadd.f32 %v371_v26, %v259_v9  ;;  %v605_v37 = vadd.f32 %v541_v16, %v429_v48  ;;  %v1775_v55 = vlaneseq  ;;  %v5137_v26 = vld [vmem:[#allocation10_spill] sm:$0xff] }
 0x141   :  { %v416_v39 = vadd.f32 %v352_v45, %v240_v35  ;;  %v150_v7 = vmul.f32 %v3433_v29, %v2896_v25  ;;  %v366_v2 = vmul.f32 %v3440_v59, %v2900_v27  ;;  %v527_v22 = vmul.f32 %v3186_v51, %v3260_v10  ;;  %v2728_v45 = vld [vmem:[%s4934_s0 + $0xc] ss:$0 sm:$0xff]  ;;  %v3647_v51 = vld [vmem:[%s4934_s0 + $0xd] ss:$0 sm:$0xff]  ;;  %v5138_v35 = vld [vmem:[#allocation21_spill] sm:$0xff] }
 0x142   :  { %v3633_v14 = vadd.f32 %v548_v40, %v436_v6  ;;  %v547_v44 = vmul.f32 %v3593_v60, %v2974_v62  ;;  %v415_v30 = vadd.f32 %v351_v32, %v239_v33  ;;  %v913_v16 = vmul.f32 %v2728_v45, %v5122_v31  ;;  %v5143_v60 = vld [vmem:[#allocation26_spill] sm:$0xff] }
 0x143   :  { %v3623_v34 = vpop.xlane.xlu2 %723  ;;  %721 = vadd.xlane.f32.xlu1 %v642_v54  ;;  %v3625_v5 = vpop.xlane.xlu0 %725  ;;  %v592_v8 = vadd.f32 %v528_v15, %v416_v39  ;;  %v254_v48 = vadd.f32 %v5137_v26, %v150_v7  ;;  %v634_v61 = vmax.f32 %v570_v56, 0.0  ;;  %v641_v9 = vmax.f32 %v577_v13, 0.0  ;;  %v2730_v56 = vld [vmem:[%s4934_s0 + $0x4] ss:$0 sm:$0xff] }
 0x144   :  { %v3642_v54 = vadd.f32 %v547_v44, %v435_v17  ;;  %v1057_v32 = vmul.f32 %v3647_v51, %v5123_v0  ;;  %v669_v40 = vmax.f32 %v605_v37, 0.0  ;;  %v542_v15 = vmul.f32 %v3460_v43, %v5138_v35  ;;  %v5140_v43 = vld [vmem:[#allocation28_spill] sm:$0xff] }
 0x145   :  { %v905_v13 = vmul.f32 %v2730_v56, %v5122_v31  ;;  %v3658_v33 = vand.u32 127, %v1775_v55  ;;  %v591_v17 = vadd.f32 %v527_v22, %v415_v30  ;;  %v676_v39 = vmax.f32 %v3633_v14, 0.0  ;;  %v2731_v14 = vld [vmem:[%s4934_s0 + $0x5] ss:$0 sm:$0xff] }
 0x146   :  { %v1402_v59 = vpop.xlane.xlu1 %1401  ;;  %v977_v7 = vadd.f32 %v913_v16, %v5127_v3  ;;  %v3667_v44 = vmul.f32 %v5140_v43, %v2954_v50  ;;  %v656_v55 = vmax.f32 %v592_v8, 0.0  ;;  %v3683_v8 = vmul.f32 %v2728_v45, %v5129_v38 }
 0x147   :  { %v1518_v6 = vadd.f32 %v1402_v59, %v3543_v28  ;;  %5139 = vst [vmem:[#allocation18_spill] sm:$0xff] %v3658_v33  ;;  %v430_v28 = vadd.f32 %v366_v2, %v254_v48  ;;  %v3663_v37 = vadd.f32 %v905_v13, %v5127_v3  ;;  %v5141_v59 = vld [vmem:[#allocation29_spill] sm:$0xff]  ;;  %v3678_v2 = vmul.f32 %v2731_v14, %v5123_v0 }
 0x148   :  { %705 = vadd.xlane.f32.xlu2 %v634_v61  ;;  %719 = vadd.xlane.f32.xlu0 %v641_v9  ;;  %v3671_v29 = vmul.f32 %v5141_v59, %v3113_v57  ;;  %v1121_v22 = vadd.f32 %v1057_v32, %v977_v7  ;;  %v906_v9 = vmul.f32 %v2730_v56, %v5129_v38  ;;  %v3686_v32 = vadd.s32 4294967288, %v3658_v33 }
 0x149   :  { %v606_v16 = vadd.f32 %v542_v15, %v430_v28  ;;  %v1050_v13 = vmul.f32 %v2731_v14, %v3422_v41  ;;  %v655_v57 = vmax.f32 %v591_v17, 0.0  ;;  %v1711_v50 = vunpack.c.l.b16 %v5143_v60 }
 0x14a   :  { %5142 = vst [vmem:[#allocation19_spill] sm:$0xff] %v3686_v32  ;;  %v1719_v15 = vunpack.c.l.b16 %v3558_v47  ;;  %v1720_v56 = vunpack.c.h.b16 %v3558_v47  ;;  %v1573_v28 = vmul.f32 0.00390625, %v3610_v12  ;;  %v1582_v45 = vmul.f32 0.00390625, %v1518_v6 }
 0x14b   :  { %v1386_v30 = vpop.xlane.xlu2 %1385  ;;  %775 = vadd.xlane.f32.xlu1 %v669_v40  ;;  %v1400_v48 = vpop.xlane.xlu0 %1399  ;;  %v1712_v40 = vunpack.c.h.b16 %v5143_v60  ;;  %v970_v17 = vadd.f32 %v906_v9, %v5131_v11  ;;  %v3706_v47 = vadd.s32 4294967280, %v3658_v33  ;;  %v3709_v12 = vadd.s32 4294967272, %v3658_v33 }
 0x14c   :  { %v1510_v7 = vadd.f32 %v1386_v30, %v3573_v1  ;;  %v1517_v61 = vadd.f32 %v1400_v48, %v3575_v18  ;;  %v670_v1 = vmax.f32 %v606_v16, 0.0  ;;  %v3700_v18 = vld [vmem:[%s4934_s0 + $0xe] ss:$0 sm:$0xff]  ;;  %v1777_v30 = vperm.slane %v1711_v50, %v3658_v33  ;;  %v2733_v50 = vld [vmem:[%s4934_s0 + $0x6] ss:$0 sm:$0xff] }
 0x14d   :  { %v1201_v60 = vmul.f32 %v3700_v18, %v3317_v46  ;;  %5144 = vst [vmem:[#allocation28_spill] sm:$0xff] %v3706_v47  ;;  %v1779_v48 = vperm.slane %v1712_v40, %v3686_v32  ;;  %v1806_v16 = vperm.slane %v1719_v15, %v3658_v33 }
 0x14e   :  { %v1574_v14 = vmul.f32 0.00390625, %v1510_v7  ;;  %v1581_v3 = vmul.f32 0.00390625, %v1517_v61  ;;  %v3695_v0 = vpop.xlane.xlu1 %727  ;;  %5145 = vst [vmem:[#allocation29_spill] sm:$0xff] %v3709_v12  ;;  %v1807_v7 = vperm.slane %v1720_v56, %v3686_v32 }
 0x150   :  { %v1636_v6 = vpack.c.bf16 %v1574_v14, %v1573_v28  ;;  %v1640_v61 = vpack.c.bf16 %v1582_v45, %v1581_v3  ;;  %747 = vadd.xlane.f32.xlu2 %v655_v57  ;;  %749 = vadd.xlane.f32.xlu0 %v656_v55  ;;  %v1265_v3 = vadd.f32 %v1201_v60, %v1121_v22 }
 0x151   :  { %v1194_v57 = vmul.f32 %v2733_v50, %v3424_v53  ;;  %v1781_v22 = vsel %vm1780_vm0, %v1779_v48, %v1777_v30  ;;  %v1808_v45 = vsel %vm1780_vm0, %v1807_v7, %v1806_v16 }
 0x152   :  { %v1713_v31 = vunpack.c.l.b16 %v1636_v6  ;;  %v1714_v9 = vunpack.c.h.b16 %v1636_v6  ;;  %v1721_v36 = vunpack.c.l.b16 %v1640_v61  ;;  %v1722_v20 = vunpack.c.h.b16 %v1640_v61 }
 0x153   :  { %v1412_v35 = vpop.xlane.xlu2 %1411  ;;  %789 = vadd.xlane.f32.xlu1 %v676_v39  ;;  %v1414_v28 = vpop.xlane.xlu0 %1413  ;;  %v3726_v39 = vld [vmem:[%s4934_s0 + $0x34] ss:$0 sm:$0xff]  ;;  %v1114_v61 = vadd.f32 %v1050_v13, %v970_v17  ;;  %v1329_v7 = vmax.f32 %v1265_v3, 0.0  ;;  %v1058_v3 = vmul.f32 %v3647_v51, %v3422_v41 }
 0x154   :  { %v1783_v55 = vperm.slane %v1713_v31, %v3706_v47  ;;  %v1787_v40 = vperm.slane %v1714_v9, %v3709_v12  ;;  %v1809_v15 = vperm.slane %v1721_v36, %v3706_v47  ;;  %v1811_v56 = vperm.slane %v1722_v20, %v3709_v12  ;;  %5146 = vst [vmem:[#allocation26_spill] sm:$0xff] %v3726_v39 }
 0x155   :  { %v1523_v14 = vadd.f32 %v1412_v35, %v3623_v34  ;;  %v1524_v60 = vadd.f32 %v1414_v28, %v3625_v5  ;;  %v1193_v20 = vmul.f32 %v2733_v50, %v3317_v46  ;;  %v5149_v34 = vmax.f32 %v3642_v54, 0.0  ;;  %v5150_v28 = vld [vmem:[#allocation32_spill] sm:$0xff] }
 0x156   :  { %v1785_v31 = vsel %vm1784_vm1, %v1783_v55, %v1781_v22  ;;  %v1810_v6 = vsel %vm1784_vm1, %v1809_v15, %v1808_v45  ;;  %v3734_v36 = vpop.xlane.xlu1 %741  ;;  %v1113_v5 = vadd.f32 %v3678_v2, %v3663_v37  ;;  %v992_v35 = vadd.f32 %v3667_v44, %v2956_v52  ;;  %v3760_v37 = vld [vmem:[%s4934_s0 + $0x35] ss:$0 sm:$0xff] }
 0x157   :  { %v3738_v9 = vsel %vm1788_vm2, %v1787_v40, %v1785_v31  ;;  %v3741_v30 = vsel %vm1788_vm2, %v1811_v56, %v1810_v6  ;;  %v1587_v48 = vmul.f32 0.00390625, %v1523_v14  ;;  %v1588_v16 = vmul.f32 0.00390625, %v1524_v60  ;;  %5151 = vst [vmem:[#allocation32_spill] sm:$0xff] %v3760_v37  ;;  %v5152_v56 = vld [vmem:[#allocation24_spill] sm:$0xff] }
 0x158   :  { %5147 = vst [vmem:[#allocation40_spill] sm:$0xff] %v3738_v9  ;;  %777 = vadd.xlane.f32.xlu2 %v670_v1  ;;  %787 = vadd.xlane.f32.xlu0 %v5149_v34  ;;  %v947_v13 = vmul.f32 %v3726_v39, %v2894_v24  ;;  %v1216_v50 = vmul.f32 %v5150_v28, %v3245_v42 }
 0x159   :  { %5148 = vst [vmem:[#allocation41_spill] sm:$0xff] %v3741_v30  ;;  %v3751_v17 = vpack.c.bf16 %v1588_v16, %v1587_v48  ;;  %v978_v1 = vadd.f32 %v3683_v8, %v5131_v11  ;;  %v1257_v54 = vadd.f32 %v1193_v20, %v1113_v5  ;;  %v1258_v55 = vadd.f32 %v1194_v57, %v1114_v61  ;;  %v5153_v61 = vld [vmem:[#allocation16_spill] sm:$0xff]  ;;  %v5154_v48 = vld [vmem:[#allocation25_spill] sm:$0xff] }
 0x15a   :  { %v1136_v40 = vadd.f32 %v3671_v29, %v992_v35  ;;  %v927_v15 = vmul.f32 %v5140_v43, %v2888_v21  ;;  %v1071_v8 = vmul.f32 %v5141_v59, %v3041_v63  ;;  %v1091_v57 = vmul.f32 %v3760_v37, %v2985_v4 }
 0x15b   :  { %v730_v44 = vpop.xlane.xlu2 %729  ;;  %1407 = vadd.xlane.f32.xlu1 %v1329_v7  ;;  %v740_v2 = vpop.xlane.xlu0 %739  ;;  %v941_v22 = vmul.f32 %v5152_v56, %v2892_v23  ;;  %v1122_v14 = vadd.f32 %v1058_v3, %v978_v1  ;;  %v1011_v29 = vadd.f32 %v947_v13, %v2884_v19  ;;  %v1321_v51 = vmax.f32 %v1257_v54, 0.0  ;;  %v3788_v13 = vld [vmem:[%s4934_s0 + $0x36] ss:$0 sm:$0xff]  ;;  %v5156_v7 = vld [vmem:[#allocation3_spill] sm:$0xff] }
 0x15c   :  { %v1280_v45 = vadd.f32 %v1216_v50, %v1136_v40  ;;  %v991_v60 = vadd.f32 %v927_v15, %v3075_v49  ;;  %v1322_v6 = vmax.f32 %v1258_v55, 0.0  ;;  %v1202_v43 = vmul.f32 %v3700_v18, %v3424_v53  ;;  %5155 = vst [vmem:[#allocation24_spill] sm:$0xff] %v3788_v13 }
 0x15d   :  { %v1215_v59 = vmul.f32 %v5150_v28, %v3260_v10  ;;  %v1085_v16 = vmul.f32 %v5154_v48, %v5153_v61  ;;  %v942_v34 = vmul.f32 %v5152_v56, %v2896_v25  ;;  %v1155_v35 = vadd.f32 %v1091_v57, %v1011_v29  ;;  %v2734_v56 = vld [vmem:[%s4934_s0 + $0x10] ss:$0 sm:$0xff] }
 0x15e   :  { %v1428_v31 = vpop.xlane.xlu1 %1427  ;;  %v1135_v5 = vadd.f32 %v1071_v8, %v991_v60  ;;  %v1344_v18 = vmax.f32 %v1280_v45, 0.0  ;;  %v1005_v28 = vadd.f32 %v941_v22, %v5156_v7  ;;  %v1086_v1 = vmul.f32 %v5154_v48, %v2900_v27  ;;  %v5157_v8 = vld [vmem:[#allocation8_spill] sm:$0xff]  ;;  %v5158_v45 = vld [vmem:[#allocation6_spill] sm:$0xff] }
 0x15f   :  { %v3779_v20 = vadd.f32 %v1428_v31, %v740_v2  ;;  %v1006_v50 = vadd.f32 %v942_v34, %v5137_v26  ;;  %v1266_v54 = vadd.f32 %v1202_v43, %v1122_v14  ;;  %v1235_v2 = vmul.f32 %v3788_v13, %v2974_v62 }
 0x160   :  { %1391 = vadd.xlane.f32.xlu2 %v1321_v51  ;;  %1393 = vadd.xlane.f32.xlu0 %v1322_v6  ;;  %v1279_v55 = vadd.f32 %v1215_v59, %v1135_v5  ;;  %v1149_v15 = vadd.f32 %v1085_v16, %v1005_v28  ;;  %v1229_v57 = vmul.f32 %v5157_v8, %v2965_v58  ;;  %v5159_v51 = vld [vmem:[#allocation21_spill] sm:$0xff]  ;;  %v1727_v43 = vunpack.c.l.b16 %v3751_v17 }
 0x161   :  { %v130_v22 = vmul.f32 %v2734_v56, %v5129_v38  ;;  %v948_v14 = vmul.f32 %v3726_v39, %v5158_v45  ;;  %v1299_v31 = vadd.f32 %v1235_v2, %v1155_v35  ;;  %v1230_v6 = vmul.f32 %v5157_v8, %v5159_v51  ;;  %v5161_v35 = vld [vmem:[#allocation11_spill] sm:$0xff]  ;;  %v2736_v8 = vld [vmem:[%s4934_s0 + $0x12] ss:$0 sm:$0xff] }
 0x162   :  { %v1728_v59 = vunpack.c.h.b16 %v3751_v17  ;;  %v1150_v48 = vadd.f32 %v1086_v1, %v1006_v50  ;;  %v1330_v28 = vmax.f32 %v1266_v54, 0.0  ;;  %v1343_v30 = vmax.f32 %v1279_v55, 0.0 }
 0x163   :  { %v1416_v40 = vpop.xlane.xlu2 %1415  ;;  %1437 = vadd.xlane.f32.xlu1 %v1344_v18  ;;  %v1418_v3 = vpop.xlane.xlu0 %1417  ;;  %v234_v16 = vadd.f32 %v5131_v11, %v130_v22  ;;  %v1293_v9 = vadd.f32 %v1229_v57, %v1149_v15  ;;  %v1092_v2 = vmul.f32 %v3760_v37, %v5161_v35  ;;  %v1363_v50 = vmax.f32 %v1299_v31, 0.0 }
 0x164   :  { %v1525_v60 = vadd.f32 %v1416_v40, %v3695_v0  ;;  %v1526_v29 = vadd.f32 %v1418_v3, %v730_v44  ;;  %v2735_v0 = vld [vmem:[%s4934_s0 + $0x11] ss:$0 sm:$0xff]  ;;  %v1294_v1 = vadd.f32 %v1230_v6, %v1150_v48  ;;  %v5162_v40 = vld [vmem:[#allocation2_spill] sm:$0xff]  ;;  %v1821_v54 = vperm.slane %v1727_v43, %v3658_v33  ;;  %v5165_v48 = vld [vmem:[#allocation13_spill] sm:$0xff] }
 0x165   :  { %v346_v44 = vmul.f32 %v2735_v0, %v3422_v41  ;;  %v1012_v3 = vadd.f32 %v948_v14, %v5162_v40  ;;  %v1822_v55 = vperm.slane %v1728_v59, %v3686_v32  ;;  %v522_v57 = vmul.f32 %v2736_v8, %v3424_v53 }
 0x166   :  { %v1589_v34 = vmul.f32 0.00390625, %v1525_v60  ;;  %v1590_v5 = vmul.f32 0.00390625, %v1526_v29  ;;  %v3810_v18 = vpop.xlane.xlu1 %701  ;;  %v5163_v29 = vld [vmem:[#allocation12_spill] sm:$0xff]  ;;  %v1357_v14 = vmax.f32 %v1293_v9, 0.0  ;;  %v129_v59 = vmul.f32 %v2734_v56, %v5165_v48 }
 0x167   :  { %5160 = vst [vmem:[#allocation25_spill] sm:$0xff] %v3810_v18  ;;  %v410_v15 = vadd.f32 %v346_v44, %v234_v16  ;;  %v1156_v43 = vadd.f32 %v1092_v2, %v1012_v3  ;;  %v5166_v16 = vld [vmem:[#allocation9_spill] sm:$0xff]  ;;  %v1823_v33 = vsel %vm1780_vm0, %v1822_v55, %v1821_v54  ;;  %v5168_v18 = vld [vmem:[#allocation27_spill] sm:$0xff]  ;;  %v1595_v2 = vmul.f32 0.00390625, %v3779_v20  ;;  %v5171_v54 = vld [vmem:[#allocation14_spill] sm:$0xff] }
 0x168   :  { %v1644_v17 = vpack.c.bf16 %v1590_v5, %v1589_v34  ;;  %1409 = vadd.xlane.f32.xlu2 %v1330_v28  ;;  %1435 = vadd.xlane.f32.xlu0 %v1343_v30  ;;  %v1236_v30 = vmul.f32 %v3788_v13, %v5163_v29  ;;  %v157_v34 = vmul.f32 %v5166_v16, %v2892_v23  ;;  %v3853_v20 = vld [vmem:[%s4934_s0 + $0x38] ss:$0 sm:$0xff] }
 0x169   :  { %v586_v13 = vadd.f32 %v522_v57, %v410_v15  ;;  %v233_v9 = vadd.f32 %v5168_v18, %v129_v59  ;;  %5173 = vst [vmem:[#allocation21_spill] sm:$0xff] %v3853_v20 }
 0x16a   :  { %v1729_v22 = vunpack.c.l.b16 %v1644_v17  ;;  %v1730_v60 = vunpack.c.h.b16 %v1644_v17  ;;  %v5167_v17 = vld [vmem:[#allocation30_spill] sm:$0xff]  ;;  %v261_v59 = vadd.f32 %v5156_v7, %v157_v34 }
 0x16b   :  { %v1430_v31 = vpop.xlane.xlu2 %1429  ;;  %1475 = vadd.xlane.f32.xlu1 %v1363_v50  ;;  %v3827_v6 = vpop.xlane.xlu0 %699  ;;  %v345_v32 = vmul.f32 %v2735_v0, %v5167_v17  ;;  %v1358_v50 = vmax.f32 %v1294_v1, 0.0  ;;  %v5172_v1 = vld [vmem:[#allocation35_spill] sm:$0xff] }
 0x16c   :  { %5164 = vst [vmem:[#allocation8_spill] sm:$0xff] %v3827_v6  ;;  %v1824_v5 = vperm.slane %v1729_v22, %v3706_v47  ;;  %v1826_v28 = vperm.slane %v1730_v60, %v3709_v12  ;;  %v1532_v44 = vadd.f32 %v1430_v31, %v3734_v36  ;;  %v521_v22 = vmul.f32 %v2736_v8, %v3317_v46  ;;  %v5170_v36 = vld [vmem:[#allocation17_spill] sm:$0xff]  ;;  %v3902_v47 = vld [vmem:[%s4934_s0 + $0x22] ss:$0 sm:$0xff] }
 0x16d   :  { %v373_v0 = vmul.f32 %v5170_v36, %v5153_v61  ;;  %v144_v55 = vmul.f32 %v5172_v1, %v5171_v54  ;;  %v1300_v8 = vadd.f32 %v1236_v30, %v1156_v43  ;;  %v409_v57 = vadd.f32 %v345_v32, %v233_v9  ;;  %v3870_v1 = vld [vmem:[%s4934_s0 + $0x20] ss:$0 sm:$0xff]  ;;  %v3877_v32 = vld [vmem:[%s4934_s0 + $0x21] ss:$0 sm:$0xff]  ;;  %5181 = vst [vmem:[#allocation27_spill] sm:$0xff] %v3902_v47 }
 0x16e   :  { %v1825_v56 = vsel %vm1784_vm1, %v1824_v5, %v1823_v33  ;;  %v1596_v3 = vmul.f32 0.00390625, %v1532_v44  ;;  %v3840_v6 = vpop.xlane.xlu1 %743  ;;  %v3858_v33 = vld [vmem:[%s4934_s0 + $0x39] ss:$0 sm:$0xff]  ;;  %v650_v31 = vmax.f32 %v586_v13, 0.0  ;;  %v5175_v5 = vld [vmem:[#allocation31_spill] sm:$0xff]  ;;  %v164_v44 = vmul.f32 %v3853_v20, %v5158_v45  ;;  %5176 = vst [vmem:[#allocation2_spill] sm:$0xff] %v3870_v1 }
 0x16f   :  { %v3844_v60 = vsel %vm1788_vm2, %v1826_v28, %v1825_v56  ;;  %5174 = vst [vmem:[#allocation11_spill] sm:$0xff] %v3858_v33  ;;  %v549_v28 = vmul.f32 %v5175_v5, %v2965_v58  ;;  %v585_v56 = vadd.f32 %v521_v22, %v409_v57  ;;  %v5178_v13 = vld [vmem:[#allocation23_spill] sm:$0xff]  ;;  %v380_v9 = vmul.f32 %v3858_v33, %v5161_v35 }
 0x170   :  { %5169 = vst [vmem:[#allocation6_spill] sm:$0xff] %v3844_v60  ;;  %v3860_v15 = vpack.c.bf16 %v1596_v3, %v1595_v2  ;;  %1463 = vadd.xlane.f32.xlu2 %v1357_v14  ;;  %1465 = vadd.xlane.f32.xlu0 %v1358_v50  ;;  %v143_v14 = vmul.f32 %v3870_v1, %v2888_v21  ;;  %v3888_v2 = vld [vmem:[%s4934_s0 + $0x3a] ss:$0 sm:$0xff]  ;;  %v1364_v60 = vmax.f32 %v1300_v8, 0.0 }
 0x171   :  { %5177 = vst [vmem:[#allocation12_spill] sm:$0xff] %v3877_v32  ;;  %v360_v30 = vmul.f32 %v3877_v32, %v5178_v13  ;;  %v437_v50 = vadd.f32 %v373_v0, %v261_v59  ;;  %v359_v22 = vmul.f32 %v3877_v32, %v3041_v63  ;;  %v248_v57 = vadd.f32 %v2956_v52, %v144_v55 }
 0x172   :  { %5179 = vst [vmem:[#allocation9_spill] sm:$0xff] %v3888_v2  ;;  %v247_v3 = vadd.f32 %v3075_v49, %v143_v14  ;;  %v268_v1 = vadd.f32 %v5162_v40, %v164_v44  ;;  %v158_v0 = vmul.f32 %v5166_v16, %v2896_v25  ;;  %v649_v12 = vmax.f32 %v585_v56, 0.0 }
 0x173   :  { %v716_v43 = vpop.xlane.xlu2 %715  ;;  %737 = vadd.xlane.f32.xlu1 %v650_v31  ;;  %v3881_v34 = vpop.xlane.xlu0 %717  ;;  %v613_v31 = vadd.f32 %v549_v28, %v437_v50  ;;  %v535_v14 = vmul.f32 %v3902_v47, %v3260_v10  ;;  %v424_v32 = vadd.f32 %v360_v30, %v248_v57  ;;  %v536_v55 = vmul.f32 %v3902_v47, %v3245_v42 }
 0x174   :  { %v444_v8 = vadd.f32 %v380_v9, %v268_v1  ;;  %v556_v28 = vmul.f32 %v3888_v2, %v5163_v29  ;;  %v262_v16 = vadd.f32 %v5137_v26, %v158_v0  ;;  %v950_v44 = vmul.f32 %v3726_v39, %v2896_v25  ;;  %v5182_v0 = vld [vmem:[#allocation36_spill] sm:$0xff] }
 0x175   :  { %v423_v56 = vadd.f32 %v359_v22, %v247_v3  ;;  %v374_v50 = vmul.f32 %v5170_v36, %v2900_v27  ;;  %v163_v30 = vmul.f32 %v3853_v20, %v2894_v24  ;;  %v677_v57 = vmax.f32 %v613_v31, 0.0  ;;  %v5183_v31 = vld [vmem:[#allocation37_spill] sm:$0xff] }
 0x176   :  { %v3897_v59 = vpop.xlane.xlu1 %757  ;;  %v1014_v1 = vadd.f32 %v950_v44, %v5137_v26  ;;  %v1094_v9 = vmul.f32 %v3760_v37, %v2900_v27  ;;  %v936_v47 = vmul.f32 %v5182_v0, %v5171_v54  ;;  %v600_v25 = vadd.f32 %v536_v55, %v424_v32 }
 0x177   :  { %5180 = vst [vmem:[#allocation30_spill] sm:$0xff] %v3897_v59  ;;  %v599_v59 = vadd.f32 %v535_v14, %v423_v56  ;;  %v620_v22 = vadd.f32 %v556_v28, %v444_v8  ;;  %v1080_v44 = vmul.f32 %v5183_v31, %v5178_v13  ;;  %v438_v27 = vadd.f32 %v374_v50, %v262_v16  ;;  %v2740_v14 = vld [vmem:[%s4934_s0 + $0x14] ss:$0 sm:$0xff]  ;;  %v3947_v16 = vld [vmem:[%s4934_s0 + $0x3c] ss:$0 sm:$0xff] }
 0x178   :  { %1477 = vadd.xlane.f32.xlu2 %v1364_v60  ;;  %735 = vadd.xlane.f32.xlu0 %v649_v12  ;;  %v379_v12 = vmul.f32 %v3858_v33, %v2985_v4  ;;  %v935_v60 = vmul.f32 %v5182_v0, %v2888_v21  ;;  %v267_v26 = vadd.f32 %v2884_v19, %v163_v30  ;;  %v664_v0 = vmax.f32 %v600_v25, 0.0 }
 0x179   :  { %v921_v55 = vmul.f32 %v2740_v14, %v5165_v48  ;;  %v922_v56 = vmul.f32 %v2740_v14, %v5129_v38  ;;  %v1000_v8 = vadd.f32 %v936_v47, %v2956_v52  ;;  %v949_v28 = vmul.f32 %v3726_v39, %v2892_v23  ;;  %5184 = vst [vmem:[#allocation17_spill] sm:$0xff] %v3947_v16 }
 0x17a   :  { %v999_v32 = vadd.f32 %v935_v60, %v3075_v49  ;;  %v663_v30 = vmax.f32 %v599_v59, 0.0  ;;  %v550_v60 = vmul.f32 %v5175_v5, %v5159_v51  ;;  %v443_v33 = vadd.f32 %v379_v12, %v267_v26  ;;  %v3979_v12 = vld [vmem:[%s4934_s0 + $0x3e] ss:$0 sm:$0xff] }
 0x17b   :  { %v3926_v36 = vpop.xlane.xlu2 %745  ;;  %791 = vadd.xlane.f32.xlu1 %v677_v57  ;;  %v3928_v3 = vpop.xlane.xlu0 %755  ;;  %v3939_v57 = vadd.f32 %v1094_v9, %v1014_v1  ;;  %v3954_v1 = vld [vmem:[%s4934_s0 + $0x3d] ss:$0 sm:$0xff]  ;;  %v1079_v9 = vmul.f32 %v5183_v31, %v3041_v63  ;;  %v986_v14 = vadd.f32 %v922_v56, %v5131_v11  ;;  %v3961_v39 = vadd.f32 %v1080_v44, %v1000_v8  ;;  %v2742_v44 = vld [vmem:[%s4934_s0 + $0x15] ss:$0 sm:$0xff] }
 0x17c   :  { %v684_v25 = vmax.f32 %v620_v22, 0.0  ;;  %v555_v26 = vmul.f32 %v3888_v2, %v2974_v62  ;;  %v1093_v5 = vmul.f32 %v3760_v37, %v5153_v61  ;;  %v5185_v22 = vld [vmem:[#allocation22_spill] sm:$0xff]  ;;  %v1066_v56 = vmul.f32 %v2742_v44, %v3422_v41 }
 0x17d   :  { %v1223_v31 = vmul.f32 %v5185_v22, %v3260_v10  ;;  %v1013_v8 = vadd.f32 %v949_v28, %v5156_v7  ;;  %v956_v37 = vmul.f32 %v3947_v16, %v5158_v45  ;;  %v3994_v2 = vmul.f32 %v3954_v1, %v5161_v35  ;;  %v5187_v45 = vld [vmem:[#allocation25_spill] sm:$0xff] }
 0x17e   :  { %v1404_v50 = vpop.xlane.xlu1 %1403  ;;  %v1143_v10 = vadd.f32 %v1079_v9, %v999_v32  ;;  %v1065_v20 = vmul.f32 %v2742_v44, %v5167_v17  ;;  %v1130_v23 = vadd.f32 %v1066_v56, %v986_v14  ;;  %v985_v35 = vadd.f32 %v921_v55, %v5168_v18 }
 0x17f   :  { %v3956_v47 = vadd.f32 %v1404_v50, %v716_v43  ;;  %v3970_v43 = vld [vmem:[%s4934_s0 + $0x18] ss:$0 sm:$0xff]  ;;  %v955_v50 = vmul.f32 %v3947_v16, %v2894_v24  ;;  %v2743_v24 = vld [vmem:[%s4934_s0 + $0x16] ss:$0 sm:$0xff]  ;;  %v1157_v14 = vadd.f32 %v1093_v5, %v1013_v8 }
 0x180   :  { %763 = vadd.xlane.f32.xlu2 %v663_v30  ;;  %765 = vadd.xlane.f32.xlu0 %v664_v0  ;;  %v3974_v59 = vmul.f32 %v3970_v43, %v5165_v48  ;;  %v614_v30 = vadd.f32 %v550_v60, %v438_v27  ;;  %v619_v0 = vadd.f32 %v555_v26, %v443_v33  ;;  %v5186_v33 = vld [vmem:[#allocation8_spill] sm:$0xff] }
 0x181   :  { %v1210_v27 = vmul.f32 %v2743_v24, %v3424_v53  ;;  %v1287_v32 = vadd.f32 %v1223_v31, %v1143_v10  ;;  %v1209_v9 = vmul.f32 %v2743_v24, %v3317_v46  ;;  %v5188_v26 = vld [vmem:[#allocation24_spill] sm:$0xff]  ;;  %v4021_v8 = vadd.f32 %v955_v50, %v2884_v19 }
 0x182   :  { %v1237_v44 = vmul.f32 %v5188_v26, %v2965_v58  ;;  %v678_v53 = vmax.f32 %v614_v30, 0.0 }
 0x183   :  { %v1388_v22 = vpop.xlane.xlu2 %1387  ;;  %805 = vadd.xlane.f32.xlu1 %v684_v25  ;;  %v1390_v61 = vpop.xlane.xlu0 %1389  ;;  %v4006_v25 = vmul.f32 %v3979_v12, %v5163_v29  ;;  %v1274_v55 = vadd.f32 %v1210_v27, %v1130_v23  ;;  %v1238_v29 = vmul.f32 %v5188_v26, %v5159_v51  ;;  %v1351_v30 = vmax.f32 %v1287_v32, 0.0  ;;  %v5190_v23 = vld [vmem:[#allocation39_spill] sm:$0xff]  ;;  %v4031_v27 = vld [vmem:[%s4934_s0 + $0x26] ss:$0 sm:$0xff]  ;;  %v5216_v26 = vld [vmem:[#allocation17_spill] sm:$0xff] }
 0x184   :  { %v1511_v28 = vadd.f32 %v1388_v22, %v5186_v33  ;;  %v1512_v60 = vadd.f32 %v1390_v61, %v5187_v45  ;;  %v683_v22 = vmax.f32 %v619_v0, 0.0  ;;  %v1129_v33 = vadd.f32 %v1065_v20, %v985_v35  ;;  %v5189_v45 = vld [vmem:[#allocation18_spill] sm:$0xff]  ;;  %5191 = vst [vmem:[#allocation14_spill] sm:$0xff] %v4031_v27 }
 0x185   :  { %v4015_v10 = vadd.s32 4294967264, %v5189_v45  ;;  %v4018_v5 = vadd.s32 4294967256, %v5189_v45  ;;  %v4026_v20 = vmul.f32 %v5190_v23, %v5171_v54  ;;  %v4035_v19 = vadd.f32 %v1237_v44, %v1157_v14 }
 0x186   :  { %v1575_v56 = vmul.f32 0.00390625, %v1511_v28  ;;  %v1576_v16 = vmul.f32 0.00390625, %v1512_v60  ;;  %v1434_v7 = vpop.xlane.xlu1 %1433  ;;  %v1273_v0 = vadd.f32 %v1209_v9, %v1129_v33  ;;  %v1302_v50 = vadd.f32 %v1238_v29, %v3939_v57 }
 0x187   :  { %v1534_v61 = vadd.f32 %v1434_v7, %v3926_v36  ;;  %v1020_v7 = vadd.f32 %v956_v37, %v5162_v40  ;;  %v1338_v40 = vmax.f32 %v1274_v55, 0.0  ;;  %v1735_v9 = vunpack.c.l.b16 %v3860_v15 }
 0x188   :  { %v1637_v31 = vpack.c.bf16 %v1576_v16, %v1575_v56  ;;  %793 = vadd.xlane.f32.xlu2 %v678_v53  ;;  %803 = vadd.xlane.f32.xlu0 %v683_v22  ;;  %v1224_v53 = vmul.f32 %v4031_v27, %v3245_v42  ;;  %v1736_v14 = vunpack.c.h.b16 %v3860_v15  ;;  %v1583_v44 = vmul.f32 0.00390625, %v3956_v47  ;;  %v5192_v22 = vld [vmem:[#allocation40_spill] sm:$0xff]  ;;  %v2745_v15 = vld [vmem:[%s4934_s0 + $0x19] ss:$0 sm:$0xff] }
 0x189   :  { %v1337_v56 = vmax.f32 %v1273_v0, 0.0  ;;  %v1598_v55 = vmul.f32 0.00390625, %v1534_v61  ;;  %v1099_v47 = vmul.f32 %v3954_v1, %v2985_v4  ;;  %v5214_v27 = vld [vmem:[#allocation9_spill] sm:$0xff] }
 0x18a   :  { %v1715_v36 = vunpack.c.l.b16 %v1637_v31  ;;  %v1716_v24 = vunpack.c.h.b16 %v1637_v31  ;;  %v1288_v23 = vadd.f32 %v1224_v53, %v3961_v39  ;;  %v1365_v39 = vmax.f32 %v4035_v19, 0.0 }
 0x18b   :  { %v1406_v16 = vpop.xlane.xlu2 %1405  ;;  %1451 = vadd.xlane.f32.xlu1 %v1351_v30  ;;  %v1432_v37 = vpop.xlane.xlu0 %1431 }
 0x18c   :  { %v1791_v28 = vperm.slane %v1715_v36, %v4015_v10  ;;  %v1795_v60 = vperm.slane %v1716_v24, %v4018_v5  ;;  %v1520_v35 = vadd.f32 %v1406_v16, %v3881_v34  ;;  %v1533_v32 = vadd.f32 %v1432_v37, %v3840_v6  ;;  %v5194_v24 = vld [vmem:[#allocation19_spill] sm:$0xff]  ;;  %v2746_v37 = vld [vmem:[%s4934_s0 + $0x1a] ss:$0 sm:$0xff] }
 0x18d   :  { %v241_v6 = vadd.f32 %v5168_v18, %v3974_v59  ;;  %v353_v34 = vmul.f32 %v2745_v15, %v5167_v17  ;;  %v1836_v36 = vperm.slane %v1735_v9, %v5189_v45  ;;  %v1837_v16 = vperm.slane %v1736_v14, %v5194_v24 }
 0x18e   :  { %v1793_v33 = vsel %vm1792_vm3, %v1791_v28, %v5192_v22  ;;  %v1584_v57 = vmul.f32 0.00390625, %v1520_v35  ;;  %v1597_v29 = vmul.f32 0.00390625, %v1533_v32  ;;  %v4047_v31 = vpop.xlane.xlu1 %731  ;;  %v1366_v59 = vmax.f32 %v1302_v50, 0.0  ;;  %v4072_v50 = vld [vmem:[%s4934_s0 + $0x29] ss:$0 sm:$0xff] }
 0x18f   :  { %v4050_v30 = vsel %vm1796_vm4, %v1795_v60, %v1793_v33  ;;  %v529_v28 = vmul.f32 %v2746_v37, %v3317_v46  ;;  %v417_v53 = vadd.f32 %v353_v34, %v241_v6  ;;  %v1164_v9 = vadd.f32 %v3994_v2, %v1020_v7  ;;  %5195 = vst [vmem:[#allocation31_spill] sm:$0xff] %v4072_v50  ;;  %v5196_v33 = vld [vmem:[#allocation28_spill] sm:$0xff]  ;;  %v5198_v7 = vld [vmem:[#allocation30_spill] sm:$0xff] }
 0x190   :  { %5193 = vst [vmem:[#allocation35_spill] sm:$0xff] %v4050_v30  ;;  %v1641_v61 = vpack.c.bf16 %v1584_v57, %v1583_v44  ;;  %v1648_v0 = vpack.c.bf16 %v1598_v55, %v1597_v29  ;;  %1423 = vadd.xlane.f32.xlu2 %v1337_v56  ;;  %1425 = vadd.xlane.f32.xlu0 %v1338_v40  ;;  %v5197_v57 = vld [vmem:[#allocation29_spill] sm:$0xff] }
 0x191   :  { %v368_v14 = vmul.f32 %v4072_v50, %v5178_v13  ;;  %v1838_v19 = vsel %vm1780_vm0, %v1837_v16, %v1836_v36  ;;  %v593_v34 = vadd.f32 %v529_v28, %v417_v53  ;;  %v1243_v28 = vmul.f32 %v3979_v12, %v2974_v62 }
 0x192   :  { %v1723_v60 = vunpack.c.l.b16 %v1641_v61  ;;  %v1724_v35 = vunpack.c.h.b16 %v1641_v61  ;;  %v1737_v4 = vunpack.c.l.b16 %v1648_v0  ;;  %v1738_v32 = vunpack.c.h.b16 %v1648_v0  ;;  %v5199_v61 = vld [vmem:[#allocation41_spill] sm:$0xff] }
 0x193   :  { %v1444_v44 = vpop.xlane.xlu2 %1443  ;;  %1481 = vadd.xlane.f32.xlu1 %v1366_v59  ;;  %v1446_v40 = vpop.xlane.xlu0 %1445 }
 0x194   :  { %v1813_v56 = vperm.slane %v1723_v60, %v4015_v10  ;;  %v1815_v22 = vperm.slane %v1724_v35, %v4018_v5  ;;  %v1839_v55 = vperm.slane %v1737_v4, %v5196_v33  ;;  %v1841_v29 = vperm.slane %v1738_v32, %v5197_v57 }
 0x195   :  { %v1539_v2 = vadd.f32 %v1444_v44, %v3928_v3  ;;  %v1540_v6 = vadd.f32 %v1446_v40, %v5198_v7  ;;  %v1352_v60 = vmax.f32 %v1288_v23, 0.0  ;;  %v1163_v35 = vadd.f32 %v1099_v47, %v4021_v8  ;;  %v4107_v40 = vld [vmem:[%s4934_s0 + $0x2a] ss:$0 sm:$0xff] }
 0x196   :  { %v1814_v0 = vsel %vm1792_vm3, %v1813_v56, %v5199_v61  ;;  %v1840_v59 = vsel %vm1784_vm1, %v1839_v55, %v1838_v19  ;;  %v4086_v30 = vpop.xlane.xlu1 %761  ;;  %v1308_v32 = vadd.f32 %v4006_v25, %v1164_v9  ;;  %v138_v23 = vmul.f32 %v3970_v43, %v5129_v38  ;;  %5202 = vst [vmem:[#allocation37_spill] sm:$0xff] %v4107_v40  ;;  %v2750_v19 = vld [vmem:[%s4934_s0 + $0x1c] ss:$0 sm:$0xff] }
 0x197   :  { %v4090_v4 = vsel %vm1796_vm4, %v1815_v22, %v1814_v0  ;;  %v4093_v36 = vsel %vm1788_vm2, %v1841_v29, %v1840_v59  ;;  %v1603_v3 = vmul.f32 0.00390625, %v1539_v2  ;;  %v1604_v16 = vmul.f32 0.00390625, %v1540_v6  ;;  %v5204_v6 = vld [vmem:[#allocation4_spill] sm:$0xff]  ;;  %v5206_v0 = vld [vmem:[#allocation5_spill] sm:$0xff] }
 0x198   :  { %5200 = vst [vmem:[#allocation23_spill] sm:$0xff] %v4090_v4  ;;  %1453 = vadd.xlane.f32.xlu2 %v1352_v60  ;;  %1479 = vadd.xlane.f32.xlu0 %v1365_v39  ;;  %v657_v8 = vmax.f32 %v593_v34, 0.0  ;;  %v256_v47 = vadd.f32 %v2956_v52, %v4026_v20  ;;  %v544_v39 = vmul.f32 %v4107_v40, %v3245_v42  ;;  %v4119_v20 = vld [vmem:[%s4934_s0 + $0x28] ss:$0 sm:$0xff]  ;;  %v1372_v22 = vmax.f32 %v1308_v32, 0.0  ;;  %v5205_v34 = vld [vmem:[#allocation21_spill] sm:$0xff] }
 0x199   :  { %5201 = vst [vmem:[#allocation36_spill] sm:$0xff] %v4093_v36  ;;  %v4100_v44 = vpack.c.bf16 %v1604_v16, %v1603_v3  ;;  %v1307_v62 = vadd.f32 %v1243_v28, %v1163_v35  ;;  %v242_v25 = vadd.f32 %v5131_v11, %v138_v23  ;;  %v151_v56 = vmul.f32 %v4119_v20, %v2888_v21  ;;  %v5207_v3 = vld [vmem:[#allocation38_spill] sm:$0xff]  ;;  %v5212_v36 = vld [vmem:[#allocation7_spill] sm:$0xff] }
 0x19a   :  { %v432_v9 = vadd.f32 %v368_v14, %v256_v47  ;;  %5203 = vst [vmem:[#allocation22_spill] sm:$0xff] %v4119_v20  ;;  %v354_v55 = vmul.f32 %v2745_v15, %v3422_v41  ;;  %v367_v29 = vmul.f32 %v4072_v50, %v3041_v63  ;;  %v929_v14 = vmul.f32 %v2750_v19, %v5165_v48  ;;  %v5208_v28 = vld [vmem:[#allocation34_spill] sm:$0xff]  ;;  %v2751_v47 = vld [vmem:[%s4934_s0 + $0x1d] ss:$0 sm:$0xff] }
 0x19b   :  { %v4112_v53 = vpop.xlane.xlu2 %733  ;;  %751 = vadd.xlane.f32.xlu1 %v657_v8  ;;  %v4114_v43 = vpop.xlane.xlu0 %759  ;;  %v255_v7 = vadd.f32 %v3075_v49, %v151_v56  ;;  %v165_v61 = vmul.f32 %v5205_v34, %v5204_v6  ;;  %v166_v59 = vmul.f32 %v5205_v34, %v5206_v0  ;;  %v1371_v15 = vmax.f32 %v1307_v62, 0.0  ;;  %v5210_v56 = vld [vmem:[#allocation11_spill] sm:$0xff] }
 0x19c   :  { %v608_v2 = vadd.f32 %v544_v39, %v432_v9  ;;  %v418_v35 = vadd.f32 %v354_v55, %v242_v25  ;;  %v530_v16 = vmul.f32 %v2746_v37, %v5207_v3  ;;  %v543_v32 = vmul.f32 %v4107_v40, %v5208_v28  ;;  %v5209_v9 = vld [vmem:[#allocation16_spill] sm:$0xff]  ;;  %v5211_v25 = vld [vmem:[#allocation10_spill] sm:$0xff]  ;;  %v5213_v40 = vld [vmem:[#allocation3_spill] sm:$0xff] }
 0x19d   :  { %v993_v8 = vadd.f32 %v929_v14, %v5168_v18  ;;  %v1073_v39 = vmul.f32 %v2751_v47, %v5167_v17  ;;  %v381_v62 = vmul.f32 %v5210_v56, %v5209_v9  ;;  %v431_v37 = vadd.f32 %v367_v29, %v255_v7  ;;  %v2752_v14 = vld [vmem:[%s4934_s0 + $0x1e] ss:$0 sm:$0xff] }
 0x19e   :  { %v1420_v60 = vpop.xlane.xlu1 %1419  ;;  %v270_v55 = vadd.f32 %v5211_v25, %v166_v59  ;;  %v1217_v4 = vmul.f32 %v2752_v14, %v3317_v46  ;;  %v269_v50 = vadd.f32 %v5213_v40, %v165_v61  ;;  %v557_v34 = vmul.f32 %v5214_v27, %v2965_v58 }
 0x19f   :  { %v4139_v23 = vadd.f32 %v1420_v60, %v4047_v31  ;;  %v382_v31 = vmul.f32 %v5210_v56, %v5212_v36  ;;  %v672_v60 = vmax.f32 %v608_v2, 0.0  ;;  %v1137_v59 = vadd.f32 %v1073_v39, %v993_v8  ;;  %v4165_v56 = vld [vmem:[%s4934_s0 + $0x2c] ss:$0 sm:$0xff] }
 0x1a0   :  { %1491 = vadd.xlane.f32.xlu2 %v1371_v15  ;;  %1493 = vadd.xlane.f32.xlu0 %v1372_v22  ;;  %v594_v15 = vadd.f32 %v530_v16, %v418_v35  ;;  %v607_v22 = vadd.f32 %v543_v32, %v431_v37  ;;  %v445_v2 = vadd.f32 %v381_v62, %v269_v50  ;;  %v4176_v50 = vld [vmem:[%s4934_s0 + $0x2d] ss:$0 sm:$0xff] }
 0x1a1   :  { %5215 = vst [vmem:[#allocation8_spill] sm:$0xff] %v4165_v56  ;;  %v944_v61 = vmul.f32 %v4165_v56, %v5171_v54  ;;  %v446_v20 = vadd.f32 %v382_v31, %v270_v55  ;;  %v957_v35 = vmul.f32 %v5216_v26, %v5204_v6  ;;  %v1281_v16 = vadd.f32 %v1217_v4, %v1137_v59  ;;  %v4188_v31 = vld [vmem:[%s4934_s0 + $0x2e] ss:$0 sm:$0xff] }
 0x1a2   :  { %v621_v32 = vadd.f32 %v557_v34, %v445_v2  ;;  %v558_v37 = vmul.f32 %v5214_v27, %v5159_v51  ;;  %v1088_v8 = vmul.f32 %v4176_v50, %v5178_v13  ;;  %v658_v62 = vmax.f32 %v594_v15, 0.0 }
 0x1a3   :  { %v4158_v29 = vpop.xlane.xlu2 %771  ;;  %781 = vadd.xlane.f32.xlu1 %v672_v60  ;;  %v4160_v7 = vpop.xlane.xlu0 %773  ;;  %v671_v60 = vmax.f32 %v607_v22, 0.0  ;;  %v930_v55 = vmul.f32 %v2750_v19, %v5129_v38  ;;  %v1101_v4 = vmul.f32 %v3954_v1, %v5209_v9  ;;  %v1008_v34 = vadd.f32 %v944_v61, %v2956_v52  ;;  %v5217_v9 = vld [vmem:[#allocation2_spill] sm:$0xff] }
 0x1a4   :  { %v1232_v59 = vmul.f32 %v4188_v31, %v3245_v42  ;;  %v943_v15 = vmul.f32 %v4165_v56, %v2888_v21  ;;  %v1021_v22 = vadd.f32 %v957_v35, %v5213_v40  ;;  %v1345_v2 = vmax.f32 %v1281_v16, 0.0 }
 0x1a5   :  { %v994_v19 = vadd.f32 %v930_v55, %v5131_v11  ;;  %v622_v61 = vadd.f32 %v558_v37, %v446_v20  ;;  %v685_v52 = vmax.f32 %v621_v32, 0.0  ;;  %v1074_v42 = vmul.f32 %v2751_v47, %v3422_v41 }
 0x1a6   :  { %v1450_v39 = vpop.xlane.xlu1 %1449  ;;  %v1007_v27 = vadd.f32 %v943_v15, %v3075_v49  ;;  %v4201_v56 = vadd.f32 %v1101_v4, %v1021_v22  ;;  %v1245_v40 = vmul.f32 %v3979_v12, %v2965_v58  ;;  %v958_v20 = vmul.f32 %v5216_v26, %v5206_v0 }
 0x1a7   :  { %v1542_v6 = vadd.f32 %v1450_v39, %v4086_v30  ;;  %v145_v30 = vmul.f32 %v5217_v9, %v5165_v48  ;;  %v1152_v39 = vadd.f32 %v1088_v8, %v1008_v34  ;;  %v1087_v48 = vmul.f32 %v4176_v50, %v3041_v63 }
 0x1a8   :  { %753 = vadd.xlane.f32.xlu2 %v658_v62  ;;  %779 = vadd.xlane.f32.xlu0 %v671_v60  ;;  %v1138_v16 = vadd.f32 %v1074_v42, %v994_v19  ;;  %v1218_v32 = vmul.f32 %v2752_v14, %v5207_v3  ;;  %v1743_v37 = vunpack.c.l.b16 %v4100_v44  ;;  %v1744_v8 = vunpack.c.h.b16 %v4100_v44  ;;  %v5219_v42 = vld [vmem:[#allocation12_spill] sm:$0xff] }
 0x1a9   :  { %v249_v38 = vadd.f32 %v5168_v18, %v145_v30  ;;  %v1296_v55 = vadd.f32 %v1232_v59, %v1152_v39  ;;  %v686_v4 = vmax.f32 %v622_v61, 0.0  ;;  %v1231_v34 = vmul.f32 %v4188_v31, %v5208_v28  ;;  %v4226_v44 = vld [vmem:[%s4934_s0 + $0x30] ss:$0 sm:$0xff] }
 0x1aa   :  { %v1591_v58 = vmul.f32 0.00390625, %v4139_v23  ;;  %v1606_v59 = vmul.f32 0.00390625, %v1542_v6  ;;  %v1102_v14 = vmul.f32 %v3954_v1, %v5212_v36  ;;  %v160_v23 = vmul.f32 %v4226_v44, %v5171_v54  ;;  %v5220_v36 = vld [vmem:[#allocation27_spill] sm:$0xff] }
 0x1ab   :  { %v1422_v62 = vpop.xlane.xlu2 %1421  ;;  %1439 = vadd.xlane.f32.xlu1 %v1345_v2  ;;  %v1448_v60 = vpop.xlane.xlu0 %1447  ;;  %v1360_v22 = vmax.f32 %v1296_v55, 0.0  ;;  %v1852_v2 = vperm.slane %v1744_v8, %v5194_v24  ;;  %v537_v39 = vmul.f32 %v5220_v36, %v3317_v46  ;;  %v1246_v55 = vmul.f32 %v3979_v12, %v5159_v51 }
 0x1ac   :  { %v1528_v35 = vadd.f32 %v1422_v62, %v4112_v53  ;;  %v1541_v47 = vadd.f32 %v1448_v60, %v4114_v43  ;;  %v1151_v53 = vadd.f32 %v1087_v48, %v1007_v27  ;;  %v361_v43 = vmul.f32 %v5219_v42, %v5167_v17 }
 0x1ad   :  { %v1282_v48 = vadd.f32 %v1218_v32, %v1138_v16  ;;  %v1851_v27 = vperm.slane %v1743_v37, %v5189_v45  ;;  %v4240_v16 = vld [vmem:[%s4934_s0 + $0x31] ss:$0 sm:$0xff] }
 0x1ae   :  { %v1592_v15 = vmul.f32 0.00390625, %v1528_v35  ;;  %v1605_v0 = vmul.f32 0.00390625, %v1541_v47  ;;  %v4217_v30 = vpop.xlane.xlu1 %703  ;;  %v1295_v61 = vadd.f32 %v1231_v34, %v1151_v53  ;;  %v376_v32 = vmul.f32 %v4240_v16, %v5178_v13 }
 0x1af   :  { %5218 = vst [vmem:[#allocation25_spill] sm:$0xff] %v4217_v30 }
 0x1b0   :  { %v1645_v6 = vpack.c.bf16 %v1592_v15, %v1591_v58  ;;  %v1652_v19 = vpack.c.bf16 %v1606_v59, %v1605_v0  ;;  %807 = vadd.xlane.f32.xlu2 %v685_v52  ;;  %809 = vadd.xlane.f32.xlu0 %v686_v4  ;;  %v425_v59 = vadd.f32 %v361_v43, %v249_v38  ;;  %v5221_v15 = vld [vmem:[#allocation6_spill] sm:$0xff] }
 0x1b1   :  { %v1022_v52 = vadd.f32 %v958_v20, %v5211_v25  ;;  %v1853_v25 = vsel %vm1780_vm0, %v1852_v2, %v1851_v27  ;;  %v5224_v2 = vld [vmem:[#allocation20_spill] sm:$0xff] }
 0x1b2   :  { %v1731_v62 = vunpack.c.l.b16 %v1645_v6  ;;  %v1732_v60 = vunpack.c.h.b16 %v1645_v6  ;;  %v1745_v35 = vunpack.c.l.b16 %v1652_v19  ;;  %v1746_v47 = vunpack.c.h.b16 %v1652_v19 }
 0x1b3   :  { %v1460_v30 = vpop.xlane.xlu2 %1459  ;;  %1469 = vadd.xlane.f32.xlu1 %v1360_v22  ;;  %v1462_v58 = vpop.xlane.xlu0 %1461  ;;  %v601_v34 = vadd.f32 %v537_v39, %v425_v59  ;;  %v1346_v6 = vmax.f32 %v1282_v48, 0.0  ;;  %v1359_v19 = vmax.f32 %v1295_v61, 0.0  ;;  %v146_v39 = vmul.f32 %v5217_v9, %v5224_v2  ;;  %v5226_v61 = vld [vmem:[#allocation15_spill] sm:$0xff] }
 0x1b4   :  { %v1828_v37 = vperm.slane %v1731_v62, %v4015_v10  ;;  %v1830_v8 = vperm.slane %v1732_v60, %v4018_v5  ;;  %v1854_v4 = vperm.slane %v1745_v35, %v5196_v33  ;;  %v1856_v38 = vperm.slane %v1746_v47, %v5197_v57  ;;  %v4271_v47 = vld [vmem:[%s4934_s0 + $0x32] ss:$0 sm:$0xff]  ;;  %v5240_v33 = vld [vmem:[#allocation37_spill] sm:$0xff] }
 0x1b5   :  { %v1547_v51 = vadd.f32 %v1460_v30, %v4158_v29  ;;  %v1548_v20 = vadd.f32 %v1462_v58, %v4160_v7  ;;  %v1309_v7 = vadd.f32 %v1245_v40, %v4201_v56  ;;  %v1166_v30 = vadd.f32 %v1102_v14, %v1022_v52  ;;  %v5227_v58 = vld [vmem:[#allocation33_spill] sm:$0xff] }
 0x1b6   :  { %v1829_v0 = vsel %vm1792_vm3, %v1828_v37, %v5221_v15  ;;  %v1855_v53 = vsel %vm1784_vm1, %v1854_v4, %v1853_v25  ;;  %v4254_v43 = vpop.xlane.xlu1 %721  ;;  %v665_v48 = vmax.f32 %v601_v34, 0.0  ;;  %v264_v35 = vadd.f32 %v5226_v61, %v160_v23  ;;  %v5229_v15 = vld [vmem:[#allocation26_spill] sm:$0xff] }
 0x1b7   :  { %v4257_v22 = vsel %vm1796_vm4, %v1830_v8, %v1829_v0  ;;  %v4260_v62 = vsel %vm1788_vm2, %v1856_v38, %v1855_v53  ;;  %v1611_v27 = vmul.f32 0.00390625, %v1547_v51  ;;  %v1612_v29 = vmul.f32 0.00390625, %v1548_v20  ;;  %v5230_v0 = vld [vmem:[#allocation32_spill] sm:$0xff] }
 0x1b8   :  { %5222 = vst [vmem:[#allocation18_spill] sm:$0xff] %v4257_v22  ;;  %1441 = vadd.xlane.f32.xlu2 %v1346_v6  ;;  %1467 = vadd.xlane.f32.xlu0 %v1359_v19  ;;  %v552_v59 = vmul.f32 %v4271_v47, %v5227_v58  ;;  %v1310_v37 = vadd.f32 %v1246_v55, %v1166_v30  ;;  %v1373_v4 = vmax.f32 %v1309_v7, 0.0  ;;  %v2759_v6 = vld [vmem:[%s4934_s0 + $0x24] ss:$0 sm:$0xff]  ;;  %v5231_v30 = vld [vmem:[#allocation24_spill] sm:$0xff] }
 0x1b9   :  { %5223 = vst [vmem:[#allocation39_spill] sm:$0xff] %v4260_v62  ;;  %v4265_v60 = vpack.c.bf16 %v1612_v29, %v1611_v27  ;;  %v250_v56 = vadd.f32 %v5131_v11, %v146_v39  ;;  %v440_v14 = vadd.f32 %v376_v32, %v264_v35  ;;  %v159_v23 = vmul.f32 %v4226_v44, %v2888_v21 }
 0x1ba   :  { %v362_v52 = vmul.f32 %v5219_v42, %v3422_v41  ;;  %v375_v8 = vmul.f32 %v4240_v16, %v3041_v63  ;;  %v1374_v51 = vmax.f32 %v1310_v37, 0.0  ;;  %v538_v32 = vmul.f32 %v5220_v36, %v5207_v3  ;;  %v5232_v37 = vld [vmem:[#allocation13_spill] sm:$0xff] }
 0x1bb   :  { %5225 = vst [vmem:[#allocation40_spill] sm:$0xff] %v4265_v60  ;;  %v4276_v40 = vpop.xlane.xlu2 %705  ;;  %767 = vadd.xlane.f32.xlu1 %v665_v48  ;;  %v4278_v9 = vpop.xlane.xlu0 %719  ;;  %v616_v38 = vadd.f32 %v552_v59, %v440_v14  ;;  %v263_v55 = vadd.f32 %v3075_v49, %v159_v23  ;;  %v551_v34 = vmul.f32 %v4271_v47, %v5208_v28 }
 0x1bc   :  { %v426_v20 = vadd.f32 %v362_v52, %v250_v56  ;;  %v951_v42 = vmul.f32 %v5229_v15, %v2888_v21  ;;  %v1095_v53 = vmul.f32 %v5230_v0, %v3041_v63  ;;  %v938_v19 = vmul.f32 %v2759_v6, %v5224_v2 }
 0x1bd   :  { %v439_v27 = vadd.f32 %v375_v8, %v263_v55  ;;  %v952_v36 = vmul.f32 %v5229_v15, %v5171_v54  ;;  %v680_v29 = vmax.f32 %v616_v38, 0.0  ;;  %v1239_v39 = vmul.f32 %v5231_v30, %v5208_v28  ;;  %v2760_v8 = vld [vmem:[%s4934_s0 + $0x25] ss:$0 sm:$0xff] }
 0x1be   :  { %v4287_v25 = vpop.xlane.xlu1 %775  ;;  %v1015_v7 = vadd.f32 %v951_v42, %v3075_v49  ;;  %v1002_v48 = vadd.f32 %v938_v19, %v5131_v11  ;;  %v602_v35 = vadd.f32 %v538_v32, %v426_v20  ;;  %v937_v56 = vmul.f32 %v2759_v6, %v5232_v37  ;;  %v5233_v38 = vld [vmem:[#allocation22_spill] sm:$0xff] }
 0x1bf   :  { %5228 = vst [vmem:[#allocation30_spill] sm:$0xff] %v4287_v25  ;;  %v615_v59 = vadd.f32 %v551_v34, %v439_v27  ;;  %v154_v55 = vmul.f32 %v5233_v38, %v5224_v2  ;;  %v1081_v20 = vmul.f32 %v2760_v8, %v5167_v17  ;;  %v1016_v32 = vadd.f32 %v952_v36, %v5226_v61 }
 0x1c0   :  { %1495 = vadd.xlane.f32.xlu2 %v1373_v4  ;;  %1497 = vadd.xlane.f32.xlu0 %v1374_v51  ;;  %v1159_v52 = vadd.f32 %v1095_v53, %v1015_v7  ;;  %v1082_v4 = vmul.f32 %v2760_v8, %v3422_v41  ;;  %v1001_v51 = vadd.f32 %v937_v56, %v5168_v18  ;;  %v5234_v53 = vld [vmem:[#allocation21_spill] sm:$0xff]  ;;  %v666_v27 = vmax.f32 %v602_v35, 0.0  ;;  %v5236_v7 = vld [vmem:[#allocation14_spill] sm:$0xff]  ;;  %v5237_v8 = vld [vmem:[#allocation31_spill] sm:$0xff] }
 0x1c1   :  { %v258_v42 = vadd.f32 %v5131_v11, %v154_v55  ;;  %v168_v6 = vmul.f32 %v5234_v53, %v5171_v54  ;;  %v1225_v62 = vmul.f32 %v5236_v7, %v3317_v46  ;;  %v1226_v56 = vmul.f32 %v5236_v7, %v5207_v3  ;;  %v5239_v55 = vld [vmem:[#allocation11_spill] sm:$0xff] }
 0x1c2   :  { %v1303_v34 = vadd.f32 %v1239_v39, %v1159_v52  ;;  %v1146_v15 = vadd.f32 %v1082_v4, %v1002_v48  ;;  %v370_v36 = vmul.f32 %v5237_v8, %v3422_v41  ;;  %v1096_v39 = vmul.f32 %v5230_v0, %v5178_v13  ;;  %v5238_v52 = vld [vmem:[#allocation8_spill] sm:$0xff] }
 0x1c3   :  { %v4308_v14 = vpop.xlane.xlu2 %747  ;;  %797 = vadd.xlane.f32.xlu1 %v680_v29  ;;  %v4310_v23 = vpop.xlane.xlu0 %749  ;;  %v679_v29 = vmax.f32 %v615_v59, 0.0  ;;  %v153_v48 = vmul.f32 %v5233_v38, %v5232_v37  ;;  %v945_v4 = vmul.f32 %v5238_v52, %v5232_v37  ;;  %v1145_v35 = vadd.f32 %v1081_v20, %v1001_v51  ;;  %v5241_v51 = vld [vmem:[#allocation9_spill] sm:$0xff] }
 0x1c4   :  { %v167_v59 = vmul.f32 %v5234_v53, %v2888_v21  ;;  %v384_v7 = vmul.f32 %v5239_v55, %v5178_v13  ;;  %v1367_v22 = vmax.f32 %v1303_v34, 0.0  ;;  %v434_v57 = vadd.f32 %v370_v36, %v258_v42 }
 0x1c5   :  { %v546_v0 = vmul.f32 %v5240_v33, %v5207_v3  ;;  %v1240_v38 = vmul.f32 %v5231_v30, %v5227_v58  ;;  %v1290_v24 = vadd.f32 %v1226_v56, %v1146_v15  ;;  %v560_v20 = vmul.f32 %v5241_v51, %v5227_v58 }
 0x1c6   :  { %v4324_v19 = vpop.xlane.xlu1 %789  ;;  %v1160_v34 = vadd.f32 %v1096_v39, %v1016_v32  ;;  %v257_v42 = vadd.f32 %v5168_v18, %v153_v48  ;;  %v1009_v36 = vadd.f32 %v945_v4, %v5168_v18  ;;  %v960_v30 = vmul.f32 %v5216_v26, %v5171_v54 }
 0x1c7   :  { %5235 = vst [vmem:[#allocation41_spill] sm:$0xff] %v4324_v19  ;;  %v1289_v19 = vadd.f32 %v1225_v62, %v1145_v35  ;;  %v369_v62 = vmul.f32 %v5237_v8, %v5167_v17  ;;  %v1089_v15 = vmul.f32 %v4176_v50, %v5167_v17  ;;  %v610_v56 = vadd.f32 %v546_v0, %v434_v57 }
 0x1c8   :  { %769 = vadd.xlane.f32.xlu2 %v666_v27  ;;  %795 = vadd.xlane.f32.xlu0 %v679_v29  ;;  %v272_v27 = vadd.f32 %v5226_v61, %v168_v6  ;;  %v383_v6 = vmul.f32 %v5239_v55, %v3041_v63  ;;  %v1304_v35 = vadd.f32 %v1240_v38, %v1160_v34  ;;  %v1354_v54 = vmax.f32 %v1290_v24, 0.0 }
 0x1c9   :  { %v271_v32 = vadd.f32 %v3075_v49, %v167_v59  ;;  %v1104_v39 = vmul.f32 %v3954_v1, %v5178_v13  ;;  %v1353_v4 = vmax.f32 %v1289_v19, 0.0  ;;  %v545_v8 = vmul.f32 %v5240_v33, %v3317_v46 }
 0x1ca   :  { %v1248_v57 = vmul.f32 %v3979_v12, %v5227_v58  ;;  %v959_v59 = vmul.f32 %v5216_v26, %v2888_v21  ;;  %v433_v13 = vadd.f32 %v369_v62, %v257_v42  ;;  %v1153_v24 = vadd.f32 %v1089_v15, %v1009_v36  ;;  %v2761_v36 = vld [vmem:[%s4934_s0 + $0x34] ss:$0 sm:$0xff]  ;;  %v5243_v62 = vld [vmem:[#allocation25_spill] sm:$0xff] }
 0x1cb   :  { %v4349_v29 = vpop.xlane.xlu2 %777  ;;  %1483 = vadd.xlane.f32.xlu1 %v1367_v22  ;;  %v4351_v60 = vpop.xlane.xlu0 %787  ;;  %v448_v22 = vadd.f32 %v384_v7, %v272_v27  ;;  %v1024_v7 = vadd.f32 %v960_v30, %v5226_v61  ;;  %v447_v19 = vadd.f32 %v383_v6, %v271_v32  ;;  %v674_v0 = vmax.f32 %v610_v56, 0.0 }
 0x1cc   :  { %5242 = vst [vmem:[#allocation4_spill] sm:$0xff] %v4349_v29  ;;  %v1368_v33 = vmax.f32 %v1304_v35, 0.0  ;;  %v1233_v38 = vmul.f32 %v4188_v31, %v3317_v46  ;;  %v609_v27 = vadd.f32 %v545_v8, %v433_v13  ;;  %v946_v58 = vmul.f32 %v5238_v52, %v5224_v2  ;;  %v4395_v52 = vld [vmem:[%s4934_s0 + $0x35] ss:$0 sm:$0xff] }
 0x1cd   :  { %v4368_v29 = vadd.f32 %v560_v20, %v448_v22  ;;  %v1090_v21 = vmul.f32 %v4176_v50, %v3422_v41  ;;  %v1023_v42 = vadd.f32 %v959_v59, %v3075_v49  ;;  %v953_v30 = vmul.f32 %v2761_v36, %v5232_v37 }
 0x1ce   :  { %v1408_v48 = vpop.xlane.xlu1 %1407  ;;  %v1097_v50 = vmul.f32 %v4395_v52, %v5167_v17  ;;  %v1103_v49 = vmul.f32 %v3954_v1, %v3041_v63  ;;  %v161_v22 = vmul.f32 %v4226_v44, %v5232_v37  ;;  %v1297_v56 = vadd.f32 %v1233_v38, %v1153_v24 }
 0x1cf   :  { %v4371_v25 = vadd.f32 %v1408_v48, %v4278_v9  ;;  %v1168_v9 = vadd.f32 %v1104_v39, %v1024_v7  ;;  %v688_v61 = vmax.f32 %v4368_v29, 0.0  ;;  %v559_v35 = vmul.f32 %v5241_v51, %v5208_v28 }
 0x1d0   :  { %1455 = vadd.xlane.f32.xlu2 %v1353_v4  ;;  %1457 = vadd.xlane.f32.xlu0 %v1354_v54  ;;  %v1010_v32 = vadd.f32 %v946_v58, %v5131_v11  ;;  %v377_v39 = vmul.f32 %v4240_v16, %v5167_v17  ;;  %v673_v8 = vmax.f32 %v609_v27, 0.0  ;;  %v265_v1 = vadd.f32 %v5168_v18, %v161_v22 }
 0x1d1   :  { %v4385_v34 = vadd.f32 %v1248_v57, %v1168_v9  ;;  %v162_v7 = vmul.f32 %v4226_v44, %v5224_v2  ;;  %v378_v51 = vmul.f32 %v4240_v16, %v3422_v41  ;;  %v4418_v57 = vadd.s32 4294967248, %v5189_v45 }
 0x1d2   :  { %v4421_v59 = vadd.s32 4294967240, %v5189_v45  ;;  %v1167_v24 = vadd.f32 %v1103_v49, %v1023_v42  ;;  %v1154_v38 = vadd.f32 %v1090_v21, %v1010_v32  ;;  %v1234_v9 = vmul.f32 %v4188_v31, %v5207_v3  ;;  %v5244_v49 = vld [vmem:[#allocation35_spill] sm:$0xff] }
 0x1d3   :  { %v1392_v26 = vpop.xlane.xlu2 %1391  ;;  %785 = vadd.xlane.f32.xlu1 %v674_v0  ;;  %v1394_v20 = vpop.xlane.xlu0 %1393  ;;  %v1361_v0 = vmax.f32 %v1297_v56, 0.0  ;;  %v4425_v16 = vadd.f32 %v377_v39, %v265_v1 }
 0x1d4   :  { %v1513_v15 = vadd.f32 %v1392_v26, %v5243_v62  ;;  %v1514_v6 = vadd.f32 %v1394_v20, %v4276_v40  ;;  %v1017_v40 = vadd.f32 %v953_v30, %v5168_v18 }
 0x1d6   :  { %v1577_v48 = vmul.f32 0.00390625, %v1513_v15  ;;  %v1578_v4 = vmul.f32 0.00390625, %v1514_v6  ;;  %v1438_v54 = vpop.xlane.xlu1 %1437  ;;  %v1161_v58 = vadd.f32 %v1097_v50, %v1017_v40  ;;  %v1585_v50 = vmul.f32 0.00390625, %v4371_v25 }
 0x1d7   :  { %v1536_v63 = vadd.f32 %v1438_v54, %v4310_v23  ;;  %v623_v23 = vadd.f32 %v559_v35, %v447_v19  ;;  %v170_v19 = vmul.f32 %v5234_v53, %v5224_v2  ;;  %v1298_v15 = vadd.f32 %v1234_v9, %v1154_v38 }
 0x1d8   :  { %v1638_v13 = vpack.c.bf16 %v1578_v4, %v1577_v48  ;;  %1485 = vadd.xlane.f32.xlu2 %v1368_v33  ;;  %783 = vadd.xlane.f32.xlu0 %v673_v8  ;;  %v1247_v33 = vmul.f32 %v3979_v12, %v5208_v28  ;;  %v954_v6 = vmul.f32 %v2761_v36, %v5224_v2  ;;  %v1376_v36 = vmax.f32 %v4385_v34, 0.0 }
 0x1d9   :  { %v687_v62 = vmax.f32 %v623_v23, 0.0  ;;  %v1600_v28 = vmul.f32 0.00390625, %v1536_v63  ;;  %v386_v48 = vmul.f32 %v5239_v55, %v3422_v41  ;;  %v1362_v4 = vmax.f32 %v1298_v15, 0.0 }
 0x1da   :  { %v1717_v44 = vunpack.c.l.b16 %v1638_v13  ;;  %v1718_v27 = vunpack.c.h.b16 %v1638_v13  ;;  %v274_v8 = vadd.f32 %v5131_v11, %v170_v19  ;;  %v1018_v40 = vadd.f32 %v954_v6, %v5131_v11 }
 0x1db   :  { %v1410_v26 = vpop.xlane.xlu2 %1409  ;;  %1471 = vadd.xlane.f32.xlu1 %v1361_v0  ;;  %v1436_v20 = vpop.xlane.xlu0 %1435  ;;  %v553_v55 = vmul.f32 %v4271_v47, %v3317_v46  ;;  %v554_v0 = vmul.f32 %v4271_v47, %v5207_v3 }
 0x1dc   :  { %v1799_v21 = vperm.slane %v1717_v44, %v4418_v57  ;;  %v1803_v31 = vperm.slane %v1718_v27, %v4421_v59  ;;  %v1522_v42 = vadd.f32 %v1410_v26, %v4254_v43  ;;  %v1535_v30 = vadd.f32 %v1436_v20, %v4308_v14  ;;  %v5245_v27 = vld [vmem:[#allocation30_spill] sm:$0xff]  ;;  %v5246_v20 = vld [vmem:[#allocation4_spill] sm:$0xff] }
 0x1dd   :  { %v1311_v43 = vadd.f32 %v1247_v33, %v1167_v24  ;;  %v266_v14 = vadd.f32 %v5131_v11, %v162_v7 }
 0x1de   :  { %v1801_v12 = vsel %vm1800_vm5, %v1799_v21, %v5244_v49  ;;  %v1586_v22 = vmul.f32 0.00390625, %v1522_v42  ;;  %v1599_v53 = vmul.f32 0.00390625, %v1535_v30  ;;  %v1476_v56 = vpop.xlane.xlu1 %1475  ;;  %v5247_v21 = vld [vmem:[#allocation40_spill] sm:$0xff]  ;;  %v5248_v42 = vld [vmem:[#allocation23_spill] sm:$0xff] }
 0x1df   :  { %v1805_v35 = vsel %vm1804_vm6, %v1803_v31, %v1801_v12  ;;  %v4441_v32 = vadd.f32 %v1476_v56, %v4351_v60  ;;  %v2763_v60 = vld [vmem:[%s4934_s0 + $0x36] ss:$0 sm:$0xff]  ;;  %v1375_v13 = vmax.f32 %v1311_v43, 0.0  ;;  %v442_v24 = vadd.f32 %v378_v51, %v266_v14 }
 0x1e0   :  { %v1642_v25 = vpack.c.bf16 %v1586_v22, %v1585_v50  ;;  %v1649_v39 = vpack.c.bf16 %v1600_v28, %v1599_v53  ;;  %811 = vadd.xlane.f32.xlu2 %v687_v62  ;;  %813 = vadd.xlane.f32.xlu0 %v688_v61  ;;  %v1241_v54 = vmul.f32 %v2763_v60, %v3317_v46  ;;  %v1751_v31 = vunpack.c.l.b16 %v5247_v21  ;;  %v5249_v30 = vld [vmem:[#allocation36_spill] sm:$0xff]  ;;  %v2764_v22 = vld [vmem:[%s4934_s0 + $0x3a] ss:$0 sm:$0xff] }
 0x1e1   :  { %v1752_v51 = vunpack.c.h.b16 %v5247_v21  ;;  %v450_v28 = vadd.f32 %v386_v48, %v274_v8  ;;  %v562_v53 = vmul.f32 %v2764_v22, %v5207_v3  ;;  %v618_v14 = vadd.f32 %v554_v0, %v442_v24 }
 0x1e2   :  { %v1725_v63 = vunpack.c.l.b16 %v1642_v25  ;;  %v1726_v1 = vunpack.c.h.b16 %v1642_v25  ;;  %v1739_v29 = vunpack.c.l.b16 %v1649_v39  ;;  %v1740_v61 = vunpack.c.h.b16 %v1649_v39  ;;  %v2765_v25 = vld [vmem:[%s4934_s0 + $0x38] ss:$0 sm:$0xff] }
 0x1e3   :  { %v1464_v7 = vpop.xlane.xlu2 %1463  ;;  %1501 = vadd.xlane.f32.xlu1 %v1376_v36  ;;  %v1466_v34 = vpop.xlane.xlu0 %1465  ;;  %v1305_v19 = vadd.f32 %v1241_v54, %v1161_v58  ;;  %v169_v39 = vmul.f32 %v2765_v25, %v5232_v37  ;;  %v5250_v36 = vld [vmem:[#allocation19_spill] sm:$0xff]  ;;  %v617_v48 = vadd.f32 %v553_v55, %v4425_v16  ;;  %v1098_v54 = vmul.f32 %v4395_v52, %v3422_v41  ;;  %v5252_v52 = vld [vmem:[#allocation28_spill] sm:$0xff] }
 0x1e4   :  { %v1817_v23 = vperm.slane %v1725_v63, %v4418_v57  ;;  %v1819_v38 = vperm.slane %v1726_v1, %v4421_v59  ;;  %v1843_v9 = vperm.slane %v1739_v29, %v4015_v10  ;;  %v1845_v44 = vperm.slane %v1740_v61, %v4018_v5 }
 0x1e5   :  { %v1549_v26 = vadd.f32 %v1464_v7, %v5245_v27  ;;  %v1550_v33 = vadd.f32 %v1466_v34, %v5246_v20  ;;  %v1369_v43 = vmax.f32 %v1305_v19, 0.0  ;;  %v273_v61 = vadd.f32 %v5168_v18, %v169_v39  ;;  %v2766_v7 = vld [vmem:[%s4934_s0 + $0x39] ss:$0 sm:$0xff] }
 0x1e6   :  { %v1818_v47 = vsel %vm1800_vm5, %v1817_v23, %v5248_v42  ;;  %v1844_v50 = vsel %vm1792_vm3, %v1843_v9, %v5249_v30  ;;  %v4471_v62 = vpop.xlane.xlu1 %737  ;;  %v385_v34 = vmul.f32 %v2766_v7, %v5167_v17  ;;  %v626_v0 = vadd.f32 %v562_v53, %v450_v28  ;;  %v2767_v42 = vld [vmem:[%s4934_s0 + $0x3c] ss:$0 sm:$0xff] }
 0x1e7   :  { %v1820_v15 = vsel %vm1804_vm6, %v1819_v38, %v1818_v47  ;;  %v4475_v6 = vsel %vm1796_vm4, %v1845_v44, %v1844_v50  ;;  %v1613_v49 = vmul.f32 0.00390625, %v1549_v26  ;;  %v1614_v12 = vmul.f32 0.00390625, %v1550_v33  ;;  %v5253_v38 = vld [vmem:[#allocation29_spill] sm:$0xff] }
 0x1e8   :  { %v4477_v58 = vsel %vm1911_vm7, %v1820_v15, %v1805_v35  ;;  %1473 = vadd.xlane.f32.xlu2 %v1362_v4  ;;  %1499 = vadd.xlane.f32.xlu0 %v1375_v13  ;;  %v1866_v35 = vperm.slane %v1751_v31, %v5189_v45  ;;  %v1867_v4 = vperm.slane %v1752_v51, %v5250_v36  ;;  %v5251_v13 = vld [vmem:[#allocation41_spill] sm:$0xff]  ;;  %v682_v44 = vmax.f32 %v618_v14, 0.0 }
 0x1e9   :  { %v1656_v56 = vpack.c.bf16 %v1614_v12, %v1613_v49  ;;  %v1162_v16 = vadd.f32 %v1098_v54, %v1018_v40  ;;  %v1242_v55 = vmul.f32 %v2763_v60, %v5207_v3  ;;  %v561_v27 = vmul.f32 %v2764_v22, %v3317_v46  ;;  %v2768_v22 = vld [vmem:[%s4934_s0 + $0x3d] ss:$0 sm:$0xff] }
 0x1ea   :  { %v1868_v26 = vsel %vm1780_vm0, %v1867_v4, %v1866_v35  ;;  %v1619_v20 = vmul.f32 0.00390625, %v4441_v32  ;;  %v681_v21 = vmax.f32 %v617_v48, 0.0  ;;  %v449_v51 = vadd.f32 %v385_v34, %v273_v61 }
 0x1eb   :  { %v1753_v8 = vunpack.c.l.b16 %v1656_v56  ;;  %v1754_v63 = vunpack.c.h.b16 %v1656_v56  ;;  %v1478_v1 = vpop.xlane.xlu2 %1477  ;;  %1487 = vadd.xlane.f32.xlu1 %v1369_v43  ;;  %v736_v29 = vpop.xlane.xlu0 %735  ;;  %v962_v47 = vmul.f32 %v2767_v42, %v5224_v2  ;;  %v690_v32 = vmax.f32 %v626_v0, 0.0 }
 0x1ec   :  { %v1556_v24 = vadd.f32 %v1478_v1, %v5251_v13  ;;  %v1306_v30 = vadd.f32 %v1242_v55, %v1162_v16  ;;  %v625_v50 = vadd.f32 %v561_v27, %v449_v51  ;;  %v961_v28 = vmul.f32 %v2767_v42, %v5232_v37 }
 0x1ed   :  { %v1869_v23 = vperm.slane %v1753_v8, %v5252_v52  ;;  %v1871_v9 = vperm.slane %v1754_v63, %v5253_v38  ;;  %v1026_v15 = vadd.f32 %v962_v47, %v5131_v11  ;;  %v1105_v53 = vmul.f32 %v2768_v22, %v5167_v17  ;;  %v2769_v11 = vld [vmem:[%s4934_s0 + $0x3e] ss:$0 sm:$0xff] }
 0x1ee   :  { %v1620_v33 = vmul.f32 0.00390625, %v1556_v24  ;;  %v792_v19 = vpop.xlane.xlu1 %791  ;;  %v1106_v56 = vmul.f32 %v2768_v22, %v3422_v41  ;;  %v1370_v43 = vmax.f32 %v1306_v30, 0.0  ;;  %v1025_v2 = vadd.f32 %v961_v28, %v5168_v18 }
 0x1ef   :  { %v1870_v31 = vsel %vm1784_vm1, %v1869_v23, %v1868_v26  ;;  %v689_v25 = vmax.f32 %v625_v50, 0.0  ;;  %v1249_v37 = vmul.f32 %v2769_v11, %v3317_v46  ;;  %v1250_v35 = vmul.f32 %v2769_v11, %v5207_v3 }
 0x1f0   :  { %v4506_v40 = vsel %vm1788_vm2, %v1871_v9, %v1870_v31  ;;  %v4508_v60 = vpack.c.bf16 %v1620_v33, %v1619_v20  ;;  %799 = vadd.xlane.f32.xlu2 %v681_v21  ;;  %801 = vadd.xlane.f32.xlu0 %v682_v44  ;;  %v1170_v39 = vadd.f32 %v1106_v56, %v1026_v15  ;;  %v5254_v31 = vld [vmem:[#allocation18_spill] sm:$0xff] }
 0x1f1   :  { %v1169_v17 = vadd.f32 %v1105_v53, %v1025_v2 }
 0x1f2   :  { %v1314_v41 = vadd.f32 %v1250_v35, %v1170_v39  ;;  %v1759_v21 = vunpack.c.l.b16 %v4508_v60 }
 0x1f3   :  { %v764_v49 = vpop.xlane.xlu2 %763  ;;  %817 = vadd.xlane.f32.xlu1 %v690_v32  ;;  %v766_v12 = vpop.xlane.xlu0 %765  ;;  %v1313_v4 = vadd.f32 %v1249_v37, %v1169_v17 }
 0x1f4   :  { %v1378_v63 = vmax.f32 %v1314_v41, 0.0 }
 0x1f5   :  { %v1377_v8 = vmax.f32 %v1313_v4, 0.0  ;;  %v5255_v4 = vld [vmem:[#allocation39_spill] sm:$0xff] }
 0x1f6   :  { %v4522_v14 = vpop.xlane.xlu1 %805 }
 0x1f8   :  { %1489 = vadd.xlane.f32.xlu2 %v1370_v43  ;;  %815 = vadd.xlane.f32.xlu0 %v689_v25 }
 0x1fb   :  { %v794_v48 = vpop.xlane.xlu2 %793  ;;  %v804_v54 = vpop.xlane.xlu0 %803 }
 0x1fe   :  { %v1452_v18 = vpop.xlane.xlu1 %1451 }
 0x1ff   :  { %v1543_v1 = vadd.f32 %v1452_v18, %v764_v49 }
 0x200   :  { %1503 = vadd.xlane.f32.xlu2 %v1377_v8  ;;  %1505 = vadd.xlane.f32.xlu0 %v1378_v63 }
 0x203   :  { %v1424_v61 = vpop.xlane.xlu2 %1423  ;;  %v1426_v7 = vpop.xlane.xlu0 %1425 }
 0x204   :  { %v1529_v34 = vadd.f32 %v1424_v61, %v736_v29  ;;  %v1530_v46 = vadd.f32 %v1426_v7, %v4471_v62  ;;  %v1760_v29 = vunpack.c.h.b16 %v4508_v60  ;;  %v1607_v62 = vmul.f32 0.00390625, %v1543_v1 }
 0x206   :  { %v1593_v13 = vmul.f32 0.00390625, %v1529_v34  ;;  %v1594_v3 = vmul.f32 0.00390625, %v1530_v46  ;;  %v1482_v24 = vpop.xlane.xlu1 %1481  ;;  %v1882_v60 = vperm.slane %v1760_v29, %v5250_v36 }
 0x207   :  { %v1558_v0 = vadd.f32 %v1482_v24, %v794_v48 }
 0x208   :  { %v1646_v16 = vpack.c.bf16 %v1594_v3, %v1593_v13 }
 0x209   :  { %v1622_v42 = vmul.f32 0.00390625, %v1558_v0 }
 0x20a   :  { %v1733_v55 = vunpack.c.l.b16 %v1646_v16  ;;  %v1734_v23 = vunpack.c.h.b16 %v1646_v16 }
 0x20b   :  { %v1454_v9 = vpop.xlane.xlu2 %1453  ;;  %v1480_v44 = vpop.xlane.xlu0 %1479 }
 0x20c   :  { %v1832_v27 = vperm.slane %v1733_v55, %v4418_v57  ;;  %v1834_v26 = vperm.slane %v1734_v23, %v4421_v59  ;;  %v1544_v20 = vadd.f32 %v1454_v9, %v766_v12  ;;  %v1557_v33 = vadd.f32 %v1480_v44, %v792_v19 }
 0x20d   :  { %v1881_v12 = vperm.slane %v1759_v21, %v5189_v45 }
 0x20e   :  { %v1833_v51 = vsel %vm1800_vm5, %v1832_v27, %v5254_v31  ;;  %v1608_v47 = vmul.f32 0.00390625, %v1544_v20  ;;  %v1621_v32 = vmul.f32 0.00390625, %v1557_v33  ;;  %v752_v30 = vpop.xlane.xlu1 %751 }
 0x20f   :  { %v1835_v50 = vsel %vm1804_vm6, %v1834_v26, %v1833_v51  ;;  %v1883_v39 = vsel %vm1780_vm0, %v1882_v60, %v1881_v12 }
 0x210   :  { %v4538_v15 = vsel %vm1913_vm8, %v1835_v50, %v4477_v58  ;;  %v1653_v49 = vpack.c.bf16 %v1608_v47, %v1607_v62  ;;  %v1660_v19 = vpack.c.bf16 %v1622_v42, %v1621_v32 }
 0x212   :  { %v1747_v28 = vunpack.c.l.b16 %v1653_v49  ;;  %v1748_v22 = vunpack.c.h.b16 %v1653_v49  ;;  %v1761_v53 = vunpack.c.l.b16 %v1660_v19  ;;  %v1762_v56 = vunpack.c.h.b16 %v1660_v19 }
 0x213   :  { %v1492_v43 = vpop.xlane.xlu2 %1491  ;;  %v1494_v2 = vpop.xlane.xlu0 %1493 }
 0x214   :  { %v1858_v25 = vperm.slane %v1747_v28, %v4015_v10  ;;  %v1860_v11 = vperm.slane %v1748_v22, %v4018_v5  ;;  %v1884_v37 = vperm.slane %v1761_v53, %v5252_v52  ;;  %v1886_v58 = vperm.slane %v1762_v56, %v5253_v38 }
 0x215   :  { %v1563_v35 = vadd.f32 %v1492_v43, %v804_v54  ;;  %v1564_v17 = vadd.f32 %v1494_v2, %v4522_v14 }
 0x216   :  { %v1859_v41 = vsel %vm1792_vm3, %v1858_v25, %v5255_v4  ;;  %v1885_v48 = vsel %vm1784_vm1, %v1884_v37, %v1883_v39  ;;  %v782_v18 = vpop.xlane.xlu1 %781 }
 0x217   :  { %v4552_v8 = vsel %vm1796_vm4, %v1860_v11, %v1859_v41  ;;  %v4555_v63 = vsel %vm1788_vm2, %v1886_v58, %v1885_v48  ;;  %v1627_v1 = vmul.f32 0.00390625, %v1563_v35  ;;  %v1628_v61 = vmul.f32 0.00390625, %v1564_v17 }
 0x219   :  { %v1663_v7 = vpack.c.bf16 %v1628_v61, %v1627_v1 }
 0x21b   :  { %v754_v34 = vpop.xlane.xlu2 %753  ;;  %v780_v46 = vpop.xlane.xlu0 %779  ;;  %v1767_v28 = vunpack.c.l.b16 %v1663_v7  ;;  %v1768_v22 = vunpack.c.h.b16 %v1663_v7 }
 0x21d   :  { %v1896_v39 = vperm.slane %v1767_v28, %v5189_v45  ;;  %v1897_v35 = vperm.slane %v1768_v22, %v5250_v36  ;;  %v2595_v22 = vld [vmem:[%s4936_s3 + $0x8] sm:$0xff] }
 0x21e   :  { %v1440_v54 = vpop.xlane.xlu1 %1439 }
 0x21f   :  { %v1537_v13 = vadd.f32 %v1440_v54, %v752_v30 }
 0x221   :  { %v1601_v44 = vmul.f32 0.00390625, %v1537_v13 }
 0x223   :  { %v808_v14 = vpop.xlane.xlu2 %807  ;;  %v810_v3 = vpop.xlane.xlu0 %809 }
 0x226   :  { %v1470_v24 = vpop.xlane.xlu1 %1469 }
 0x227   :  { %v1552_v0 = vadd.f32 %v1470_v24, %v782_v18  ;;  %v1898_v18 = vsel %vm1780_vm0, %v1897_v35, %v1896_v39  ;;  %v2452_v39 = vld [vmem:[%s4937_s5 + $0x60] sm:$0xf]  ;;  %v2611_v35 = vld [vmem:[%s4937_s5 + $0x64] sm:$0xf0] }
 0x229   :  { %v1616_v27 = vmul.f32 0.00390625, %v1552_v0 }
 0x22b   :  { %v1442_v16 = vpop.xlane.xlu2 %1441  ;;  %v1468_v55 = vpop.xlane.xlu0 %1467 }
 0x22c   :  { %v1538_v23 = vadd.f32 %v1442_v16, %v754_v34  ;;  %v1551_v9 = vadd.f32 %v1468_v55, %v780_v46 }
 0x22e   :  { %v1602_v26 = vmul.f32 0.00390625, %v1538_v23  ;;  %v1615_v20 = vmul.f32 0.00390625, %v1551_v9  ;;  %v768_v33 = vpop.xlane.xlu1 %767 }
 0x230   :  { %v1650_v21 = vpack.c.bf16 %v1602_v26, %v1601_v44  ;;  %v1657_v29 = vpack.c.bf16 %v1616_v27, %v1615_v20 }
 0x232   :  { %v1741_v62 = vunpack.c.l.b16 %v1650_v21  ;;  %v1742_v31 = vunpack.c.h.b16 %v1650_v21  ;;  %v1755_v51 = vunpack.c.l.b16 %v1657_v29  ;;  %v1756_v42 = vunpack.c.h.b16 %v1657_v29  ;;  %v2597_v29 = vld [vmem:[%s4936_s3 + $0x18] sm:$0xff] }
 0x233   :  { %v1496_v47 = vpop.xlane.xlu2 %1495  ;;  %v1498_v32 = vpop.xlane.xlu0 %1497  ;;  %1958 = vmatpush.bf16.msra.mxu0 %v2597_v29 }
 0x234   :  { %v1847_v30 = vperm.slane %v1741_v62, %v4418_v57  ;;  %v1849_v50 = vperm.slane %v1742_v31, %v4421_v59  ;;  %v1873_v49 = vperm.slane %v1755_v51, %v4015_v10  ;;  %v1875_v19 = vperm.slane %v1756_v42, %v4018_v5 }
 0x235   :  { %v1565_v12 = vadd.f32 %v1496_v47, %v808_v14  ;;  %v1566_v60 = vadd.f32 %v1498_v32, %v810_v3 }
 0x236   :  { %v1848_v53 = vsel %vm1800_vm5, %v1847_v30, %v4475_v6  ;;  %v1874_v56 = vsel %vm1792_vm3, %v1873_v49, %v4506_v40  ;;  %v798_v43 = vpop.xlane.xlu1 %797  ;;  %v2596_v30 = vld [vmem:[%s4936_s3 + $0x10] sm:$0xff] }
 0x237   :  { %v1850_v2 = vsel %vm1804_vm6, %v1849_v50, %v1848_v53  ;;  %v4567_v25 = vsel %vm1796_vm4, %v1875_v19, %v1874_v56  ;;  %v1629_v11 = vmul.f32 0.00390625, %v1565_v12  ;;  %v1630_v37 = vmul.f32 0.00390625, %v1566_v60  ;;  %1959 = vmatpush.bf16.msra.mxu0 %v2596_v30 }
 0x238   :  { %v1916_v50 = vsel %vm1915_vm9, %v1850_v2, %v4538_v15  ;;  %v2613_v15 = vld [vmem:[%s4937_s5 + $0x74] sm:$0xf0]  ;;  %v2612_v2 = vld [vmem:[%s4937_s5 + $0x74] sm:$0xf] }
 0x239   :  { %v1664_v58 = vpack.c.bf16 %v1630_v37, %v1629_v11 }
 0x23b   :  { %v1769_v17 = vunpack.c.l.b16 %v1664_v58  ;;  %v1770_v4 = vunpack.c.h.b16 %v1664_v58  ;;  %v770_v41 = vpop.xlane.xlu2 %769  ;;  %v796_v6 = vpop.xlane.xlu0 %795  ;;  %v2462_v58 = vld [vmem:[%s4937_s5 + $0x78] sm:$0xf0]  ;;  %1960 = vmatpush.bf16.msra.mxu0 %v2595_v22 }
 0x23d   :  { %v1899_v48 = vperm.slane %v1769_v17, %v5252_v52  ;;  %v1901_v40 = vperm.slane %v1770_v4, %v5253_v38  ;;  %v2465_v4 = vor.u32 %v2612_v2, %v2462_v58 }
 0x23e   :  { %v1484_v7 = vpop.xlane.xlu1 %1483 }
 0x23f   :  { %v1900_v1 = vsel %vm1784_vm1, %v1899_v48, %v1898_v18  ;;  %v1559_v62 = vadd.f32 %v1484_v7, %v796_v6  ;;  %v2454_v6 = vld [vmem:[%s4937_s5 + $0x68] sm:$0xf0]  ;;  %v2594_v7 = vld [vmem:[%s4936_s3] sm:$0xff]  ;;  %2085 = vmatpush.bf16.msra.mxu2 %v2465_v4 }
 0x240   :  { %v4576_v61 = vsel %vm1788_vm2, %v1901_v40, %v1900_v1  ;;  %1961 = vmatpush.bf16.msra.mxu0 %v2594_v7  ;;  %v2422_v4 = vld [vmem:[%s4937_s5 + $0x28] sm:$0xf0] }
 0x241   :  { %v1623_v19 = vmul.f32 0.00390625, %v1559_v62 }
 0x243   :  { %v1456_v34 = vpop.xlane.xlu2 %1455  ;;  %v1458_v45 = vpop.xlane.xlu0 %1457 }
 0x244   :  { %v1545_v46 = vadd.f32 %v1456_v34, %v768_v33  ;;  %v1546_v36 = vadd.f32 %v1458_v45, %v770_v41  ;;  %v2610_v41 = vld [vmem:[%s4937_s5 + $0x64] sm:$0xf]  ;;  %v2453_v45 = vor.u32 %v2611_v35, %v2452_v39  ;;  %v2603_v35 = vld [vmem:[%s4937_s5 + $0x24] sm:$0xf0] }
 0x246   :  { %v786_v54 = vpop.xlane.xlu1 %785  ;;  %v1609_v13 = vmul.f32 0.00390625, %v1545_v46  ;;  %v1610_v14 = vmul.f32 0.00390625, %v1546_v36  ;;  %v2457_v46 = vor.u32 %v2610_v41, %v2454_v6  ;;  %v2444_v36 = vld [vmem:[%s4937_s5 + $0x50] sm:$0xf] }
 0x248   :  { %v1654_v52 = vpack.c.bf16 %v1610_v14, %v1609_v13  ;;  %v2608_v14 = vld [vmem:[%s4937_s5 + $0x54] sm:$0xf]  ;;  %2086 = vmatpush.bf16.msra.mxu2 %v2457_v46 }
 0x24a   :  { %v1749_v0 = vunpack.c.l.b16 %v1654_v52  ;;  %v1750_v23 = vunpack.c.h.b16 %v1654_v52 }
 0x24b   :  { %v1486_v3 = vpop.xlane.xlu2 %1485  ;;  %v784_v24 = vpop.xlane.xlu0 %783 }
 0x24c   :  { %v1862_v9 = vperm.slane %v1749_v0, %v4418_v57  ;;  %v1864_v44 = vperm.slane %v1750_v23, %v4421_v59  ;;  %v1560_v51 = vadd.f32 %v1486_v3, %v798_v43  ;;  %v2460_v43 = vld [vmem:[%s4937_s5 + $0x70] sm:$0xf]  ;;  %v2446_v3 = vld [vmem:[%s4937_s5 + $0x58] sm:$0xf0] }
 0x24d   :  { %v2461_v17 = vor.u32 %v2613_v15, %v2460_v43 }
 0x24e   :  { %v1472_v55 = vpop.xlane.xlu1 %1471  ;;  %v1863_v26 = vsel %vm1800_vm5, %v1862_v9, %v4552_v8  ;;  %v1624_v12 = vmul.f32 0.00390625, %v1560_v51  ;;  %v2449_v9 = vor.u32 %v2608_v14, %v2446_v3 }
 0x24f   :  { %v1553_v27 = vadd.f32 %v1472_v55, %v784_v24  ;;  %v1865_v31 = vsel %vm1804_vm6, %v1864_v44, %v1863_v26  ;;  %2072 = vmatpush.bf16.msra.mxu1 %v2461_v17  ;;  %v2436_v44 = vld [vmem:[%s4937_s5 + $0x40] sm:$0xf]  ;;  %v2607_v26 = vld [vmem:[%s4937_s5 + $0x44] sm:$0xf0]  ;;  %v2602_v17 = vld [vmem:[%s4937_s5 + $0x24] sm:$0xf] }
 0x250   :  { %v1918_v49 = vsel %vm1917_vm10, %v1865_v31, %v1916_v50  ;;  %v1661_v48 = vpack.c.bf16 %v1624_v12, %v1623_v19  ;;  %2087 = vmatpush.bf16.msra.mxu2 %v2449_v9  ;;  %v2604_v50 = vld [vmem:[%s4937_s5 + $0x34] sm:$0xf]  ;;  %v2599_v9 = vld [vmem:[%s4937_s5 + $0x4] sm:$0xf0] }
 0x251   :  { %v1617_v42 = vmul.f32 0.00390625, %v1553_v27 }
 0x252   :  { %v1763_v24 = vunpack.c.l.b16 %v1661_v48 }
 0x253   :  { %v812_v38 = vpop.xlane.xlu2 %811  ;;  %v814_v16 = vpop.xlane.xlu0 %813  ;;  %2073 = vmatpush.bf16.msra.mxu1 %v2453_v45  ;;  %v2425_v45 = vor.u32 %v2602_v17, %v2422_v4  ;;  %v2500_v4 = vld [vmem:[%s4938_s7 + $0x40] sm:$0xf] }
 0x254   :  { %v1888_v29 = vperm.slane %v1763_v24, %v4015_v10 }
 0x256   :  { %v1502_v47 = vpop.xlane.xlu1 %1501  ;;  %v1889_v12 = vsel %vm1792_vm3, %v1888_v29, %v4555_v63  ;;  %v2628_v29 = vld [vmem:[%s4938_s7 + $0x74] sm:$0xf] }
 0x257   :  { %v1568_v40 = vadd.f32 %v1502_v47, %v814_v16 }
 0x25b   :  { %v1474_v20 = vpop.xlane.xlu2 %1473  ;;  %v1500_v33 = vpop.xlane.xlu0 %1499 }
 0x25c   :  { %v1554_v21 = vadd.f32 %v1474_v20, %v786_v54  ;;  %v1567_v1 = vadd.f32 %v1500_v33, %v812_v38  ;;  %v1632_v38 = vmul.f32 0.00390625, %v1568_v40  ;;  %v2606_v20 = vld [vmem:[%s4937_s5 + $0x44] sm:$0xf]  ;;  %v2438_v33 = vld [vmem:[%s4937_s5 + $0x48] sm:$0xf0] }
 0x25d   :  { %v2441_v47 = vor.u32 %v2606_v20, %v2438_v33  ;;  %v2524_v33 = vld [vmem:[%s4938_s7 + $0x70] sm:$0xf] }
 0x25e   :  { %v1618_v32 = vmul.f32 0.00390625, %v1554_v21  ;;  %v1488_v54 = vpop.xlane.xlu1 %1487  ;;  %v1631_v52 = vmul.f32 0.00390625, %v1567_v1  ;;  %v1764_v21 = vunpack.c.h.b16 %v1661_v48 }
 0x25f   :  { %2088 = vmatpush.bf16.msra.mxu2 %v2441_v47  ;;  %v2627_v47 = vld [vmem:[%s4938_s7 + $0x64] sm:$0xf0] }
 0x260   :  { %v1658_v8 = vpack.c.bf16 %v1618_v32, %v1617_v42  ;;  %v1665_v62 = vpack.c.bf16 %v1632_v38, %v1631_v52  ;;  %v2437_v42 = vor.u32 %v2607_v26, %v2436_v44  ;;  %v2428_v32 = vld [vmem:[%s4937_s5 + $0x30] sm:$0xf]  ;;  %v1890_v19 = vperm.slane %v1764_v21, %v4018_v5  ;;  %v2406_v26 = vld [vmem:[%s4937_s5 + $0x8] sm:$0xf0]  ;;  %v2629_v21 = vld [vmem:[%s4938_s7 + $0x74] sm:$0xf0] }
 0x262   :  { %v1757_v60 = vunpack.c.l.b16 %v1658_v8  ;;  %v1758_v28 = vunpack.c.h.b16 %v1658_v8  ;;  %v2605_v8 = vld [vmem:[%s4937_s5 + $0x34] sm:$0xf0]  ;;  %v1891_v41 = vsel %vm1796_vm4, %v1890_v19, %v1889_v12  ;;  %v1772_v6 = vunpack.c.h.b16 %v1665_v62  ;;  %v2644_v12 = vld [vmem:[%s4938_s7 + $0xf4] sm:$0xf] }
 0x263   :  { %v800_v53 = vpop.xlane.xlu2 %799  ;;  %v802_v56 = vpop.xlane.xlu0 %801  ;;  %v2429_v15 = vor.u32 %v2605_v8, %v2428_v32  ;;  %v2518_v8 = vld [vmem:[%s4938_s7 + $0x68] sm:$0xf0]  ;;  %v2645_v19 = vld [vmem:[%s4938_s7 + $0xf4] sm:$0xf0] }
 0x264   :  { %v1877_v11 = vperm.slane %v1757_v60, %v4418_v57  ;;  %v1879_v37 = vperm.slane %v1758_v28, %v4421_v59  ;;  %v1561_v0 = vadd.f32 %v1488_v54, %v800_v53  ;;  %v1771_v60 = vunpack.c.l.b16 %v1665_v62 }
 0x265   :  { %v1905_v54 = vperm.slane %v1772_v6, %v4018_v5  ;;  %v2572_v6 = vld [vmem:[%s4938_s7 + $0xd0] sm:$0xf] }
 0x266   :  { %v1878_v18 = vsel %vm1800_vm5, %v1877_v11, %v4567_v25  ;;  %v2609_v25 = vld [vmem:[%s4937_s5 + $0x54] sm:$0xf0]  ;;  %v1625_v31 = vmul.f32 0.00390625, %v1561_v0  ;;  %v818_v28 = vpop.xlane.xlu1 %817  ;;  %v2420_v11 = vld [vmem:[%s4937_s5 + $0x20] sm:$0xf]  ;;  %v1903_v48 = vperm.slane %v1771_v60, %v4015_v10 }
 0x267   :  { %v1880_v34 = vsel %vm1804_vm6, %v1879_v37, %v1878_v18  ;;  %v2445_v23 = vor.u32 %v2609_v25, %v2444_v36  ;;  %v2590_v60 = vld [vmem:[%s4938_s7 + $0xf8] sm:$0xf0] }
 0x268   :  { %v4629_v13 = vsel %vm1919_vm11, %v1880_v34, %v1918_v49  ;;  %v2430_v49 = vld [vmem:[%s4937_s5 + $0x38] sm:$0xf0]  ;;  %v2421_v34 = vor.u32 %v2603_v35, %v2420_v11  ;;  %v1904_v25 = vsel %vm1792_vm3, %v1903_v48, %v4576_v61  ;;  %v2412_v61 = vld [vmem:[%s4937_s5 + $0x10] sm:$0xf]  ;;  %v2643_v11 = vld [vmem:[%s4938_s7 + $0xe4] sm:$0xf0] }
 0x269   :  { %2074 = vmatpush.bf16.msra.mxu1 %v2445_v23  ;;  %v2433_v2 = vor.u32 %v2604_v50, %v2430_v49  ;;  %v1906_v52 = vsel %vm1796_vm4, %v1905_v54, %v1904_v25  ;;  %v2404_v23 = vld [vmem:[%s4937_s5] sm:$0xf]  ;;  %v2588_v50 = vld [vmem:[%s4938_s7 + $0xf0] sm:$0xf]  ;;  %v2641_v48 = vld [vmem:[%s4938_s7 + $0xd4] sm:$0xf0] }
 0x26a   :  { %v2405_v20 = vor.u32 %v2599_v9, %v2404_v23  ;;  %v2639_v25 = vld [vmem:[%s4938_s7 + $0xc4] sm:$0xf0]  ;;  %v2484_v23 = vld [vmem:[%s4938_s7 + $0x20] sm:$0xf] }
 0x26b   :  { %v1490_v16 = vpop.xlane.xlu2 %1489  ;;  %v816_v55 = vpop.xlane.xlu0 %815  ;;  %2089 = vmatpush.bf16.msra.mxu2 %v2433_v2  ;;  %v2580_v2 = vld [vmem:[%s4938_s7 + $0xe0] sm:$0xf]  ;;  %v2619_v9 = vld [vmem:[%s4938_s7 + $0x24] sm:$0xf0] }
 0x26c   :  { %v1562_v27 = vadd.f32 %v1490_v16, %v802_v56 }
 0x26d   :  { %2075 = vmatpush.bf16.msra.mxu1 %v2437_v42  ;;  %v2516_v42 = vld [vmem:[%s4938_s7 + $0x60] sm:$0xf] }
 0x26e   :  { %v1626_v51 = vmul.f32 0.00390625, %v1562_v27  ;;  %v2598_v27 = vld [vmem:[%s4937_s5 + $0x4] sm:$0xf]  ;;  %v2517_v49 = vor.u32 %v2627_v47, %v2516_v42 }
 0x26f   :  { %2090 = vmatpush.bf16.msra.mxu2 %v2425_v45  ;;  %v2409_v62 = vor.u32 %v2598_v27, %v2406_v26  ;;  %v2573_v45 = vor.u32 %v2641_v48, %v2572_v6  ;;  %v2618_v27 = vld [vmem:[%s4938_s7 + $0x24] sm:$0xf]  ;;  %v2486_v26 = vld [vmem:[%s4938_s7 + $0x28] sm:$0xf0]  ;;  %v2532_v6 = vld [vmem:[%s4938_s7 + $0x80] sm:$0xf] }
 0x270   :  { %v1662_v30 = vpack.c.bf16 %v1626_v51, %v1625_v31  ;;  %v2525_v31 = vor.u32 %v2629_v21, %v2524_v33  ;;  %v2526_v51 = vld [vmem:[%s4938_s7 + $0x78] sm:$0xf0]  ;;  %v2485_v21 = vor.u32 %v2619_v9, %v2484_v23  ;;  %v2631_v48 = vld [vmem:[%s4938_s7 + $0x84] sm:$0xf0] }
 0x271   :  { %2076 = vmatpush.bf16.msra.mxu1 %v2429_v15  ;;  %v2529_v32 = vor.u32 %v2628_v29, %v2526_v51  ;;  %v2624_v15 = vld [vmem:[%s4938_s7 + $0x54] sm:$0xf]  ;;  %v2719_v29 = vld [vmem:[%s4935_s4] ss:$0 sm:$0xff] }
 0x272   :  { %v1765_v22 = vunpack.c.l.b16 %v1662_v30  ;;  %v1766_v53 = vunpack.c.h.b16 %v1662_v30  ;;  %v2626_v30 = vld [vmem:[%s4938_s7 + $0x64] sm:$0xf]  ;;  %2300 = vmatpush.bf16.msra.mxu3 %v2525_v31 }
 0x273   :  { %v1504_v56 = vpop.xlane.xlu2 %1503  ;;  %v1506_v43 = vpop.xlane.xlu0 %1505 }
 0x274   :  { %v1892_v37 = vperm.slane %v1765_v22, %v4418_v57  ;;  %v1894_v58 = vperm.slane %v1766_v53, %v4421_v59  ;;  %v1569_v39 = vadd.f32 %v1504_v56, %v816_v55  ;;  %v1570_v63 = vadd.f32 %v1506_v43, %v818_v28  ;;  %v2414_v55 = vld [vmem:[%s4937_s5 + $0x18] sm:$0xf0]  ;;  %v2508_v53 = vld [vmem:[%s4938_s7 + $0x50] sm:$0xf]  ;;  %v2625_v56 = vld [vmem:[%s4938_s7 + $0x54] sm:$0xf0] }
 0x275   :  { %2077 = vmatpush.bf16.msra.mxu1 %v2421_v34  ;;  %v2589_v28 = vor.u32 %v2645_v19, %v2588_v50  ;;  %v2593_v22 = vor.u32 %v2644_v12, %v2590_v60  ;;  %v2521_v43 = vor.u32 %v2626_v30, %v2518_v8  ;;  %v2509_v35 = vor.u32 %v2625_v56, %v2508_v53  ;;  %v2502_v34 = vld [vmem:[%s4938_s7 + $0x48] sm:$0xf0]  ;;  %v2476_v30 = vld [vmem:[%s4938_s7 + $0x10] sm:$0xf]  ;;  %v2617_v8 = vld [vmem:[%s4938_s7 + $0x14] sm:$0xf0] }
 0x276   :  { %v1633_v40 = vmul.f32 0.00390625, %v1569_v39  ;;  %v1634_v18 = vmul.f32 0.00390625, %v1570_v63  ;;  %v1893_v1 = vsel %vm1800_vm5, %v1892_v37, %v1891_v41  ;;  %v2510_v37 = vld [vmem:[%s4938_s7 + $0x58] sm:$0xf0]  ;;  %v2642_v39 = vld [vmem:[%s4938_s7 + $0xe4] sm:$0xf]  ;;  %2301 = vmatpush.bf16.msra.mxu3 %v2517_v49  ;;  %v2477_v49 = vor.u32 %v2617_v8, %v2476_v30 }
 0x277   :  { %v1895_v7 = vsel %vm1804_vm6, %v1894_v58, %v1893_v1  ;;  %2313 = vmatpush.bf16.msrb.mxu0 %v2589_v28  ;;  %v2581_v58 = vor.u32 %v2643_v11, %v2580_v2  ;;  %v2582_v63 = vld [vmem:[%s4938_s7 + $0xe8] sm:$0xf0]  ;;  %v2623_v41 = vld [vmem:[%s4938_s7 + $0x44] sm:$0xf0]  ;;  %v2574_v1 = vld [vmem:[%s4938_s7 + $0xd8] sm:$0xf0] }
 0x278   :  { %v1666_v46 = vpack.c.bf16 %v1634_v18, %v1633_v40  ;;  %v1922_v36 = vsel %vm1921_vm12, %v1895_v7, %v4629_v13  ;;  %v2585_v17 = vor.u32 %v2642_v39, %v2582_v63  ;;  %v2640_v40 = vld [vmem:[%s4938_s7 + $0xd4] sm:$0xf]  ;;  %v2513_v18 = vor.u32 %v2624_v15, %v2510_v37  ;;  %v2622_v7 = vld [vmem:[%s4938_s7 + $0x44] sm:$0xf]  ;;  %v2478_v19 = vld [vmem:[%s4938_s7 + $0x18] sm:$0xf0] }
 0x279   :  { %v2501_v54 = vor.u32 %v2623_v41, %v2500_v4  ;;  %v2616_v50 = vld [vmem:[%s4938_s7 + $0x14] sm:$0xf]  ;;  %v2548_v12 = vld [vmem:[%s4938_s7 + $0xa0] sm:$0xf]  ;;  %v2635_v60 = vld [vmem:[%s4938_s7 + $0xa4] sm:$0xf0] }
 0x27a   :  { %v1773_v14 = vunpack.c.l.b16 %v1666_v46  ;;  %v1774_v10 = vunpack.c.h.b16 %v1666_v46  ;;  %v2577_v46 = vor.u32 %v2640_v40, %v2574_v1  ;;  %2302 = vmatpush.bf16.msra.mxu3 %v2509_v35  ;;  %v2481_v28 = vor.u32 %v2616_v50, %v2478_v19  ;;  %v2634_v53 = vld [vmem:[%s4938_s7 + $0xa4] sm:$0xf]  ;;  %v2550_v56 = vld [vmem:[%s4938_s7 + $0xa8] sm:$0xf0]  ;;  %v2615_v2 = vld [vmem:[%s4938_s7 + $0x4] sm:$0xf0] }
 0x27b   :  { %2314 = vmatpush.bf16.msrb.mxu0 %v2581_v58  ;;  %v2553_v15 = vor.u32 %v2634_v53, %v2550_v56  ;;  %v2614_v11 = vld [vmem:[%s4938_s7 + $0x4] sm:$0xf]  ;;  %v2470_v37 = vld [vmem:[%s4938_s7 + $0x8] sm:$0xf0]  ;;  %v2540_v63 = vld [vmem:[%s4938_s7 + $0x90] sm:$0xf] }
 0x27c   :  { %v1907_v3 = vperm.slane %v1773_v14, %v4418_v57  ;;  %v1909_v24 = vperm.slane %v1774_v10, %v4421_v59  ;;  %v2601_v57 = vld [vmem:[%s4937_s5 + $0x14] sm:$0xf0]  ;;  %v2600_v59 = vld [vmem:[%s4937_s5 + $0x14] sm:$0xf]  ;;  %v2638_v14 = vld [vmem:[%s4938_s7 + $0xc4] sm:$0xf]  ;;  %v2473_v39 = vor.u32 %v2614_v11, %v2470_v37 }
 0x27d   :  { %v2413_v16 = vor.u32 %v2601_v57, %v2412_v61  ;;  %v2417_v44 = vor.u32 %v2600_v59, %v2414_v55  ;;  %v2566_v10 = vld [vmem:[%s4938_s7 + $0xc8] sm:$0xf0]  ;;  %v2556_v61 = vld [vmem:[%s4938_s7 + $0xb0] sm:$0xf]  ;;  %v2637_v59 = vld [vmem:[%s4938_s7 + $0xb4] sm:$0xf0] }
 0x27e   :  { %v1908_v0 = vsel %vm1800_vm5, %v1907_v3, %v1906_v52  ;;  %v2492_v3 = vld [vmem:[%s4938_s7 + $0x30] sm:$0xf]  ;;  %v2505_v52 = vor.u32 %v2622_v7, %v2502_v34  ;;  %2303 = vmatpush.bf16.msra.mxu3 %v2501_v54  ;;  %v2558_v55 = vld [vmem:[%s4938_s7 + $0xb8] sm:$0xf0]  ;;  %v2633_v35 = vld [vmem:[%s4938_s7 + $0x94] sm:$0xf0]  ;;  %v2533_v7 = vor.u32 %v2631_v48, %v2532_v6 }
 0x27f   :  { %v1910_v13 = vsel %vm1804_vm6, %v1909_v24, %v1908_v0  ;;  %2078 = vmatpush.bf16.msra.mxu1 %v2413_v16  ;;  %2091 = vmatpush.bf16.msra.mxu2 %v2417_v44  ;;  %v2621_v24 = vld [vmem:[%s4938_s7 + $0x34] sm:$0xf0]  ;;  %v2620_v0 = vld [vmem:[%s4938_s7 + $0x34] sm:$0xf]  ;;  %v2541_v4 = vor.u32 %v2633_v35, %v2540_v63  ;;  %v2542_v41 = vld [vmem:[%s4938_s7 + $0x98] sm:$0xf0] }
 0x280   :  { %v1924_v38 = vsel %vm1923_vm13, %v1910_v13, %v1922_v36  ;;  %v2564_v36 = vld [vmem:[%s4938_s7 + $0xc0] sm:$0xf]  ;;  %2315 = vmatpush.bf16.msrb.mxu0 %v2573_v45  ;;  %v2494_v13 = vld [vmem:[%s4938_s7 + $0x38] sm:$0xf0]  ;;  %v2493_v57 = vor.u32 %v2621_v24, %v2492_v3  ;;  %v2636_v16 = vld [vmem:[%s4938_s7 + $0xb4] sm:$0xf] }
 0x281   :  { %v1925_v5 = vpack.c.b16 %v1924_v38, %v1924_v38  ;;  %v2565_v38 = vor.u32 %v2639_v25, %v2564_v36  ;;  %v2497_v44 = vor.u32 %v2620_v0, %v2494_v13  ;;  %v2561_v33 = vor.u32 %v2636_v16, %v2558_v55  ;;  %v2534_v1 = vld [vmem:[%s4938_s7 + $0x88] sm:$0xf0]  ;;  %v1986_v45 = vld [vmem:[%s4940_s6] sm:$0x3] }
 0x282   :  { %2304 = vmatpush.bf16.msra.mxu3 %v2493_v57 }
 0x283   :  { %2401 = vmatmul.msk.bf16.vlgmr.msra.gmra.mxu0 %vm1950_vm14, %v1925_v5  ;;  %2079 = vmatpush.bf16.msra.mxu1 %v2405_v20  ;;  %v2569_v5 = vor.u32 %v2638_v14, %v2566_v10  ;;  %v2557_v20 = vor.u32 %v2637_v59, %v2556_v61  ;;  %v1989_v14 = vperm.slane %v1986_v45, 1  ;;  %v2134_v61 = vld [vmem:[%s4941_s8] sm:$0x3] }
 0x284   :  { %2092 = vmatpush.bf16.msra.mxu2 %v2409_v62  ;;  %2316 = vmatpush.bf16.msrb.mxu0 %v2565_v38  ;;  %v2489_v62 = vor.u32 %v2618_v27, %v2486_v26  ;;  %v2136_v57 = vperm.slane %v2134_v61, 0  ;;  %v2137_v55 = vperm.slane %v2134_v61, 1 }
 0x286   :  { %2305 = vmatpush.bf16.msra.mxu3 %v2485_v21 }
 0x287   :  { %2326 = vmatpush.bf16.msrb.mxu1 %v2529_v32 }
 0x288   :  { %2339 = vmatpush.bf16.msrb.mxu2 %v2593_v22  ;;  %2317 = vmatpush.bf16.msrb.mxu0 %v2557_v20  ;;  %v2549_v22 = vor.u32 %v2635_v60, %v2548_v12 }
 0x28a   :  { %2306 = vmatpush.bf16.msra.mxu3 %v2477_v49 }
 0x28b   :  { %2327 = vmatpush.bf16.msrb.mxu1 %v2521_v43  ;;  %v2468_v43 = vld [vmem:[%s4938_s7] sm:$0xf] }
 0x28c   :  { %2340 = vmatpush.bf16.msrb.mxu2 %v2585_v17  ;;  %2318 = vmatpush.bf16.msrb.mxu0 %v2549_v22  ;;  %v2469_v58 = vor.u32 %v2615_v2, %v2468_v43  ;;  %v2632_v17 = vld [vmem:[%s4938_s7 + $0x94] sm:$0xf] }
 0x28d   :  { %v2545_v40 = vor.u32 %v2632_v17, %v2542_v41 }
 0x28e   :  { %2307 = vmatpush.bf16.msra.mxu3 %v2469_v58 }
 0x28f   :  { %2328 = vmatpush.bf16.msrb.mxu1 %v2513_v18  ;;  %v2630_v18 = vld [vmem:[%s4938_s7 + $0x84] sm:$0xf] }
 0x290   :  { %2341 = vmatpush.bf16.msrb.mxu2 %v2577_v46  ;;  %2319 = vmatpush.bf16.msrb.mxu0 %v2541_v4  ;;  %v2537_v34 = vor.u32 %v2630_v18, %v2534_v1  ;;  %v1988_v46 = vperm.slane %v1986_v45, 0 }
 0x293   :  { %2329 = vmatpush.bf16.msrb.mxu1 %v2505_v52 }
 0x294   :  { %2342 = vmatpush.bf16.msrb.mxu2 %v2569_v5  ;;  %2320 = vmatpush.bf16.msrb.mxu0 %v2533_v7 }
 0x297   :  { %2330 = vmatpush.bf16.msrb.mxu1 %v2497_v44 }
 0x298   :  { %2343 = vmatpush.bf16.msrb.mxu2 %v2561_v33 }
 0x29b   :  { %2331 = vmatpush.bf16.msrb.mxu1 %v2489_v62 }
 0x29c   :  { %2344 = vmatpush.bf16.msrb.mxu2 %v2553_v15 }
 0x29f   :  { %2332 = vmatpush.bf16.msrb.mxu1 %v2481_v28 }
 0x2a0   :  { %2345 = vmatpush.bf16.msrb.mxu2 %v2545_v40 }
 0x2a3   :  { %2333 = vmatpush.bf16.msrb.mxu1 %v2473_v39 }
 0x2a4   :  { %2346 = vmatpush.bf16.msrb.mxu2 %v2537_v34 }
 0x300   :  { %v1963_v31 = vpop.f32.mrf.mxu0 }
 0x301   :  { %v1964_v51 = vadd.f32 %v2719_v29, %v1963_v31 }
 0x303   :  { %v1967_v42 = vmax.f32 %v1964_v51, 0.0 }
 0x305   :  { %1968 = vst [vmem:[%s4939_s9] sm:$0xff] %v1967_v42  ;;  %v1969_v47 = vpack.c.bf16 %v1967_v42, %v1967_v42 }
 0x307   :  { %2080 = vmatmul.bf16.vlgmr.msra.gmra.mxu1 %v1969_v47  ;;  %2093 = vmatmul.bf16.vlgmr.msra.gmra.mxu2 %v1969_v47 }
 0x308   :  { %v1965_v32 = vpop.f32.mrf.mxu0 }
 0x384   :  { %v2081_v36 = vpop.f32.mrf.mxu1 }
 0x385   :  { %v2082_v54 = vadd.f32 %v2081_v36, %v1988_v46 }
 0x387   :  { %v2098_v25 = vmax.f32 %v2082_v54, 0.0 }
 0x389   :  { %v2100_v10 = vpack.c.bf16 %v2098_v25, %v2098_v25 }
 0x38a   :  { %v2094_v3 = vpop.f32.mrf.mxu2 }
 0x38b   :  { %v2095_v24 = vadd.f32 %v2094_v3, %v1989_v14  ;;  %2308 = vmatmul.bf16.vlgmr.msra.gmra.mxu3 %v2100_v10  ;;  %2334 = vmatmul.bf16.vlgmr.msrb.gmra.mxu1 %v2100_v10 }
 0x38c   :  { %v2083_v52 = vpop.f32.mrf.mxu1 }
 0x38d   :  { %v2099_v0 = vmax.f32 %v2095_v24, 0.0 }
 0x38f   :  { %v2101_v13 = vpack.c.bf16 %v2099_v0, %v2099_v0 }
 0x391   :  { %2321 = vmatmul.bf16.vlgmr.msrb.gmra.mxu0 %v2101_v13  ;;  %2347 = vmatmul.bf16.vlgmr.msrb.gmra.mxu2 %v2101_v13 }
 0x392   :  { %v2096_v38 = vpop.f32.mrf.mxu2 }
 0x408   :  { %v2335_v5 = vpop.f32.mrf.mxu1 }
 0x409   :  { %v2336_v27 = vadd.f32 %v2335_v5, %v2137_v55 }
 0x40e   :  { %v2309_v59 = vpop.f32.mrf.mxu3  ;;  %v2322_v16 = vpop.f32.mrf.mxu0 }
 0x40f   :  { %v2310_v23 = vadd.f32 %v2309_v59, %v2136_v57 }
 0x410   :  { %v2337_v9 = vpop.f32.mrf.mxu1 }
 0x411   :  { %v2323_v44 = vadd.f32 %v2322_v16, %v2310_v23 }
 0x413   :  { %2352 = vmax.xlane.f32.xlu1 %v2323_v44  ;;  %2374 = vst [vmem:[%s4942_s10] sm:$0xff] %v2323_v44 }
 0x414   :  { %v2348_v26 = vpop.f32.mrf.mxu2 }
 0x415   :  { %v2349_v20 = vadd.f32 %v2348_v26, %v2336_v27 }
 0x416   :  { %v2311_v33 = vpop.f32.mrf.mxu3  ;;  %v2324_v21 = vpop.f32.mrf.mxu0 }
 0x417   :  { %2376 = vst [vmem:[%s4942_s10 + $0x10] sm:$0xff] %v2349_v20 }
 0x41c   :  { %v2350_v29 = vpop.f32.mrf.mxu2 }
 0x486   :  { %v2353_v62 = vpop.xlane.xlu1 %2352 }
 0x487   :  { %v2354_v31 = vsub.f32 %v2323_v44, %v2353_v62 }
 0x489   :  { %v2355_v51 = vmul.f32 1.442695, %v2354_v31 }
 0x48b   :  { %2720 = vpow2.f32 %v2355_v51 }
 0x491   :  { %v2721_v42 = vpop.eup %2720 }
 0x492   :  { %2357 = vadd.xlane.f32.xlu2 %v2721_v42 }
 0x505   :  { %v2358_v47 = vpop.xlane.xlu2 %2357 }
 0x506   :  { %2722 = vrcp.f32 %v2358_v47  ;;  %v2370_v50 = vand.u32 2147483648, %v2358_v47  ;;  %v2368_v19 = vand.u32 2147483647, %v2358_v47  ;;  %vm2364_vm0 = vweird.f32 %v2358_v47 }
 0x508   :  { %v2371_v60 = vor.u32 1.1754944e-38, %v2370_v50  ;;  %vm2369_vm2 = vcmp.eq.f32.partialorder %v2368_v19, 8.507059e+37 }
 0x50c   :  { %v2723_v32 = vpop.eup %2722 }
 0x50d   :  { %v2360_v30 = vmul.f32 %v2723_v32, %v2358_v47  ;;  %vm2365_vm15 = vweird.f32 %v2723_v32 }
 0x50e   :  { %vm2366_vm1 = vmor %vm2364_vm0, %vm2365_vm15 }
 0x50f   :  { %v2361_v8 = vsub.f32 1.0, %v2360_v30 }
 0x511   :  { %v2362_v49 = vmul.f32 %v2723_v32, %v2361_v8 }
 0x513   :  { %v2363_v12 = vadd.f32 %v2723_v32, %v2362_v49 }
 0x515   :  { %v2367_v28 = vsel %vm2366_vm1, %v2723_v32, %v2363_v12 }
 0x516   :  { %v2372_v22 = vsel %vm2369_vm2, %v2371_v60, %v2367_v28 }
 0x517   :  { %v2373_v53 = vmul.f32 %v2721_v42, %v2372_v22 }
 0x519   :  { %2375 = vst [vmem:[%s4942_s10 + $0x8] sm:$0xff] %v2373_v53 }

// kernel: rdanet_forward.1
= control target key start
LH: loop header
LB: loop body
LE: loop exit
PB: predicated region body
PF: predicated region fallthrough
CT: control target
= control target key end

     0   :  { %v2770_v0 = vmov 0   ;;  %v2771_v9 = vmov 1   ;;  %v2772_v14 = vmov 2   ;;  %vm1780_vm0 = vcmask 130112   ;;  %s4932_s2 = inlined_call_operand.vmem [shape: f32[64,1], index: 2, kind: input, shape index: {}]   ;;  %s4933_s1 = inlined_call_operand.vmem [shape: f32[64,3], index: 1, kind: input, shape index: {}]   ;;  %s4934_s0 = inlined_call_operand.vmem [shape: f32[8,3,256], index: 0, kind: input, shape index: {}]   ;;  %s4935_s4 = inlined_call_operand.vmem [shape: f32[1,128], index: 4, kind: input, shape index: {}]   ;;  %s4936_s3 = inlined_call_operand.vmem [shape: bf16[64,128], index: 3, kind: input, shape index: {}]   ;;  %s4937_s5 = inlined_call_operand.vmem [shape: bf16[128,256], index: 5, kind: input, shape index: {}]   ;;  %s4938_s7 = inlined_call_operand.vmem [shape: bf16[256,256], index: 7, kind: input, shape index: {}]   ;;  %s4939_s9 = inlined_call_operand.vmem [shape: f32[8,128], index: 9, kind: output, shape index: {0}]   ;;  %s4940_s6 = inlined_call_operand.vmem [shape: f32[1,256], index: 6, kind: input, shape index: {}]   ;;  %s4941_s8 = inlined_call_operand.vmem [shape: f32[1,256], index: 8, kind: input, shape index: {}]   ;;  %s4942_s10 = inlined_call_operand.vmem [shape: f32[8,384], index: 10, kind: output, shape index: {1}]  }
   0x1   :  { %2651 = vset.pattern.permute.xlu2 %v2770_v0  ;;  %2650 = vset.pattern.permute.xlu1 %v2770_v0  ;;  %v43_v1 = vld [vmem:[%s4932_s2] sm:$0xff]  ;;  %v37_v2 = vld [vmem:[%s4933_s1 + $0x10] sm:$0xff]  ;;  %v44_v4 = vld [vmem:[%s4932_s2 + $0x8] sm:$0xff]  ;;  %vm1784_vm1 = vcmask 195712   ;;  %vm1788_vm2 = vcmask 261312   ;;  %vm1792_vm3 = vcmask 326912  }
   0x2   :  { %v35_v3 = vld [vmem:[%s4933_s1] sm:$0xff]  ;;  %2649 = vset.pattern.permute.xlu0 %v2770_v0  ;;  %173 = vperm.xlu2 %2651, %v43_v1   ;;  %v38_v5 = vld [vmem:[%s4933_s1 + $0x18] sm:$0xff]  ;;  %v36_v6 = vld [vmem:[%s4933_s1 + $0x8] sm:$0xff]  ;;  %vm1796_vm4 = vcmask 392512   ;;  %vm1800_vm5 = vcmask 458112   ;;  %vm1804_vm6 = vcmask 523712  }
   0x3   :  { %79 = vperm.xlu1 %2650, %v37_v2   ;;  %69 = vperm.xlu0 %2649, %v35_v3   ;;  %v39_v7 = vld [vmem:[%s4933_s1 + $0x20] sm:$0xff]  ;;  %v46_v8 = vld [vmem:[%s4932_s2 + $0x18] sm:$0xff]  ;;  %v45_v10 = vld [vmem:[%s4932_s2 + $0x10] sm:$0xff]  ;;  %vm1911_vm7 = vcmask 1041409   ;;  %vm1913_vm8 = vcmask 1042434   ;;  %vm1915_vm9 = vcmask 1043459  }
   0x4   :  { %v41_v11 = vld [vmem:[%s4933_s1 + $0x30] sm:$0xff]  ;;  %v40_v12 = vld [vmem:[%s4933_s1 + $0x28] sm:$0xff]  ;;  %v47_v15 = vld [vmem:[%s4932_s2 + $0x20] sm:$0xff]  ;;  %vm1917_vm10 = vcmask 1044484   ;;  %vm1919_vm11 = vcmask 1045509   ;;  %vm1921_vm12 = vcmask 1046534  }
   0x5   :  { %v48_v13 = vld [vmem:[%s4932_s2 + $0x28] sm:$0xff]  ;;  %v42_v16 = vld [vmem:[%s4933_s1 + $0x38] sm:$0xff]  ;;  %v49_v17 = vld [vmem:[%s4932_s2 + $0x30] sm:$0xff]  ;;  %vm1923_vm13 = vcmask 1047559   ;;  %vm1950_vm14 = vcmask 523264  }
   0x6   :  { %v50_v18 = vld [vmem:[%s4932_s2 + $0x38] sm:$0xff]  ;;  %v2905_v28 = vld [vmem:[%s4934_s0] ss:$0 sm:$0xff]  ;;  %v2912_v30 = vld [vmem:[%s4934_s0 + $0x1] ss:$0 sm:$0xff] }
   0x7   :  { %5083 = vst [vmem:[#allocation8_spill] sm:$0xff] %v2912_v30  ;;  %v2917_v31 = vld [vmem:[%s4934_s0 + $0x2] ss:$0 sm:$0xff]  ;;  %v2924_v33 = vld [vmem:[%s4934_s0 + $0x4] ss:$0 sm:$0xff] }
   0x8   :  { %5084 = vst [vmem:[#allocation9_spill] sm:$0xff] %v2917_v31  ;;  %v2929_v34 = vld [vmem:[%s4934_s0 + $0x5] ss:$0 sm:$0xff]  ;;  %v2947_v43 = vld [vmem:[%s4934_s0 + $0x6] ss:$0 sm:$0xff] }
   0x9   :  { %v2972_v61 = vld [vmem:[%s4934_s0 + $0x8] ss:$0 sm:$0xff] }
   0xa   :  { %178 = vperm.xlu2 %2651, %v44_v4   ;;  %5092 = vst [vmem:[#allocation17_spill] sm:$0xff] %v2972_v61 }
   0xb   :  { %84 = vperm.xlu1 %2650, %v38_v5   ;;  %74 = vperm.xlu0 %2649, %v36_v6  }
  0x12   :  { %89 = vperm.xlu2 %2651, %v39_v7  }
  0x13   :  { %2652 = vset.pattern.permute.xlu1 %v2771_v9  ;;  %188 = vperm.xlu0 %2649, %v46_v8  }
  0x14   :  { %296 = vperm.xlu1 %2652, %v36_v6  }
  0x1a   :  { %183 = vperm.xlu2 %2651, %v45_v10  }
  0x1b   :  { %99 = vperm.xlu0 %2649, %v41_v11  }
  0x1c   :  { %2653 = vset.pattern.permute.xlu1 %v2770_v0 }
  0x1d   :  { %94 = vperm.xlu1 %2653, %v40_v12  }
  0x22   :  { %2655 = vset.pattern.permute.xlu2 %v2771_v9 }
  0x23   :  { %198 = vperm.xlu0 %2649, %v48_v13   ;;  %304 = vperm.xlu2 %2655, %v38_v5  }
  0x25   :  { %2654 = vset.pattern.permute.xlu1 %v2771_v9 }
  0x26   :  { %300 = vperm.xlu1 %2654, %v37_v2  }
  0x2b   :  { %2662 = vset.pattern.permute.xlu0 %v2772_v14  ;;  %2657 = vset.pattern.permute.xlu2 %v2772_v14 }
  0x2c   :  { %476 = vperm.xlu0 %2662, %v37_v2   ;;  %472 = vperm.xlu2 %2657, %v36_v6   ;;  %v2991_v6 = vld [vmem:[%s4934_s0 + $0xa] ss:$0 sm:$0xff] }
  0x2d   :  { %5094 = vst [vmem:[#allocation19_spill] sm:$0xff] %v2991_v6 }
  0x2e   :  { %2656 = vset.pattern.permute.xlu1 %v2772_v14 }
  0x2f   :  { %468 = vperm.xlu1 %2656, %v35_v3  }
  0x34   :  { %2663 = vset.pattern.permute.xlu0 %v2771_v9  ;;  %2659 = vset.pattern.permute.xlu2 %v2770_v0 }
  0x35   :  { %292 = vperm.xlu0 %2663, %v35_v3   ;;  %193 = vperm.xlu2 %2659, %v47_v15   ;;  %v2983_v3 = vld [vmem:[%s4934_s0 + $0x9] ss:$0 sm:$0xff] }
  0x36   :  { %5093 = vst [vmem:[#allocation18_spill] sm:$0xff] %v2983_v3 }
  0x37   :  { %2658 = vset.pattern.permute.xlu1 %v2770_v0 }
  0x38   :  { %104 = vperm.xlu1 %2658, %v42_v16  }
  0x3d   :  { %320 = vperm.xlu0 %2663, %v42_v16   ;;  %2661 = vset.pattern.permute.xlu2 %v2771_v9 }
  0x3e   :  { %312 = vperm.xlu2 %2661, %v40_v12  }
  0x40   :  { %2660 = vset.pattern.permute.xlu1 %v2771_v9 }
  0x41   :  { %308 = vperm.xlu1 %2660, %v39_v7  }
  0x45   :  { %2670 = vset.pattern.permute.xlu0 %v2772_v14 }
  0x46   :  { %2665 = vset.pattern.permute.xlu2 %v2770_v0 }
  0x47   :  { %203 = vperm.xlu2 %2665, %v49_v17  }
  0x49   :  { %2664 = vset.pattern.permute.xlu1 %v2772_v14 }
  0x4a   :  { %480 = vperm.xlu1 %2664, %v38_v5  }
  0x4f   :  { %2667 = vset.pattern.permute.xlu2 %v2771_v9 }
  0x50   :  { %316 = vperm.xlu2 %2667, %v41_v11  }
  0x52   :  { %2666 = vset.pattern.permute.xlu1 %v2770_v0 }
  0x53   :  { %208 = vperm.xlu1 %2666, %v50_v18  }
  0x58   :  { %2669 = vset.pattern.permute.xlu2 %v2772_v14 }
  0x59   :  { %488 = vperm.xlu2 %2669, %v40_v12  }
  0x5b   :  { %2668 = vset.pattern.permute.xlu1 %v2772_v14 }
  0x5c   :  { %484 = vperm.xlu1 %2668, %v39_v7   ;;  %v2884_v19 = vpop.permute.xlu2 %173 }
  0x61   :  { %496 = vperm.xlu2 %2669, %v42_v16  }
  0x64   :  { %492 = vperm.xlu1 %2668, %v41_v11   ;;  %v2886_v20 = vpop.permute.xlu2 %178 }
  0x65   :  { %5077 = vst [vmem:[#allocation2_spill] sm:$0xff] %v2886_v20 }
  0x6c   :  { %v2888_v21 = vpop.permute.xlu2 %89 }
  0x74   :  { %v2890_v22 = vpop.permute.xlu2 %183 }
  0x75   :  { %5078 = vst [vmem:[#allocation3_spill] sm:$0xff] %v2890_v22  ;;  %v2892_v23 = vpop.permute.xlu1 %79  ;;  %v2894_v24 = vpop.permute.xlu0 %69 }
  0x76   :  { %5079 = vst [vmem:[#allocation4_spill] sm:$0xff] %v2892_v23  ;;  %v109_v55 = vmul.f32 %v2905_v28, %v2892_v23  ;;  %v115_v1 = vmul.f32 %v2972_v61, %v2894_v24  ;;  %v107_v2 = vmul.f32 %v2905_v28, %v2894_v24  ;;  %v899_v7 = vmul.f32 %v2924_v33, %v2894_v24 }
  0x78   :  { %v213_v57 = vadd.f32 %v2890_v22, %v109_v55  ;;  %v219_v5 = vadd.f32 %v2884_v19, %v115_v1  ;;  %v211_v9 = vadd.f32 %v2884_v19, %v107_v2  ;;  %v3035_v55 = vld [vmem:[%s4934_s0 + $0xe] ss:$0 sm:$0xff] }
  0x7d   :  { %v2896_v25 = vpop.permute.xlu1 %84  ;;  %v2898_v26 = vpop.permute.xlu0 %74 }
  0x7e   :  { %5080 = vst [vmem:[#allocation5_spill] sm:$0xff] %v2896_v25  ;;  %v2900_v27 = vpop.permute.xlu2 %304  ;;  %v108_v29 = vmul.f32 %v2905_v28, %v2898_v26  ;;  %v900_v40 = vmul.f32 %v2924_v33, %v2898_v26  ;;  %v116_v11 = vmul.f32 %v2972_v61, %v2898_v26 }
  0x7f   :  { %5081 = vst [vmem:[#allocation6_spill] sm:$0xff] %v2898_v26 }
  0x80   :  { %5082 = vst [vmem:[#allocation7_spill] sm:$0xff] %v2900_v27  ;;  %v212_v37 = vadd.f32 %v2886_v20, %v108_v29  ;;  %v964_v45 = vadd.f32 %v900_v40, %v2886_v20  ;;  %v3017_v40 = vld [vmem:[%s4934_s0 + $0xc] ss:$0 sm:$0xff] }
  0x85   :  { %v2919_v32 = vpop.permute.xlu0 %188 }
  0x86   :  { %5085 = vst [vmem:[#allocation10_spill] sm:$0xff] %v2919_v32  ;;  %v2931_v35 = vpop.permute.xlu1 %296  ;;  %v2933_v36 = vpop.permute.xlu2 %472 }
  0x87   :  { %5086 = vst [vmem:[#allocation11_spill] sm:$0xff] %v2931_v35  ;;  %v324_v38 = vmul.f32 %v2912_v30, %v2931_v35  ;;  %v500_v39 = vmul.f32 %v2917_v31, %v2933_v36  ;;  %v1044_v42 = vmul.f32 %v2929_v34, %v2931_v35  ;;  %v1188_v49 = vmul.f32 %v2947_v43, %v2933_v36 }
  0x88   :  { %5087 = vst [vmem:[#allocation12_spill] sm:$0xff] %v2933_v36  ;;  %v332_v13 = vmul.f32 %v2983_v3, %v2931_v35  ;;  %v1196_v2 = vmul.f32 %v3035_v55, %v2933_v36 }
  0x89   :  { %v388_v41 = vadd.f32 %v324_v38, %v212_v37  ;;  %v1108_v48 = vadd.f32 %v1044_v42, %v964_v45  ;;  %v220_v38 = vadd.f32 %v2886_v20, %v116_v11 }
  0x8b   :  { %v564_v44 = vadd.f32 %v500_v39, %v388_v41  ;;  %v1252_v51 = vadd.f32 %v1188_v49, %v1108_v48  ;;  %v963_v39 = vadd.f32 %v899_v7, %v2884_v19  ;;  %v508_v41 = vmul.f32 %v2991_v6, %v2933_v36  ;;  %v3024_v48 = vld [vmem:[%s4934_s0 + $0xd] ss:$0 sm:$0xff] }
  0x8c   :  { %v396_v45 = vadd.f32 %v332_v13, %v220_v38  ;;  %v334_v13 = vmul.f32 %v2983_v3, %v2900_v27 }
  0x8d   :  { %v2950_v46 = vpop.permute.xlu0 %99  ;;  %v628_v47 = vmax.f32 %v564_v44, 0.0  ;;  %v1316_v53 = vmax.f32 %v1252_v51, 0.0  ;;  %v907_v51 = vmul.f32 %v3017_v40, %v2894_v24 }
  0x8e   :  { %5088 = vst [vmem:[#allocation13_spill] sm:$0xff] %v2950_v46 }
  0x8f   :  { %693 = vadd.xlane.f32.xlu1 %v628_v47  ;;  %v2954_v50 = vpop.permute.xlu1 %94 }
  0x90   :  { %5089 = vst [vmem:[#allocation14_spill] sm:$0xff] %v2954_v50 }
  0x95   :  { %v2956_v52 = vpop.permute.xlu0 %198 }
  0x96   :  { %5090 = vst [vmem:[#allocation15_spill] sm:$0xff] %v2956_v52 }
  0x97   :  { %1381 = vadd.xlane.f32.xlu1 %v1316_v53  ;;  %v908_v53 = vmul.f32 %v3017_v40, %v2898_v26 }
  0x98   :  { %v2958_v54 = vpop.permute.xlu1 %300 }
  0x99   :  { %5091 = vst [vmem:[#allocation16_spill] sm:$0xff] %v2958_v54  ;;  %v325_v56 = vmul.f32 %v2912_v30, %v2958_v54  ;;  %v972_v1 = vadd.f32 %v908_v53, %v2886_v20 }
  0x9b   :  { %v389_v59 = vadd.f32 %v325_v56, %v213_v57  ;;  %v572_v56 = vadd.f32 %v508_v41, %v396_v45  ;;  %v333_v41 = vmul.f32 %v2983_v3, %v2958_v54 }
  0x9e   :  { %v2965_v58 = vpop.permute.xlu0 %476 }
  0x9f   :  { %v501_v60 = vmul.f32 %v2917_v31, %v2965_v58 }
  0xa1   :  { %v2974_v62 = vpop.permute.xlu1 %468  ;;  %v565_v63 = vadd.f32 %v501_v60, %v389_v59  ;;  %v1052_v60 = vmul.f32 %v3024_v48, %v2931_v35 }
  0xa2   :  { %v507_v12 = vmul.f32 %v2991_v6, %v2974_v62  ;;  %v499_v17 = vmul.f32 %v2917_v31, %v2974_v62  ;;  %v1187_v49 = vmul.f32 %v2947_v43, %v2974_v62  ;;  %v1195_v11 = vmul.f32 %v3035_v55, %v2974_v62 }
  0xa3   :  { %v629_v0 = vmax.f32 %v565_v63, 0.0 }
  0xa5   :  { %695 = vadd.xlane.f32.xlu1 %v629_v0  ;;  %v971_v0 = vadd.f32 %v907_v51, %v2884_v19 }
  0xa7   :  { %v2985_v4 = vpop.permute.xlu0 %292 }
  0xa8   :  { %v331_v8 = vmul.f32 %v2983_v3, %v2985_v4  ;;  %v323_v10 = vmul.f32 %v2912_v30, %v2985_v4  ;;  %v1043_v18 = vmul.f32 %v2929_v34, %v2985_v4  ;;  %v1051_v59 = vmul.f32 %v3024_v48, %v2985_v4 }
  0xaa   :  { %v3006_v14 = vpop.permute.xlu1 %104  ;;  %v395_v15 = vadd.f32 %v331_v8, %v219_v5  ;;  %v387_v16 = vadd.f32 %v323_v10, %v211_v9  ;;  %v1107_v47 = vadd.f32 %v1043_v18, %v963_v39  ;;  %v636_v5 = vmax.f32 %v572_v56, 0.0 }
  0xab   :  { %5095 = vst [vmem:[#allocation20_spill] sm:$0xff] %v3006_v14  ;;  %v1115_v8 = vadd.f32 %v1051_v59, %v971_v0  ;;  %v1116_v9 = vadd.f32 %v1052_v60, %v972_v1  ;;  %v118_v10 = vmul.f32 %v2972_v61, %v2896_v25  ;;  %v110_v18 = vmul.f32 %v2905_v28, %v2896_v25  ;;  %v3084_v59 = vld [vmem:[%s4934_s0 + $0x11] ss:$0 sm:$0xff] }
  0xac   :  { %v571_v29 = vadd.f32 %v507_v12, %v395_v15  ;;  %v563_v37 = vadd.f32 %v499_v17, %v387_v16  ;;  %v1251_v57 = vadd.f32 %v1187_v49, %v1107_v47  ;;  %v117_v15 = vmul.f32 %v2972_v61, %v2892_v23  ;;  %v3075_v49 = vpop.permute.xlu2 %193  ;;  %5097 = vst [vmem:[#allocation22_spill] sm:$0xff] %v3084_v59 }
  0xad   :  { %v222_v12 = vadd.f32 %v2919_v32, %v118_v10  ;;  %v1259_v16 = vadd.f32 %v1195_v11, %v1115_v8  ;;  %v1260_v17 = vadd.f32 %v1196_v2, %v1116_v9  ;;  %v214_v38 = vadd.f32 %v2919_v32, %v110_v18  ;;  %v3098_v11 = vld [vmem:[%s4934_s0 + $0x12] ss:$0 sm:$0xff] }
  0xae   :  { %v635_v42 = vmax.f32 %v571_v29, 0.0  ;;  %v627_v44 = vmax.f32 %v563_v37, 0.0  ;;  %v1315_v7 = vmax.f32 %v1251_v57, 0.0  ;;  %v3061_v29 = vld [vmem:[%s4934_s0 + $0x10] ss:$0 sm:$0xff]  ;;  %v326_v39 = vmul.f32 %v2912_v30, %v2900_v27 }
  0xaf   :  { %v221_v45 = vadd.f32 %v2890_v22, %v117_v15  ;;  %v901_v47 = vmul.f32 %v2924_v33, %v2892_v23  ;;  %v1323_v51 = vmax.f32 %v1259_v16, 0.0  ;;  %v1324_v53 = vmax.f32 %v1260_v17, 0.0 }
  0xb0   :  { %707 = vadd.xlane.f32.xlu2 %v635_v42  ;;  %691 = vadd.xlane.f32.xlu0 %v627_v44  ;;  %v398_v42 = vadd.f32 %v334_v13, %v222_v12  ;;  %v509_v57 = vmul.f32 %v2991_v6, %v2965_v58  ;;  %v1045_v0 = vmul.f32 %v2929_v34, %v2958_v54 }
  0xb1   :  { %v123_v1 = vmul.f32 %v3061_v29, %v2894_v24  ;;  %v390_v2 = vadd.f32 %v326_v39, %v214_v38  ;;  %v965_v9 = vadd.f32 %v901_v47, %v2890_v22  ;;  %v1189_v10 = vmul.f32 %v2947_v43, %v2965_v58 }
  0xb2   :  { %v339_v15 = vmul.f32 %v3084_v59, %v2985_v4  ;;  %v340_v16 = vmul.f32 %v3084_v59, %v2931_v35 }
  0xb3   :  { %v3041_v63 = vpop.permute.xlu1 %308  ;;  %v1109_v17 = vadd.f32 %v1045_v0, %v965_v9  ;;  %v227_v18 = vadd.f32 %v2884_v19, %v123_v1 }
  0xb5   :  { %v1253_v39 = vadd.f32 %v1189_v10, %v1109_v17  ;;  %v403_v47 = vadd.f32 %v339_v15, %v227_v18  ;;  %v3126_v10 = vld [vmem:[%s4934_s0 + $0x14] ss:$0 sm:$0xff]  ;;  %v1053_v15 = vmul.f32 %v3024_v48, %v2958_v54  ;;  %v125_v18 = vmul.f32 %v3061_v29, %v2892_v23 }
  0xb6   :  { %5099 = vst [vmem:[#allocation24_spill] sm:$0xff] %v3126_v10 }
  0xb7   :  { %v1317_v0 = vmax.f32 %v1253_v39, 0.0 }
  0xb8   :  { %709 = vadd.xlane.f32.xlu2 %v636_v5  ;;  %1379 = vadd.xlane.f32.xlu0 %v1315_v7  ;;  %v397_v5 = vadd.f32 %v333_v41, %v221_v45  ;;  %v124_v7 = vmul.f32 %v3061_v29, %v2898_v26  ;;  %v516_v41 = vmul.f32 %v3098_v11, %v2933_v36 }
  0xba   :  { %v573_v13 = vadd.f32 %v509_v57, %v397_v5  ;;  %v228_v38 = vadd.f32 %v2886_v20, %v124_v7  ;;  %v3113_v57 = vpop.permute.xlu2 %312 }
  0xbb   :  { %5098 = vst [vmem:[#allocation23_spill] sm:$0xff] %v3113_v57 }
  0xbc   :  { %v3063_v37 = vpop.permute.xlu1 %480  ;;  %v637_v45 = vmax.f32 %v573_v13, 0.0  ;;  %v1046_v13 = vmul.f32 %v2929_v34, %v2900_v27 }
  0xbd   :  { %5096 = vst [vmem:[#allocation21_spill] sm:$0xff] %v3063_v37  ;;  %v510_v44 = vmul.f32 %v2991_v6, %v3063_v37  ;;  %v502_v56 = vmul.f32 %v2917_v31, %v3063_v37  ;;  %v1198_v1 = vmul.f32 %v3035_v55, %v3063_v37 }
  0xbf   :  { %v574_v60 = vadd.f32 %v510_v44, %v398_v42  ;;  %v566_v12 = vadd.f32 %v502_v56, %v390_v2  ;;  %v910_v42 = vmul.f32 %v3017_v40, %v2896_v25  ;;  %v1054_v56 = vmul.f32 %v3024_v48, %v2900_v27 }
  0xc0   :  { %1395 = vadd.xlane.f32.xlu2 %v1323_v51  ;;  %1397 = vadd.xlane.f32.xlu0 %v1324_v53  ;;  %v404_v51 = vadd.f32 %v340_v16, %v228_v38  ;;  %v909_v2 = vmul.f32 %v3017_v40, %v2892_v23 }
  0xc1   :  { %v638_v8 = vmax.f32 %v574_v60, 0.0  ;;  %v630_v44 = vmax.f32 %v566_v12, 0.0  ;;  %v974_v53 = vadd.f32 %v910_v42, %v2919_v32  ;;  %v515_v60 = vmul.f32 %v3098_v11, %v2974_v62 }
  0xc2   :  { %v580_v7 = vadd.f32 %v516_v41, %v404_v51  ;;  %v973_v17 = vadd.f32 %v909_v2, %v2890_v22  ;;  %v1190_v41 = vmul.f32 %v2947_v43, %v3063_v37  ;;  %v1197_v42 = vmul.f32 %v3035_v55, %v2965_v58 }
  0xc3   :  { %713 = vadd.xlane.f32.xlu1 %v638_v8  ;;  %v579_v5 = vadd.f32 %v515_v60, %v403_v47  ;;  %v902_v8 = vmul.f32 %v2924_v33, %v2896_v25  ;;  %v1118_v9 = vadd.f32 %v1054_v56, %v974_v53  ;;  %v915_v47 = vmul.f32 %v3126_v10, %v2894_v24  ;;  %v3154_v60 = vld [vmem:[%s4934_s0 + $0x18] ss:$0 sm:$0xff] }
  0xc4   :  { %v644_v39 = vmax.f32 %v580_v7, 0.0  ;;  %v1117_v53 = vadd.f32 %v1053_v15, %v973_v17  ;;  %v916_v56 = vmul.f32 %v3126_v10, %v2898_v26  ;;  %v517_v2 = vmul.f32 %v3098_v11, %v2965_v58  ;;  %v3167_v7 = vld [vmem:[%s4934_s0 + $0x19] ss:$0 sm:$0xff] }
  0xc5   :  { %v966_v12 = vadd.f32 %v902_v8, %v2919_v32  ;;  %v1262_v16 = vadd.f32 %v1198_v1, %v1118_v9  ;;  %v643_v38 = vmax.f32 %v579_v5, 0.0  ;;  %v229_v1 = vadd.f32 %v2890_v22, %v125_v18  ;;  %v3162_v5 = vld [vmem:[%s4934_s0 + $0x16] ss:$0 sm:$0xff]  ;;  %v3169_v8 = vpop.permute.xlu2 %203 }
  0xc6   :  { %5101 = vst [vmem:[#allocation26_spill] sm:$0xff] %v3162_v5  ;;  %v132_v17 = vmul.f32 %v3154_v60, %v2898_v26  ;;  %v979_v18 = vadd.f32 %v915_v47, %v2884_v19 }
  0xc7   :  { %v1110_v51 = vadd.f32 %v1046_v13, %v966_v12  ;;  %5102 = vst [vmem:[#allocation27_spill] sm:$0xff] %v3169_v8  ;;  %v1261_v12 = vadd.f32 %v1197_v42, %v1117_v53  ;;  %v348_v42 = vmul.f32 %v3167_v7, %v2931_v35 }
  0xc8   :  { %697 = vadd.xlane.f32.xlu2 %v630_v44  ;;  %711 = vadd.xlane.f32.xlu0 %v637_v45  ;;  %v3143_v44 = vld [vmem:[%s4934_s0 + $0x15] ss:$0 sm:$0xff]  ;;  %v341_v45 = vmul.f32 %v3084_v59, %v2958_v54  ;;  %v236_v47 = vadd.f32 %v2886_v20, %v132_v17  ;;  %v126_v17 = vmul.f32 %v3061_v29, %v2896_v25 }
  0xc9   :  { %5100 = vst [vmem:[#allocation25_spill] sm:$0xff] %v3143_v44  ;;  %v1254_v9 = vadd.f32 %v1190_v41, %v1110_v51  ;;  %v1059_v13 = vmul.f32 %v3143_v44, %v2985_v4  ;;  %v1060_v15 = vmul.f32 %v3143_v44, %v2931_v35  ;;  %v1204_v41 = vmul.f32 %v3162_v5, %v2933_v36  ;;  %v3186_v51 = vld [vmem:[%s4934_s0 + $0x1a] ss:$0 sm:$0xff] }
  0xca   :  { %v1325_v53 = vmax.f32 %v1261_v12, 0.0  ;;  %v524_v12 = vmul.f32 %v3186_v51, %v2933_v36 }
  0xcb   :  { %1383 = vadd.xlane.f32.xlu1 %v1317_v0  ;;  %v1326_v0 = vmax.f32 %v1262_v16, 0.0  ;;  %v405_v16 = vadd.f32 %v341_v45, %v229_v1  ;;  %v1318_v45 = vmax.f32 %v1254_v9, 0.0  ;;  %v412_v9 = vadd.f32 %v348_v42, %v236_v47 }
  0xcd   :  { %v3211_v42 = vpop.permute.xlu2 %316 }
  0xce   :  { %5105 = vst [vmem:[#allocation30_spill] sm:$0xff] %v3211_v42  ;;  %v523_v42 = vmul.f32 %v3186_v51, %v2974_v62 }
  0xd0   :  { %723 = vadd.xlane.f32.xlu2 %v643_v38  ;;  %725 = vadd.xlane.f32.xlu0 %v644_v39  ;;  %v980_v38 = vadd.f32 %v916_v56, %v2886_v20  ;;  %v581_v39 = vadd.f32 %v517_v2, %v405_v16  ;;  %v3192_v56 = vld [vmem:[%s4934_s0 + $0x1c] ss:$0 sm:$0xff]  ;;  %v1203_v2 = vmul.f32 %v3162_v5, %v2974_v62 }
  0xd1   :  { %5103 = vst [vmem:[#allocation28_spill] sm:$0xff] %v3192_v56  ;;  %v131_v16 = vmul.f32 %v3154_v60, %v2894_v24 }
  0xd2   :  { %v1124_v1 = vadd.f32 %v1060_v15, %v980_v38  ;;  %v645_v14 = vmax.f32 %v581_v39, 0.0  ;;  %v923_v38 = vmul.f32 %v3192_v56, %v2894_v24  ;;  %v3209_v39 = vld [vmem:[%s4934_s0 + $0x1d] ss:$0 sm:$0xff] }
  0xd3   :  { %1401 = vadd.xlane.f32.xlu1 %v1326_v0  ;;  %v1123_v0 = vadd.f32 %v1059_v13, %v979_v18  ;;  %v347_v18 = vmul.f32 %v3167_v7, %v2985_v4  ;;  %5104 = vst [vmem:[#allocation29_spill] sm:$0xff] %v3209_v39 }
  0xd4   :  { %v1268_v15 = vadd.f32 %v1204_v41, %v1124_v1  ;;  %v342_v41 = vmul.f32 %v3084_v59, %v2900_v27  ;;  %v987_v46 = vadd.f32 %v923_v38, %v2884_v19  ;;  %v3224_v59 = vpop.permute.xlu1 %208  ;;  %v918_v38 = vmul.f32 %v3126_v10, %v2896_v25 }
  0xd5   :  { %v1267_v13 = vadd.f32 %v1203_v2, %v1123_v0  ;;  %v588_v0 = vadd.f32 %v524_v12, %v412_v9  ;;  %v518_v2 = vmul.f32 %v3098_v11, %v3063_v37  ;;  %5106 = vst [vmem:[#allocation31_spill] sm:$0xff] %v3224_v59  ;;  %v3229_v12 = vld [vmem:[%s4934_s0 + $0x1e] ss:$0 sm:$0xff] }
  0xd6   :  { %v1332_v47 = vmax.f32 %v1268_v15, 0.0  ;;  %5107 = vst [vmem:[#allocation32_spill] sm:$0xff] %v3229_v12 }
  0xd7   :  { %v1331_v1 = vmax.f32 %v1267_v13, 0.0  ;;  %v917_v13 = vmul.f32 %v3126_v10, %v2892_v23 }
  0xd8   :  { %1385 = vadd.xlane.f32.xlu2 %v1318_v45  ;;  %1399 = vadd.xlane.f32.xlu0 %v1325_v53  ;;  %v230_v45 = vadd.f32 %v2919_v32, %v126_v17  ;;  %v235_v53 = vadd.f32 %v2884_v19, %v131_v16  ;;  %v652_v16 = vmax.f32 %v588_v0, 0.0 }
  0xda   :  { %v411_v8 = vadd.f32 %v347_v18, %v235_v53  ;;  %v406_v17 = vadd.f32 %v342_v41, %v230_v45  ;;  %v1211_v45 = vmul.f32 %v3229_v12, %v2974_v62  ;;  %v982_v41 = vadd.f32 %v918_v38, %v2919_v32 }
  0xdb   :  { %727 = vadd.xlane.f32.xlu1 %v645_v14  ;;  %v1067_v14 = vmul.f32 %v3209_v39, %v2985_v4  ;;  %v1062_v53 = vmul.f32 %v3143_v44, %v2900_v27  ;;  %v924_v38 = vmul.f32 %v3192_v56, %v2898_v26 }
  0xdc   :  { %v582_v15 = vadd.f32 %v518_v2, %v406_v17  ;;  %v587_v18 = vadd.f32 %v523_v42, %v411_v8  ;;  %v112_v8 = vmul.f32 %v2905_v28, %v2954_v50  ;;  %v3245_v42 = vpop.permute.xlu2 %488  ;;  %v1205_v2 = vmul.f32 %v3162_v5, %v2965_v58  ;;  %v3260_v10 = vpop.permute.xlu1 %484 }
  0xdd   :  { %v1131_v9 = vadd.f32 %v1067_v14, %v987_v46  ;;  %v1061_v46 = vmul.f32 %v3143_v44, %v2958_v54  ;;  %v981_v14 = vadd.f32 %v917_v13, %v2890_v22  ;;  %5108 = vst [vmem:[#allocation33_spill] sm:$0xff] %v3245_v42  ;;  %v1206_v17 = vmul.f32 %v3162_v5, %v3063_v37 }
  0xde   :  { %v1126_v13 = vadd.f32 %v1062_v53, %v982_v41  ;;  %v1068_v5 = vmul.f32 %v3209_v39, %v2931_v35  ;;  %5109 = vst [vmem:[#allocation34_spill] sm:$0xff] %v3260_v10  ;;  %v988_v41 = vadd.f32 %v924_v38, %v2886_v20  ;;  %v327_v53 = vmul.f32 %v2912_v30, %v3041_v63 }
  0xdf   :  { %v1275_v0 = vadd.f32 %v1211_v45, %v1131_v9  ;;  %v1125_v9 = vadd.f32 %v1061_v46, %v981_v14  ;;  %v111_v46 = vmul.f32 %v2905_v28, %v2888_v21  ;;  %v1212_v14 = vmul.f32 %v3229_v12, %v2933_v36 }
  0xe0   :  { %1411 = vadd.xlane.f32.xlu2 %v1331_v1  ;;  %1413 = vadd.xlane.f32.xlu0 %v1332_v47  ;;  %v646_v1 = vmax.f32 %v582_v15, 0.0  ;;  %v651_v47 = vmax.f32 %v587_v18, 0.0  ;;  %v216_v15 = vadd.f32 %v2956_v52, %v112_v8  ;;  %v504_v18 = vmul.f32 %v2917_v31, %v3245_v42 }
  0xe1   :  { %v1339_v45 = vmax.f32 %v1275_v0, 0.0  ;;  %v1269_v59 = vadd.f32 %v1205_v2, %v1125_v9  ;;  %v1270_v44 = vadd.f32 %v1206_v17, %v1126_v13  ;;  %v215_v8 = vadd.f32 %v3075_v49, %v111_v46 }
  0xe2   :  { %v503_v9 = vmul.f32 %v2917_v31, %v3260_v10  ;;  %v349_v13 = vmul.f32 %v3167_v7, %v2958_v54 }
  0xe3   :  { %741 = vadd.xlane.f32.xlu1 %v652_v16  ;;  %v328_v16 = vmul.f32 %v2912_v30, %v3113_v57  ;;  %v1333_v2 = vmax.f32 %v1269_v59, 0.0  ;;  %v1334_v17 = vmax.f32 %v1270_v44, 0.0  ;;  %v391_v38 = vadd.f32 %v327_v53, %v215_v8  ;;  %v3284_v44 = vld [vmem:[%s4934_s0 + $0x20] ss:$0 sm:$0xff] }
  0xe4   :  { %v120_v59 = vmul.f32 %v2972_v61, %v2954_v50  ;;  %5110 = vst [vmem:[#allocation35_spill] sm:$0xff] %v3284_v44  ;;  %v119_v53 = vmul.f32 %v2972_v61, %v2888_v21  ;;  %v335_v8 = vmul.f32 %v2983_v3, %v3041_v63 }
  0xe5   :  { %v567_v46 = vadd.f32 %v503_v9, %v391_v38  ;;  %v3306_v9 = vld [vmem:[%s4934_s0 + $0x22] ss:$0 sm:$0xff] }
  0xe7   :  { %v631_v38 = vmax.f32 %v567_v46, 0.0  ;;  %v3317_v46 = vpop.permute.xlu1 %492 }
  0xe8   :  { %729 = vadd.xlane.f32.xlu2 %v646_v1  ;;  %739 = vadd.xlane.f32.xlu0 %v651_v47  ;;  %v392_v1 = vadd.f32 %v328_v16, %v216_v15  ;;  %v133_v47 = vmul.f32 %v3154_v60, %v2892_v23  ;;  %v1132_v16 = vadd.f32 %v1068_v5, %v988_v41  ;;  %v3289_v5 = vld [vmem:[%s4934_s0 + $0x21] ss:$0 sm:$0xff] }
  0xea   :  { %v568_v0 = vadd.f32 %v504_v18, %v392_v1  ;;  %v237_v15 = vadd.f32 %v2890_v22, %v133_v47  ;;  %v525_v18 = vmul.f32 %v3186_v51, %v2965_v58  ;;  %v1276_v1 = vadd.f32 %v1212_v14, %v1132_v16 }
  0xeb   :  { %1427 = vadd.xlane.f32.xlu1 %v1339_v45  ;;  %v336_v47 = vmul.f32 %v2983_v3, %v3113_v57  ;;  %v224_v14 = vadd.f32 %v2956_v52, %v120_v59  ;;  %v356_v16 = vmul.f32 %v3289_v5, %v2931_v35 }
  0xec   :  { %v632_v45 = vmax.f32 %v568_v0, 0.0  ;;  %v413_v41 = vadd.f32 %v349_v13, %v237_v15  ;;  %v140_v0 = vmul.f32 %v3284_v44, %v2898_v26  ;;  %v1340_v13 = vmax.f32 %v1276_v1, 0.0 }
  0xed   :  { %v512_v15 = vmul.f32 %v2991_v6, %v3245_v42  ;;  %v532_v1 = vmul.f32 %v3306_v9, %v2933_v36 }
  0xf0   :  { %1415 = vadd.xlane.f32.xlu2 %v1333_v2  ;;  %1417 = vadd.xlane.f32.xlu0 %v1334_v17  ;;  %v589_v2 = vadd.f32 %v525_v18, %v413_v41  ;;  %v223_v17 = vadd.f32 %v3075_v49, %v119_v53  ;;  %v244_v18 = vadd.f32 %v2886_v20, %v140_v0 }
  0xf1   :  { %v400_v41 = vadd.f32 %v336_v47, %v224_v14  ;;  %v139_v53 = vmul.f32 %v3284_v44, %v2894_v24  ;;  %v355_v0 = vmul.f32 %v3289_v5, %v2985_v4  ;;  %v350_v47 = vmul.f32 %v3167_v7, %v2900_v27 }
  0xf2   :  { %v399_v59 = vadd.f32 %v335_v8, %v223_v17  ;;  %v653_v3 = vmax.f32 %v589_v2, 0.0  ;;  %v420_v61 = vadd.f32 %v356_v16, %v244_v18 }
  0xf3   :  { %701 = vadd.xlane.f32.xlu1 %v632_v45  ;;  %v511_v45 = vmul.f32 %v2991_v6, %v3260_v10  ;;  %v576_v30 = vadd.f32 %v512_v15, %v400_v41  ;;  %v134_v6 = vmul.f32 %v3154_v60, %v2896_v25  ;;  %v243_v2 = vadd.f32 %v2884_v19, %v139_v53 }
  0xf4   :  { %v596_v17 = vadd.f32 %v532_v1, %v420_v61  ;;  %v531_v15 = vmul.f32 %v3306_v9, %v2974_v62  ;;  %v904_v61 = vmul.f32 %v2924_v33, %v2954_v50 }
  0xf5   :  { %v575_v31 = vadd.f32 %v511_v45, %v399_v59  ;;  %v238_v8 = vadd.f32 %v2919_v32, %v134_v6  ;;  %v640_v16 = vmax.f32 %v576_v30, 0.0  ;;  %v911_v45 = vmul.f32 %v3017_v40, %v2888_v21 }
  0xf6   :  { %v660_v18 = vmax.f32 %v596_v17, 0.0  ;;  %v1199_v30 = vmul.f32 %v3035_v55, %v3260_v10 }
  0xf7   :  { %v639_v14 = vmax.f32 %v575_v31, 0.0  ;;  %v414_v6 = vadd.f32 %v350_v47, %v238_v8  ;;  %v975_v31 = vadd.f32 %v911_v45, %v3075_v49  ;;  %v1047_v8 = vmul.f32 %v2929_v34, %v3041_v63 }
  0xf8   :  { %1429 = vadd.xlane.f32.xlu2 %v1340_v13  ;;  %699 = vadd.xlane.f32.xlu0 %v631_v38  ;;  %v526_v13 = vmul.f32 %v3186_v51, %v3063_v37  ;;  %v419_v38 = vadd.f32 %v355_v0, %v243_v2  ;;  %v903_v0 = vmul.f32 %v2924_v33, %v2888_v21 }
  0xf9   :  { %v1048_v47 = vmul.f32 %v2929_v34, %v3113_v57  ;;  %v1191_v45 = vmul.f32 %v2947_v43, %v3260_v10  ;;  %v1192_v33 = vmul.f32 %v2947_v43, %v3245_v42  ;;  %v1070_v34 = vmul.f32 %v3209_v39, %v2900_v27 }
  0xfa   :  { %v590_v41 = vadd.f32 %v526_v13, %v414_v6  ;;  %v595_v53 = vadd.f32 %v531_v15, %v419_v38  ;;  %v967_v17 = vadd.f32 %v903_v0, %v3075_v49 }
  0xfb   :  { %743 = vadd.xlane.f32.xlu1 %v653_v3  ;;  %v1055_v3 = vmul.f32 %v3024_v48, %v3041_v63 }
  0xfc   :  { %v654_v13 = vmax.f32 %v590_v41, 0.0  ;;  %v659_v38 = vmax.f32 %v595_v53, 0.0  ;;  %v1111_v6 = vadd.f32 %v1047_v8, %v967_v17  ;;  %v1056_v8 = vmul.f32 %v3024_v48, %v3113_v57 }
  0xfd   :  { %v1119_v1 = vadd.f32 %v1055_v3, %v975_v31  ;;  %v1214_v31 = vmul.f32 %v3229_v12, %v3063_v37  ;;  %v1213_v48 = vmul.f32 %v3229_v12, %v2965_v58 }
  0xfe   :  { %v1255_v41 = vadd.f32 %v1191_v45, %v1111_v6 }
  0xff   :  { %v1263_v2 = vadd.f32 %v1199_v30, %v1119_v1  ;;  %v912_v30 = vmul.f32 %v3017_v40, %v2954_v50  ;;  %v3372_v40 = vld [vmem:[%s4934_s0 + $0x24] ss:$0 sm:$0xff] }
 0x100   :  { %715 = vadd.xlane.f32.xlu2 %v639_v14  ;;  %717 = vadd.xlane.f32.xlu0 %v640_v16  ;;  %v968_v14 = vadd.f32 %v904_v61, %v2956_v52  ;;  %v926_v16 = vmul.f32 %v3192_v56, %v2896_v25  ;;  %v925_v61 = vmul.f32 %v3192_v56, %v2892_v23 }
 0x101   :  { %5111 = vst [vmem:[#allocation36_spill] sm:$0xff] %v3372_v40  ;;  %v976_v17 = vadd.f32 %v912_v30, %v2956_v52  ;;  %v519_v30 = vmul.f32 %v3098_v11, %v3260_v10 }
 0x102   :  { %v694_v59 = vpop.xlane.xlu1 %693  ;;  %v990_v3 = vadd.f32 %v926_v16, %v2919_v32  ;;  %v1112_v15 = vadd.f32 %v1048_v47, %v968_v14  ;;  %v1069_v47 = vmul.f32 %v3209_v39, %v2958_v54  ;;  %v989_v14 = vadd.f32 %v925_v61, %v2890_v22  ;;  %v3399_v61 = vld [vmem:[%s4934_s0 + $0x26] ss:$0 sm:$0xff] }
 0x103   :  { %757 = vadd.xlane.f32.xlu1 %v660_v18  ;;  %v1327_v18 = vmax.f32 %v1263_v2, 0.0  ;;  %v1120_v45 = vadd.f32 %v1056_v8, %v976_v17 }
 0x104   :  { %v1256_v53 = vadd.f32 %v1192_v33, %v1112_v15  ;;  %v1134_v0 = vadd.f32 %v1070_v34, %v990_v3  ;;  %v127_v33 = vmul.f32 %v3061_v29, %v2888_v21  ;;  %v5113_v3 = vld [vmem:[#allocation22_spill] sm:$0xff]  ;;  %v1133_v6 = vadd.f32 %v1069_v47, %v989_v14 }
 0x105   :  { %v343_v34 = vmul.f32 %v5113_v3, %v3041_v63  ;;  %v932_v15 = vmul.f32 %v3372_v40, %v2898_v26  ;;  %5114 = vst [vmem:[#allocation22_spill] sm:$0xff] %v3399_v61  ;;  %v1220_v14 = vmul.f32 %v3399_v61, %v2933_v36 }
 0x106   :  { %v1278_v2 = vadd.f32 %v1214_v31, %v1134_v0  ;;  %v1320_v16 = vmax.f32 %v1256_v53, 0.0  ;;  %v231_v31 = vadd.f32 %v3075_v49, %v127_v33 }
 0x108   :  { %745 = vadd.xlane.f32.xlu2 %v654_v13  ;;  %755 = vadd.xlane.f32.xlu0 %v659_v38  ;;  %v1200_v13 = vmul.f32 %v3035_v55, %v3245_v42  ;;  %v3383_v38 = vld [vmem:[%s4934_s0 + $0x25] ss:$0 sm:$0xff]  ;;  %v931_v55 = vmul.f32 %v3372_v40, %v2894_v24  ;;  %v407_v8 = vadd.f32 %v343_v34, %v231_v31 }
 0x109   :  { %5112 = vst [vmem:[#allocation37_spill] sm:$0xff] %v3383_v38  ;;  %v1075_v53 = vmul.f32 %v3383_v38, %v2985_v4  ;;  %v1076_v0 = vmul.f32 %v3383_v38, %v2931_v35  ;;  %v358_v34 = vmul.f32 %v3289_v5, %v2900_v27  ;;  %v141_v31 = vmul.f32 %v3284_v44, %v2892_v23 }
 0x10a   :  { %v1382_v43 = vpop.xlane.xlu1 %1381  ;;  %v995_v47 = vadd.f32 %v931_v55, %v2884_v19  ;;  %v583_v17 = vadd.f32 %v519_v30, %v407_v8  ;;  %v344_v8 = vmul.f32 %v5113_v3, %v3113_v57 }
 0x10b   :  { %v3363_v1 = vadd.f32 %v1382_v43, %v694_v59  ;;  %1403 = vadd.xlane.f32.xlu1 %v1327_v18  ;;  %v1319_v59 = vmax.f32 %v1255_v41, 0.0  ;;  %v1342_v18 = vmax.f32 %v1278_v2, 0.0  ;;  %v1264_v43 = vadd.f32 %v1200_v13, %v1120_v45 }
 0x10c   :  { %v1277_v41 = vadd.f32 %v1213_v48, %v1133_v6  ;;  %v996_v2 = vadd.f32 %v932_v15, %v2886_v20  ;;  %v1139_v48 = vadd.f32 %v1075_v53, %v995_v47  ;;  %v1219_v6 = vmul.f32 %v3399_v61, %v2974_v62  ;;  %v3424_v53 = vpop.permute.xlu2 %496 }
 0x10d   :  { %v647_v55 = vmax.f32 %v583_v17, 0.0  ;;  %v534_v15 = vmul.f32 %v3306_v9, %v3063_v37  ;;  %5115 = vst [vmem:[#allocation38_spill] sm:$0xff] %v3424_v53  ;;  %v357_v47 = vmul.f32 %v3289_v5, %v2958_v54  ;;  %v520_v5 = vmul.f32 %v3098_v11, %v3245_v42 }
 0x10e   :  { %v1341_v13 = vmax.f32 %v1277_v41, 0.0  ;;  %v1140_v45 = vadd.f32 %v1076_v0, %v996_v2  ;;  %v1283_v30 = vadd.f32 %v1219_v6, %v1139_v48  ;;  %v3422_v41 = vpop.permute.xlu0 %320  ;;  %v5117_v48 = vld [vmem:[#allocation24_spill] sm:$0xff] }
 0x110   :  { %1387 = vadd.xlane.f32.xlu2 %v1319_v59  ;;  %1389 = vadd.xlane.f32.xlu0 %v1320_v16  ;;  %v142_v59 = vmul.f32 %v3284_v44, %v2896_v25  ;;  %v1328_v16 = vmax.f32 %v1264_v43, 0.0  ;;  %v1284_v43 = vadd.f32 %v1220_v14, %v1140_v45  ;;  %v245_v14 = vadd.f32 %v2890_v22, %v141_v31 }
 0x111   :  { %v919_v45 = vmul.f32 %v5117_v48, %v2888_v21 }
 0x112   :  { %v246_v33 = vadd.f32 %v2919_v32, %v142_v59  ;;  %v3440_v59 = vld [vmem:[%s4934_s0 + $0x29] ss:$0 sm:$0xff]  ;;  %v1348_v3 = vmax.f32 %v1284_v43, 0.0  ;;  %v3460_v43 = vld [vmem:[%s4934_s0 + $0x2a] ss:$0 sm:$0xff] }
 0x113   :  { %1433 = vadd.xlane.f32.xlu1 %v1342_v18  ;;  %v128_v18 = vmul.f32 %v3061_v29, %v2954_v50  ;;  %v3433_v29 = vld [vmem:[%s4934_s0 + $0x28] ss:$0 sm:$0xff]  ;;  %v983_v31 = vadd.f32 %v919_v45, %v3075_v49  ;;  %v540_v39 = vmul.f32 %v3460_v43, %v2933_v36 }
 0x114   :  { %v422_v0 = vadd.f32 %v358_v34, %v246_v33  ;;  %5116 = vst [vmem:[#allocation39_spill] sm:$0xff] %v3433_v29  ;;  %v5118_v33 = vld [vmem:[#allocation25_spill] sm:$0xff]  ;;  %v148_v6 = vmul.f32 %v3433_v29, %v2898_v26 }
 0x115   :  { %v232_v17 = vadd.f32 %v2956_v52, %v128_v18  ;;  %v1063_v34 = vmul.f32 %v5118_v33, %v3041_v63  ;;  %v147_v18 = vmul.f32 %v3433_v29, %v2894_v24 }
 0x116   :  { %v598_v2 = vadd.f32 %v534_v15, %v422_v0  ;;  %v421_v15 = vadd.f32 %v357_v47, %v245_v14  ;;  %v364_v0 = vmul.f32 %v3440_v59, %v2931_v35  ;;  %v363_v47 = vmul.f32 %v3440_v59, %v2985_v4 }
 0x117   :  { %v1127_v14 = vadd.f32 %v1063_v34, %v983_v31  ;;  %v251_v45 = vadd.f32 %v2884_v19, %v147_v18  ;;  %v1078_v34 = vmul.f32 %v3383_v38, %v2900_v27  ;;  %v920_v18 = vmul.f32 %v5117_v48, %v2954_v50  ;;  %v3490_v48 = vld [vmem:[%s4934_s0 + $0x2c] ss:$0 sm:$0xff] }
 0x118   :  { %1405 = vadd.xlane.f32.xlu2 %v1328_v16  ;;  %1431 = vadd.xlane.f32.xlu0 %v1341_v13  ;;  %v1347_v16 = vmax.f32 %v1283_v30, 0.0  ;;  %v533_v13 = vmul.f32 %v3306_v9, %v2965_v58  ;;  %v662_v11 = vmax.f32 %v598_v2, 0.0  ;;  %v5119_v9 = vld [vmem:[#allocation26_spill] sm:$0xff]  ;;  %5120 = vst [vmem:[#allocation24_spill] sm:$0xff] %v3490_v48 }
 0x119   :  { %v1207_v30 = vmul.f32 %v5119_v9, %v3260_v10 }
 0x11b   :  { %731 = vadd.xlane.f32.xlu1 %v647_v55  ;;  %v408_v55 = vadd.f32 %v344_v8, %v232_v17  ;;  %v597_v8 = vadd.f32 %v533_v13, %v421_v15  ;;  %v1271_v44 = vadd.f32 %v1207_v30, %v1127_v14  ;;  %v427_v15 = vadd.f32 %v363_v47, %v251_v45 }
 0x11d   :  { %v1335_v31 = vmax.f32 %v1271_v44, 0.0  ;;  %v984_v44 = vadd.f32 %v920_v18, %v2956_v52  ;;  %v1208_v18 = vmul.f32 %v5119_v9, %v3245_v42 }
 0x120   :  { %1443 = vadd.xlane.f32.xlu2 %v1347_v16  ;;  %1445 = vadd.xlane.f32.xlu0 %v1348_v3  ;;  %v584_v16 = vadd.f32 %v520_v5, %v408_v55  ;;  %v252_v3 = vadd.f32 %v2886_v20, %v148_v6  ;;  %v934_v5 = vmul.f32 %v3372_v40, %v2896_v25  ;;  %v661_v55 = vmax.f32 %v597_v8, 0.0 }
 0x121   :  { %v539_v6 = vmul.f32 %v3460_v43, %v2974_v62 }
 0x122   :  { %v428_v12 = vadd.f32 %v364_v0, %v252_v3  ;;  %v648_v13 = vmax.f32 %v584_v16, 0.0  ;;  %v998_v56 = vadd.f32 %v934_v5, %v2919_v32  ;;  %v1222_v0 = vmul.f32 %v3399_v61, %v3063_v37 }
 0x123   :  { %v3466_v17 = vpop.xlane.xlu2 %707  ;;  %761 = vadd.xlane.f32.xlu1 %v662_v11  ;;  %v692_v2 = vpop.xlane.xlu0 %691  ;;  %v933_v11 = vmul.f32 %v3372_v40, %v2892_v23  ;;  %v603_v16 = vadd.f32 %v539_v6, %v427_v15  ;;  %v1064_v3 = vmul.f32 %v5118_v33, %v3113_v57 }
 0x124   :  { %v604_v30 = vadd.f32 %v540_v39, %v428_v12  ;;  %v1142_v14 = vadd.f32 %v1078_v34, %v998_v56  ;;  %v1077_v12 = vmul.f32 %v3383_v38, %v2958_v54  ;;  %v3499_v56 = vld [vmem:[%s4934_s0 + $0x2d] ss:$0 sm:$0xff]  ;;  %v3506_v15 = vpop.xlane.xlu1 %695 }
 0x125   :  { %v997_v39 = vadd.f32 %v933_v11, %v2890_v22  ;;  %5121 = vst [vmem:[#allocation25_spill] sm:$0xff] %v3499_v56  ;;  %v667_v6 = vmax.f32 %v603_v16, 0.0  ;;  %v1128_v11 = vadd.f32 %v1064_v3, %v984_v44  ;;  %v3521_v16 = vld [vmem:[%s4934_s0 + $0x2e] ss:$0 sm:$0xff]  ;;  %v1084_v9 = vmul.f32 %v3499_v56, %v2931_v35  ;;  %v5128_v44 = vld [vmem:[#allocation9_spill] sm:$0xff] }
 0x126   :  { %v668_v5 = vmax.f32 %v604_v30, 0.0  ;;  %v1286_v33 = vadd.f32 %v1222_v0, %v1142_v14  ;;  %v5123_v0 = vld [vmem:[#allocation30_spill] sm:$0xff]  ;;  %v5127_v3 = vld [vmem:[#allocation27_spill] sm:$0xff] }
 0x128   :  { %733 = vadd.xlane.f32.xlu2 %v648_v13  ;;  %759 = vadd.xlane.f32.xlu0 %v661_v55  ;;  %v1221_v13 = vmul.f32 %v3399_v61, %v2965_v58  ;;  %v1572_v55 = vmul.f32 0.00390625, %v3363_v1  ;;  %v939_v61 = vmul.f32 %v3490_v48, %v2894_v24  ;;  %v1141_v1 = vadd.f32 %v1077_v12, %v997_v39 }
 0x12b   :  { %v710_v8 = vpop.xlane.xlu2 %709  ;;  %1419 = vadd.xlane.f32.xlu1 %v1335_v31  ;;  %v1380_v47 = vpop.xlane.xlu0 %1379  ;;  %v5122_v31 = vld [vmem:[#allocation13_spill] sm:$0xff] }
 0x12c   :  { %v1507_v45 = vadd.f32 %v1380_v47, %v692_v2  ;;  %v940_v2 = vmul.f32 %v3490_v48, %v2898_v26  ;;  %v113_v30 = vmul.f32 %v2905_v28, %v5122_v31  ;;  %v5124_v47 = vld [vmem:[#allocation8_spill] sm:$0xff]  ;;  %v1350_v28 = vmax.f32 %v1286_v33, 0.0  ;;  %v5130_v33 = vld [vmem:[#allocation17_spill] sm:$0xff] }
 0x12d   :  { %v329_v14 = vmul.f32 %v5124_v47, %v5123_v0  ;;  %5126 = vst [vmem:[#allocation8_spill] sm:$0xff] %v3521_v16  ;;  %v505_v47 = vmul.f32 %v5128_v44, %v3317_v46  ;;  %v1003_v48 = vadd.f32 %v939_v61, %v2884_v19 }
 0x12e   :  { %v1571_v34 = vmul.f32 0.00390625, %v1507_v45  ;;  %v217_v45 = vadd.f32 %v5127_v3, %v113_v30  ;;  %v1004_v39 = vadd.f32 %v940_v2, %v2886_v20 }
 0x130   :  { %v3516_v38 = vpack.c.bf16 %v1572_v55, %v1571_v34  ;;  %771 = vadd.xlane.f32.xlu2 %v667_v6  ;;  %773 = vadd.xlane.f32.xlu0 %v668_v5  ;;  %v1083_v55 = vmul.f32 %v3499_v56, %v2985_v4  ;;  %v1272_v34 = vadd.f32 %v1208_v18, %v1128_v11  ;;  %v5131_v11 = vld [vmem:[#allocation31_spill] sm:$0xff] }
 0x131   :  { %v1285_v5 = vadd.f32 %v1221_v13, %v1141_v1  ;;  %v393_v40 = vadd.f32 %v329_v14, %v217_v45  ;;  %v1148_v44 = vadd.f32 %v1084_v9, %v1004_v39  ;;  %v1228_v56 = vmul.f32 %v3521_v16, %v2933_v36  ;;  %v3541_v14 = vld [vmem:[%s4934_s0 + $0x30] ss:$0 sm:$0xff]  ;;  %v5133_v9 = vld [vmem:[#allocation18_spill] sm:$0xff] }
 0x132   :  { %5125 = vst [vmem:[#allocation26_spill] sm:$0xff] %v3516_v38  ;;  %v5129_v38 = vld [vmem:[#allocation20_spill] sm:$0xff]  ;;  %v1147_v13 = vadd.f32 %v1083_v55, %v1003_v48  ;;  %v1336_v45 = vmax.f32 %v1272_v34, 0.0  ;;  %v156_v48 = vmul.f32 %v3541_v14, %v2898_v26  ;;  %v2724_v34 = vld [vmem:[%s4934_s0] ss:$0 sm:$0xff] }
 0x133   :  { %v1396_v12 = vpop.xlane.xlu2 %1395  ;;  %1449 = vadd.xlane.f32.xlu1 %v1350_v28  ;;  %v1398_v6 = vpop.xlane.xlu0 %1397  ;;  %v122_v37 = vmul.f32 %v5130_v33, %v5129_v38  ;;  %v569_v18 = vadd.f32 %v505_v47, %v393_v40  ;;  %5132 = vst [vmem:[#allocation9_spill] sm:$0xff] %v3541_v14  ;;  %v338_v40 = vmul.f32 %v5133_v9, %v3422_v41 }
 0x134   :  { %v1515_v30 = vadd.f32 %v1396_v12, %v3466_v17  ;;  %v1516_v32 = vadd.f32 %v1398_v6, %v710_v8  ;;  %v1349_v17 = vmax.f32 %v1285_v5, 0.0  ;;  %v1227_v8 = vmul.f32 %v3521_v16, %v2974_v62 }
 0x135   :  { %v226_v2 = vadd.f32 %v5131_v11, %v122_v37  ;;  %v149_v37 = vmul.f32 %v3433_v29, %v2892_v23  ;;  %v1292_v55 = vadd.f32 %v1228_v56, %v1148_v44  ;;  %v114_v5 = vmul.f32 %v2724_v34, %v5129_v38 }
 0x136   :  { %v1579_v61 = vmul.f32 0.00390625, %v1515_v30  ;;  %v1580_v1 = vmul.f32 0.00390625, %v1516_v32  ;;  %v3543_v28 = vpop.xlane.xlu1 %713  ;;  %v3556_v32 = vld [vmem:[%s4934_s0 + $0x31] ss:$0 sm:$0xff]  ;;  %v633_v39 = vmax.f32 %v569_v18, 0.0  ;;  %v1291_v12 = vadd.f32 %v1227_v8, %v1147_v13  ;;  %v5135_v30 = vld [vmem:[#allocation19_spill] sm:$0xff] }
 0x137   :  { %5134 = vst [vmem:[#allocation17_spill] sm:$0xff] %v3556_v32  ;;  %v402_v6 = vadd.f32 %v338_v40, %v226_v2  ;;  %v514_v26 = vmul.f32 %v5135_v30, %v3424_v53  ;;  %v218_v16 = vadd.f32 %v5131_v11, %v114_v5  ;;  %v365_v56 = vmul.f32 %v3440_v59, %v2958_v54  ;;  %v2725_v8 = vld [vmem:[%s4934_s0 + $0x1] ss:$0 sm:$0xff]  ;;  %v2727_v54 = vld [vmem:[%s4934_s0 + $0xa] ss:$0 sm:$0xff] }
 0x138   :  { %v3558_v47 = vpack.c.bf16 %v1580_v1, %v1579_v61  ;;  %1421 = vadd.xlane.f32.xlu2 %v1336_v45  ;;  %1447 = vadd.xlane.f32.xlu0 %v1349_v17  ;;  %v121_v61 = vmul.f32 %v5130_v33, %v5122_v31  ;;  %v135_v44 = vmul.f32 %v3154_v60, %v2888_v21  ;;  %v1356_v17 = vmax.f32 %v1292_v55, 0.0 }
 0x139   :  { %v253_v13 = vadd.f32 %v2890_v22, %v149_v37  ;;  %v136_v2 = vmul.f32 %v3154_v60, %v2954_v50  ;;  %v352_v45 = vmul.f32 %v3167_v7, %v3113_v57  ;;  %v372_v33 = vmul.f32 %v3556_v32, %v2931_v35  ;;  %v3593_v60 = vld [vmem:[%s4934_s0 + $0x32] ss:$0 sm:$0xff] }
 0x13a   :  { %v330_v40 = vmul.f32 %v2725_v8, %v3422_v41  ;;  %v337_v34 = vmul.f32 %v5133_v9, %v5123_v0  ;;  %5136 = vst [vmem:[#allocation31_spill] sm:$0xff] %v3593_v60  ;;  %v155_v37 = vmul.f32 %v3541_v14, %v2894_v24  ;;  %v1355_v5 = vmax.f32 %v1291_v12, 0.0  ;;  %v2726_v9 = vld [vmem:[%s4934_s0 + $0x2] ss:$0 sm:$0xff] }
 0x13b   :  { %v3573_v1 = vpop.xlane.xlu2 %697  ;;  %703 = vadd.xlane.f32.xlu1 %v633_v39  ;;  %v3575_v18 = vpop.xlane.xlu0 %711  ;;  %v578_v39 = vadd.f32 %v514_v26, %v402_v6  ;;  %v225_v55 = vadd.f32 %v5127_v3, %v121_v61  ;;  %v260_v30 = vadd.f32 %v2886_v20, %v156_v48  ;;  %v506_v8 = vmul.f32 %v2726_v9, %v3424_v53 }
 0x13c   :  { %v394_v22 = vadd.f32 %v330_v40, %v218_v16  ;;  %v513_v14 = vmul.f32 %v2727_v54, %v3317_v46  ;;  %v371_v26 = vmul.f32 %v3556_v32, %v2985_v4  ;;  %v429_v48 = vadd.f32 %v365_v56, %v253_v13 }
 0x13d   :  { %v541_v16 = vmul.f32 %v3460_v43, %v2965_v58  ;;  %v436_v6 = vadd.f32 %v372_v33, %v260_v30  ;;  %v401_v61 = vadd.f32 %v337_v34, %v225_v55  ;;  %v548_v40 = vmul.f32 %v3593_v60, %v2933_v36 }
 0x13e   :  { %v1384_v35 = vpop.xlane.xlu1 %1383  ;;  %v259_v9 = vadd.f32 %v2884_v19, %v155_v37  ;;  %v642_v54 = vmax.f32 %v578_v39, 0.0  ;;  %v351_v32 = vmul.f32 %v3167_v7, %v3041_v63  ;;  %v570_v56 = vadd.f32 %v506_v8, %v394_v22 }
 0x13f   :  { %v3610_v12 = vadd.f32 %v1384_v35, %v3506_v15  ;;  %v240_v35 = vadd.f32 %v2956_v52, %v136_v2  ;;  %v528_v15 = vmul.f32 %v3186_v51, %v3245_v42  ;;  %v577_v13 = vadd.f32 %v513_v14, %v401_v61 }
 0x140   :  { %1459 = vadd.xlane.f32.xlu2 %v1355_v5  ;;  %1461 = vadd.xlane.f32.xlu0 %v1356_v17  ;;  %v239_v33 = vadd.f32 %v3075_v49, %v135_v44  ;;  %v435_v17 = vadd.f32 %v371_v26, %v259_v9  ;;  %v605_v37 = vadd.f32 %v541_v16, %v429_v48  ;;  %v1775_v55 = vlaneseq  ;;  %v5137_v26 = vld [vmem:[#allocation10_spill] sm:$0xff] }
 0x141   :  { %v416_v39 = vadd.f32 %v352_v45, %v240_v35  ;;  %v150_v7 = vmul.f32 %v3433_v29, %v2896_v25  ;;  %v366_v2 = vmul.f32 %v3440_v59, %v2900_v27  ;;  %v527_v22 = vmul.f32 %v3186_v51, %v3260_v10  ;;  %v2728_v45 = vld [vmem:[%s4934_s0 + $0xc] ss:$0 sm:$0xff]  ;;  %v3647_v51 = vld [vmem:[%s4934_s0 + $0xd] ss:$0 sm:$0xff]  ;;  %v5138_v35 = vld [vmem:[#allocation21_spill] sm:$0xff] }
 0x142   :  { %v3633_v14 = vadd.f32 %v548_v40, %v436_v6  ;;  %v547_v44 = vmul.f32 %v3593_v60, %v2974_v62  ;;  %v415_v30 = vadd.f32 %v351_v32, %v239_v33  ;;  %v913_v16 = vmul.f32 %v2728_v45, %v5122_v31  ;;  %v5143_v60 = vld [vmem:[#allocation26_spill] sm:$0xff] }
 0x143   :  { %v3623_v34 = vpop.xlane.xlu2 %723  ;;  %721 = vadd.xlane.f32.xlu1 %v642_v54  ;;  %v3625_v5 = vpop.xlane.xlu0 %725  ;;  %v592_v8 = vadd.f32 %v528_v15, %v416_v39  ;;  %v254_v48 = vadd.f32 %v5137_v26, %v150_v7  ;;  %v634_v61 = vmax.f32 %v570_v56, 0.0  ;;  %v641_v9 = vmax.f32 %v577_v13, 0.0  ;;  %v2730_v56 = vld [vmem:[%s4934_s0 + $0x4] ss:$0 sm:$0xff] }
 0x144   :  { %v3642_v54 = vadd.f32 %v547_v44, %v435_v17  ;;  %v1057_v32 = vmul.f32 %v3647_v51, %v5123_v0  ;;  %v669_v40 = vmax.f32 %v605_v37, 0.0  ;;  %v542_v15 = vmul.f32 %v3460_v43, %v5138_v35  ;;  %v5140_v43 = vld [vmem:[#allocation28_spill] sm:$0xff] }
 0x145   :  { %v905_v13 = vmul.f32 %v2730_v56, %v5122_v31  ;;  %v3658_v33 = vand.u32 127, %v1775_v55  ;;  %v591_v17 = vadd.f32 %v527_v22, %v415_v30  ;;  %v676_v39 = vmax.f32 %v3633_v14, 0.0  ;;  %v2731_v14 = vld [vmem:[%s4934_s0 + $0x5] ss:$0 sm:$0xff] }
 0x146   :  { %v1402_v59 = vpop.xlane.xlu1 %1401  ;;  %v977_v7 = vadd.f32 %v913_v16, %v5127_v3  ;;  %v3667_v44 = vmul.f32 %v5140_v43, %v2954_v50  ;;  %v656_v55 = vmax.f32 %v592_v8, 0.0  ;;  %v3683_v8 = vmul.f32 %v2728_v45, %v5129_v38 }
 0x147   :  { %v1518_v6 = vadd.f32 %v1402_v59, %v3543_v28  ;;  %5139 = vst [vmem:[#allocation18_spill] sm:$0xff] %v3658_v33  ;;  %v430_v28 = vadd.f32 %v366_v2, %v254_v48  ;;  %v3663_v37 = vadd.f32 %v905_v13, %v5127_v3  ;;  %v5141_v59 = vld [vmem:[#allocation29_spill] sm:$0xff]  ;;  %v3678_v2 = vmul.f32 %v2731_v14, %v5123_v0 }
 0x148   :  { %705 = vadd.xlane.f32.xlu2 %v634_v61  ;;  %719 = vadd.xlane.f32.xlu0 %v641_v9  ;;  %v3671_v29 = vmul.f32 %v5141_v59, %v3113_v57  ;;  %v1121_v22 = vadd.f32 %v1057_v32, %v977_v7  ;;  %v906_v9 = vmul.f32 %v2730_v56, %v5129_v38  ;;  %v3686_v32 = vadd.s32 4294967288, %v3658_v33 }
 0x149   :  { %v606_v16 = vadd.f32 %v542_v15, %v430_v28  ;;  %v1050_v13 = vmul.f32 %v2731_v14, %v3422_v41  ;;  %v655_v57 = vmax.f32 %v591_v17, 0.0  ;;  %v1711_v50 = vunpack.c.l.b16 %v5143_v60 }
 0x14a   :  { %5142 = vst [vmem:[#allocation19_spill] sm:$0xff] %v3686_v32  ;;  %v1719_v15 = vunpack.c.l.b16 %v3558_v47  ;;  %v1720_v56 = vunpack.c.h.b16 %v3558_v47  ;;  %v1573_v28 = vmul.f32 0.00390625, %v3610_v12  ;;  %v1582_v45 = vmul.f32 0.00390625, %v1518_v6 }
 0x14b   :  { %v1386_v30 = vpop.xlane.xlu2 %1385  ;;  %775 = vadd.xlane.f32.xlu1 %v669_v40  ;;  %v1400_v48 = vpop.xlane.xlu0 %1399  ;;  %v1712_v40 = vunpack.c.h.b16 %v5143_v60  ;;  %v970_v17 = vadd.f32 %v906_v9, %v5131_v11  ;;  %v3706_v47 = vadd.s32 4294967280, %v3658_v33  ;;  %v3709_v12 = vadd.s32 4294967272, %v3658_v33 }
 0x14c   :  { %v1510_v7 = vadd.f32 %v1386_v30, %v3573_v1  ;;  %v1517_v61 = vadd.f32 %v1400_v48, %v3575_v18  ;;  %v670_v1 = vmax.f32 %v606_v16, 0.0  ;;  %v3700_v18 = vld [vmem:[%s4934_s0 + $0xe] ss:$0 sm:$0xff]  ;;  %v1777_v30 = vperm.slane %v1711_v50, %v3658_v33  ;;  %v2733_v50 = vld [vmem:[%s4934_s0 + $0x6] ss:$0 sm:$0xff] }
 0x14d   :  { %v1201_v60 = vmul.f32 %v3700_v18, %v3317_v46  ;;  %5144 = vst [vmem:[#allocation28_spill] sm:$0xff] %v3706_v47  ;;  %v1779_v48 = vperm.slane %v1712_v40, %v3686_v32  ;;  %v1806_v16 = vperm.slane %v1719_v15, %v3658_v33 }
 0x14e   :  { %v1574_v14 = vmul.f32 0.00390625, %v1510_v7  ;;  %v1581_v3 = vmul.f32 0.00390625, %v1517_v61  ;;  %v3695_v0 = vpop.xlane.xlu1 %727  ;;  %5145 = vst [vmem:[#allocation29_spill] sm:$0xff] %v3709_v12  ;;  %v1807_v7 = vperm.slane %v1720_v56, %v3686_v32 }
 0x150   :  { %v1636_v6 = vpack.c.bf16 %v1574_v14, %v1573_v28  ;;  %v1640_v61 = vpack.c.bf16 %v1582_v45, %v1581_v3  ;;  %747 = vadd.xlane.f32.xlu2 %v655_v57  ;;  %749 = vadd.xlane.f32.xlu0 %v656_v55  ;;  %v1265_v3 = vadd.f32 %v1201_v60, %v1121_v22 }
 0x151   :  { %v1194_v57 = vmul.f32 %v2733_v50, %v3424_v53  ;;  %v1781_v22 = vsel %vm1780_vm0, %v1779_v48, %v1777_v30  ;;  %v1808_v45 = vsel %vm1780_vm0, %v1807_v7, %v1806_v16 }
 0x152   :  { %v1713_v31 = vunpack.c.l.b16 %v1636_v6  ;;  %v1714_v9 = vunpack.c.h.b16 %v1636_v6  ;;  %v1721_v36 = vunpack.c.l.b16 %v1640_v61  ;;  %v1722_v20 = vunpack.c.h.b16 %v1640_v61 }
 0x153   :  { %v1412_v35 = vpop.xlane.xlu2 %1411  ;;  %789 = vadd.xlane.f32.xlu1 %v676_v39  ;;  %v1414_v28 = vpop.xlane.xlu0 %1413  ;;  %v3726_v39 = vld [vmem:[%s4934_s0 + $0x34] ss:$0 sm:$0xff]  ;;  %v1114_v61 = vadd.f32 %v1050_v13, %v970_v17  ;;  %v1329_v7 = vmax.f32 %v1265_v3, 0.0  ;;  %v1058_v3 = vmul.f32 %v3647_v51, %v3422_v41 }
 0x154   :  { %v1783_v55 = vperm.slane %v1713_v31, %v3706_v47  ;;  %v1787_v40 = vperm.slane %v1714_v9, %v3709_v12  ;;  %v1809_v15 = vperm.slane %v1721_v36, %v3706_v47  ;;  %v1811_v56 = vperm.slane %v1722_v20, %v3709_v12  ;;  %5146 = vst [vmem:[#allocation26_spill] sm:$0xff] %v3726_v39 }
 0x155   :  { %v1523_v14 = vadd.f32 %v1412_v35, %v3623_v34  ;;  %v1524_v60 = vadd.f32 %v1414_v28, %v3625_v5  ;;  %v1193_v20 = vmul.f32 %v2733_v50, %v3317_v46  ;;  %v5149_v34 = vmax.f32 %v3642_v54, 0.0  ;;  %v5150_v28 = vld [vmem:[#allocation32_spill] sm:$0xff] }
 0x156   :  { %v1785_v31 = vsel %vm1784_vm1, %v1783_v55, %v1781_v22  ;;  %v1810_v6 = vsel %vm1784_vm1, %v1809_v15, %v1808_v45  ;;  %v3734_v36 = vpop.xlane.xlu1 %741  ;;  %v1113_v5 = vadd.f32 %v3678_v2, %v3663_v37  ;;  %v992_v35 = vadd.f32 %v3667_v44, %v2956_v52  ;;  %v3760_v37 = vld [vmem:[%s4934_s0 + $0x35] ss:$0 sm:$0xff] }
 0x157   :  { %v3738_v9 = vsel %vm1788_vm2, %v1787_v40, %v1785_v31  ;;  %v3741_v30 = vsel %vm1788_vm2, %v1811_v56, %v1810_v6  ;;  %v1587_v48 = vmul.f32 0.00390625, %v1523_v14  ;;  %v1588_v16 = vmul.f32 0.00390625, %v1524_v60  ;;  %5151 = vst [vmem:[#allocation32_spill] sm:$0xff] %v3760_v37  ;;  %v5152_v56 = vld [vmem:[#allocation24_spill] sm:$0xff] }
 0x158   :  { %5147 = vst [vmem:[#allocation40_spill] sm:$0xff] %v3738_v9  ;;  %777 = vadd.xlane.f32.xlu2 %v670_v1  ;;  %787 = vadd.xlane.f32.xlu0 %v5149_v34  ;;  %v947_v13 = vmul.f32 %v3726_v39, %v2894_v24  ;;  %v1216_v50 = vmul.f32 %v5150_v28, %v3245_v42 }
 0x159   :  { %5148 = vst [vmem:[#allocation41_spill] sm:$0xff] %v3741_v30  ;;  %v3751_v17 = vpack.c.bf16 %v1588_v16, %v1587_v48  ;;  %v978_v1 = vadd.f32 %v3683_v8, %v5131_v11  ;;  %v1257_v54 = vadd.f32 %v1193_v20, %v1113_v5  ;;  %v1258_v55 = vadd.f32 %v1194_v57, %v1114_v61  ;;  %v5153_v61 = vld [vmem:[#allocation16_spill] sm:$0xff]  ;;  %v5154_v48 = vld [vmem:[#allocation25_spill] sm:$0xff] }
 0x15a   :  { %v1136_v40 = vadd.f32 %v3671_v29, %v992_v35  ;;  %v927_v15 = vmul.f32 %v5140_v43, %v2888_v21  ;;  %v1071_v8 = vmul.f32 %v5141_v59, %v3041_v63  ;;  %v1091_v57 = vmul.f32 %v3760_v37, %v2985_v4 }
 0x15b   :  { %v730_v44 = vpop.xlane.xlu2 %729  ;;  %1407 = vadd.xlane.f32.xlu1 %v1329_v7  ;;  %v740_v2 = vpop.xlane.xlu0 %739  ;;  %v941_v22 = vmul.f32 %v5152_v56, %v2892_v23  ;;  %v1122_v14 = vadd.f32 %v1058_v3, %v978_v1  ;;  %v1011_v29 = vadd.f32 %v947_v13, %v2884_v19  ;;  %v1321_v51 = vmax.f32 %v1257_v54, 0.0  ;;  %v3788_v13 = vld [vmem:[%s4934_s0 + $0x36] ss:$0 sm:$0xff]  ;;  %v5156_v7 = vld [vmem:[#allocation3_spill] sm:$0xff] }
 0x15c   :  { %v1280_v45 = vadd.f32 %v1216_v50, %v1136_v40  ;;  %v991_v60 = vadd.f32 %v927_v15, %v3075_v49  ;;  %v1322_v6 = vmax.f32 %v1258_v55, 0.0  ;;  %v1202_v43 = vmul.f32 %v3700_v18, %v3424_v53  ;;  %5155 = vst [vmem:[#allocation24_spill] sm:$0xff] %v3788_v13 }
 0x15d   :  { %v1215_v59 = vmul.f32 %v5150_v28, %v3260_v10  ;;  %v1085_v16 = vmul.f32 %v5154_v48, %v5153_v61  ;;  %v942_v34 = vmul.f32 %v5152_v56, %v2896_v25  ;;  %v1155_v35 = vadd.f32 %v1091_v57, %v1011_v29  ;;  %v2734_v56 = vld [vmem:[%s4934_s0 + $0x10] ss:$0 sm:$0xff] }
 0x15e   :  { %v1428_v31 = vpop.xlane.xlu1 %1427  ;;  %v1135_v5 = vadd.f32 %v1071_v8, %v991_v60  ;;  %v1344_v18 = vmax.f32 %v1280_v45, 0.0  ;;  %v1005_v28 = vadd.f32 %v941_v22, %v5156_v7  ;;  %v1086_v1 = vmul.f32 %v5154_v48, %v2900_v27  ;;  %v5157_v8 = vld [vmem:[#allocation8_spill] sm:$0xff]  ;;  %v5158_v45 = vld [vmem:[#allocation6_spill] sm:$0xff] }
 0x15f   :  { %v3779_v20 = vadd.f32 %v1428_v31, %v740_v2  ;;  %v1006_v50 = vadd.f32 %v942_v34, %v5137_v26  ;;  %v1266_v54 = vadd.f32 %v1202_v43, %v1122_v14  ;;  %v1235_v2 = vmul.f32 %v3788_v13, %v2974_v62 }
 0x160   :  { %1391 = vadd.xlane.f32.xlu2 %v1321_v51  ;;  %1393 = vadd.xlane.f32.xlu0 %v1322_v6  ;;  %v1279_v55 = vadd.f32 %v1215_v59, %v1135_v5  ;;  %v1149_v15 = vadd.f32 %v1085_v16, %v1005_v28  ;;  %v1229_v57 = vmul.f32 %v5157_v8, %v2965_v58  ;;  %v5159_v51 = vld [vmem:[#allocation21_spill] sm:$0xff]  ;;  %v1727_v43 = vunpack.c.l.b16 %v3751_v17 }
 0x161   :  { %v130_v22 = vmul.f32 %v2734_v56, %v5129_v38  ;;  %v948_v14 = vmul.f32 %v3726_v39, %v5158_v45  ;;  %v1299_v31 = vadd.f32 %v1235_v2, %v1155_v35  ;;  %v1230_v6 = vmul.f32 %v5157_v8, %v5159_v51  ;;  %v5161_v35 = vld [vmem:[#allocation11_spill] sm:$0xff]  ;;  %v2736_v8 = vld [vmem:[%s4934_s0 + $0x12] ss:$0 sm:$0xff] }
 0x162   :  { %v1728_v59 = vunpack.c.h.b16 %v3751_v17  ;;  %v1150_v48 = vadd.f32 %v1086_v1, %v1006_v50  ;;  %v1330_v28 = vmax.f32 %v1266_v54, 0.0  ;;  %v1343_v30 = vmax.f32 %v1279_v55, 0.0 }
 0x163   :  { %v1416_v40 = vpop.xlane.xlu2 %1415  ;;  %1437 = vadd.xlane.f32.xlu1 %v1344_v18  ;;  %v1418_v3 = vpop.xlane.xlu0 %1417  ;;  %v234_v16 = vadd.f32 %v5131_v11, %v130_v22  ;;  %v1293_v9 = vadd.f32 %v1229_v57, %v1149_v15  ;;  %v1092_v2 = vmul.f32 %v3760_v37, %v5161_v35  ;;  %v1363_v50 = vmax.f32 %v1299_v31, 0.0 }
 0x164   :  { %v1525_v60 = vadd.f32 %v1416_v40, %v3695_v0  ;;  %v1526_v29 = vadd.f32 %v1418_v3, %v730_v44  ;;  %v2735_v0 = vld [vmem:[%s4934_s0 + $0x11] ss:$0 sm:$0xff]  ;;  %v1294_v1 = vadd.f32 %v1230_v6, %v1150_v48  ;;  %v5162_v40 = vld [vmem:[#allocation2_spill] sm:$0xff]  ;;  %v1821_v54 = vperm.slane %v1727_v43, %v3658_v33  ;;  %v5165_v48 = vld [vmem:[#allocation13_spill] sm:$0xff] }
 0x165   :  { %v346_v44 = vmul.f32 %v2735_v0, %v3422_v41  ;;  %v1012_v3 = vadd.f32 %v948_v14, %v5162_v40  ;;  %v1822_v55 = vperm.slane %v1728_v59, %v3686_v32  ;;  %v522_v57 = vmul.f32 %v2736_v8, %v3424_v53 }
 0x166   :  { %v1589_v34 = vmul.f32 0.00390625, %v1525_v60  ;;  %v1590_v5 = vmul.f32 0.00390625, %v1526_v29  ;;  %v3810_v18 = vpop.xlane.xlu1 %701  ;;  %v5163_v29 = vld [vmem:[#allocation12_spill] sm:$0xff]  ;;  %v1357_v14 = vmax.f32 %v1293_v9, 0.0  ;;  %v129_v59 = vmul.f32 %v2734_v56, %v5165_v48 }
 0x167   :  { %5160 = vst [vmem:[#allocation25_spill] sm:$0xff] %v3810_v18  ;;  %v410_v15 = vadd.f32 %v346_v44, %v234_v16  ;;  %v1156_v43 = vadd.f32 %v1092_v2, %v1012_v3  ;;  %v5166_v16 = vld [vmem:[#allocation9_spill] sm:$0xff]  ;;  %v1823_v33 = vsel %vm1780_vm0, %v1822_v55, %v1821_v54  ;;  %v5168_v18 = vld [vmem:[#allocation27_spill] sm:$0xff]  ;;  %v1595_v2 = vmul.f32 0.00390625, %v3779_v20  ;;  %v5171_v54 = vld [vmem:[#allocation14_spill] sm:$0xff] }
 0x168   :  { %v1644_v17 = vpack.c.bf16 %v1590_v5, %v1589_v34  ;;  %1409 = vadd.xlane.f32.xlu2 %v1330_v28  ;;  %1435 = vadd.xlane.f32.xlu0 %v1343_v30  ;;  %v1236_v30 = vmul.f32 %v3788_v13, %v5163_v29  ;;  %v157_v34 = vmul.f32 %v5166_v16, %v2892_v23  ;;  %v3853_v20 = vld [vmem:[%s4934_s0 + $0x38] ss:$0 sm:$0xff] }
 0x169   :  { %v586_v13 = vadd.f32 %v522_v57, %v410_v15  ;;  %v233_v9 = vadd.f32 %v5168_v18, %v129_v59  ;;  %5173 = vst [vmem:[#allocation21_spill] sm:$0xff] %v3853_v20 }
 0x16a   :  { %v1729_v22 = vunpack.c.l.b16 %v1644_v17  ;;  %v1730_v60 = vunpack.c.h.b16 %v1644_v17  ;;  %v5167_v17 = vld [vmem:[#allocation30_spill] sm:$0xff]  ;;  %v261_v59 = vadd.f32 %v5156_v7, %v157_v34 }
 0x16b   :  { %v1430_v31 = vpop.xlane.xlu2 %1429  ;;  %1475 = vadd.xlane.f32.xlu1 %v1363_v50  ;;  %v3827_v6 = vpop.xlane.xlu0 %699  ;;  %v345_v32 = vmul.f32 %v2735_v0, %v5167_v17  ;;  %v1358_v50 = vmax.f32 %v1294_v1, 0.0  ;;  %v5172_v1 = vld [vmem:[#allocation35_spill] sm:$0xff] }
 0x16c   :  { %5164 = vst [vmem:[#allocation8_spill] sm:$0xff] %v3827_v6  ;;  %v1824_v5 = vperm.slane %v1729_v22, %v3706_v47  ;;  %v1826_v28 = vperm.slane %v1730_v60, %v3709_v12  ;;  %v1532_v44 = vadd.f32 %v1430_v31, %v3734_v36  ;;  %v521_v22 = vmul.f32 %v2736_v8, %v3317_v46  ;;  %v5170_v36 = vld [vmem:[#allocation17_spill] sm:$0xff]  ;;  %v3902_v47 = vld [vmem:[%s4934_s0 + $0x22] ss:$0 sm:$0xff] }
 0x16d   :  { %v373_v0 = vmul.f32 %v5170_v36, %v5153_v61  ;;  %v144_v55 = vmul.f32 %v5172_v1, %v5171_v54  ;;  %v1300_v8 = vadd.f32 %v1236_v30, %v1156_v43  ;;  %v409_v57 = vadd.f32 %v345_v32, %v233_v9  ;;  %v3870_v1 = vld [vmem:[%s4934_s0 + $0x20] ss:$0 sm:$0xff]  ;;  %v3877_v32 = vld [vmem:[%s4934_s0 + $0x21] ss:$0 sm:$0xff]  ;;  %5181 = vst [vmem:[#allocation27_spill] sm:$0xff] %v3902_v47 }
 0x16e   :  { %v1825_v56 = vsel %vm1784_vm1, %v1824_v5, %v1823_v33  ;;  %v1596_v3 = vmul.f32 0.00390625, %v1532_v44  ;;  %v3840_v6 = vpop.xlane.xlu1 %743  ;;  %v3858_v33 = vld [vmem:[%s4934_s0 + $0x39] ss:$0 sm:$0xff]  ;;  %v650_v31 = vmax.f32 %v586_v13, 0.0  ;;  %v5175_v5 = vld [vmem:[#allocation31_spill] sm:$0xff]  ;;  %v164_v44 = vmul.f32 %v3853_v20, %v5158_v45  ;;  %5176 = vst [vmem:[#allocation2_spill] sm:$0xff] %v3870_v1 }
 0x16f   :  { %v3844_v60 = vsel %vm1788_vm2, %v1826_v28, %v1825_v56  ;;  %5174 = vst [vmem:[#allocation11_spill] sm:$0xff] %v3858_v33  ;;  %v549_v28 = vmul.f32 %v5175_v5, %v2965_v58  ;;  %v585_v56 = vadd.f32 %v521_v22, %v409_v57  ;;  %v5178_v13 = vld [vmem:[#allocation23_spill] sm:$0xff]  ;;  %v380_v9 = vmul.f32 %v3858_v33, %v5161_v35 }
 0x170   :  { %5169 = vst [vmem:[#allocation6_spill] sm:$0xff] %v3844_v60  ;;  %v3860_v15 = vpack.c.bf16 %v1596_v3, %v1595_v2  ;;  %1463 = vadd.xlane.f32.xlu2 %v1357_v14  ;;  %1465 = vadd.xlane.f32.xlu0 %v1358_v50  ;;  %v143_v14 = vmul.f32 %v3870_v1, %v2888_v21  ;;  %v3888_v2 = vld [vmem:[%s4934_s0 + $0x3a] ss:$0 sm:$0xff]  ;;  %v1364_v60 = vmax.f32 %v1300_v8, 0.0 }
 0x171   :  { %5177 = vst [vmem:[#allocation12_spill] sm:$0xff] %v3877_v32  ;;  %v360_v30 = vmul.f32 %v3877_v32, %v5178_v13  ;;  %v437_v50 = vadd.f32 %v373_v0, %v261_v59  ;;  %v359_v22 = vmul.f32 %v3877_v32, %v3041_v63  ;;  %v248_v57 = vadd.f32 %v2956_v52, %v144_v55 }
 0x172   :  { %5179 = vst [vmem:[#allocation9_spill] sm:$0xff] %v3888_v2  ;;  %v247_v3 = vadd.f32 %v3075_v49, %v143_v14  ;;  %v268_v1 = vadd.f32 %v5162_v40, %v164_v44  ;;  %v158_v0 = vmul.f32 %v5166_v16, %v2896_v25  ;;  %v649_v12 = vmax.f32 %v585_v56, 0.0 }
 0x173   :  { %v716_v43 = vpop.xlane.xlu2 %715  ;;  %737 = vadd.xlane.f32.xlu1 %v650_v31  ;;  %v3881_v34 = vpop.xlane.xlu0 %717  ;;  %v613_v31 = vadd.f32 %v549_v28, %v437_v50  ;;  %v535_v14 = vmul.f32 %v3902_v47, %v3260_v10  ;;  %v424_v32 = vadd.f32 %v360_v30, %v248_v57  ;;  %v536_v55 = vmul.f32 %v3902_v47, %v3245_v42 }
 0x174   :  { %v444_v8 = vadd.f32 %v380_v9, %v268_v1  ;;  %v556_v28 = vmul.f32 %v3888_v2, %v5163_v29  ;;  %v262_v16 = vadd.f32 %v5137_v26, %v158_v0  ;;  %v950_v44 = vmul.f32 %v3726_v39, %v2896_v25  ;;  %v5182_v0 = vld [vmem:[#allocation36_spill] sm:$0xff] }
 0x175   :  { %v423_v56 = vadd.f32 %v359_v22, %v247_v3  ;;  %v374_v50 = vmul.f32 %v5170_v36, %v2900_v27  ;;  %v163_v30 = vmul.f32 %v3853_v20, %v2894_v24  ;;  %v677_v57 = vmax.f32 %v613_v31, 0.0  ;;  %v5183_v31 = vld [vmem:[#allocation37_spill] sm:$0xff] }
 0x176   :  { %v3897_v59 = vpop.xlane.xlu1 %757  ;;  %v1014_v1 = vadd.f32 %v950_v44, %v5137_v26  ;;  %v1094_v9 = vmul.f32 %v3760_v37, %v2900_v27  ;;  %v936_v47 = vmul.f32 %v5182_v0, %v5171_v54  ;;  %v600_v25 = vadd.f32 %v536_v55, %v424_v32 }
 0x177   :  { %5180 = vst [vmem:[#allocation30_spill] sm:$0xff] %v3897_v59  ;;  %v599_v59 = vadd.f32 %v535_v14, %v423_v56  ;;  %v620_v22 = vadd.f32 %v556_v28, %v444_v8  ;;  %v1080_v44 = vmul.f32 %v5183_v31, %v5178_v13  ;;  %v438_v27 = vadd.f32 %v374_v50, %v262_v16  ;;  %v2740_v14 = vld [vmem:[%s4934_s0 + $0x14] ss:$0 sm:$0xff]  ;;  %v3947_v16 = vld [vmem:[%s4934_s0 + $0x3c] ss:$0 sm:$0xff] }
 0x178   :  { %1477 = vadd.xlane.f32.xlu2 %v1364_v60  ;;  %735 = vadd.xlane.f32.xlu0 %v649_v12  ;;  %v379_v12 = vmul.f32 %v3858_v33, %v2985_v4  ;;  %v935_v60 = vmul.f32 %v5182_v0, %v2888_v21  ;;  %v267_v26 = vadd.f32 %v2884_v19, %v163_v30  ;;  %v664_v0 = vmax.f32 %v600_v25, 0.0 }
 0x179   :  { %v921_v55 = vmul.f32 %v2740_v14, %v5165_v48  ;;  %v922_v56 = vmul.f32 %v2740_v14, %v5129_v38  ;;  %v1000_v8 = vadd.f32 %v936_v47, %v2956_v52  ;;  %v949_v28 = vmul.f32 %v3726_v39, %v2892_v23  ;;  %5184 = vst [vmem:[#allocation17_spill] sm:$0xff] %v3947_v16 }
 0x17a   :  { %v999_v32 = vadd.f32 %v935_v60, %v3075_v49  ;;  %v663_v30 = vmax.f32 %v599_v59, 0.0  ;;  %v550_v60 = vmul.f32 %v5175_v5, %v5159_v51  ;;  %v443_v33 = vadd.f32 %v379_v12, %v267_v26  ;;  %v3979_v12 = vld [vmem:[%s4934_s0 + $0x3e] ss:$0 sm:$0xff] }
 0x17b   :  { %v3926_v36 = vpop.xlane.xlu2 %745  ;;  %791 = vadd.xlane.f32.xlu1 %v677_v57  ;;  %v3928_v3 = vpop.xlane.xlu0 %755  ;;  %v3939_v57 = vadd.f32 %v1094_v9, %v1014_v1  ;;  %v3954_v1 = vld [vmem:[%s4934_s0 + $0x3d] ss:$0 sm:$0xff]  ;;  %v1079_v9 = vmul.f32 %v5183_v31, %v3041_v63  ;;  %v986_v14 = vadd.f32 %v922_v56, %v5131_v11  ;;  %v3961_v39 = vadd.f32 %v1080_v44, %v1000_v8  ;;  %v2742_v44 = vld [vmem:[%s4934_s0 + $0x15] ss:$0 sm:$0xff] }
 0x17c   :  { %v684_v25 = vmax.f32 %v620_v22, 0.0  ;;  %v555_v26 = vmul.f32 %v3888_v2, %v2974_v62  ;;  %v1093_v5 = vmul.f32 %v3760_v37, %v5153_v61  ;;  %v5185_v22 = vld [vmem:[#allocation22_spill] sm:$0xff]  ;;  %v1066_v56 = vmul.f32 %v2742_v44, %v3422_v41 }
 0x17d   :  { %v1223_v31 = vmul.f32 %v5185_v22, %v3260_v10  ;;  %v1013_v8 = vadd.f32 %v949_v28, %v5156_v7  ;;  %v956_v37 = vmul.f32 %v3947_v16, %v5158_v45  ;;  %v3994_v2 = vmul.f32 %v3954_v1, %v5161_v35  ;;  %v5187_v45 = vld [vmem:[#allocation25_spill] sm:$0xff] }
 0x17e   :  { %v1404_v50 = vpop.xlane.xlu1 %1403  ;;  %v1143_v10 = vadd.f32 %v1079_v9, %v999_v32  ;;  %v1065_v20 = vmul.f32 %v2742_v44, %v5167_v17  ;;  %v1130_v23 = vadd.f32 %v1066_v56, %v986_v14  ;;  %v985_v35 = vadd.f32 %v921_v55, %v5168_v18 }
 0x17f   :  { %v3956_v47 = vadd.f32 %v1404_v50, %v716_v43  ;;  %v3970_v43 = vld [vmem:[%s4934_s0 + $0x18] ss:$0 sm:$0xff]  ;;  %v955_v50 = vmul.f32 %v3947_v16, %v2894_v24  ;;  %v2743_v24 = vld [vmem:[%s4934_s0 + $0x16] ss:$0 sm:$0xff]  ;;  %v1157_v14 = vadd.f32 %v1093_v5, %v1013_v8 }
 0x180   :  { %763 = vadd.xlane.f32.xlu2 %v663_v30  ;;  %765 = vadd.xlane.f32.xlu0 %v664_v0  ;;  %v3974_v59 = vmul.f32 %v3970_v43, %v5165_v48  ;;  %v614_v30 = vadd.f32 %v550_v60, %v438_v27  ;;  %v619_v0 = vadd.f32 %v555_v26, %v443_v33  ;;  %v5186_v33 = vld [vmem:[#allocation8_spill] sm:$0xff] }
 0x181   :  { %v1210_v27 = vmul.f32 %v2743_v24, %v3424_v53  ;;  %v1287_v32 = vadd.f32 %v1223_v31, %v1143_v10  ;;  %v1209_v9 = vmul.f32 %v2743_v24, %v3317_v46  ;;  %v5188_v26 = vld [vmem:[#allocation24_spill] sm:$0xff]  ;;  %v4021_v8 = vadd.f32 %v955_v50, %v2884_v19 }
 0x182   :  { %v1237_v44 = vmul.f32 %v5188_v26, %v2965_v58  ;;  %v678_v53 = vmax.f32 %v614_v30, 0.0 }
 0x183   :  { %v1388_v22 = vpop.xlane.xlu2 %1387  ;;  %805 = vadd.xlane.f32.xlu1 %v684_v25  ;;  %v1390_v61 = vpop.xlane.xlu0 %1389  ;;  %v4006_v25 = vmul.f32 %v3979_v12, %v5163_v29  ;;  %v1274_v55 = vadd.f32 %v1210_v27, %v1130_v23  ;;  %v1238_v29 = vmul.f32 %v5188_v26, %v5159_v51  ;;  %v1351_v30 = vmax.f32 %v1287_v32, 0.0  ;;  %v5190_v23 = vld [vmem:[#allocation39_spill] sm:$0xff]  ;;  %v4031_v27 = vld [vmem:[%s4934_s0 + $0x26] ss:$0 sm:$0xff]  ;;  %v5216_v26 = vld [vmem:[#allocation17_spill] sm:$0xff] }
 0x184   :  { %v1511_v28 = vadd.f32 %v1388_v22, %v5186_v33  ;;  %v1512_v60 = vadd.f32 %v1390_v61, %v5187_v45  ;;  %v683_v22 = vmax.f32 %v619_v0, 0.0  ;;  %v1129_v33 = vadd.f32 %v1065_v20, %v985_v35  ;;  %v5189_v45 = vld [vmem:[#allocation18_spill] sm:$0xff]  ;;  %5191 = vst [vmem:[#allocation14_spill] sm:$0xff] %v4031_v27 }
 0x185   :  { %v4015_v10 = vadd.s32 4294967264, %v5189_v45  ;;  %v4018_v5 = vadd.s32 4294967256, %v5189_v45  ;;  %v4026_v20 = vmul.f32 %v5190_v23, %v5171_v54  ;;  %v4035_v19 = vadd.f32 %v1237_v44, %v1157_v14 }
 0x186   :  { %v1575_v56 = vmul.f32 0.00390625, %v1511_v28  ;;  %v1576_v16 = vmul.f32 0.00390625, %v1512_v60  ;;  %v1434_v7 = vpop.xlane.xlu1 %1433  ;;  %v1273_v0 = vadd.f32 %v1209_v9, %v1129_v33  ;;  %v1302_v50 = vadd.f32 %v1238_v29, %v3939_v57 }
 0x187   :  { %v1534_v61 = vadd.f32 %v1434_v7, %v3926_v36  ;;  %v1020_v7 = vadd.f32 %v956_v37, %v5162_v40  ;;  %v1338_v40 = vmax.f32 %v1274_v55, 0.0  ;;  %v1735_v9 = vunpack.c.l.b16 %v3860_v15 }
 0x188   :  { %v1637_v31 = vpack.c.bf16 %v1576_v16, %v1575_v56  ;;  %793 = vadd.xlane.f32.xlu2 %v678_v53  ;;  %803 = vadd.xlane.f32.xlu0 %v683_v22  ;;  %v1224_v53 = vmul.f32 %v4031_v27, %v3245_v42  ;;  %v1736_v14 = vunpack.c.h.b16 %v3860_v15  ;;  %v1583_v44 = vmul.f32 0.00390625, %v3956_v47  ;;  %v5192_v22 = vld [vmem:[#allocation40_spill] sm:$0xff]  ;;  %v2745_v15 = vld [vmem:[%s4934_s0 + $0x19] ss:$0 sm:$0xff] }
 0x189   :  { %v1337_v56 = vmax.f32 %v1273_v0, 0.0  ;;  %v1598_v55 = vmul.f32 0.00390625, %v1534_v61  ;;  %v1099_v47 = vmul.f32 %v3954_v1, %v2985_v4  ;;  %v5214_v27 = vld [vmem:[#allocation9_spill] sm:$0xff] }
 0x18a   :  { %v1715_v36 = vunpack.c.l.b16 %v1637_v31  ;;  %v1716_v24 = vunpack.c.h.b16 %v1637_v31  ;;  %v1288_v23 = vadd.f32 %v1224_v53, %v3961_v39  ;;  %v1365_v39 = vmax.f32 %v4035_v19, 0.0 }
 0x18b   :  { %v1406_v16 = vpop.xlane.xlu2 %1405  ;;  %1451 = vadd.xlane.f32.xlu1 %v1351_v30  ;;  %v1432_v37 = vpop.xlane.xlu0 %1431 }
 0x18c   :  { %v1791_v28 = vperm.slane %v1715_v36, %v4015_v10  ;;  %v1795_v60 = vperm.slane %v1716_v24, %v4018_v5  ;;  %v1520_v35 = vadd.f32 %v1406_v16, %v3881_v34  ;;  %v1533_v32 = vadd.f32 %v1432_v37, %v3840_v6  ;;  %v5194_v24 = vld [vmem:[#allocation19_spill] sm:$0xff]  ;;  %v2746_v37 = vld [vmem:[%s4934_s0 + $0x1a] ss:$0 sm:$0xff] }
 0x18d   :  { %v241_v6 = vadd.f32 %v5168_v18, %v3974_v59  ;;  %v353_v34 = vmul.f32 %v2745_v15, %v5167_v17  ;;  %v1836_v36 = vperm.slane %v1735_v9, %v5189_v45  ;;  %v1837_v16 = vperm.slane %v1736_v14, %v5194_v24 }
 0x18e   :  { %v1793_v33 = vsel %vm1792_vm3, %v1791_v28, %v5192_v22  ;;  %v1584_v57 = vmul.f32 0.00390625, %v1520_v35  ;;  %v1597_v29 = vmul.f32 0.00390625, %v1533_v32  ;;  %v4047_v31 = vpop.xlane.xlu1 %731  ;;  %v1366_v59 = vmax.f32 %v1302_v50, 0.0  ;;  %v4072_v50 = vld [vmem:[%s4934_s0 + $0x29] ss:$0 sm:$0xff] }
 0x18f   :  { %v4050_v30 = vsel %vm1796_vm4, %v1795_v60, %v1793_v33  ;;  %v529_v28 = vmul.f32 %v2746_v37, %v3317_v46  ;;  %v417_v53 = vadd.f32 %v353_v34, %v241_v6  ;;  %v1164_v9 = vadd.f32 %v3994_v2, %v1020_v7  ;;  %5195 = vst [vmem:[#allocation31_spill] sm:$0xff] %v4072_v50  ;;  %v5196_v33 = vld [vmem:[#allocation28_spill] sm:$0xff]  ;;  %v5198_v7 = vld [vmem:[#allocation30_spill] sm:$0xff] }
 0x190   :  { %5193 = vst [vmem:[#allocation35_spill] sm:$0xff] %v4050_v30  ;;  %v1641_v61 = vpack.c.bf16 %v1584_v57, %v1583_v44  ;;  %v1648_v0 = vpack.c.bf16 %v1598_v55, %v1597_v29  ;;  %1423 = vadd.xlane.f32.xlu2 %v1337_v56  ;;  %1425 = vadd.xlane.f32.xlu0 %v1338_v40  ;;  %v5197_v57 = vld [vmem:[#allocation29_spill] sm:$0xff] }
 0x191   :  { %v368_v14 = vmul.f32 %v4072_v50, %v5178_v13  ;;  %v1838_v19 = vsel %vm1780_vm0, %v1837_v16, %v1836_v36  ;;  %v593_v34 = vadd.f32 %v529_v28, %v417_v53  ;;  %v1243_v28 = vmul.f32 %v3979_v12, %v2974_v62 }
 0x192   :  { %v1723_v60 = vunpack.c.l.b16 %v1641_v61  ;;  %v1724_v35 = vunpack.c.h.b16 %v1641_v61  ;;  %v1737_v4 = vunpack.c.l.b16 %v1648_v0  ;;  %v1738_v32 = vunpack.c.h.b16 %v1648_v0  ;;  %v5199_v61 = vld [vmem:[#allocation41_spill] sm:$0xff] }
 0x193   :  { %v1444_v44 = vpop.xlane.xlu2 %1443  ;;  %1481 = vadd.xlane.f32.xlu1 %v1366_v59  ;;  %v1446_v40 = vpop.xlane.xlu0 %1445 }
 0x194   :  { %v1813_v56 = vperm.slane %v1723_v60, %v4015_v10  ;;  %v1815_v22 = vperm.slane %v1724_v35, %v4018_v5  ;;  %v1839_v55 = vperm.slane %v1737_v4, %v5196_v33  ;;  %v1841_v29 = vperm.slane %v1738_v32, %v5197_v57 }
 0x195   :  { %v1539_v2 = vadd.f32 %v1444_v44, %v3928_v3  ;;  %v1540_v6 = vadd.f32 %v1446_v40, %v5198_v7  ;;  %v1352_v60 = vmax.f32 %v1288_v23, 0.0  ;;  %v1163_v35 = vadd.f32 %v1099_v47, %v4021_v8  ;;  %v4107_v40 = vld [vmem:[%s4934_s0 + $0x2a] ss:$0 sm:$0xff] }
 0x196   :  { %v1814_v0 = vsel %vm1792_vm3, %v1813_v56, %v5199_v61  ;;  %v1840_v59 = vsel %vm1784_vm1, %v1839_v55, %v1838_v19  ;;  %v4086_v30 = vpop.xlane.xlu1 %761  ;;  %v1308_v32 = vadd.f32 %v4006_v25, %v1164_v9  ;;  %v138_v23 = vmul.f32 %v3970_v43, %v5129_v38  ;;  %5202 = vst [vmem:[#allocation37_spill] sm:$0xff] %v4107_v40  ;;  %v2750_v19 = vld [vmem:[%s4934_s0 + $0x1c] ss:$0 sm:$0xff] }
 0x197   :  { %v4090_v4 = vsel %vm1796_vm4, %v1815_v22, %v1814_v0  ;;  %v4093_v36 = vsel %vm1788_vm2, %v1841_v29, %v1840_v59  ;;  %v1603_v3 = vmul.f32 0.00390625, %v1539_v2  ;;  %v1604_v16 = vmul.f32 0.00390625, %v1540_v6  ;;  %v5204_v6 = vld [vmem:[#allocation4_spill] sm:$0xff]  ;;  %v5206_v0 = vld [vmem:[#allocation5_spill] sm:$0xff] }
 0x198   :  { %5200 = vst [vmem:[#allocation23_spill] sm:$0xff] %v4090_v4  ;;  %1453 = vadd.xlane.f32.xlu2 %v1352_v60  ;;  %1479 = vadd.xlane.f32.xlu0 %v1365_v39  ;;  %v657_v8 = vmax.f32 %v593_v34, 0.0  ;;  %v256_v47 = vadd.f32 %v2956_v52, %v4026_v20  ;;  %v544_v39 = vmul.f32 %v4107_v40, %v3245_v42  ;;  %v4119_v20 = vld [vmem:[%s4934_s0 + $0x28] ss:$0 sm:$0xff]  ;;  %v1372_v22 = vmax.f32 %v1308_v32, 0.0  ;;  %v5205_v34 = vld [vmem:[#allocation21_spill] sm:$0xff] }
 0x199   :  { %5201 = vst [vmem:[#allocation36_spill] sm:$0xff] %v4093_v36  ;;  %v4100_v44 = vpack.c.bf16 %v1604_v16, %v1603_v3  ;;  %v1307_v62 = vadd.f32 %v1243_v28, %v1163_v35  ;;  %v242_v25 = vadd.f32 %v5131_v11, %v138_v23  ;;  %v151_v56 = vmul.f32 %v4119_v20, %v2888_v21  ;;  %v5207_v3 = vld [vmem:[#allocation38_spill] sm:$0xff]  ;;  %v5212_v36 = vld [vmem:[#allocation7_spill] sm:$0xff] }
 0x19a   :  { %v432_v9 = vadd.f32 %v368_v14, %v256_v47  ;;  %5203 = vst [vmem:[#allocation22_spill] sm:$0xff] %v4119_v20  ;;  %v354_v55 = vmul.f32 %v2745_v15, %v3422_v41  ;;  %v367_v29 = vmul.f32 %v4072_v50, %v3041_v63  ;;  %v929_v14 = vmul.f32 %v2750_v19, %v5165_v48  ;;  %v5208_v28 = vld [vmem:[#allocation34_spill] sm:$0xff]  ;;  %v2751_v47 = vld [vmem:[%s4934_s0 + $0x1d] ss:$0 sm:$0xff] }
 0x19b   :  { %v4112_v53 = vpop.xlane.xlu2 %733  ;;  %751 = vadd.xlane.f32.xlu1 %v657_v8  ;;  %v4114_v43 = vpop.xlane.xlu0 %759  ;;  %v255_v7 = vadd.f32 %v3075_v49, %v151_v56  ;;  %v165_v61 = vmul.f32 %v5205_v34, %v5204_v6  ;;  %v166_v59 = vmul.f32 %v5205_v34, %v5206_v0  ;;  %v1371_v15 = vmax.f32 %v1307_v62, 0.0  ;;  %v5210_v56 = vld [vmem:[#allocation11_spill] sm:$0xff] }
 0x19c   :  { %v608_v2 = vadd.f32 %v544_v39, %v432_v9  ;;  %v418_v35 = vadd.f32 %v354_v55, %v242_v25  ;;  %v530_v16 = vmul.f32 %v2746_v37, %v5207_v3  ;;  %v543_v32 = vmul.f32 %v4107_v40, %v5208_v28  ;;  %v5209_v9 = vld [vmem:[#allocation16_spill] sm:$0xff]  ;;  %v5211_v25 = vld [vmem:[#allocation10_spill] sm:$0xff]  ;;  %v5213_v40 = vld [vmem:[#allocation3_spill] sm:$0xff] }
 0x19d   :  { %v993_v8 = vadd.f32 %v929_v14, %v5168_v18  ;;  %v1073_v39 = vmul.f32 %v2751_v47, %v5167_v17  ;;  %v381_v62 = vmul.f32 %v5210_v56, %v5209_v9  ;;  %v431_v37 = vadd.f32 %v367_v29, %v255_v7  ;;  %v2752_v14 = vld [vmem:[%s4934_s0 + $0x1e] ss:$0 sm:$0xff] }
 0x19e   :  { %v1420_v60 = vpop.xlane.xlu1 %1419  ;;  %v270_v55 = vadd.f32 %v5211_v25, %v166_v59  ;;  %v1217_v4 = vmul.f32 %v2752_v14, %v3317_v46  ;;  %v269_v50 = vadd.f32 %v5213_v40, %v165_v61  ;;  %v557_v34 = vmul.f32 %v5214_v27, %v2965_v58 }
 0x19f   :  { %v4139_v23 = vadd.f32 %v1420_v60, %v4047_v31  ;;  %v382_v31 = vmul.f32 %v5210_v56, %v5212_v36  ;;  %v672_v60 = vmax.f32 %v608_v2, 0.0  ;;  %v1137_v59 = vadd.f32 %v1073_v39, %v993_v8  ;;  %v4165_v56 = vld [vmem:[%s4934_s0 + $0x2c] ss:$0 sm:$0xff] }
 0x1a0   :  { %1491 = vadd.xlane.f32.xlu2 %v1371_v15  ;;  %1493 = vadd.xlane.f32.xlu0 %v1372_v22  ;;  %v594_v15 = vadd.f32 %v530_v16, %v418_v35  ;;  %v607_v22 = vadd.f32 %v543_v32, %v431_v37  ;;  %v445_v2 = vadd.f32 %v381_v62, %v269_v50  ;;  %v4176_v50 = vld [vmem:[%s4934_s0 + $0x2d] ss:$0 sm:$0xff] }
 0x1a1   :  { %5215 = vst [vmem:[#allocation8_spill] sm:$0xff] %v4165_v56  ;;  %v944_v61 = vmul.f32 %v4165_v56, %v5171_v54  ;;  %v446_v20 = vadd.f32 %v382_v31, %v270_v55  ;;  %v957_v35 = vmul.f32 %v5216_v26, %v5204_v6  ;;  %v1281_v16 = vadd.f32 %v1217_v4, %v1137_v59  ;;  %v4188_v31 = vld [vmem:[%s4934_s0 + $0x2e] ss:$0 sm:$0xff] }
 0x1a2   :  { %v621_v32 = vadd.f32 %v557_v34, %v445_v2  ;;  %v558_v37 = vmul.f32 %v5214_v27, %v5159_v51  ;;  %v1088_v8 = vmul.f32 %v4176_v50, %v5178_v13  ;;  %v658_v62 = vmax.f32 %v594_v15, 0.0 }
 0x1a3   :  { %v4158_v29 = vpop.xlane.xlu2 %771  ;;  %781 = vadd.xlane.f32.xlu1 %v672_v60  ;;  %v4160_v7 = vpop.xlane.xlu0 %773  ;;  %v671_v60 = vmax.f32 %v607_v22, 0.0  ;;  %v930_v55 = vmul.f32 %v2750_v19, %v5129_v38  ;;  %v1101_v4 = vmul.f32 %v3954_v1, %v5209_v9  ;;  %v1008_v34 = vadd.f32 %v944_v61, %v2956_v52  ;;  %v5217_v9 = vld [vmem:[#allocation2_spill] sm:$0xff] }
 0x1a4   :  { %v1232_v59 = vmul.f32 %v4188_v31, %v3245_v42  ;;  %v943_v15 = vmul.f32 %v4165_v56, %v2888_v21  ;;  %v1021_v22 = vadd.f32 %v957_v35, %v5213_v40  ;;  %v1345_v2 = vmax.f32 %v1281_v16, 0.0 }
 0x1a5   :  { %v994_v19 = vadd.f32 %v930_v55, %v5131_v11  ;;  %v622_v61 = vadd.f32 %v558_v37, %v446_v20  ;;  %v685_v52 = vmax.f32 %v621_v32, 0.0  ;;  %v1074_v42 = vmul.f32 %v2751_v47, %v3422_v41 }
 0x1a6   :  { %v1450_v39 = vpop.xlane.xlu1 %1449  ;;  %v1007_v27 = vadd.f32 %v943_v15, %v3075_v49  ;;  %v4201_v56 = vadd.f32 %v1101_v4, %v1021_v22  ;;  %v1245_v40 = vmul.f32 %v3979_v12, %v2965_v58  ;;  %v958_v20 = vmul.f32 %v5216_v26, %v5206_v0 }
 0x1a7   :  { %v1542_v6 = vadd.f32 %v1450_v39, %v4086_v30  ;;  %v145_v30 = vmul.f32 %v5217_v9, %v5165_v48  ;;  %v1152_v39 = vadd.f32 %v1088_v8, %v1008_v34  ;;  %v1087_v48 = vmul.f32 %v4176_v50, %v3041_v63 }
 0x1a8   :  { %753 = vadd.xlane.f32.xlu2 %v658_v62  ;;  %779 = vadd.xlane.f32.xlu0 %v671_v60  ;;  %v1138_v16 = vadd.f32 %v1074_v42, %v994_v19  ;;  %v1218_v32 = vmul.f32 %v2752_v14, %v5207_v3  ;;  %v1743_v37 = vunpack.c.l.b16 %v4100_v44  ;;  %v1744_v8 = vunpack.c.h.b16 %v4100_v44  ;;  %v5219_v42 = vld [vmem:[#allocation12_spill] sm:$0xff] }
 0x1a9   :  { %v249_v38 = vadd.f32 %v5168_v18, %v145_v30  ;;  %v1296_v55 = vadd.f32 %v1232_v59, %v1152_v39  ;;  %v686_v4 = vmax.f32 %v622_v61, 0.0  ;;  %v1231_v34 = vmul.f32 %v4188_v31, %v5208_v28  ;;  %v4226_v44 = vld [vmem:[%s4934_s0 + $0x30] ss:$0 sm:$0xff] }
 0x1aa   :  { %v1591_v58 = vmul.f32 0.00390625, %v4139_v23  ;;  %v1606_v59 = vmul.f32 0.00390625, %v1542_v6  ;;  %v1102_v14 = vmul.f32 %v3954_v1, %v5212_v36  ;;  %v160_v23 = vmul.f32 %v4226_v44, %v5171_v54  ;;  %v5220_v36 = vld [vmem:[#allocation27_spill] sm:$0xff] }
 0x1ab   :  { %v1422_v62 = vpop.xlane.xlu2 %1421  ;;  %1439 = vadd.xlane.f32.xlu1 %v1345_v2  ;;  %v1448_v60 = vpop.xlane.xlu0 %1447  ;;  %v1360_v22 = vmax.f32 %v1296_v55, 0.0  ;;  %v1852_v2 = vperm.slane %v1744_v8, %v5194_v24  ;;  %v537_v39 = vmul.f32 %v5220_v36, %v3317_v46  ;;  %v1246_v55 = vmul.f32 %v3979_v12, %v5159_v51 }
 0x1ac   :  { %v1528_v35 = vadd.f32 %v1422_v62, %v4112_v53  ;;  %v1541_v47 = vadd.f32 %v1448_v60, %v4114_v43  ;;  %v1151_v53 = vadd.f32 %v1087_v48, %v1007_v27  ;;  %v361_v43 = vmul.f32 %v5219_v42, %v5167_v17 }
 0x1ad   :  { %v1282_v48 = vadd.f32 %v1218_v32, %v1138_v16  ;;  %v1851_v27 = vperm.slane %v1743_v37, %v5189_v45  ;;  %v4240_v16 = vld [vmem:[%s4934_s0 + $0x31] ss:$0 sm:$0xff] }
 0x1ae   :  { %v1592_v15 = vmul.f32 0.00390625, %v1528_v35  ;;  %v1605_v0 = vmul.f32 0.00390625, %v1541_v47  ;;  %v4217_v30 = vpop.xlane.xlu1 %703  ;;  %v1295_v61 = vadd.f32 %v1231_v34, %v1151_v53  ;;  %v376_v32 = vmul.f32 %v4240_v16, %v5178_v13 }
 0x1af   :  { %5218 = vst [vmem:[#allocation25_spill] sm:$0xff] %v4217_v30 }
 0x1b0   :  { %v1645_v6 = vpack.c.bf16 %v1592_v15, %v1591_v58  ;;  %v1652_v19 = vpack.c.bf16 %v1606_v59, %v1605_v0  ;;  %807 = vadd.xlane.f32.xlu2 %v685_v52  ;;  %809 = vadd.xlane.f32.xlu0 %v686_v4  ;;  %v425_v59 = vadd.f32 %v361_v43, %v249_v38  ;;  %v5221_v15 = vld [vmem:[#allocation6_spill] sm:$0xff] }
 0x1b1   :  { %v1022_v52 = vadd.f32 %v958_v20, %v5211_v25  ;;  %v1853_v25 = vsel %vm1780_vm0, %v1852_v2, %v1851_v27  ;;  %v5224_v2 = vld [vmem:[#allocation20_spill] sm:$0xff] }
 0x1b2   :  { %v1731_v62 = vunpack.c.l.b16 %v1645_v6  ;;  %v1732_v60 = vunpack.c.h.b16 %v1645_v6  ;;  %v1745_v35 = vunpack.c.l.b16 %v1652_v19  ;;  %v1746_v47 = vunpack.c.h.b16 %v1652_v19 }
 0x1b3   :  { %v1460_v30 = vpop.xlane.xlu2 %1459  ;;  %1469 = vadd.xlane.f32.xlu1 %v1360_v22  ;;  %v1462_v58 = vpop.xlane.xlu0 %1461  ;;  %v601_v34 = vadd.f32 %v537_v39, %v425_v59  ;;  %v1346_v6 = vmax.f32 %v1282_v48, 0.0  ;;  %v1359_v19 = vmax.f32 %v1295_v61, 0.0  ;;  %v146_v39 = vmul.f32 %v5217_v9, %v5224_v2  ;;  %v5226_v61 = vld [vmem:[#allocation15_spill] sm:$0xff] }
 0x1b4   :  { %v1828_v37 = vperm.slane %v1731_v62, %v4015_v10  ;;  %v1830_v8 = vperm.slane %v1732_v60, %v4018_v5  ;;  %v1854_v4 = vperm.slane %v1745_v35, %v5196_v33  ;;  %v1856_v38 = vperm.slane %v1746_v47, %v5197_v57  ;;  %v4271_v47 = vld [vmem:[%s4934_s0 + $0x32] ss:$0 sm:$0xff]  ;;  %v5240_v33 = vld [vmem:[#allocation37_spill] sm:$0xff] }
 0x1b5   :  { %v1547_v51 = vadd.f32 %v1460_v30, %v4158_v29  ;;  %v1548_v20 = vadd.f32 %v1462_v58, %v4160_v7  ;;  %v1309_v7 = vadd.f32 %v1245_v40, %v4201_v56  ;;  %v1166_v30 = vadd.f32 %v1102_v14, %v1022_v52  ;;  %v5227_v58 = vld [vmem:[#allocation33_spill] sm:$0xff] }
 0x1b6   :  { %v1829_v0 = vsel %vm1792_vm3, %v1828_v37, %v5221_v15  ;;  %v1855_v53 = vsel %vm1784_vm1, %v1854_v4, %v1853_v25  ;;  %v4254_v43 = vpop.xlane.xlu1 %721  ;;  %v665_v48 = vmax.f32 %v601_v34, 0.0  ;;  %v264_v35 = vadd.f32 %v5226_v61, %v160_v23  ;;  %v5229_v15 = vld [vmem:[#allocation26_spill] sm:$0xff] }
 0x1b7   :  { %v4257_v22 = vsel %vm1796_vm4, %v1830_v8, %v1829_v0  ;;  %v4260_v62 = vsel %vm1788_vm2, %v1856_v38, %v1855_v53  ;;  %v1611_v27 = vmul.f32 0.00390625, %v1547_v51  ;;  %v1612_v29 = vmul.f32 0.00390625, %v1548_v20  ;;  %v5230_v0 = vld [vmem:[#allocation32_spill] sm:$0xff] }
 0x1b8   :  { %5222 = vst [vmem:[#allocation18_spill] sm:$0xff] %v4257_v22  ;;  %1441 = vadd.xlane.f32.xlu2 %v1346_v6  ;;  %1467 = vadd.xlane.f32.xlu0 %v1359_v19  ;;  %v552_v59 = vmul.f32 %v4271_v47, %v5227_v58  ;;  %v1310_v37 = vadd.f32 %v1246_v55, %v1166_v30  ;;  %v1373_v4 = vmax.f32 %v1309_v7, 0.0  ;;  %v2759_v6 = vld [vmem:[%s4934_s0 + $0x24] ss:$0 sm:$0xff]  ;;  %v5231_v30 = vld [vmem:[#allocation24_spill] sm:$0xff] }
 0x1b9   :  { %5223 = vst [vmem:[#allocation39_spill] sm:$0xff] %v4260_v62  ;;  %v4265_v60 = vpack.c.bf16 %v1612_v29, %v1611_v27  ;;  %v250_v56 = vadd.f32 %v5131_v11, %v146_v39  ;;  %v440_v14 = vadd.f32 %v376_v32, %v264_v35  ;;  %v159_v23 = vmul.f32 %v4226_v44, %v2888_v21 }
 0x1ba   :  { %v362_v52 = vmul.f32 %v5219_v42, %v3422_v41  ;;  %v375_v8 = vmul.f32 %v4240_v16, %v3041_v63  ;;  %v1374_v51 = vmax.f32 %v1310_v37, 0.0  ;;  %v538_v32 = vmul.f32 %v5220_v36, %v5207_v3  ;;  %v5232_v37 = vld [vmem:[#allocation13_spill] sm:$0xff] }
 0x1bb   :  { %5225 = vst [vmem:[#allocation40_spill] sm:$0xff] %v4265_v60  ;;  %v4276_v40 = vpop.xlane.xlu2 %705  ;;  %767 = vadd.xlane.f32.xlu1 %v665_v48  ;;  %v4278_v9 = vpop.xlane.xlu0 %719  ;;  %v616_v38 = vadd.f32 %v552_v59, %v440_v14  ;;  %v263_v55 = vadd.f32 %v3075_v49, %v159_v23  ;;  %v551_v34 = vmul.f32 %v4271_v47, %v5208_v28 }
 0x1bc   :  { %v426_v20 = vadd.f32 %v362_v52, %v250_v56  ;;  %v951_v42 = vmul.f32 %v5229_v15, %v2888_v21  ;;  %v1095_v53 = vmul.f32 %v5230_v0, %v3041_v63  ;;  %v938_v19 = vmul.f32 %v2759_v6, %v5224_v2 }
 0x1bd   :  { %v439_v27 = vadd.f32 %v375_v8, %v263_v55  ;;  %v952_v36 = vmul.f32 %v5229_v15, %v5171_v54  ;;  %v680_v29 = vmax.f32 %v616_v38, 0.0  ;;  %v1239_v39 = vmul.f32 %v5231_v30, %v5208_v28  ;;  %v2760_v8 = vld [vmem:[%s4934_s0 + $0x25] ss:$0 sm:$0xff] }
 0x1be   :  { %v4287_v25 = vpop.xlane.xlu1 %775  ;;  %v1015_v7 = vadd.f32 %v951_v42, %v3075_v49  ;;  %v1002_v48 = vadd.f32 %v938_v19, %v5131_v11  ;;  %v602_v35 = vadd.f32 %v538_v32, %v426_v20  ;;  %v937_v56 = vmul.f32 %v2759_v6, %v5232_v37  ;;  %v5233_v38 = vld [vmem:[#allocation22_spill] sm:$0xff] }
 0x1bf   :  { %5228 = vst [vmem:[#allocation30_spill] sm:$0xff] %v4287_v25  ;;  %v615_v59 = vadd.f32 %v551_v34, %v439_v27  ;;  %v154_v55 = vmul.f32 %v5233_v38, %v5224_v2  ;;  %v1081_v20 = vmul.f32 %v2760_v8, %v5167_v17  ;;  %v1016_v32 = vadd.f32 %v952_v36, %v5226_v61 }
 0x1c0   :  { %1495 = vadd.xlane.f32.xlu2 %v1373_v4  ;;  %1497 = vadd.xlane.f32.xlu0 %v1374_v51  ;;  %v1159_v52 = vadd.f32 %v1095_v53, %v1015_v7  ;;  %v1082_v4 = vmul.f32 %v2760_v8, %v3422_v41  ;;  %v1001_v51 = vadd.f32 %v937_v56, %v5168_v18  ;;  %v5234_v53 = vld [vmem:[#allocation21_spill] sm:$0xff]  ;;  %v666_v27 = vmax.f32 %v602_v35, 0.0  ;;  %v5236_v7 = vld [vmem:[#allocation14_spill] sm:$0xff]  ;;  %v5237_v8 = vld [vmem:[#allocation31_spill] sm:$0xff] }
 0x1c1   :  { %v258_v42 = vadd.f32 %v5131_v11, %v154_v55  ;;  %v168_v6 = vmul.f32 %v5234_v53, %v5171_v54  ;;  %v1225_v62 = vmul.f32 %v5236_v7, %v3317_v46  ;;  %v1226_v56 = vmul.f32 %v5236_v7, %v5207_v3  ;;  %v5239_v55 = vld [vmem:[#allocation11_spill] sm:$0xff] }
 0x1c2   :  { %v1303_v34 = vadd.f32 %v1239_v39, %v1159_v52  ;;  %v1146_v15 = vadd.f32 %v1082_v4, %v1002_v48  ;;  %v370_v36 = vmul.f32 %v5237_v8, %v3422_v41  ;;  %v1096_v39 = vmul.f32 %v5230_v0, %v5178_v13  ;;  %v5238_v52 = vld [vmem:[#allocation8_spill] sm:$0xff] }
 0x1c3   :  { %v4308_v14 = vpop.xlane.xlu2 %747  ;;  %797 = vadd.xlane.f32.xlu1 %v680_v29  ;;  %v4310_v23 = vpop.xlane.xlu0 %749  ;;  %v679_v29 = vmax.f32 %v615_v59, 0.0  ;;  %v153_v48 = vmul.f32 %v5233_v38, %v5232_v37  ;;  %v945_v4 = vmul.f32 %v5238_v52, %v5232_v37  ;;  %v1145_v35 = vadd.f32 %v1081_v20, %v1001_v51  ;;  %v5241_v51 = vld [vmem:[#allocation9_spill] sm:$0xff] }
 0x1c4   :  { %v167_v59 = vmul.f32 %v5234_v53, %v2888_v21  ;;  %v384_v7 = vmul.f32 %v5239_v55, %v5178_v13  ;;  %v1367_v22 = vmax.f32 %v1303_v34, 0.0  ;;  %v434_v57 = vadd.f32 %v370_v36, %v258_v42 }
 0x1c5   :  { %v546_v0 = vmul.f32 %v5240_v33, %v5207_v3  ;;  %v1240_v38 = vmul.f32 %v5231_v30, %v5227_v58  ;;  %v1290_v24 = vadd.f32 %v1226_v56, %v1146_v15  ;;  %v560_v20 = vmul.f32 %v5241_v51, %v5227_v58 }
 0x1c6   :  { %v4324_v19 = vpop.xlane.xlu1 %789  ;;  %v1160_v34 = vadd.f32 %v1096_v39, %v1016_v32  ;;  %v257_v42 = vadd.f32 %v5168_v18, %v153_v48  ;;  %v1009_v36 = vadd.f32 %v945_v4, %v5168_v18  ;;  %v960_v30 = vmul.f32 %v5216_v26, %v5171_v54 }
 0x1c7   :  { %5235 = vst [vmem:[#allocation41_spill] sm:$0xff] %v4324_v19  ;;  %v1289_v19 = vadd.f32 %v1225_v62, %v1145_v35  ;;  %v369_v62 = vmul.f32 %v5237_v8, %v5167_v17  ;;  %v1089_v15 = vmul.f32 %v4176_v50, %v5167_v17  ;;  %v610_v56 = vadd.f32 %v546_v0, %v434_v57 }
 0x1c8   :  { %769 = vadd.xlane.f32.xlu2 %v666_v27  ;;  %795 = vadd.xlane.f32.xlu0 %v679_v29  ;;  %v272_v27 = vadd.f32 %v5226_v61, %v168_v6  ;;  %v383_v6 = vmul.f32 %v5239_v55, %v3041_v63  ;;  %v1304_v35 = vadd.f32 %v1240_v38, %v1160_v34  ;;  %v1354_v54 = vmax.f32 %v1290_v24, 0.0 }
 0x1c9   :  { %v271_v32 = vadd.f32 %v3075_v49, %v167_v59  ;;  %v1104_v39 = vmul.f32 %v3954_v1, %v5178_v13  ;;  %v1353_v4 = vmax.f32 %v1289_v19, 0.0  ;;  %v545_v8 = vmul.f32 %v5240_v33, %v3317_v46 }
 0x1ca   :  { %v1248_v57 = vmul.f32 %v3979_v12, %v5227_v58  ;;  %v959_v59 = vmul.f32 %v5216_v26, %v2888_v21  ;;  %v433_v13 = vadd.f32 %v369_v62, %v257_v42  ;;  %v1153_v24 = vadd.f32 %v1089_v15, %v1009_v36  ;;  %v2761_v36 = vld [vmem:[%s4934_s0 + $0x34] ss:$0 sm:$0xff]  ;;  %v5243_v62 = vld [vmem:[#allocation25_spill] sm:$0xff] }
 0x1cb   :  { %v4349_v29 = vpop.xlane.xlu2 %777  ;;  %1483 = vadd.xlane.f32.xlu1 %v1367_v22  ;;  %v4351_v60 = vpop.xlane.xlu0 %787  ;;  %v448_v22 = vadd.f32 %v384_v7, %v272_v27  ;;  %v1024_v7 = vadd.f32 %v960_v30, %v5226_v61  ;;  %v447_v19 = vadd.f32 %v383_v6, %v271_v32  ;;  %v674_v0 = vmax.f32 %v610_v56, 0.0 }
 0x1cc   :  { %5242 = vst [vmem:[#allocation4_spill] sm:$0xff] %v4349_v29  ;;  %v1368_v33 = vmax.f32 %v1304_v35, 0.0  ;;  %v1233_v38 = vmul.f32 %v4188_v31, %v3317_v46  ;;  %v609_v27 = vadd.f32 %v545_v8, %v433_v13  ;;  %v946_v58 = vmul.f32 %v5238_v52, %v5224_v2  ;;  %v4395_v52 = vld [vmem:[%s4934_s0 + $0x35] ss:$0 sm:$0xff] }
 0x1cd   :  { %v4368_v29 = vadd.f32 %v560_v20, %v448_v22  ;;  %v1090_v21 = vmul.f32 %v4176_v50, %v3422_v41  ;;  %v1023_v42 = vadd.f32 %v959_v59, %v3075_v49  ;;  %v953_v30 = vmul.f32 %v2761_v36, %v5232_v37 }
 0x1ce   :  { %v1408_v48 = vpop.xlane.xlu1 %1407  ;;  %v1097_v50 = vmul.f32 %v4395_v52, %v5167_v17  ;;  %v1103_v49 = vmul.f32 %v3954_v1, %v3041_v63  ;;  %v161_v22 = vmul.f32 %v4226_v44, %v5232_v37  ;;  %v1297_v56 = vadd.f32 %v1233_v38, %v1153_v24 }
 0x1cf   :  { %v4371_v25 = vadd.f32 %v1408_v48, %v4278_v9  ;;  %v1168_v9 = vadd.f32 %v1104_v39, %v1024_v7  ;;  %v688_v61 = vmax.f32 %v4368_v29, 0.0  ;;  %v559_v35 = vmul.f32 %v5241_v51, %v5208_v28 }
 0x1d0   :  { %1455 = vadd.xlane.f32.xlu2 %v1353_v4  ;;  %1457 = vadd.xlane.f32.xlu0 %v1354_v54  ;;  %v1010_v32 = vadd.f32 %v946_v58, %v5131_v11  ;;  %v377_v39 = vmul.f32 %v4240_v16, %v5167_v17  ;;  %v673_v8 = vmax.f32 %v609_v27, 0.0  ;;  %v265_v1 = vadd.f32 %v5168_v18, %v161_v22 }
 0x1d1   :  { %v4385_v34 = vadd.f32 %v1248_v57, %v1168_v9  ;;  %v162_v7 = vmul.f32 %v4226_v44, %v5224_v2  ;;  %v378_v51 = vmul.f32 %v4240_v16, %v3422_v41  ;;  %v4418_v57 = vadd.s32 4294967248, %v5189_v45 }
 0x1d2   :  { %v4421_v59 = vadd.s32 4294967240, %v5189_v45  ;;  %v1167_v24 = vadd.f32 %v1103_v49, %v1023_v42  ;;  %v1154_v38 = vadd.f32 %v1090_v21, %v1010_v32  ;;  %v1234_v9 = vmul.f32 %v4188_v31, %v5207_v3  ;;  %v5244_v49 = vld [vmem:[#allocation35_spill] sm:$0xff] }
 0x1d3   :  { %v1392_v26 = vpop.xlane.xlu2 %1391  ;;  %785 = vadd.xlane.f32.xlu1 %v674_v0  ;;  %v1394_v20 = vpop.xlane.xlu0 %1393  ;;  %v1361_v0 = vmax.f32 %v1297_v56, 0.0  ;;  %v4425_v16 = vadd.f32 %v377_v39, %v265_v1 }
 0x1d4   :  { %v1513_v15 = vadd.f32 %v1392_v26, %v5243_v62  ;;  %v1514_v6 = vadd.f32 %v1394_v20, %v4276_v40  ;;  %v1017_v40 = vadd.f32 %v953_v30, %v5168_v18 }
 0x1d6   :  { %v1577_v48 = vmul.f32 0.00390625, %v1513_v15  ;;  %v1578_v4 = vmul.f32 0.00390625, %v1514_v6  ;;  %v1438_v54 = vpop.xlane.xlu1 %1437  ;;  %v1161_v58 = vadd.f32 %v1097_v50, %v1017_v40  ;;  %v1585_v50 = vmul.f32 0.00390625, %v4371_v25 }
 0x1d7   :  { %v1536_v63 = vadd.f32 %v1438_v54, %v4310_v23  ;;  %v623_v23 = vadd.f32 %v559_v35, %v447_v19  ;;  %v170_v19 = vmul.f32 %v5234_v53, %v5224_v2  ;;  %v1298_v15 = vadd.f32 %v1234_v9, %v1154_v38 }
 0x1d8   :  { %v1638_v13 = vpack.c.bf16 %v1578_v4, %v1577_v48  ;;  %1485 = vadd.xlane.f32.xlu2 %v1368_v33  ;;  %783 = vadd.xlane.f32.xlu0 %v673_v8  ;;  %v1247_v33 = vmul.f32 %v3979_v12, %v5208_v28  ;;  %v954_v6 = vmul.f32 %v2761_v36, %v5224_v2  ;;  %v1376_v36 = vmax.f32 %v4385_v34, 0.0 }
 0x1d9   :  { %v687_v62 = vmax.f32 %v623_v23, 0.0  ;;  %v1600_v28 = vmul.f32 0.00390625, %v1536_v63  ;;  %v386_v48 = vmul.f32 %v5239_v55, %v3422_v41  ;;  %v1362_v4 = vmax.f32 %v1298_v15, 0.0 }
 0x1da   :  { %v1717_v44 = vunpack.c.l.b16 %v1638_v13  ;;  %v1718_v27 = vunpack.c.h.b16 %v1638_v13  ;;  %v274_v8 = vadd.f32 %v5131_v11, %v170_v19  ;;  %v1018_v40 = vadd.f32 %v954_v6, %v5131_v11 }
 0x1db   :  { %v1410_v26 = vpop.xlane.xlu2 %1409  ;;  %1471 = vadd.xlane.f32.xlu1 %v1361_v0  ;;  %v1436_v20 = vpop.xlane.xlu0 %1435  ;;  %v553_v55 = vmul.f32 %v4271_v47, %v3317_v46  ;;  %v554_v0 = vmul.f32 %v4271_v47, %v5207_v3 }
 0x1dc   :  { %v1799_v21 = vperm.slane %v1717_v44, %v4418_v57  ;;  %v1803_v31 = vperm.slane %v1718_v27, %v4421_v59  ;;  %v1522_v42 = vadd.f32 %v1410_v26, %v4254_v43  ;;  %v1535_v30 = vadd.f32 %v1436_v20, %v4308_v14  ;;  %v5245_v27 = vld [vmem:[#allocation30_spill] sm:$0xff]  ;;  %v5246_v20 = vld [vmem:[#allocation4_spill] sm:$0xff] }
 0x1dd   :  { %v1311_v43 = vadd.f32 %v1247_v33, %v1167_v24  ;;  %v266_v14 = vadd.f32 %v5131_v11, %v162_v7 }
 0x1de   :  { %v1801_v12 = vsel %vm1800_vm5, %v1799_v21, %v5244_v49  ;;  %v1586_v22 = vmul.f32 0.00390625, %v1522_v42  ;;  %v1599_v53 = vmul.f32 0.00390625, %v1535_v30  ;;  %v1476_v56 = vpop.xlane.xlu1 %1475  ;;  %v5247_v21 = vld [vmem:[#allocation40_spill] sm:$0xff]  ;;  %v5248_v42 = vld [vmem:[#allocation23_spill] sm:$0xff] }
 0x1df   :  { %v1805_v35 = vsel %vm1804_vm6, %v1803_v31, %v1801_v12  ;;  %v4441_v32 = vadd.f32 %v1476_v56, %v4351_v60  ;;  %v2763_v60 = vld [vmem:[%s4934_s0 + $0x36] ss:$0 sm:$0xff]  ;;  %v1375_v13 = vmax.f32 %v1311_v43, 0.0  ;;  %v442_v24 = vadd.f32 %v378_v51, %v266_v14 }
 0x1e0   :  { %v1642_v25 = vpack.c.bf16 %v1586_v22, %v1585_v50  ;;  %v1649_v39 = vpack.c.bf16 %v1600_v28, %v1599_v53  ;;  %811 = vadd.xlane.f32.xlu2 %v687_v62  ;;  %813 = vadd.xlane.f32.xlu0 %v688_v61  ;;  %v1241_v54 = vmul.f32 %v2763_v60, %v3317_v46  ;;  %v1751_v31 = vunpack.c.l.b16 %v5247_v21  ;;  %v5249_v30 = vld [vmem:[#allocation36_spill] sm:$0xff]  ;;  %v2764_v22 = vld [vmem:[%s4934_s0 + $0x3a] ss:$0 sm:$0xff] }
 0x1e1   :  { %v1752_v51 = vunpack.c.h.b16 %v5247_v21  ;;  %v450_v28 = vadd.f32 %v386_v48, %v274_v8  ;;  %v562_v53 = vmul.f32 %v2764_v22, %v5207_v3  ;;  %v618_v14 = vadd.f32 %v554_v0, %v442_v24 }
 0x1e2   :  { %v1725_v63 = vunpack.c.l.b16 %v1642_v25  ;;  %v1726_v1 = vunpack.c.h.b16 %v1642_v25  ;;  %v1739_v29 = vunpack.c.l.b16 %v1649_v39  ;;  %v1740_v61 = vunpack.c.h.b16 %v1649_v39  ;;  %v2765_v25 = vld [vmem:[%s4934_s0 + $0x38] ss:$0 sm:$0xff] }
 0x1e3   :  { %v1464_v7 = vpop.xlane.xlu2 %1463  ;;  %1501 = vadd.xlane.f32.xlu1 %v1376_v36  ;;  %v1466_v34 = vpop.xlane.xlu0 %1465  ;;  %v1305_v19 = vadd.f32 %v1241_v54, %v1161_v58  ;;  %v169_v39 = vmul.f32 %v2765_v25, %v5232_v37  ;;  %v5250_v36 = vld [vmem:[#allocation19_spill] sm:$0xff]  ;;  %v617_v48 = vadd.f32 %v553_v55, %v4425_v16  ;;  %v1098_v54 = vmul.f32 %v4395_v52, %v3422_v41  ;;  %v5252_v52 = vld [vmem:[#allocation28_spill] sm:$0xff] }
 0x1e4   :  { %v1817_v23 = vperm.slane %v1725_v63, %v4418_v57  ;;  %v1819_v38 = vperm.slane %v1726_v1, %v4421_v59  ;;  %v1843_v9 = vperm.slane %v1739_v29, %v4015_v10  ;;  %v1845_v44 = vperm.slane %v1740_v61, %v4018_v5 }
 0x1e5   :  { %v1549_v26 = vadd.f32 %v1464_v7, %v5245_v27  ;;  %v1550_v33 = vadd.f32 %v1466_v34, %v5246_v20  ;;  %v1369_v43 = vmax.f32 %v1305_v19, 0.0  ;;  %v273_v61 = vadd.f32 %v5168_v18, %v169_v39  ;;  %v2766_v7 = vld [vmem:[%s4934_s0 + $0x39] ss:$0 sm:$0xff] }
 0x1e6   :  { %v1818_v47 = vsel %vm1800_vm5, %v1817_v23, %v5248_v42  ;;  %v1844_v50 = vsel %vm1792_vm3, %v1843_v9, %v5249_v30  ;;  %v4471_v62 = vpop.xlane.xlu1 %737  ;;  %v385_v34 = vmul.f32 %v2766_v7, %v5167_v17  ;;  %v626_v0 = vadd.f32 %v562_v53, %v450_v28  ;;  %v2767_v42 = vld [vmem:[%s4934_s0 + $0x3c] ss:$0 sm:$0xff] }
 0x1e7   :  { %v1820_v15 = vsel %vm1804_vm6, %v1819_v38, %v1818_v47  ;;  %v4475_v6 = vsel %vm1796_vm4, %v1845_v44, %v1844_v50  ;;  %v1613_v49 = vmul.f32 0.00390625, %v1549_v26  ;;  %v1614_v12 = vmul.f32 0.00390625, %v1550_v33  ;;  %v5253_v38 = vld [vmem:[#allocation29_spill] sm:$0xff] }
 0x1e8   :  { %v4477_v58 = vsel %vm1911_vm7, %v1820_v15, %v1805_v35  ;;  %1473 = vadd.xlane.f32.xlu2 %v1362_v4  ;;  %1499 = vadd.xlane.f32.xlu0 %v1375_v13  ;;  %v1866_v35 = vperm.slane %v1751_v31, %v5189_v45  ;;  %v1867_v4 = vperm.slane %v1752_v51, %v5250_v36  ;;  %v5251_v13 = vld [vmem:[#allocation41_spill] sm:$0xff]  ;;  %v682_v44 = vmax.f32 %v618_v14, 0.0 }
 0x1e9   :  { %v1656_v56 = vpack.c.bf16 %v1614_v12, %v1613_v49  ;;  %v1162_v16 = vadd.f32 %v1098_v54, %v1018_v40  ;;  %v1242_v55 = vmul.f32 %v2763_v60, %v5207_v3  ;;  %v561_v27 = vmul.f32 %v2764_v22, %v3317_v46  ;;  %v2768_v22 = vld [vmem:[%s4934_s0 + $0x3d] ss:$0 sm:$0xff] }
 0x1ea   :  { %v1868_v26 = vsel %vm1780_vm0, %v1867_v4, %v1866_v35  ;;  %v1619_v20 = vmul.f32 0.00390625, %v4441_v32  ;;  %v681_v21 = vmax.f32 %v617_v48, 0.0  ;;  %v449_v51 = vadd.f32 %v385_v34, %v273_v61 }
 0x1eb   :  { %v1753_v8 = vunpack.c.l.b16 %v1656_v56  ;;  %v1754_v63 = vunpack.c.h.b16 %v1656_v56  ;;  %v1478_v1 = vpop.xlane.xlu2 %1477  ;;  %1487 = vadd.xlane.f32.xlu1 %v1369_v43  ;;  %v736_v29 = vpop.xlane.xlu0 %735  ;;  %v962_v47 = vmul.f32 %v2767_v42, %v5224_v2  ;;  %v690_v32 = vmax.f32 %v626_v0, 0.0 }
 0x1ec   :  { %v1556_v24 = vadd.f32 %v1478_v1, %v5251_v13  ;;  %v1306_v30 = vadd.f32 %v1242_v55, %v1162_v16  ;;  %v625_v50 = vadd.f32 %v561_v27, %v449_v51  ;;  %v961_v28 = vmul.f32 %v2767_v42, %v5232_v37 }
 0x1ed   :  { %v1869_v23 = vperm.slane %v1753_v8, %v5252_v52  ;;  %v1871_v9 = vperm.slane %v1754_v63, %v5253_v38  ;;  %v1026_v15 = vadd.f32 %v962_v47, %v5131_v11  ;;  %v1105_v53 = vmul.f32 %v2768_v22, %v5167_v17  ;;  %v2769_v11 = vld [vmem:[%s4934_s0 + $0x3e] ss:$0 sm:$0xff] }
 0x1ee   :  { %v1620_v33 = vmul.f32 0.00390625, %v1556_v24  ;;  %v792_v19 = vpop.xlane.xlu1 %791  ;;  %v1106_v56 = vmul.f32 %v2768_v22, %v3422_v41  ;;  %v1370_v43 = vmax.f32 %v1306_v30, 0.0  ;;  %v1025_v2 = vadd.f32 %v961_v28, %v5168_v18 }
 0x1ef   :  { %v1870_v31 = vsel %vm1784_vm1, %v1869_v23, %v1868_v26  ;;  %v689_v25 = vmax.f32 %v625_v50, 0.0  ;;  %v1249_v37 = vmul.f32 %v2769_v11, %v3317_v46  ;;  %v1250_v35 = vmul.f32 %v2769_v11, %v5207_v3 }
 0x1f0   :  { %v4506_v40 = vsel %vm1788_vm2, %v1871_v9, %v1870_v31  ;;  %v4508_v60 = vpack.c.bf16 %v1620_v33, %v1619_v20  ;;  %799 = vadd.xlane.f32.xlu2 %v681_v21  ;;  %801 = vadd.xlane.f32.xlu0 %v682_v44  ;;  %v1170_v39 = vadd.f32 %v1106_v56, %v1026_v15  ;;  %v5254_v31 = vld [vmem:[#allocation18_spill] sm:$0xff] }
 0x1f1   :  { %v1169_v17 = vadd.f32 %v1105_v53, %v1025_v2 }
 0x1f2   :  { %v1314_v41 = vadd.f32 %v1250_v35, %v1170_v39  ;;  %v1759_v21 = vunpack.c.l.b16 %v4508_v60 }
 0x1f3   :  { %v764_v49 = vpop.xlane.xlu2 %763  ;;  %817 = vadd.xlane.f32.xlu1 %v690_v32  ;;  %v766_v12 = vpop.xlane.xlu0 %765  ;;  %v1313_v4 = vadd.f32 %v1249_v37, %v1169_v17 }
 0x1f4   :  { %v1378_v63 = vmax.f32 %v1314_v41, 0.0 }
 0x1f5   :  { %v1377_v8 = vmax.f32 %v1313_v4, 0.0  ;;  %v5255_v4 = vld [vmem:[#allocation39_spill] sm:$0xff] }
 0x1f6   :  { %v4522_v14 = vpop.xlane.xlu1 %805 }
 0x1f8   :  { %1489 = vadd.xlane.f32.xlu2 %v1370_v43  ;;  %815 = vadd.xlane.f32.xlu0 %v689_v25 }
 0x1fb   :  { %v794_v48 = vpop.xlane.xlu2 %793  ;;  %v804_v54 = vpop.xlane.xlu0 %803 }
 0x1fe   :  { %v1452_v18 = vpop.xlane.xlu1 %1451 }
 0x1ff   :  { %v1543_v1 = vadd.f32 %v1452_v18, %v764_v49 }
 0x200   :  { %1503 = vadd.xlane.f32.xlu2 %v1377_v8  ;;  %1505 = vadd.xlane.f32.xlu0 %v1378_v63 }
 0x203   :  { %v1424_v61 = vpop.xlane.xlu2 %1423  ;;  %v1426_v7 = vpop.xlane.xlu0 %1425 }
 0x204   :  { %v1529_v34 = vadd.f32 %v1424_v61, %v736_v29  ;;  %v1530_v46 = vadd.f32 %v1426_v7, %v4471_v62  ;;  %v1760_v29 = vunpack.c.h.b16 %v4508_v60  ;;  %v1607_v62 = vmul.f32 0.00390625, %v1543_v1 }
 0x206   :  { %v1593_v13 = vmul.f32 0.00390625, %v1529_v34  ;;  %v1594_v3 = vmul.f32 0.00390625, %v1530_v46  ;;  %v1482_v24 = vpop.xlane.xlu1 %1481  ;;  %v1882_v60 = vperm.slane %v1760_v29, %v5250_v36 }
 0x207   :  { %v1558_v0 = vadd.f32 %v1482_v24, %v794_v48 }
 0x208   :  { %v1646_v16 = vpack.c.bf16 %v1594_v3, %v1593_v13 }
 0x209   :  { %v1622_v42 = vmul.f32 0.00390625, %v1558_v0 }
 0x20a   :  { %v1733_v55 = vunpack.c.l.b16 %v1646_v16  ;;  %v1734_v23 = vunpack.c.h.b16 %v1646_v16 }
 0x20b   :  { %v1454_v9 = vpop.xlane.xlu2 %1453  ;;  %v1480_v44 = vpop.xlane.xlu0 %1479 }
 0x20c   :  { %v1832_v27 = vperm.slane %v1733_v55, %v4418_v57  ;;  %v1834_v26 = vperm.slane %v1734_v23, %v4421_v59  ;;  %v1544_v20 = vadd.f32 %v1454_v9, %v766_v12  ;;  %v1557_v33 = vadd.f32 %v1480_v44, %v792_v19 }
 0x20d   :  { %v1881_v12 = vperm.slane %v1759_v21, %v5189_v45 }
 0x20e   :  { %v1833_v51 = vsel %vm1800_vm5, %v1832_v27, %v5254_v31  ;;  %v1608_v47 = vmul.f32 0.00390625, %v1544_v20  ;;  %v1621_v32 = vmul.f32 0.00390625, %v1557_v33  ;;  %v752_v30 = vpop.xlane.xlu1 %751 }
 0x20f   :  { %v1835_v50 = vsel %vm1804_vm6, %v1834_v26, %v1833_v51  ;;  %v1883_v39 = vsel %vm1780_vm0, %v1882_v60, %v1881_v12 }
 0x210   :  { %v4538_v15 = vsel %vm1913_vm8, %v1835_v50, %v4477_v58  ;;  %v1653_v49 = vpack.c.bf16 %v1608_v47, %v1607_v62  ;;  %v1660_v19 = vpack.c.bf16 %v1622_v42, %v1621_v32 }
 0x212   :  { %v1747_v28 = vunpack.c.l.b16 %v1653_v49  ;;  %v1748_v22 = vunpack.c.h.b16 %v1653_v49  ;;  %v1761_v53 = vunpack.c.l.b16 %v1660_v19  ;;  %v1762_v56 = vunpack.c.h.b16 %v1660_v19 }
 0x213   :  { %v1492_v43 = vpop.xlane.xlu2 %1491  ;;  %v1494_v2 = vpop.xlane.xlu0 %1493 }
 0x214   :  { %v1858_v25 = vperm.slane %v1747_v28, %v4015_v10  ;;  %v1860_v11 = vperm.slane %v1748_v22, %v4018_v5  ;;  %v1884_v37 = vperm.slane %v1761_v53, %v5252_v52  ;;  %v1886_v58 = vperm.slane %v1762_v56, %v5253_v38 }
 0x215   :  { %v1563_v35 = vadd.f32 %v1492_v43, %v804_v54  ;;  %v1564_v17 = vadd.f32 %v1494_v2, %v4522_v14 }
 0x216   :  { %v1859_v41 = vsel %vm1792_vm3, %v1858_v25, %v5255_v4  ;;  %v1885_v48 = vsel %vm1784_vm1, %v1884_v37, %v1883_v39  ;;  %v782_v18 = vpop.xlane.xlu1 %781 }
 0x217   :  { %v4552_v8 = vsel %vm1796_vm4, %v1860_v11, %v1859_v41  ;;  %v4555_v63 = vsel %vm1788_vm2, %v1886_v58, %v1885_v48  ;;  %v1627_v1 = vmul.f32 0.00390625, %v1563_v35  ;;  %v1628_v61 = vmul.f32 0.00390625, %v1564_v17 }
 0x219   :  { %v1663_v7 = vpack.c.bf16 %v1628_v61, %v1627_v1 }
 0x21b   :  { %v754_v34 = vpop.xlane.xlu2 %753  ;;  %v780_v46 = vpop.xlane.xlu0 %779  ;;  %v1767_v28 = vunpack.c.l.b16 %v1663_v7  ;;  %v1768_v22 = vunpack.c.h.b16 %v1663_v7 }
 0x21d   :  { %v1896_v39 = vperm.slane %v1767_v28, %v5189_v45  ;;  %v1897_v35 = vperm.slane %v1768_v22, %v5250_v36  ;;  %v2595_v22 = vld [vmem:[%s4936_s3 + $0x8] sm:$0xff] }
 0x21e   :  { %v1440_v54 = vpop.xlane.xlu1 %1439 }
 0x21f   :  { %v1537_v13 = vadd.f32 %v1440_v54, %v752_v30 }
 0x221   :  { %v1601_v44 = vmul.f32 0.00390625, %v1537_v13 }
 0x223   :  { %v808_v14 = vpop.xlane.xlu2 %807  ;;  %v810_v3 = vpop.xlane.xlu0 %809 }
 0x226   :  { %v1470_v24 = vpop.xlane.xlu1 %1469 }
 0x227   :  { %v1552_v0 = vadd.f32 %v1470_v24, %v782_v18  ;;  %v1898_v18 = vsel %vm1780_vm0, %v1897_v35, %v1896_v39  ;;  %v2452_v39 = vld [vmem:[%s4937_s5 + $0x60] sm:$0xf]  ;;  %v2611_v35 = vld [vmem:[%s4937_s5 + $0x64] sm:$0xf0] }
 0x229   :  { %v1616_v27 = vmul.f32 0.00390625, %v1552_v0 }
 0x22b   :  { %v1442_v16 = vpop.xlane.xlu2 %1441  ;;  %v1468_v55 = vpop.xlane.xlu0 %1467 }
 0x22c   :  { %v1538_v23 = vadd.f32 %v1442_v16, %v754_v34  ;;  %v1551_v9 = vadd.f32 %v1468_v55, %v780_v46 }
 0x22e   :  { %v1602_v26 = vmul.f32 0.00390625, %v1538_v23  ;;  %v1615_v20 = vmul.f32 0.00390625, %v1551_v9  ;;  %v768_v33 = vpop.xlane.xlu1 %767 }
 0x230   :  { %v1650_v21 = vpack.c.bf16 %v1602_v26, %v1601_v44  ;;  %v1657_v29 = vpack.c.bf16 %v1616_v27, %v1615_v20 }
 0x232   :  { %v1741_v62 = vunpack.c.l.b16 %v1650_v21  ;;  %v1742_v31 = vunpack.c.h.b16 %v1650_v21  ;;  %v1755_v51 = vunpack.c.l.b16 %v1657_v29  ;;  %v1756_v42 = vunpack.c.h.b16 %v1657_v29  ;;  %v2597_v29 = vld [vmem:[%s4936_s3 + $0x18] sm:$0xff] }
 0x233   :  { %v1496_v47 = vpop.xlane.xlu2 %1495  ;;  %v1498_v32 = vpop.xlane.xlu0 %1497  ;;  %1958 = vmatpush.bf16.msra.mxu0 %v2597_v29 }
 0x234   :  { %v1847_v30 = vperm.slane %v1741_v62, %v4418_v57  ;;  %v1849_v50 = vperm.slane %v1742_v31, %v4421_v59  ;;  %v1873_v49 = vperm.slane %v1755_v51, %v4015_v10  ;;  %v1875_v19 = vperm.slane %v1756_v42, %v4018_v5 }
 0x235   :  { %v1565_v12 = vadd.f32 %v1496_v47, %v808_v14  ;;  %v1566_v60 = vadd.f32 %v1498_v32, %v810_v3 }
 0x236   :  { %v1848_v53 = vsel %vm1800_vm5, %v1847_v30, %v4475_v6  ;;  %v1874_v56 = vsel %vm1792_vm3, %v1873_v49, %v4506_v40  ;;  %v798_v43 = vpop.xlane.xlu1 %797  ;;  %v2596_v30 = vld [vmem:[%s4936_s3 + $0x10] sm:$0xff] }
 0x237   :  { %v1850_v2 = vsel %vm1804_vm6, %v1849_v50, %v1848_v53  ;;  %v4567_v25 = vsel %vm1796_vm4, %v1875_v19, %v1874_v56  ;;  %v1629_v11 = vmul.f32 0.00390625, %v1565_v12  ;;  %v1630_v37 = vmul.f32 0.00390625, %v1566_v60  ;;  %1959 = vmatpush.bf16.msra.mxu0 %v2596_v30 }
 0x238   :  { %v1916_v50 = vsel %vm1915_vm9, %v1850_v2, %v4538_v15  ;;  %v2613_v15 = vld [vmem:[%s4937_s5 + $0x74] sm:$0xf0]  ;;  %v2612_v2 = vld [vmem:[%s4937_s5 + $0x74] sm:$0xf] }
 0x239   :  { %v1664_v58 = vpack.c.bf16 %v1630_v37, %v1629_v11 }
 0x23b   :  { %v1769_v17 = vunpack.c.l.b16 %v1664_v58  ;;  %v1770_v4 = vunpack.c.h.b16 %v1664_v58  ;;  %v770_v41 = vpop.xlane.xlu2 %769  ;;  %v796_v6 = vpop.xlane.xlu0 %795  ;;  %v2462_v58 = vld [vmem:[%s4937_s5 + $0x78] sm:$0xf0]  ;;  %1960 = vmatpush.bf16.msra.mxu0 %v2595_v22 }
 0x23d   :  { %v1899_v48 = vperm.slane %v1769_v17, %v5252_v52  ;;  %v1901_v40 = vperm.slane %v1770_v4, %v5253_v38  ;;  %v2465_v4 = vor.u32 %v2612_v2, %v2462_v58 }
 0x23e   :  { %v1484_v7 = vpop.xlane.xlu1 %1483 }
 0x23f   :  { %v1900_v1 = vsel %vm1784_vm1, %v1899_v48, %v1898_v18  ;;  %v1559_v62 = vadd.f32 %v1484_v7, %v796_v6  ;;  %v2454_v6 = vld [vmem:[%s4937_s5 + $0x68] sm:$0xf0]  ;;  %v2594_v7 = vld [vmem:[%s4936_s3] sm:$0xff]  ;;  %2085 = vmatpush.bf16.msra.mxu2 %v2465_v4 }
 0x240   :  { %v4576_v61 = vsel %vm1788_vm2, %v1901_v40, %v1900_v1  ;;  %1961 = vmatpush.bf16.msra.mxu0 %v2594_v7  ;;  %v2422_v4 = vld [vmem:[%s4937_s5 + $0x28] sm:$0xf0] }
 0x241   :  { %v1623_v19 = vmul.f32 0.00390625, %v1559_v62 }
 0x243   :  { %v1456_v34 = vpop.xlane.xlu2 %1455  ;;  %v1458_v45 = vpop.xlane.xlu0 %1457 }
 0x244   :  { %v1545_v46 = vadd.f32 %v1456_v34, %v768_v33  ;;  %v1546_v36 = vadd.f32 %v1458_v45, %v770_v41  ;;  %v2610_v41 = vld [vmem:[%s4937_s5 + $0x64] sm:$0xf]  ;;  %v2453_v45 = vor.u32 %v2611_v35, %v2452_v39  ;;  %v2603_v35 = vld [vmem:[%s4937_s5 + $0x24] sm:$0xf0] }
 0x246   :  { %v786_v54 = vpop.xlane.xlu1 %785  ;;  %v1609_v13 = vmul.f32 0.00390625, %v1545_v46  ;;  %v1610_v14 = vmul.f32 0.00390625, %v1546_v36  ;;  %v2457_v46 = vor.u32 %v2610_v41, %v2454_v6  ;;  %v2444_v36 = vld [vmem:[%s4937_s5 + $0x50] sm:$0xf] }
 0x248   :  { %v1654_v52 = vpack.c.bf16 %v1610_v14, %v1609_v13  ;;  %v2608_v14 = vld [vmem:[%s4937_s5 + $0x54] sm:$0xf]  ;;  %2086 = vmatpush.bf16.msra.mxu2 %v2457_v46 }
 0x24a   :  { %v1749_v0 = vunpack.c.l.b16 %v1654_v52  ;;  %v1750_v23 = vunpack.c.h.b16 %v1654_v52 }
 0x24b   :  { %v1486_v3 = vpop.xlane.xlu2 %1485  ;;  %v784_v24 = vpop.xlane.xlu0 %783 }
 0x24c   :  { %v1862_v9 = vperm.slane %v1749_v0, %v4418_v57  ;;  %v1864_v44 = vperm.slane %v1750_v23, %v4421_v59  ;;  %v1560_v51 = vadd.f32 %v1486_v3, %v798_v43  ;;  %v2460_v43 = vld [vmem:[%s4937_s5 + $0x70] sm:$0xf]  ;;  %v2446_v3 = vld [vmem:[%s4937_s5 + $0x58] sm:$0xf0] }
 0x24d   :  { %v2461_v17 = vor.u32 %v2613_v15, %v2460_v43 }
 0x24e   :  { %v1472_v55 = vpop.xlane.xlu1 %1471  ;;  %v1863_v26 = vsel %vm1800_vm5, %v1862_v9, %v4552_v8  ;;  %v1624_v12 = vmul.f32 0.00390625, %v1560_v51  ;;  %v2449_v9 = vor.u32 %v2608_v14, %v2446_v3 }
 0x24f   :  { %v1553_v27 = vadd.f32 %v1472_v55, %v784_v24  ;;  %v1865_v31 = vsel %vm1804_vm6, %v1864_v44, %v1863_v26  ;;  %2072 = vmatpush.bf16.msra.mxu1 %v2461_v17  ;;  %v2436_v44 = vld [vmem:[%s4937_s5 + $0x40] sm:$0xf]  ;;  %v2607_v26 = vld [vmem:[%s4937_s5 + $0x44] sm:$0xf0]  ;;  %v2602_v17 = vld [vmem:[%s4937_s5 + $0x24] sm:$0xf] }
 0x250   :  { %v1918_v49 = vsel %vm1917_vm10, %v1865_v31, %v1916_v50  ;;  %v1661_v48 = vpack.c.bf16 %v1624_v12, %v1623_v19  ;;  %2087 = vmatpush.bf16.msra.mxu2 %v2449_v9  ;;  %v2604_v50 = vld [vmem:[%s4937_s5 + $0x34] sm:$0xf]  ;;  %v2599_v9 = vld [vmem:[%s4937_s5 + $0x4] sm:$0xf0] }
 0x251   :  { %v1617_v42 = vmul.f32 0.00390625, %v1553_v27 }
 0x252   :  { %v1763_v24 = vunpack.c.l.b16 %v1661_v48 }
 0x253   :  { %v812_v38 = vpop.xlane.xlu2 %811  ;;  %v814_v16 = vpop.xlane.xlu0 %813  ;;  %2073 = vmatpush.bf16.msra.mxu1 %v2453_v45  ;;  %v2425_v45 = vor.u32 %v2602_v17, %v2422_v4  ;;  %v2500_v4 = vld [vmem:[%s4938_s7 + $0x40] sm:$0xf] }
 0x254   :  { %v1888_v29 = vperm.slane %v1763_v24, %v4015_v10 }
 0x256   :  { %v1502_v47 = vpop.xlane.xlu1 %1501  ;;  %v1889_v12 = vsel %vm1792_vm3, %v1888_v29, %v4555_v63  ;;  %v2628_v29 = vld [vmem:[%s4938_s7 + $0x74] sm:$0xf] }
 0x257   :  { %v1568_v40 = vadd.f32 %v1502_v47, %v814_v16 }
 0x25b   :  { %v1474_v20 = vpop.xlane.xlu2 %1473  ;;  %v1500_v33 = vpop.xlane.xlu0 %1499 }
 0x25c   :  { %v1554_v21 = vadd.f32 %v1474_v20, %v786_v54  ;;  %v1567_v1 = vadd.f32 %v1500_v33, %v812_v38  ;;  %v1632_v38 = vmul.f32 0.00390625, %v1568_v40  ;;  %v2606_v20 = vld [vmem:[%s4937_s5 + $0x44] sm:$0xf]  ;;  %v2438_v33 = vld [vmem:[%s4937_s5 + $0x48] sm:$0xf0] }
 0x25d   :  { %v2441_v47 = vor.u32 %v2606_v20, %v2438_v33  ;;  %v2524_v33 = vld [vmem:[%s4938_s7 + $0x70] sm:$0xf] }
 0x25e   :  { %v1618_v32 = vmul.f32 0.00390625, %v1554_v21  ;;  %v1488_v54 = vpop.xlane.xlu1 %1487  ;;  %v1631_v52 = vmul.f32 0.00390625, %v1567_v1  ;;  %v1764_v21 = vunpack.c.h.b16 %v1661_v48 }
 0x25f   :  { %2088 = vmatpush.bf16.msra.mxu2 %v2441_v47  ;;  %v2627_v47 = vld [vmem:[%s4938_s7 + $0x64] sm:$0xf0] }
 0x260   :  { %v1658_v8 = vpack.c.bf16 %v1618_v32, %v1617_v42  ;;  %v1665_v62 = vpack.c.bf16 %v1632_v38, %v1631_v52  ;;  %v2437_v42 = vor.u32 %v2607_v26, %v2436_v44  ;;  %v2428_v32 = vld [vmem:[%s4937_s5 + $0x30] sm:$0xf]  ;;  %v1890_v19 = vperm.slane %v1764_v21, %v4018_v5  ;;  %v2406_v26 = vld [vmem:[%s4937_s5 + $0x8] sm:$0xf0]  ;;  %v2629_v21 = vld [vmem:[%s4938_s7 + $0x74] sm:$0xf0] }
 0x262   :  { %v1757_v60 = vunpack.c.l.b16 %v1658_v8  ;;  %v1758_v28 = vunpack.c.h.b16 %v1658_v8  ;;  %v2605_v8 = vld [vmem:[%s4937_s5 + $0x34] sm:$0xf0]  ;;  %v1891_v41 = vsel %vm1796_vm4, %v1890_v19, %v1889_v12  ;;  %v1772_v6 = vunpack.c.h.b16 %v1665_v62  ;;  %v2644_v12 = vld [vmem:[%s4938_s7 + $0xf4] sm:$0xf] }
 0x263   :  { %v800_v53 = vpop.xlane.xlu2 %799  ;;  %v802_v56 = vpop.xlane.xlu0 %801  ;;  %v2429_v15 = vor.u32 %v2605_v8, %v2428_v32  ;;  %v2518_v8 = vld [vmem:[%s4938_s7 + $0x68] sm:$0xf0]  ;;  %v2645_v19 = vld [vmem:[%s4938_s7 + $0xf4] sm:$0xf0] }
 0x264   :  { %v1877_v11 = vperm.slane %v1757_v60, %v4418_v57  ;;  %v1879_v37 = vperm.slane %v1758_v28, %v4421_v59  ;;  %v1561_v0 = vadd.f32 %v1488_v54, %v800_v53  ;;  %v1771_v60 = vunpack.c.l.b16 %v1665_v62 }
 0x265   :  { %v1905_v54 = vperm.slane %v1772_v6, %v4018_v5  ;;  %v2572_v6 = vld [vmem:[%s4938_s7 + $0xd0] sm:$0xf] }
 0x266   :  { %v1878_v18 = vsel %vm1800_vm5, %v1877_v11, %v4567_v25  ;;  %v2609_v25 = vld [vmem:[%s4937_s5 + $0x54] sm:$0xf0]  ;;  %v1625_v31 = vmul.f32 0.00390625, %v1561_v0  ;;  %v818_v28 = vpop.xlane.xlu1 %817  ;;  %v2420_v11 = vld [vmem:[%s4937_s5 + $0x20] sm:$0xf]  ;;  %v1903_v48 = vperm.slane %v1771_v60, %v4015_v10 }
 0x267   :  { %v1880_v34 = vsel %vm1804_vm6, %v1879_v37, %v1878_v18  ;;  %v2445_v23 = vor.u32 %v2609_v25, %v2444_v36  ;;  %v2590_v60 = vld [vmem:[%s4938_s7 + $0xf8] sm:$0xf0] }
 0x268   :  { %v4629_v13 = vsel %vm1919_vm11, %v1880_v34, %v1918_v49  ;;  %v2430_v49 = vld [vmem:[%s4937_s5 + $0x38] sm:$0xf0]  ;;  %v2421_v34 = vor.u32 %v2603_v35, %v2420_v11  ;;  %v1904_v25 = vsel %vm1792_vm3, %v1903_v48, %v4576_v61  ;;  %v2412_v61 = vld [vmem:[%s4937_s5 + $0x10] sm:$0xf]  ;;  %v2643_v11 = vld [vmem:[%s4938_s7 + $0xe4] sm:$0xf0] }
 0x269   :  { %2074 = vmatpush.bf16.msra.mxu1 %v2445_v23  ;;  %v2433_v2 = vor.u32 %v2604_v50, %v2430_v49  ;;  %v1906_v52 = vsel %vm1796_vm4, %v1905_v54, %v1904_v25  ;;  %v2404_v23 = vld [vmem:[%s4937_s5] sm:$0xf]  ;;  %v2588_v50 = vld [vmem:[%s4938_s7 + $0xf0] sm:$0xf]  ;;  %v2641_v48 = vld [vmem:[%s4938_s7 + $0xd4] sm:$0xf0] }
 0x26a   :  { %v2405_v20 = vor.u32 %v2599_v9, %v2404_v23  ;;  %v2639_v25 = vld [vmem:[%s4938_s7 + $0xc4] sm:$0xf0]  ;;  %v2484_v23 = vld [vmem:[%s4938_s7 + $0x20] sm:$0xf] }
 0x26b   :  { %v1490_v16 = vpop.xlane.xlu2 %1489  ;;  %v816_v55 = vpop.xlane.xlu0 %815  ;;  %2089 = vmatpush.bf16.msra.mxu2 %v2433_v2  ;;  %v2580_v2 = vld [vmem:[%s4938_s7 + $0xe0] sm:$0xf]  ;;  %v2619_v9 = vld [vmem:[%s4938_s7 + $0x24] sm:$0xf0] }
 0x26c   :  { %v1562_v27 = vadd.f32 %v1490_v16, %v802_v56 }
 0x26d   :  { %2075 = vmatpush.bf16.msra.mxu1 %v2437_v42  ;;  %v2516_v42 = vld [vmem:[%s4938_s7 + $0x60] sm:$0xf] }
 0x26e   :  { %v1626_v51 = vmul.f32 0.00390625, %v1562_v27  ;;  %v2598_v27 = vld [vmem:[%s4937_s5 + $0x4] sm:$0xf]  ;;  %v2517_v49 = vor.u32 %v2627_v47, %v2516_v42 }
 0x26f   :  { %2090 = vmatpush.bf16.msra.mxu2 %v2425_v45  ;;  %v2409_v62 = vor.u32 %v2598_v27, %v2406_v26  ;;  %v2573_v45 = vor.u32 %v2641_v48, %v2572_v6  ;;  %v2618_v27 = vld [vmem:[%s4938_s7 + $0x24] sm:$0xf]  ;;  %v2486_v26 = vld [vmem:[%s4938_s7 + $0x28] sm:$0xf0]  ;;  %v2532_v6 = vld [vmem:[%s4938_s7 + $0x80] sm:$0xf] }
 0x270   :  { %v1662_v30 = vpack.c.bf16 %v1626_v51, %v1625_v31  ;;  %v2525_v31 = vor.u32 %v2629_v21, %v2524_v33  ;;  %v2526_v51 = vld [vmem:[%s4938_s7 + $0x78] sm:$0xf0]  ;;  %v2485_v21 = vor.u32 %v2619_v9, %v2484_v23  ;;  %v2631_v48 = vld [vmem:[%s4938_s7 + $0x84] sm:$0xf0] }
 0x271   :  { %2076 = vmatpush.bf16.msra.mxu1 %v2429_v15  ;;  %v2529_v32 = vor.u32 %v2628_v29, %v2526_v51  ;;  %v2624_v15 = vld [vmem:[%s4938_s7 + $0x54] sm:$0xf]  ;;  %v2719_v29 = vld [vmem:[%s4935_s4] ss:$0 sm:$0xff] }
 0x272   :  { %v1765_v22 = vunpack.c.l.b16 %v1662_v30  ;;  %v1766_v53 = vunpack.c.h.b16 %v1662_v30  ;;  %v2626_v30 = vld [vmem:[%s4938_s7 + $0x64] sm:$0xf]  ;;  %2300 = vmatpush.bf16.msra.mxu3 %v2525_v31 }
 0x273   :  { %v1504_v56 = vpop.xlane.xlu2 %1503  ;;  %v1506_v43 = vpop.xlane.xlu0 %1505 }
 0x274   :  { %v1892_v37 = vperm.slane %v1765_v22, %v4418_v57  ;;  %v1894_v58 = vperm.slane %v1766_v53, %v4421_v59  ;;  %v1569_v39 = vadd.f32 %v1504_v56, %v816_v55  ;;  %v1570_v63 = vadd.f32 %v1506_v43, %v818_v28  ;;  %v2414_v55 = vld [vmem:[%s4937_s5 + $0x18] sm:$0xf0]  ;;  %v2508_v53 = vld [vmem:[%s4938_s7 + $0x50] sm:$0xf]  ;;  %v2625_v56 = vld [vmem:[%s4938_s7 + $0x54] sm:$0xf0] }
 0x275   :  { %2077 = vmatpush.bf16.msra.mxu1 %v2421_v34  ;;  %v2589_v28 = vor.u32 %v2645_v19, %v2588_v50  ;;  %v2593_v22 = vor.u32 %v2644_v12, %v2590_v60  ;;  %v2521_v43 = vor.u32 %v2626_v30, %v2518_v8  ;;  %v2509_v35 = vor.u32 %v2625_v56, %v2508_v53  ;;  %v2502_v34 = vld [vmem:[%s4938_s7 + $0x48] sm:$0xf0]  ;;  %v2476_v30 = vld [vmem:[%s4938_s7 + $0x10] sm:$0xf]  ;;  %v2617_v8 = vld [vmem:[%s4938_s7 + $0x14] sm:$0xf0] }
 0x276   :  { %v1633_v40 = vmul.f32 0.00390625, %v1569_v39  ;;  %v1634_v18 = vmul.f32 0.00390625, %v1570_v63  ;;  %v1893_v1 = vsel %vm1800_vm5, %v1892_v37, %v1891_v41  ;;  %v2510_v37 = vld [vmem:[%s4938_s7 + $0x58] sm:$0xf0]  ;;  %v2642_v39 = vld [vmem:[%s4938_s7 + $0xe4] sm:$0xf]  ;;  %2301 = vmatpush.bf16.msra.mxu3 %v2517_v49  ;;  %v2477_v49 = vor.u32 %v2617_v8, %v2476_v30 }
 0x277   :  { %v1895_v7 = vsel %vm1804_vm6, %v1894_v58, %v1893_v1  ;;  %2313 = vmatpush.bf16.msrb.mxu0 %v2589_v28  ;;  %v2581_v58 = vor.u32 %v2643_v11, %v2580_v2  ;;  %v2582_v63 = vld [vmem:[%s4938_s7 + $0xe8] sm:$0xf0]  ;;  %v2623_v41 = vld [vmem:[%s4938_s7 + $0x44] sm:$0xf0]  ;;  %v2574_v1 = vld [vmem:[%s4938_s7 + $0xd8] sm:$0xf0] }
 0x278   :  { %v1666_v46 = vpack.c.bf16 %v1634_v18, %v1633_v40  ;;  %v1922_v36 = vsel %vm1921_vm12, %v1895_v7, %v4629_v13  ;;  %v2585_v17 = vor.u32 %v2642_v39, %v2582_v63  ;;  %v2640_v40 = vld [vmem:[%s4938_s7 + $0xd4] sm:$0xf]  ;;  %v2513_v18 = vor.u32 %v2624_v15, %v2510_v37  ;;  %v2622_v7 = vld [vmem:[%s4938_s7 + $0x44] sm:$0xf]  ;;  %v2478_v19 = vld [vmem:[%s4938_s7 + $0x18] sm:$0xf0] }
 0x279   :  { %v2501_v54 = vor.u32 %v2623_v41, %v2500_v4  ;;  %v2616_v50 = vld [vmem:[%s4938_s7 + $0x14] sm:$0xf]  ;;  %v2548_v12 = vld [vmem:[%s4938_s7 + $0xa0] sm:$0xf]  ;;  %v2635_v60 = vld [vmem:[%s4938_s7 + $0xa4] sm:$0xf0] }
 0x27a   :  { %v1773_v14 = vunpack.c.l.b16 %v1666_v46  ;;  %v1774_v10 = vunpack.c.h.b16 %v1666_v46  ;;  %v2577_v46 = vor.u32 %v2640_v40, %v2574_v1  ;;  %2302 = vmatpush.bf16.msra.mxu3 %v2509_v35  ;;  %v2481_v28 = vor.u32 %v2616_v50, %v2478_v19  ;;  %v2634_v53 = vld [vmem:[%s4938_s7 + $0xa4] sm:$0xf]  ;;  %v2550_v56 = vld [vmem:[%s4938_s7 + $0xa8] sm:$0xf0]  ;;  %v2615_v2 = vld [vmem:[%s4938_s7 + $0x4] sm:$0xf0] }
 0x27b   :  { %2314 = vmatpush.bf16.msrb.mxu0 %v2581_v58  ;;  %v2553_v15 = vor.u32 %v2634_v53, %v2550_v56  ;;  %v2614_v11 = vld [vmem:[%s4938_s7 + $0x4] sm:$0xf]  ;;  %v2470_v37 = vld [vmem:[%s4938_s7 + $0x8] sm:$0xf0]  ;;  %v2540_v63 = vld [vmem:[%s4938_s7 + $0x90] sm:$0xf] }
 0x27c   :  { %v1907_v3 = vperm.slane %v1773_v14, %v4418_v57  ;;  %v1909_v24 = vperm.slane %v1774_v10, %v4421_v59  ;;  %v2601_v57 = vld [vmem:[%s4937_s5 + $0x14] sm:$0xf0]  ;;  %v2600_v59 = vld [vmem:[%s4937_s5 + $0x14] sm:$0xf]  ;;  %v2638_v14 = vld [vmem:[%s4938_s7 + $0xc4] sm:$0xf]  ;;  %v2473_v39 = vor.u32 %v2614_v11, %v2470_v37 }
 0x27d   :  { %v2413_v16 = vor.u32 %v2601_v57, %v2412_v61  ;;  %v2417_v44 = vor.u32 %v2600_v59, %v2414_v55  ;;  %v2566_v10 = vld [vmem:[%s4938_s7 + $0xc8] sm:$0xf0]  ;;  %v2556_v61 = vld [vmem:[%s4938_s7 + $0xb0] sm:$0xf]  ;;  %v2637_v59 = vld [vmem:[%s4938_s7 + $0xb4] sm:$0xf0] }
 0x27e   :  { %v1908_v0 = vsel %vm1800_vm5, %v1907_v3, %v1906_v52  ;;  %v2492_v3 = vld [vmem:[%s4938_s7 + $0x30] sm:$0xf]  ;;  %v2505_v52 = vor.u32 %v2622_v7, %v2502_v34  ;;  %2303 = vmatpush.bf16.msra.mxu3 %v2501_v54  ;;  %v2558_v55 = vld [vmem:[%s4938_s7 + $0xb8] sm:$0xf0]  ;;  %v2633_v35 = vld [vmem:[%s4938_s7 + $0x94] sm:$0xf0]  ;;  %v2533_v7 = vor.u32 %v2631_v48, %v2532_v6 }
 0x27f   :  { %v1910_v13 = vsel %vm1804_vm6, %v1909_v24, %v1908_v0  ;;  %2078 = vmatpush.bf16.msra.mxu1 %v2413_v16  ;;  %2091 = vmatpush.bf16.msra.mxu2 %v2417_v44  ;;  %v2621_v24 = vld [vmem:[%s4938_s7 + $0x34] sm:$0xf0]  ;;  %v2620_v0 = vld [vmem:[%s4938_s7 + $0x34] sm:$0xf]  ;;  %v2541_v4 = vor.u32 %v2633_v35, %v2540_v63  ;;  %v2542_v41 = vld [vmem:[%s4938_s7 + $0x98] sm:$0xf0] }
 0x280   :  { %v1924_v38 = vsel %vm1923_vm13, %v1910_v13, %v1922_v36  ;;  %v2564_v36 = vld [vmem:[%s4938_s7 + $0xc0] sm:$0xf]  ;;  %2315 = vmatpush.bf16.msrb.mxu0 %v2573_v45  ;;  %v2494_v13 = vld [vmem:[%s4938_s7 + $0x38] sm:$0xf0]  ;;  %v2493_v57 = vor.u32 %v2621_v24, %v2492_v3  ;;  %v2636_v16 = vld [vmem:[%s4938_s7 + $0xb4] sm:$0xf] }
 0x281   :  { %v1925_v5 = vpack.c.b16 %v1924_v38, %v1924_v38  ;;  %v2565_v38 = vor.u32 %v2639_v25, %v2564_v36  ;;  %v2497_v44 = vor.u32 %v2620_v0, %v2494_v13  ;;  %v2561_v33 = vor.u32 %v2636_v16, %v2558_v55  ;;  %v2534_v1 = vld [vmem:[%s4938_s7 + $0x88] sm:$0xf0]  ;;  %v1986_v45 = vld [vmem:[%s4940_s6] sm:$0x3] }
 0x282   :  { %2304 = vmatpush.bf16.msra.mxu3 %v2493_v57 }
 0x283   :  { %2401 = vmatmul.msk.bf16.vlgmr.msra.gmra.mxu0 %vm1950_vm14, %v1925_v5  ;;  %2079 = vmatpush.bf16.msra.mxu1 %v2405_v20  ;;  %v2569_v5 = vor.u32 %v2638_v14, %v2566_v10  ;;  %v2557_v20 = vor.u32 %v2637_v59, %v2556_v61  ;;  %v1989_v14 = vperm.slane %v1986_v45, 1  ;;  %v2134_v61 = vld [vmem:[%s4941_s8] sm:$0x3] }
 0x284   :  { %2092 = vmatpush.bf16.msra.mxu2 %v2409_v62  ;;  %2316 = vmatpush.bf16.msrb.mxu0 %v2565_v38  ;;  %v2489_v62 = vor.u32 %v2618_v27, %v2486_v26  ;;  %v2136_v57 = vperm.slane %v2134_v61, 0  ;;  %v2137_v55 = vperm.slane %v2134_v61, 1 }
 0x286   :  { %2305 = vmatpush.bf16.msra.mxu3 %v2485_v21 }
 0x287   :  { %2326 = vmatpush.bf16.msrb.mxu1 %v2529_v32 }
 0x288   :  { %2339 = vmatpush.bf16.msrb.mxu2 %v2593_v22  ;;  %2317 = vmatpush.bf16.msrb.mxu0 %v2557_v20  ;;  %v2549_v22 = vor.u32 %v2635_v60, %v2548_v12 }
 0x28a   :  { %2306 = vmatpush.bf16.msra.mxu3 %v2477_v49 }
 0x28b   :  { %2327 = vmatpush.bf16.msrb.mxu1 %v2521_v43  ;;  %v2468_v43 = vld [vmem:[%s4938_s7] sm:$0xf] }
 0x28c   :  { %2340 = vmatpush.bf16.msrb.mxu2 %v2585_v17  ;;  %2318 = vmatpush.bf16.msrb.mxu0 %v2549_v22  ;;  %v2469_v58 = vor.u32 %v2615_v2, %v2468_v43  ;;  %v2632_v17 = vld [vmem:[%s4938_s7 + $0x94] sm:$0xf] }
 0x28d   :  { %v2545_v40 = vor.u32 %v2632_v17, %v2542_v41 }
 0x28e   :  { %2307 = vmatpush.bf16.msra.mxu3 %v2469_v58 }
 0x28f   :  { %2328 = vmatpush.bf16.msrb.mxu1 %v2513_v18  ;;  %v2630_v18 = vld [vmem:[%s4938_s7 + $0x84] sm:$0xf] }
 0x290   :  { %2341 = vmatpush.bf16.msrb.mxu2 %v2577_v46  ;;  %2319 = vmatpush.bf16.msrb.mxu0 %v2541_v4  ;;  %v2537_v34 = vor.u32 %v2630_v18, %v2534_v1  ;;  %v1988_v46 = vperm.slane %v1986_v45, 0 }
 0x293   :  { %2329 = vmatpush.bf16.msrb.mxu1 %v2505_v52 }
 0x294   :  { %2342 = vmatpush.bf16.msrb.mxu2 %v2569_v5  ;;  %2320 = vmatpush.bf16.msrb.mxu0 %v2533_v7 }
 0x297   :  { %2330 = vmatpush.bf16.msrb.mxu1 %v2497_v44 }
 0x298   :  { %2343 = vmatpush.bf16.msrb.mxu2 %v2561_v33 }
 0x29b   :  { %2331 = vmatpush.bf16.msrb.mxu1 %v2489_v62 }
 0x29c   :  { %2344 = vmatpush.bf16.msrb.mxu2 %v2553_v15 }
 0x29f   :  { %2332 = vmatpush.bf16.msrb.mxu1 %v2481_v28 }
 0x2a0   :  { %2345 = vmatpush.bf16.msrb.mxu2 %v2545_v40 }
 0x2a3   :  { %2333 = vmatpush.bf16.msrb.mxu1 %v2473_v39 }
 0x2a4   :  { %2346 = vmatpush.bf16.msrb.mxu2 %v2537_v34 }
 0x300   :  { %v1963_v31 = vpop.f32.mrf.mxu0 }
 0x301   :  { %v1964_v51 = vadd.f32 %v2719_v29, %v1963_v31 }
 0x303   :  { %v1967_v42 = vmax.f32 %v1964_v51, 0.0 }
 0x305   :  { %1968 = vst [vmem:[%s4939_s9] sm:$0xff] %v1967_v42  ;;  %v1969_v47 = vpack.c.bf16 %v1967_v42, %v1967_v42 }
 0x307   :  { %2080 = vmatmul.bf16.vlgmr.msra.gmra.mxu1 %v1969_v47  ;;  %2093 = vmatmul.bf16.vlgmr.msra.gmra.mxu2 %v1969_v47 }
 0x308   :  { %v1965_v32 = vpop.f32.mrf.mxu0 }
 0x384   :  { %v2081_v36 = vpop.f32.mrf.mxu1 }
 0x385   :  { %v2082_v54 = vadd.f32 %v2081_v36, %v1988_v46 }
 0x387   :  { %v2098_v25 = vmax.f32 %v2082_v54, 0.0 }
 0x389   :  { %v2100_v10 = vpack.c.bf16 %v2098_v25, %v2098_v25 }
 0x38a   :  { %v2094_v3 = vpop.f32.mrf.mxu2 }
 0x38b   :  { %v2095_v24 = vadd.f32 %v2094_v3, %v1989_v14  ;;  %2308 = vmatmul.bf16.vlgmr.msra.gmra.mxu3 %v2100_v10  ;;  %2334 = vmatmul.bf16.vlgmr.msrb.gmra.mxu1 %v2100_v10 }
 0x38c   :  { %v2083_v52 = vpop.f32.mrf.mxu1 }
 0x38d   :  { %v2099_v0 = vmax.f32 %v2095_v24, 0.0 }
 0x38f   :  { %v2101_v13 = vpack.c.bf16 %v2099_v0, %v2099_v0 }
 0x391   :  { %2321 = vmatmul.bf16.vlgmr.msrb.gmra.mxu0 %v2101_v13  ;;  %2347 = vmatmul.bf16.vlgmr.msrb.gmra.mxu2 %v2101_v13 }
 0x392   :  { %v2096_v38 = vpop.f32.mrf.mxu2 }
 0x408   :  { %v2335_v5 = vpop.f32.mrf.mxu1 }
 0x409   :  { %v2336_v27 = vadd.f32 %v2335_v5, %v2137_v55 }
 0x40e   :  { %v2309_v59 = vpop.f32.mrf.mxu3  ;;  %v2322_v16 = vpop.f32.mrf.mxu0 }
 0x40f   :  { %v2310_v23 = vadd.f32 %v2309_v59, %v2136_v57 }
 0x410   :  { %v2337_v9 = vpop.f32.mrf.mxu1 }
 0x411   :  { %v2323_v44 = vadd.f32 %v2322_v16, %v2310_v23 }
 0x413   :  { %2352 = vmax.xlane.f32.xlu1 %v2323_v44  ;;  %2374 = vst [vmem:[%s4942_s10] sm:$0xff] %v2323_v44 }
 0x414   :  { %v2348_v26 = vpop.f32.mrf.mxu2 }
 0x415   :  { %v2349_v20 = vadd.f32 %v2348_v26, %v2336_v27 }
 0x416   :  { %v2311_v33 = vpop.f32.mrf.mxu3  ;;  %v2324_v21 = vpop.f32.mrf.mxu0 }
 0x417   :  { %2376 = vst [vmem:[%s4942_s10 + $0x10] sm:$0xff] %v2349_v20 }
 0x41c   :  { %v2350_v29 = vpop.f32.mrf.mxu2 }
 0x486   :  { %v2353_v62 = vpop.xlane.xlu1 %2352 }
 0x487   :  { %v2354_v31 = vsub.f32 %v2323_v44, %v2353_v62 }
 0x489   :  { %v2355_v51 = vmul.f32 1.442695, %v2354_v31 }
 0x48b   :  { %2720 = vpow2.f32 %v2355_v51 }
 0x491   :  { %v2721_v42 = vpop.eup %2720 }
 0x492   :  { %2357 = vadd.xlane.f32.xlu2 %v2721_v42 }
 0x505   :  { %v2358_v47 = vpop.xlane.xlu2 %2357 }
 0x506   :  { %2722 = vrcp.f32 %v2358_v47  ;;  %v2370_v50 = vand.u32 2147483648, %v2358_v47  ;;  %v2368_v19 = vand.u32 2147483647, %v2358_v47  ;;  %vm2364_vm0 = vweird.f32 %v2358_v47 }
 0x508   :  { %v2371_v60 = vor.u32 1.1754944e-38, %v2370_v50  ;;  %vm2369_vm2 = vcmp.eq.f32.partialorder %v2368_v19, 8.507059e+37 }
 0x50c   :  { %v2723_v32 = vpop.eup %2722 }
 0x50d   :  { %v2360_v30 = vmul.f32 %v2723_v32, %v2358_v47  ;;  %vm2365_vm15 = vweird.f32 %v2723_v32 }
 0x50e   :  { %vm2366_vm1 = vmor %vm2364_vm0, %vm2365_vm15 }
 0x50f   :  { %v2361_v8 = vsub.f32 1.0, %v2360_v30 }
 0x511   :  { %v2362_v49 = vmul.f32 %v2723_v32, %v2361_v8 }
 0x513   :  { %v2363_v12 = vadd.f32 %v2723_v32, %v2362_v49 }
 0x515   :  { %v2367_v28 = vsel %vm2366_vm1, %v2723_v32, %v2363_v12 }
 0x516   :  { %v2372_v22 = vsel %vm2369_vm2, %v2371_v60, %v2367_v28 }
 0x517   :  { %v2373_v53 = vmul.f32 %v2721_v42, %v2372_v22 }
 0x519   :  { %2375 = vst [vmem:[%s4942_s10 + $0x8] sm:$0xff] %v2373_v53 }

</bundles_post_ra>
